<compile_context>
chip_gen: v6e
topology: v6e:2x2x1
jax: 0.10.0
libtpu: 0.0.40
codegen_flags: <defaults>
</compile_context>

<pallas_src>
import functools
import math

import jax
import jax.numpy as jnp
from jax.experimental import pallas as pl
from jax.experimental.pallas import tpu as pltpu


# ----------------------------------------------------------------------------
# Fused GeM + Flatten + concatenated-head kernel
# ----------------------------------------------------------------------------
def _fused_gem_heads_kernel(p_ref, x_ref, w_ref, b_ref, feat_ref, out_ref,
                            *, eps, log_hw):
    """One grid step k: GeM-pool one channel chunk and accumulate its head matmul.

    p_ref    : SMEM (1,)               learnable GeM exponent
    x_ref    : VMEM (N, c_chunk, HW)   feature-map chunk (spatial extent on lanes)
    w_ref    : VMEM (c_chunk, 3E)      matching slice of [w_g | w_v | w_c] (bf16)
    b_ref    : VMEM (1, 3E) f32        concatenated bias (used only in epilogue)
    feat_ref : VMEM (N, c_chunk) f32   pooled features of this chunk (lane-dense)
    out_ref  : VMEM (N, 3E) f32        resident accumulator == final head outputs
    """
    k = pl.program_id(0)

    @pl.when(k == 0)
    def _init():
        out_ref[...] = jnp.zeros_like(out_ref)

    p = p_ref[0]
    inv_p = 1.0 / p                                   # hoisted once per step
    x = x_ref[...].astype(jnp.float32)                # (N, c_chunk, HW)
    x = jnp.maximum(x, eps)                           # clamp(min=eps) -> x > 0
    xp = jnp.exp(p * jnp.log(x))                      # x**p with runtime exponent (EUP)
    s = jnp.sum(xp, axis=-1)                          # (N, c_chunk): lane reduction
    # mean(.)**(1/p) == exp((log(sum) - log(HW)) / p): divide folded into the log
    pooled = jnp.exp(inv_p * (jnp.log(s) - log_hw))
    feat_ref[...] = pooled.astype(feat_ref.dtype)

    # Head matmul of this channel chunk, accumulated in the resident f32 output.
    out_ref[...] += jnp.dot(pooled.astype(w_ref.dtype), w_ref[...],
                            preferred_element_type=jnp.float32)

    @pl.when(k == pl.num_programs(0) - 1)
    def _finalize():
        out_ref[...] = out_ref[...] + b_ref[...]      # bias added once, in epilogue


def _pick_c_chunk(C, N, HW, ncols, *, vmem_budget_bytes=16 << 20, max_chunk=512):
    """Channels handled per grid step.

    VMEM accounting uses the lane-padded f32 footprint (the kernel upcasts each
    tile to f32 and HW is padded to a multiple of 128 lanes), double-buffered,
    plus the double-buffered weight slab.  Only multiples of 128 that divide C
    exactly are returned (or C itself), so there is never a ragged tail and the
    (N, c_chunk) pooled-feature output block stays lane-dense.  Budget defaults
    are conservative enough for v7x's 64 MiB VMEM.
    """
    hw_pad = -(-HW // 128) * 128
    per_chan = 2 * N * hw_pad * 4 + 2 * ncols * 4     # input tile (f32) + weight slab
    cap = max(vmem_budget_bytes // per_chan, 128)
    cap = min(cap, max_chunk, C)
    if C <= cap:
        return C                                      # single full-extent chunk
    c = (cap // 128) * 128
    while c >= 128:
        if C % c == 0:                                # exact divisor: no ragged tail
            return c
        c -= 128
    return C                                          # fallback: one full-extent chunk


def fused_gem_heads(x, p, w_cat, b_cat, eps=1e-6, *, mxu_dtype=jnp.bfloat16,
                    vmem_budget_bytes=16 << 20, max_c_chunk=512):
    """GeM pooling + Flatten + concatenated Linear heads in one pallas_call.

    x     : (N, C, H, W) feature map (float32 or bfloat16)
    p     : (1,) learnable GeM exponent
    w_cat : (C, 3E) concatenation [w_g | w_v | w_c]
    b_cat : (3E,)  concatenation [b_g ; b_v ; b_c]

    Returns (pooled_features (N, C) f32, head_outputs (N, 3E) f32).
    """
    N, C, H, W = x.shape
    HW = H * W
    M = w_cat.shape[1]                                # 3 * E
    x3 = x.reshape(N, C, HW)                          # contiguous view: no HBM copy

    c_chunk = _pick_c_chunk(C, N, HW, M,
                            vmem_budget_bytes=vmem_budget_bytes,
                            max_chunk=max_c_chunk)
    assert C % c_chunk == 0, (C, c_chunk)
    num_k = C // c_chunk

    p_s = p.astype(jnp.float32).reshape((1,))
    # bf16 weights halve the dominant weight-HBM traffic; f32 accumulation keeps
    # the K=2048 reduction accurate.  (In practice cast/concat once, outside the step.)
    w_mx = w_cat.astype(mxu_dtype)
    b2 = b_cat.astype(jnp.float32).reshape(1, M)

    feat, heads = pl.pallas_call(
        functools.partial(_fused_gem_heads_kernel,
                          eps=float(eps), log_hw=float(math.log(HW))),
        out_shape=(jax.ShapeDtypeStruct((N, C), jnp.float32),
                   jax.ShapeDtypeStruct((N, M), jnp.float32)),
        grid=(num_k,),
        in_specs=[
            pl.BlockSpec(memory_space=pltpu.MemorySpace.SMEM),      # p (scalar)
            pl.BlockSpec((N, c_chunk, HW), lambda k: (0, k, 0)),    # feature chunk
            pl.BlockSpec((c_chunk, M), lambda k: (k, 0)),           # weight slab
            pl.BlockSpec((1, M), lambda k: (0, 0)),                 # bias
        ],
        out_specs=(
            pl.BlockSpec((N, c_chunk), lambda k: (0, k)),           # pooled features
            pl.BlockSpec((N, M), lambda k: (0, 0)),                 # heads (resident acc)
        ),
        compiler_params=pltpu.CompilerParams(
            dimension_semantics=("arbitrary",),                     # reduction axis
            vmem_limit_bytes=32 * 1024 * 1024,
        ),
    )(p_s, x3, w_mx, b2)

    return feat, heads


def head_forward(features, p, w_g, b_g, w_v, b_v, w_c, b_c, eps=1e-6,
                 *, mxu_dtype=jnp.bfloat16):
    """Module-equivalent forward of `transit` + the three heads: returns (x_g, x_v, x_c)."""
    E = w_g.shape[1]
    w_cat = jnp.concatenate([w_g, w_v, w_c], axis=1)  # in practice: prepare once
    b_cat = jnp.concatenate([b_g, b_v, b_c], axis=0)
    _, heads = fused_gem_heads(features, p, w_cat, b_cat, eps=eps, mxu_dtype=mxu_dtype)
    return heads[:, :E], heads[:, E:2 * E], heads[:, 2 * E:]


# ----------------------------------------------------------------------------
# Pure-JAX reference
# ----------------------------------------------------------------------------
def gem_reference(x, p, eps=1e-6):
    xp = jnp.maximum(x, eps) ** p[0]
    m = jnp.mean(xp, axis=(-2, -1), keepdims=True)
    return m ** (1.0 / p[0])


if __name__ == "__main__":
    key = jax.random.PRNGKey(0)
    k_x, k_g, k_v, k_c, k_b = jax.random.split(key, 5)

    # Shapes the real forward implies at the GeM boundary: the SE-ResNeXt50
    # backbone maps (N, 3, 224, 224) -> (N, 2048, 7, 7); GeM pools that to
    # (N, 2048) and the three heads are Linear(2048, 256).
    N, C, H, W = 2, 2048, 7, 7
    E = 256

    x = jax.random.normal(k_x, (N, C, H, W), dtype=jnp.float32)
    p = jnp.ones((1,), dtype=jnp.float32) * 3.0        # GeM.__init__: ones(1) * 3

    scale = 1.0 / (C ** 0.5)
    w_g = scale * jax.random.normal(k_g, (C, E), dtype=jnp.float32)
    w_v = scale * jax.random.normal(k_v, (C, E), dtype=jnp.float32)
    w_c = scale * jax.random.normal(k_c, (C, E), dtype=jnp.float32)
    b_g, b_v, b_c = 0.01 * jax.random.normal(k_b, (3, E), dtype=jnp.float32)

    # --- Pallas fused forward (GeM + Flatten + 3 heads in one pallas_call) ---
    x_g, x_v, x_c = head_forward(x, p, w_g, b_g, w_v, b_v, w_c, b_c)
    # Also pull the pooled features out of the fused kernel to check GeM tightly.
    w_cat = jnp.concatenate([w_g, w_v, w_c], axis=1)
    b_cat = jnp.concatenate([b_g, b_v, b_c], axis=0)
    feat, heads_cat = fused_gem_heads(x, p, w_cat, b_cat)
    feat, heads_cat, x_g, x_v, x_c = jax.block_until_ready(
        (feat, heads_cat, x_g, x_v, x_c))

    # --- pure-JAX reference ---
    pooled_ref = gem_reference(x, p)                   # (N, C, 1, 1)
    feat_ref = pooled_ref.reshape(N, C)
    hp = jax.lax.Precision.HIGHEST
    ref_g = jnp.dot(feat_ref, w_g, precision=hp) + b_g
    ref_v = jnp.dot(feat_ref, w_v, precision=hp) + b_v
    ref_c = jnp.dot(feat_ref, w_c, precision=hp) + b_c

    # GeM math is done in f32 inside the kernel -> tight tolerance.
    assert feat.shape == (N, C), feat.shape
    assert jnp.allclose(feat, feat_ref, rtol=1e-4, atol=1e-5), (
        float(jnp.max(jnp.abs(feat - feat_ref))))
    assert jnp.allclose(heads_cat[:, :E], x_g) and jnp.allclose(
        heads_cat[:, E:2 * E], x_v) and jnp.allclose(heads_cat[:, 2 * E:], x_c)

    # Heads use bf16 weights/LHS on the MXU with f32 accumulation -> looser tolerance.
    for got, ref in ((x_g, ref_g), (x_v, ref_v), (x_c, ref_c)):
        assert got.shape == (N, E), got.shape
        assert jnp.allclose(got, ref, rtol=5e-3, atol=1e-2), (
            float(jnp.max(jnp.abs(got - ref))))

    print("KERNEL_OK")
</pallas_src>

<mosaic_0001>
module attributes {stable_mosaic.version = 11 : i64} {
  func.func @_fused_gem_heads_kernel(%arg0: i32, %arg1: memref<1xf32, #tpu.memory_space<smem>>, %arg2: memref<2x512x49xf32, #tpu.memory_space<vmem>>, %arg3: memref<512x768xbf16, #tpu.memory_space<vmem>>, %arg4: memref<1x768xf32, #tpu.memory_space<vmem>>, %arg5: memref<2x512xf32, #tpu.memory_space<vmem>>, %arg6: memref<2x768xf32, #tpu.memory_space<vmem>>) attributes {dimension_semantics = [#tpu.dimension_semantics<arbitrary>], iteration_bounds = array<i64: 4>, scalar_prefetch = 0 : i64, scratch_operands = 0 : i64, tpu.core_type = #tpu.core_type<tc>, window_params = [{transform_indices = @transform_0, window_bounds = array<i64: 1>}, {transform_indices = @transform_1, window_bounds = array<i64: 2, 512, 49>}, {transform_indices = @transform_2, window_bounds = array<i64: 512, 768>}, {pipeline_mode = #tpu.pipeline_mode<synchronous>, transform_indices = @transform_3, window_bounds = array<i64: 1, 768>}, {transform_indices = @transform_4, window_bounds = array<i64: 2, 512>}, {pipeline_mode = #tpu.pipeline_mode<synchronous>, transform_indices = @transform_5, window_bounds = array<i64: 2, 768>}]} {
    %c0_i32 = arith.constant 0 : i32
    %0 = arith.cmpi eq, %arg0, %c0_i32 : i32
    %1 = arith.extui %0 : i1 to i32
    %c0_i32_0 = arith.constant 0 : i32
    %2 = arith.cmpi ne, %1, %c0_i32_0 : i32
    scf.if %2 {
      %cst_17 = arith.constant 0.000000e+00 : f32
      %29 = vector.broadcast %cst_17 : f32 to vector<2x768xf32>
      %c0_18 = arith.constant 0 : index
      %c0_19 = arith.constant 0 : index
      %30 = vector.load %arg6[%c0_18, %c0_19] : memref<2x768xf32, #tpu.memory_space<vmem>>, vector<2x768xf32>
      tpu.vector_store %arg6[%c0_18, %c0_19], %29 {strides = array<i32>} : memref<2x768xf32, #tpu.memory_space<vmem>>, vector<2x768xf32>,
    } else {
    }
    %c0 = arith.constant 0 : index
    %3 = memref.load %arg1[%c0] : memref<1xf32, #tpu.memory_space<smem>>
    %cst = arith.constant 1.000000e+00 : f32
    %4 = arith.divf %cst, %3 : f32
    %c0_1 = arith.constant 0 : index
    %c0_2 = arith.constant 0 : index
    %c0_3 = arith.constant 0 : index
    %5 = vector.load %arg2[%c0_1, %c0_2, %c0_3] : memref<2x512x49xf32, #tpu.memory_space<vmem>>, vector<2x512x49xf32>
    %cst_4 = arith.constant 9.99999997E-7 : f32
    %6 = vector.broadcast %cst_4 : f32 to vector<2x512x49xf32>
    %7 = arith.maximumf %5, %6 : vector<2x512x49xf32>
    %8 = math.log %7 : vector<2x512x49xf32>
    %9 = vector.broadcast %3 : f32 to vector<2x512x49xf32>
    %10 = arith.mulf %9, %8 : vector<2x512x49xf32>
    %11 = math.exp %10 : vector<2x512x49xf32>
    %cst_5 = arith.constant dense<0.000000e+00> : vector<2x512xf32>
    %12 = vector.multi_reduction <add>, %11, %cst_5 [2] : vector<2x512x49xf32> to vector<2x512xf32>
    %13 = math.log %12 : vector<2x512xf32>
    %cst_6 = arith.constant 3.89182019 : f32
    %14 = vector.broadcast %cst_6 : f32 to vector<2x512xf32>
    %15 = arith.subf %13, %14 : vector<2x512xf32>
    %16 = vector.broadcast %4 : f32 to vector<2x512xf32>
    %17 = arith.mulf %16, %15 : vector<2x512xf32>
    %18 = math.exp %17 : vector<2x512xf32>
    %c0_7 = arith.constant 0 : index
    %c0_8 = arith.constant 0 : index
    %19 = vector.load %arg5[%c0_7, %c0_8] : memref<2x512xf32, #tpu.memory_space<vmem>>, vector<2x512xf32>
    tpu.vector_store %arg5[%c0_7, %c0_8], %18 {strides = array<i32>} : memref<2x512xf32, #tpu.memory_space<vmem>>, vector<2x512xf32>,
    %c0_9 = arith.constant 0 : index
    %c0_10 = arith.constant 0 : index
    %20 = vector.load %arg6[%c0_9, %c0_10] : memref<2x768xf32, #tpu.memory_space<vmem>>, vector<2x768xf32>
    %21 = arith.truncf %18 : vector<2x512xf32> to vector<2x512xbf16>
    %c0_11 = arith.constant 0 : index
    %c0_12 = arith.constant 0 : index
    %22 = vector.load %arg3[%c0_11, %c0_12] : memref<512x768xbf16, #tpu.memory_space<vmem>>, vector<512x768xbf16>
    %cst_13 = arith.constant dense<0.000000e+00> : vector<2x768xf32>
    %23 = tpu.matmul %21, %22, %cst_13 {dimension_numbers = #tpu.dot_dimension_numbers<[1], [0], [0], [1], [0, 0, 1, 1], [], []>} : vector<2x512xbf16>, vector<512x768xbf16>, vector<2x768xf32> -> vector<2x768xf32>
    %24 = arith.addf %20, %23 : vector<2x768xf32>
    %c0_14 = arith.constant 0 : index
    %c0_15 = arith.constant 0 : index
    %25 = vector.load %arg6[%c0_14, %c0_15] : memref<2x768xf32, #tpu.memory_space<vmem>>, vector<2x768xf32>
    tpu.vector_store %arg6[%c0_14, %c0_15], %24 {strides = array<i32>} : memref<2x768xf32, #tpu.memory_space<vmem>>, vector<2x768xf32>,
    %c3_i32 = arith.constant 3 : i32
    %26 = arith.cmpi eq, %arg0, %c3_i32 : i32
    %27 = arith.extui %26 : i1 to i32
    %c0_i32_16 = arith.constant 0 : i32
    %28 = arith.cmpi ne, %27, %c0_i32_16 : i32
    scf.if %28 {
      %c0_17 = arith.constant 0 : index
      %c0_18 = arith.constant 0 : index
      %29 = vector.load %arg6[%c0_17, %c0_18] : memref<2x768xf32, #tpu.memory_space<vmem>>, vector<2x768xf32>
      %c0_19 = arith.constant 0 : index
      %c0_20 = arith.constant 0 : index
      %30 = vector.load %arg4[%c0_19, %c0_20] : memref<1x768xf32, #tpu.memory_space<vmem>>, vector<1x768xf32>
      %31 = vector.broadcast %30 : vector<1x768xf32> to vector<2x768xf32>
      %32 = arith.addf %29, %31 : vector<2x768xf32>
      %c0_21 = arith.constant 0 : index
      %c0_22 = arith.constant 0 : index
      %33 = vector.load %arg6[%c0_21, %c0_22] : memref<2x768xf32, #tpu.memory_space<vmem>>, vector<2x768xf32>
      tpu.vector_store %arg6[%c0_21, %c0_22], %32 {strides = array<i32>} : memref<2x768xf32, #tpu.memory_space<vmem>>, vector<2x768xf32>,
    } else {
    }
    return
  }
  func.func @transform_0(%arg0: i32) -> i32 {
    %c0_i32 = arith.constant 0 : i32
    %c0_i32_0 = arith.constant 0 : i32
    return %c0_i32 : i32
  }
  func.func @transform_1(%arg0: i32) -> (i32, i32, i32) {
    %c0_i32 = arith.constant 0 : i32
    %c0_i32_0 = arith.constant 0 : i32
    %c0_i32_1 = arith.constant 0 : i32
    return %c0_i32, %arg0, %c0_i32_0 : i32, i32, i32
  }
  func.func @transform_2(%arg0: i32) -> (i32, i32) {
    %c0_i32 = arith.constant 0 : i32
    %c0_i32_0 = arith.constant 0 : i32
    return %arg0, %c0_i32 : i32, i32
  }
  func.func @transform_3(%arg0: i32) -> (i32, i32) {
    %c0_i32 = arith.constant 0 : i32
    %c0_i32_0 = arith.constant 0 : i32
    %c0_i32_1 = arith.constant 0 : i32
    return %c0_i32, %c0_i32_0 : i32, i32
  }
  func.func @transform_4(%arg0: i32) -> (i32, i32) {
    %c0_i32 = arith.constant 0 : i32
    %c0_i32_0 = arith.constant 0 : i32
    return %c0_i32, %arg0 : i32, i32
  }
  func.func @transform_5(%arg0: i32) -> (i32, i32) {
    %c0_i32 = arith.constant 0 : i32
    %c0_i32_0 = arith.constant 0 : i32
    %c0_i32_1 = arith.constant 0 : i32
    return %c0_i32, %c0_i32_0 : i32, i32
  }
}

</mosaic_0001>

<bundles_post_ra>
// kernel: tpu_custom_call.1
= control target key start
LH: loop header
LB: loop body
LE: loop exit
PB: predicated region body
PF: predicated region fallthrough
CT: control target
= control target key end

     0   :  { %s19119_s0 = inlined_call_operand.<no memory space> [shape: f32[1], index: 0, kind: input, shape index: {}]   ;;  %s19120_s1 = inlined_call_operand.vmem [shape: f32[2,2048,49], index: 1, kind: input, shape index: {}]   ;;  %s19121_s2 = inlined_call_operand.hbm [shape: bf16[2048,768], index: 2, kind: input, shape index: {}]   ;;  %s19122_s3 = inlined_call_operand.hbm [shape: f32[1,768], index: 3, kind: input, shape index: {}]   ;;  %s19123_s4 = inlined_call_operand.hbm [shape: f32[2,2048], index: 4, kind: output, shape index: {0}]   ;;  %s19124_s5 = inlined_call_operand.hbm [shape: f32[2,768], index: 5, kind: output, shape index: {1}]  }
   0x1   :  { %11 = sst [smem:[#allocation2]] %s19119_s0 }
   0x2   :  { %12 = vsyncpa [#allocation5], 0 }
   0x3   :  { %14 = vsyncpa [#allocation5 + $0x1], 0 }
   0x4   :  { %15 = vsyncpa [#allocation8], 0 }
   0x5   :  { %16 = vsyncpa [#allocation6], 0 }
   0x6   :  { %18 = vsyncpa [#allocation6 + $0x1], 0 }
   0x7   :  { %19 = vsyncpa [#allocation11], 0  ;;  %s14310_s20 = smov 0   ;;  %s14312_s21 = smov 0  }
   0x8   :  { %s14314_s22 = smov 0   ;;  %s14316_s23 = smov 0  }
   0x9 LB: > { %s14331_s0 = sadd.s32 4294967295, %s14262_s23   ;;  %s12380_s24 = sadd.s32 4294967294, %s14262_s23   ;;  %s14262_s23 = sphi %s14316_s23, %s19949_s23   ;;  %s14258_s22 = sphi %s14314_s22, %s19948_s22   ;;  %s14254_s21 = sphi %s14312_s21, %s19947_s21   ;;  %s14250_s20 = sphi %s14310_s20, %s19946_s20  }
   0xa   : > { %s14335_s25 = sadd.s32 1, %s14262_s23   ;;  %s53_s26 = sadd.s32 1, %s14258_s22 }
   0xb   : > { %s50_s27 = ssub.s32 %s14262_s23, %s14335_s25  ;;  %p60_p0 = scmp.ne.s32.totalorder %s14258_s22, %s14254_s21 }
   0xc   : > { %p51_p1 = scmp.eq.s32.totalorder %s50_s27, 0  ;;  %p61_p2 = scmp.eq.s32.totalorder %s14262_s23, 0 }
   0xd   : > { %p92_p3 = scmp.ne.s32.totalorder %s14254_s21, %s14250_s20  ;;  %p19128_p4 = scmp.eq.s32.totalorder %s14331_s0, 0 }
   0xe   : > { %s14347_s28 = scalar_select %p51_p1, %s14258_s22, %s53_s26  }
   0xf   : > { %p14349_p5 = por %p61_p2, %p60_p0  ;;  %p14355_p6 = por %p19128_p4, %p92_p3 }
  0x10   : > { %p19125_p7 = scmp.eq.s32.totalorder %s14331_s0, 3  ;;  %p143_p8 = scmp.eq.s32.totalorder %s12380_s24, 3 }
  0x11   : > { %s19363_s30 = scalar_select %p14355_p6, 1, 0 }
  0x12   : > { %p12381_p9 = scmp.ge.s32.totalorder %s14262_s23, 1  ;;  %p171_p10 = scmp.lt.s32.totalorder %s14262_s23, 5 }
  0x13   : > { %p14364_p11 = por %p19125_p7, %p60_p0  ;;  %p14368_p12 = por %p143_p8, %p92_p3 }
  0x14   : > { %p14372_p13 = pnand %p12381_p9, %p171_p10  ;;  %s14264_s9 = smov [#allocation7]  }
  0x15   : > { %s19364_s6 = scalar_select %p14364_p11, 1, 0 }
  0x16   : > { %s19365_s7 = scalar_select %p14368_p12, 1, 0 }
  0x17   : > { %p12742_p2 = pneg %p14372_p13  ;;  %s187_s10 = sshll.u32 %s14264_s9, 4  ;;  %s188_s10 = int_to_ptr.vmem [resolvable:$true] %s187_s10 }
  0x18   : > { %s14125_s11 = scalar_lea.vmem %s188_s10, 96  ;;  %p14133_p6 = scmp.lt.s32.totalorder %s188_s10, %s188_s10 }
  0x19   : > { %p12743_p0 = pnand %p12742_p2, %p19128_p4  ;;  %p14126_p11 = scmp.ne.s32.totalorder %s188_s10, %s14125_s11 }
  0x1a   : > { %p14134_p12 = scmp.lt.s32.totalorder %s14125_s11, %s14125_s11 }
  0x1b   : > { %p14116_p7 = pneg %p12743_p0 }
  0x1c   : > { %p14135_p9 = por %p14134_p12, %p14133_p6 }
  0x1d   : > { %p14128_p3 = pnand %p14126_p11, %p14116_p7 }
  0x1f   : > { %p14129_p8 = pneg %p14128_p3 }
  0x21   : > { %p14136_p10 = pnand %p14135_p9, %p14129_p8 }
  0x23   : > { %14139 = shalt.err (!%p14136_p10)
}
  0x24   : > { %12745 = dma.hbm_to_vmem [thread:$0]  (!%p12743_p0), %s19122_s3, 96, %s188_s10, [#allocation8]  }
  0x25   : > { %p12383_p1 = scmp.ge.s32.totalorder %s14262_s23, 4 }
  0x27   : > { %194 = sbr.rel (%p12383_p1) target bundleno = 137 (0x89), region = 24 }
  0x2c   : > { %197 = sbr.rel (!%p14349_p5) target bundleno = 112 (0x70), region = 28  ;;  %s199_s14 = sand.u32 (%p14349_p5), 1, %s14258_s22  }
  0x2d   : > { %s12723_s15 = sshll.u32 (%p14349_p5), %s14262_s23, 9  ;;  %s12384_s16 = sshll.u32 (%p14349_p5), %s199_s14, 10 }
  0x2e   : > { %s14392_s19 = scalar_lea.vmem (%p14349_p5), %s19120_s1, %s12723_s15  ;;  %s14397_s24 = scalar_lea.vmem (%p14349_p5), [#allocation3], %s12384_s16 }
  0x2f   : > { %v487_v0 = vld [vmem:[%s14392_s19] sm:$0xff] (%p14349_p5)  ;;  %v489_v1 = vld [vmem:[%s14392_s19 + $0x8] sm:$0xff] (%p14349_p5)  ;;  %v491_v2 = vld [vmem:[%s14392_s19 + $0x10] sm:$0xff] (%p14349_p5) }
  0x30   : > { %488 = vst [vmem:[%s14397_s24] sm:$0xff] (%p14349_p5), %v487_v0  ;;  %490 = vst [vmem:[%s14397_s24 + $0x8] sm:$0xff] (%p14349_p5), %v489_v1  ;;  %v493_v3 = vld [vmem:[%s14392_s19 + $0x18] sm:$0xff] (%p14349_p5)  ;;  %v495_v4 = vld [vmem:[%s14392_s19 + $0x20] sm:$0xff] (%p14349_p5) }
  0x31   : > { %492 = vst [vmem:[%s14397_s24 + $0x10] sm:$0xff] %v491_v2  ;;  %v497_v5 = vld [vmem:[%s14392_s19 + $0x28] sm:$0xff]  ;;  %494 = vst [vmem:[%s14397_s24 + $0x18] sm:$0xff] %v493_v3  ;;  %v499_v6 = vld [vmem:[%s14392_s19 + $0x30] sm:$0xff] }
  0x32   : > { %496 = vst [vmem:[%s14397_s24 + $0x20] sm:$0xff] %v495_v4  ;;  %498 = vst [vmem:[%s14397_s24 + $0x28] sm:$0xff] %v497_v5  ;;  %v501_v7 = vld [vmem:[%s14392_s19 + $0x38] sm:$0xff]  ;;  %v503_v8 = vld [vmem:[%s14392_s19 + $0x40] sm:$0xff] }
  0x33   : > { %500 = vst [vmem:[%s14397_s24 + $0x30] sm:$0xff] %v499_v6  ;;  %502 = vst [vmem:[%s14397_s24 + $0x38] sm:$0xff] %v501_v7  ;;  %v505_v9 = vld [vmem:[%s14392_s19 + $0x48] sm:$0xff]  ;;  %v507_v10 = vld [vmem:[%s14392_s19 + $0x50] sm:$0xff] }
  0x34   : > { %504 = vst [vmem:[%s14397_s24 + $0x40] sm:$0xff] %v503_v8  ;;  %v509_v11 = vld [vmem:[%s14392_s19 + $0x58] sm:$0xff]  ;;  %506 = vst [vmem:[%s14397_s24 + $0x48] sm:$0xff] %v505_v9  ;;  %v511_v12 = vld [vmem:[%s14392_s19 + $0x60] sm:$0xff] }
  0x35   : > { %508 = vst [vmem:[%s14397_s24 + $0x50] sm:$0xff] %v507_v10  ;;  %510 = vst [vmem:[%s14397_s24 + $0x58] sm:$0xff] %v509_v11  ;;  %v513_v13 = vld [vmem:[%s14392_s19 + $0x68] sm:$0xff]  ;;  %v515_v14 = vld [vmem:[%s14392_s19 + $0x70] sm:$0xff] }
  0x36   : > { %512 = vst [vmem:[%s14397_s24 + $0x60] sm:$0xff] %v511_v12  ;;  %514 = vst [vmem:[%s14397_s24 + $0x68] sm:$0xff] %v513_v13  ;;  %v517_v15 = vld [vmem:[%s14392_s19 + $0x78] sm:$0xff]  ;;  %v519_v16 = vld [vmem:[%s14392_s19 + $0x80] sm:$0xff] }
  0x37   : > { %516 = vst [vmem:[%s14397_s24 + $0x70] sm:$0xff] %v515_v14  ;;  %v521_v17 = vld [vmem:[%s14392_s19 + $0x88] sm:$0xff]  ;;  %518 = vst [vmem:[%s14397_s24 + $0x78] sm:$0xff] %v517_v15  ;;  %v523_v18 = vld [vmem:[%s14392_s19 + $0x90] sm:$0xff] }
  0x38   : > { %520 = vst [vmem:[%s14397_s24 + $0x80] sm:$0xff] %v519_v16  ;;  %522 = vst [vmem:[%s14397_s24 + $0x88] sm:$0xff] %v521_v17  ;;  %v525_v19 = vld [vmem:[%s14392_s19 + $0x98] sm:$0xff]  ;;  %v527_v20 = vld [vmem:[%s14392_s19 + $0xa0] sm:$0xff] }
  0x39   : > { %524 = vst [vmem:[%s14397_s24 + $0x90] sm:$0xff] %v523_v18  ;;  %526 = vst [vmem:[%s14397_s24 + $0x98] sm:$0xff] %v525_v19  ;;  %v529_v21 = vld [vmem:[%s14392_s19 + $0xa8] sm:$0xff]  ;;  %v531_v22 = vld [vmem:[%s14392_s19 + $0xb0] sm:$0xff] }
  0x3a   : > { %528 = vst [vmem:[%s14397_s24 + $0xa0] sm:$0xff] %v527_v20  ;;  %v533_v23 = vld [vmem:[%s14392_s19 + $0xb8] sm:$0xff]  ;;  %530 = vst [vmem:[%s14397_s24 + $0xa8] sm:$0xff] %v529_v21  ;;  %v535_v24 = vld [vmem:[%s14392_s19 + $0xc0] sm:$0xff] }
  0x3b   : > { %532 = vst [vmem:[%s14397_s24 + $0xb0] sm:$0xff] %v531_v22  ;;  %534 = vst [vmem:[%s14397_s24 + $0xb8] sm:$0xff] %v533_v23  ;;  %v537_v25 = vld [vmem:[%s14392_s19 + $0xc8] sm:$0xff]  ;;  %v539_v26 = vld [vmem:[%s14392_s19 + $0xd0] sm:$0xff] }
  0x3c   : > { %536 = vst [vmem:[%s14397_s24 + $0xc0] sm:$0xff] %v535_v24  ;;  %538 = vst [vmem:[%s14397_s24 + $0xc8] sm:$0xff] %v537_v25  ;;  %v541_v27 = vld [vmem:[%s14392_s19 + $0xd8] sm:$0xff]  ;;  %v543_v28 = vld [vmem:[%s14392_s19 + $0xe0] sm:$0xff] }
  0x3d   : > { %540 = vst [vmem:[%s14397_s24 + $0xd0] sm:$0xff] %v539_v26  ;;  %v545_v29 = vld [vmem:[%s14392_s19 + $0xe8] sm:$0xff]  ;;  %542 = vst [vmem:[%s14397_s24 + $0xd8] sm:$0xff] %v541_v27  ;;  %v547_v30 = vld [vmem:[%s14392_s19 + $0xf0] sm:$0xff] }
  0x3e   : > { %544 = vst [vmem:[%s14397_s24 + $0xe0] sm:$0xff] %v543_v28  ;;  %546 = vst [vmem:[%s14397_s24 + $0xe8] sm:$0xff] %v545_v29  ;;  %v549_v31 = vld [vmem:[%s14392_s19 + $0xf8] sm:$0xff]  ;;  %v551_v32 = vld [vmem:[%s14392_s19 + $0x100] sm:$0xff] }
  0x3f   : > { %548 = vst [vmem:[%s14397_s24 + $0xf0] sm:$0xff] %v547_v30  ;;  %550 = vst [vmem:[%s14397_s24 + $0xf8] sm:$0xff] %v549_v31  ;;  %v553_v33 = vld [vmem:[%s14392_s19 + $0x108] sm:$0xff]  ;;  %v555_v34 = vld [vmem:[%s14392_s19 + $0x110] sm:$0xff] }
  0x40   : > { %552 = vst [vmem:[%s14397_s24 + $0x100] sm:$0xff] %v551_v32  ;;  %v557_v35 = vld [vmem:[%s14392_s19 + $0x118] sm:$0xff]  ;;  %554 = vst [vmem:[%s14397_s24 + $0x108] sm:$0xff] %v553_v33  ;;  %v559_v36 = vld [vmem:[%s14392_s19 + $0x120] sm:$0xff] }
  0x41   : > { %556 = vst [vmem:[%s14397_s24 + $0x110] sm:$0xff] %v555_v34  ;;  %558 = vst [vmem:[%s14397_s24 + $0x118] sm:$0xff] %v557_v35  ;;  %v561_v37 = vld [vmem:[%s14392_s19 + $0x128] sm:$0xff]  ;;  %v563_v38 = vld [vmem:[%s14392_s19 + $0x130] sm:$0xff] }
  0x42   : > { %560 = vst [vmem:[%s14397_s24 + $0x120] sm:$0xff] %v559_v36  ;;  %562 = vst [vmem:[%s14397_s24 + $0x128] sm:$0xff] %v561_v37  ;;  %v565_v39 = vld [vmem:[%s14392_s19 + $0x138] sm:$0xff]  ;;  %v567_v40 = vld [vmem:[%s14392_s19 + $0x140] sm:$0xff] }
  0x43   : > { %564 = vst [vmem:[%s14397_s24 + $0x130] sm:$0xff] %v563_v38  ;;  %v569_v41 = vld [vmem:[%s14392_s19 + $0x148] sm:$0xff]  ;;  %566 = vst [vmem:[%s14397_s24 + $0x138] sm:$0xff] %v565_v39  ;;  %v571_v42 = vld [vmem:[%s14392_s19 + $0x150] sm:$0xff] }
  0x44   : > { %568 = vst [vmem:[%s14397_s24 + $0x140] sm:$0xff] %v567_v40  ;;  %570 = vst [vmem:[%s14397_s24 + $0x148] sm:$0xff] %v569_v41  ;;  %v573_v43 = vld [vmem:[%s14392_s19 + $0x158] sm:$0xff]  ;;  %v575_v44 = vld [vmem:[%s14392_s19 + $0x160] sm:$0xff] }
  0x45   : > { %572 = vst [vmem:[%s14397_s24 + $0x150] sm:$0xff] %v571_v42  ;;  %574 = vst [vmem:[%s14397_s24 + $0x158] sm:$0xff] %v573_v43  ;;  %v577_v45 = vld [vmem:[%s14392_s19 + $0x168] sm:$0xff]  ;;  %v579_v46 = vld [vmem:[%s14392_s19 + $0x170] sm:$0xff] }
  0x46   : > { %576 = vst [vmem:[%s14397_s24 + $0x160] sm:$0xff] %v575_v44  ;;  %v581_v47 = vld [vmem:[%s14392_s19 + $0x178] sm:$0xff]  ;;  %578 = vst [vmem:[%s14397_s24 + $0x168] sm:$0xff] %v577_v45  ;;  %v583_v48 = vld [vmem:[%s14392_s19 + $0x180] sm:$0xff] }
  0x47   : > { %580 = vst [vmem:[%s14397_s24 + $0x170] sm:$0xff] %v579_v46  ;;  %582 = vst [vmem:[%s14397_s24 + $0x178] sm:$0xff] %v581_v47  ;;  %v585_v49 = vld [vmem:[%s14392_s19 + $0x188] sm:$0xff]  ;;  %v587_v50 = vld [vmem:[%s14392_s19 + $0x190] sm:$0xff] }
  0x48   : > { %584 = vst [vmem:[%s14397_s24 + $0x180] sm:$0xff] %v583_v48  ;;  %586 = vst [vmem:[%s14397_s24 + $0x188] sm:$0xff] %v585_v49  ;;  %v589_v51 = vld [vmem:[%s14392_s19 + $0x198] sm:$0xff]  ;;  %v591_v52 = vld [vmem:[%s14392_s19 + $0x1a0] sm:$0xff] }
  0x49   : > { %588 = vst [vmem:[%s14397_s24 + $0x190] sm:$0xff] %v587_v50  ;;  %v593_v53 = vld [vmem:[%s14392_s19 + $0x1a8] sm:$0xff]  ;;  %590 = vst [vmem:[%s14397_s24 + $0x198] sm:$0xff] %v589_v51  ;;  %v595_v54 = vld [vmem:[%s14392_s19 + $0x1b0] sm:$0xff] }
  0x4a   : > { %592 = vst [vmem:[%s14397_s24 + $0x1a0] sm:$0xff] %v591_v52  ;;  %594 = vst [vmem:[%s14397_s24 + $0x1a8] sm:$0xff] %v593_v53  ;;  %v597_v55 = vld [vmem:[%s14392_s19 + $0x1b8] sm:$0xff]  ;;  %v599_v56 = vld [vmem:[%s14392_s19 + $0x1c0] sm:$0xff] }
  0x4b   : > { %596 = vst [vmem:[%s14397_s24 + $0x1b0] sm:$0xff] %v595_v54  ;;  %598 = vst [vmem:[%s14397_s24 + $0x1b8] sm:$0xff] %v597_v55  ;;  %v601_v57 = vld [vmem:[%s14392_s19 + $0x1c8] sm:$0xff]  ;;  %v603_v58 = vld [vmem:[%s14392_s19 + $0x1d0] sm:$0xff] }
  0x4c   : > { %600 = vst [vmem:[%s14397_s24 + $0x1c0] sm:$0xff] %v599_v56  ;;  %v605_v59 = vld [vmem:[%s14392_s19 + $0x1d8] sm:$0xff]  ;;  %602 = vst [vmem:[%s14397_s24 + $0x1c8] sm:$0xff] %v601_v57  ;;  %v607_v60 = vld [vmem:[%s14392_s19 + $0x1e0] sm:$0xff] }
  0x4d   : > { %604 = vst [vmem:[%s14397_s24 + $0x1d0] sm:$0xff] %v603_v58  ;;  %606 = vst [vmem:[%s14397_s24 + $0x1d8] sm:$0xff] %v605_v59  ;;  %v609_v61 = vld [vmem:[%s14392_s19 + $0x1e8] sm:$0xff]  ;;  %v611_v62 = vld [vmem:[%s14392_s19 + $0x1f0] sm:$0xff] }
  0x4e   : > { %608 = vst [vmem:[%s14397_s24 + $0x1e0] sm:$0xff] %v607_v60  ;;  %610 = vst [vmem:[%s14397_s24 + $0x1e8] sm:$0xff] %v609_v61  ;;  %v613_v63 = vld [vmem:[%s14392_s19 + $0x1f8] sm:$0xff]  ;;  %v615_v0 = vld [vmem:[%s14392_s19 + $0x800] sm:$0xff] }
  0x4f   : > { %612 = vst [vmem:[%s14397_s24 + $0x1f0] sm:$0xff] %v611_v62  ;;  %v617_v1 = vld [vmem:[%s14392_s19 + $0x808] sm:$0xff]  ;;  %614 = vst [vmem:[%s14397_s24 + $0x1f8] sm:$0xff] %v613_v63  ;;  %v619_v2 = vld [vmem:[%s14392_s19 + $0x810] sm:$0xff] }
  0x50   : > { %616 = vst [vmem:[%s14397_s24 + $0x200] sm:$0xff] %v615_v0  ;;  %618 = vst [vmem:[%s14397_s24 + $0x208] sm:$0xff] %v617_v1  ;;  %v621_v3 = vld [vmem:[%s14392_s19 + $0x818] sm:$0xff]  ;;  %v623_v4 = vld [vmem:[%s14392_s19 + $0x820] sm:$0xff] }
  0x51   : > { %620 = vst [vmem:[%s14397_s24 + $0x210] sm:$0xff] %v619_v2  ;;  %622 = vst [vmem:[%s14397_s24 + $0x218] sm:$0xff] %v621_v3  ;;  %v625_v5 = vld [vmem:[%s14392_s19 + $0x828] sm:$0xff]  ;;  %v627_v6 = vld [vmem:[%s14392_s19 + $0x830] sm:$0xff] }
  0x52   : > { %624 = vst [vmem:[%s14397_s24 + $0x220] sm:$0xff] %v623_v4  ;;  %v629_v7 = vld [vmem:[%s14392_s19 + $0x838] sm:$0xff]  ;;  %626 = vst [vmem:[%s14397_s24 + $0x228] sm:$0xff] %v625_v5  ;;  %v631_v8 = vld [vmem:[%s14392_s19 + $0x840] sm:$0xff] }
  0x53   : > { %628 = vst [vmem:[%s14397_s24 + $0x230] sm:$0xff] %v627_v6  ;;  %630 = vst [vmem:[%s14397_s24 + $0x238] sm:$0xff] %v629_v7  ;;  %v633_v9 = vld [vmem:[%s14392_s19 + $0x848] sm:$0xff]  ;;  %v635_v10 = vld [vmem:[%s14392_s19 + $0x850] sm:$0xff] }
  0x54   : > { %632 = vst [vmem:[%s14397_s24 + $0x240] sm:$0xff] %v631_v8  ;;  %634 = vst [vmem:[%s14397_s24 + $0x248] sm:$0xff] %v633_v9  ;;  %v637_v11 = vld [vmem:[%s14392_s19 + $0x858] sm:$0xff]  ;;  %v639_v12 = vld [vmem:[%s14392_s19 + $0x860] sm:$0xff] }
  0x55   : > { %636 = vst [vmem:[%s14397_s24 + $0x250] sm:$0xff] %v635_v10  ;;  %v641_v13 = vld [vmem:[%s14392_s19 + $0x868] sm:$0xff]  ;;  %638 = vst [vmem:[%s14397_s24 + $0x258] sm:$0xff] %v637_v11  ;;  %v643_v14 = vld [vmem:[%s14392_s19 + $0x870] sm:$0xff] }
  0x56   : > { %640 = vst [vmem:[%s14397_s24 + $0x260] sm:$0xff] %v639_v12  ;;  %642 = vst [vmem:[%s14397_s24 + $0x268] sm:$0xff] %v641_v13  ;;  %v645_v15 = vld [vmem:[%s14392_s19 + $0x878] sm:$0xff]  ;;  %v647_v16 = vld [vmem:[%s14392_s19 + $0x880] sm:$0xff] }
  0x57   : > { %644 = vst [vmem:[%s14397_s24 + $0x270] sm:$0xff] %v643_v14  ;;  %646 = vst [vmem:[%s14397_s24 + $0x278] sm:$0xff] %v645_v15  ;;  %v649_v17 = vld [vmem:[%s14392_s19 + $0x888] sm:$0xff]  ;;  %v651_v18 = vld [vmem:[%s14392_s19 + $0x890] sm:$0xff] }
  0x58   : > { %648 = vst [vmem:[%s14397_s24 + $0x280] sm:$0xff] %v647_v16  ;;  %v653_v19 = vld [vmem:[%s14392_s19 + $0x898] sm:$0xff]  ;;  %650 = vst [vmem:[%s14397_s24 + $0x288] sm:$0xff] %v649_v17  ;;  %v655_v20 = vld [vmem:[%s14392_s19 + $0x8a0] sm:$0xff] }
  0x59   : > { %652 = vst [vmem:[%s14397_s24 + $0x290] sm:$0xff] %v651_v18  ;;  %654 = vst [vmem:[%s14397_s24 + $0x298] sm:$0xff] %v653_v19  ;;  %v657_v21 = vld [vmem:[%s14392_s19 + $0x8a8] sm:$0xff]  ;;  %v659_v22 = vld [vmem:[%s14392_s19 + $0x8b0] sm:$0xff] }
  0x5a   : > { %656 = vst [vmem:[%s14397_s24 + $0x2a0] sm:$0xff] %v655_v20  ;;  %658 = vst [vmem:[%s14397_s24 + $0x2a8] sm:$0xff] %v657_v21  ;;  %v661_v23 = vld [vmem:[%s14392_s19 + $0x8b8] sm:$0xff]  ;;  %v663_v24 = vld [vmem:[%s14392_s19 + $0x8c0] sm:$0xff] }
  0x5b   : > { %660 = vst [vmem:[%s14397_s24 + $0x2b0] sm:$0xff] %v659_v22  ;;  %v665_v25 = vld [vmem:[%s14392_s19 + $0x8c8] sm:$0xff]  ;;  %662 = vst [vmem:[%s14397_s24 + $0x2b8] sm:$0xff] %v661_v23  ;;  %v667_v26 = vld [vmem:[%s14392_s19 + $0x8d0] sm:$0xff] }
  0x5c   : > { %664 = vst [vmem:[%s14397_s24 + $0x2c0] sm:$0xff] %v663_v24  ;;  %666 = vst [vmem:[%s14397_s24 + $0x2c8] sm:$0xff] %v665_v25  ;;  %v669_v27 = vld [vmem:[%s14392_s19 + $0x8d8] sm:$0xff]  ;;  %v671_v28 = vld [vmem:[%s14392_s19 + $0x8e0] sm:$0xff] }
  0x5d   : > { %668 = vst [vmem:[%s14397_s24 + $0x2d0] sm:$0xff] %v667_v26  ;;  %670 = vst [vmem:[%s14397_s24 + $0x2d8] sm:$0xff] %v669_v27  ;;  %v673_v29 = vld [vmem:[%s14392_s19 + $0x8e8] sm:$0xff]  ;;  %v675_v30 = vld [vmem:[%s14392_s19 + $0x8f0] sm:$0xff] }
  0x5e   : > { %672 = vst [vmem:[%s14397_s24 + $0x2e0] sm:$0xff] %v671_v28  ;;  %v677_v31 = vld [vmem:[%s14392_s19 + $0x8f8] sm:$0xff]  ;;  %674 = vst [vmem:[%s14397_s24 + $0x2e8] sm:$0xff] %v673_v29  ;;  %v679_v32 = vld [vmem:[%s14392_s19 + $0x900] sm:$0xff] }
  0x5f   : > { %676 = vst [vmem:[%s14397_s24 + $0x2f0] sm:$0xff] %v675_v30  ;;  %678 = vst [vmem:[%s14397_s24 + $0x2f8] sm:$0xff] %v677_v31  ;;  %v681_v33 = vld [vmem:[%s14392_s19 + $0x908] sm:$0xff]  ;;  %v683_v34 = vld [vmem:[%s14392_s19 + $0x910] sm:$0xff] }
  0x60   : > { %680 = vst [vmem:[%s14397_s24 + $0x300] sm:$0xff] %v679_v32  ;;  %682 = vst [vmem:[%s14397_s24 + $0x308] sm:$0xff] %v681_v33  ;;  %v685_v35 = vld [vmem:[%s14392_s19 + $0x918] sm:$0xff]  ;;  %v687_v36 = vld [vmem:[%s14392_s19 + $0x920] sm:$0xff] }
  0x61   : > { %684 = vst [vmem:[%s14397_s24 + $0x310] sm:$0xff] %v683_v34  ;;  %v689_v37 = vld [vmem:[%s14392_s19 + $0x928] sm:$0xff]  ;;  %686 = vst [vmem:[%s14397_s24 + $0x318] sm:$0xff] %v685_v35  ;;  %v691_v38 = vld [vmem:[%s14392_s19 + $0x930] sm:$0xff] }
  0x62   : > { %688 = vst [vmem:[%s14397_s24 + $0x320] sm:$0xff] %v687_v36  ;;  %690 = vst [vmem:[%s14397_s24 + $0x328] sm:$0xff] %v689_v37  ;;  %v693_v39 = vld [vmem:[%s14392_s19 + $0x938] sm:$0xff]  ;;  %v695_v40 = vld [vmem:[%s14392_s19 + $0x940] sm:$0xff] }
  0x63   : > { %692 = vst [vmem:[%s14397_s24 + $0x330] sm:$0xff] %v691_v38  ;;  %694 = vst [vmem:[%s14397_s24 + $0x338] sm:$0xff] %v693_v39  ;;  %v697_v41 = vld [vmem:[%s14392_s19 + $0x948] sm:$0xff]  ;;  %v699_v42 = vld [vmem:[%s14392_s19 + $0x950] sm:$0xff] }
  0x64   : > { %696 = vst [vmem:[%s14397_s24 + $0x340] sm:$0xff] %v695_v40  ;;  %v701_v43 = vld [vmem:[%s14392_s19 + $0x958] sm:$0xff]  ;;  %698 = vst [vmem:[%s14397_s24 + $0x348] sm:$0xff] %v697_v41  ;;  %v703_v44 = vld [vmem:[%s14392_s19 + $0x960] sm:$0xff] }
  0x65   : > { %700 = vst [vmem:[%s14397_s24 + $0x350] sm:$0xff] %v699_v42  ;;  %702 = vst [vmem:[%s14397_s24 + $0x358] sm:$0xff] %v701_v43  ;;  %v705_v45 = vld [vmem:[%s14392_s19 + $0x968] sm:$0xff]  ;;  %v707_v46 = vld [vmem:[%s14392_s19 + $0x970] sm:$0xff] }
  0x66   : > { %704 = vst [vmem:[%s14397_s24 + $0x360] sm:$0xff] %v703_v44  ;;  %706 = vst [vmem:[%s14397_s24 + $0x368] sm:$0xff] %v705_v45  ;;  %v709_v47 = vld [vmem:[%s14392_s19 + $0x978] sm:$0xff]  ;;  %v711_v48 = vld [vmem:[%s14392_s19 + $0x980] sm:$0xff] }
  0x67   : > { %708 = vst [vmem:[%s14397_s24 + $0x370] sm:$0xff] %v707_v46  ;;  %v713_v49 = vld [vmem:[%s14392_s19 + $0x988] sm:$0xff]  ;;  %710 = vst [vmem:[%s14397_s24 + $0x378] sm:$0xff] %v709_v47  ;;  %v715_v50 = vld [vmem:[%s14392_s19 + $0x990] sm:$0xff] }
  0x68   : > { %712 = vst [vmem:[%s14397_s24 + $0x380] sm:$0xff] %v711_v48  ;;  %714 = vst [vmem:[%s14397_s24 + $0x388] sm:$0xff] %v713_v49  ;;  %v717_v51 = vld [vmem:[%s14392_s19 + $0x998] sm:$0xff]  ;;  %v719_v52 = vld [vmem:[%s14392_s19 + $0x9a0] sm:$0xff] }
  0x69   : > { %716 = vst [vmem:[%s14397_s24 + $0x390] sm:$0xff] %v715_v50  ;;  %718 = vst [vmem:[%s14397_s24 + $0x398] sm:$0xff] %v717_v51  ;;  %v721_v53 = vld [vmem:[%s14392_s19 + $0x9a8] sm:$0xff]  ;;  %v723_v54 = vld [vmem:[%s14392_s19 + $0x9b0] sm:$0xff] }
  0x6a   : > { %720 = vst [vmem:[%s14397_s24 + $0x3a0] sm:$0xff] %v719_v52  ;;  %v725_v55 = vld [vmem:[%s14392_s19 + $0x9b8] sm:$0xff]  ;;  %722 = vst [vmem:[%s14397_s24 + $0x3a8] sm:$0xff] %v721_v53  ;;  %v727_v56 = vld [vmem:[%s14392_s19 + $0x9c0] sm:$0xff] }
  0x6b   : > { %724 = vst [vmem:[%s14397_s24 + $0x3b0] sm:$0xff] %v723_v54  ;;  %726 = vst [vmem:[%s14397_s24 + $0x3b8] sm:$0xff] %v725_v55  ;;  %v729_v57 = vld [vmem:[%s14392_s19 + $0x9c8] sm:$0xff]  ;;  %v731_v58 = vld [vmem:[%s14392_s19 + $0x9d0] sm:$0xff] }
  0x6c   : > { %728 = vst [vmem:[%s14397_s24 + $0x3c0] sm:$0xff] %v727_v56  ;;  %730 = vst [vmem:[%s14397_s24 + $0x3c8] sm:$0xff] %v729_v57  ;;  %v733_v59 = vld [vmem:[%s14392_s19 + $0x9d8] sm:$0xff]  ;;  %v735_v60 = vld [vmem:[%s14392_s19 + $0x9e0] sm:$0xff] }
  0x6d   : > { %732 = vst [vmem:[%s14397_s24 + $0x3d0] sm:$0xff] %v731_v58  ;;  %v737_v61 = vld [vmem:[%s14392_s19 + $0x9e8] sm:$0xff]  ;;  %734 = vst [vmem:[%s14397_s24 + $0x3d8] sm:$0xff] %v733_v59  ;;  %v739_v62 = vld [vmem:[%s14392_s19 + $0x9f0] sm:$0xff] }
  0x6e   : > { %736 = vst [vmem:[%s14397_s24 + $0x3e0] sm:$0xff] %v735_v60  ;;  %738 = vst [vmem:[%s14397_s24 + $0x3e8] sm:$0xff] %v737_v61  ;;  %v741_v63 = vld [vmem:[%s14392_s19 + $0x9f8] sm:$0xff] }
  0x6f   : > { %740 = vst [vmem:[%s14397_s24 + $0x3f0] sm:$0xff] %v739_v62  ;;  %742 = vst [vmem:[%s14397_s24 + $0x3f8] sm:$0xff] %v741_v63 }
  0x70 PF: > { %s749_s26 = sand.u32 1, %s14258_s22   ;;  %s12726_s27 = smul.u32 24576, %s14262_s23 }
  0x71   : > { %s12725_s9 = smul.u32 1536, %s749_s26  ;;  %s14661_s15 = scalar_lea.sflag [#allocation5], %s749_s26 }
  0x72   : > { %s14657_s12 = scalar_lea.hbm %s19121_s2, %s12726_s27  ;;  %s14144_s19 = scalar_lea.hbm %s19121_s2, 98304 }
  0x73   : > { %s753_s13 = scalar_lea.vmem [#allocation4], %s12725_s9  ;;  %s14140_s16 = scalar_lea.hbm %s14657_s12, 24576 }
  0x74   : > { %s761_s14 = sshll.u32 %s753_s13, 4  ;;  %p14141_p6 = scmp.ne.s32.totalorder %s14657_s12, %s14140_s16  ;;  %s14659_s14 = int_to_ptr.vmem [resolvable:$true] %s761_s14 }
  0x75   : > { %p14145_p12 = scmp.lt.s32.totalorder %s14657_s12, %s19121_s2  ;;  %p14146_p1 = scmp.lt.s32.totalorder %s14144_s19, %s14140_s16 }
  0x76   : > { %p14142_p7 = pnand %p14141_p6, %p14349_p5 }
  0x77   : > { %p14147_p2 = por %p14146_p1, %p14145_p12 }
  0x78   : > { %p14143_p11 = pneg %p14142_p7 }
  0x7a   : > { %p14148_p0 = pnand %p14147_p2, %p14143_p11 }
  0x7c   : > { %14151 = shalt.err (!%p14148_p0)
}
  0x7d   : > { %s14152_s26 = scalar_lea.vmem %s14659_s14, 24576  ;;  %s14265_s9 = smov [#allocation4]  }
  0x7e   : > { %p14153_p3 = scmp.ne.s32.totalorder %s14659_s14, %s14152_s26  ;;  %s14156_s10 = sshll.u32 %s14265_s9, 4  ;;  %s14157_s10 = int_to_ptr.vmem [resolvable:$false] %s14156_s10 }
  0x7f   : > { %s14158_s11 = scalar_lea.vmem %s14157_s10, 49152  ;;  %p14159_p10 = scmp.lt.s32.totalorder %s14659_s14, %s14157_s10 }
  0x80   : > { %p14154_p8 = pnand %p14153_p3, %p14349_p5  ;;  %p14160_p6 = scmp.lt.s32.totalorder %s14158_s11, %s14152_s26 }
  0x82   : > { %p14155_p9 = pneg %p14154_p8  ;;  %p14161_p7 = por %p14160_p6, %p14159_p10 }
  0x84   : > { %p14162_p4 = pnand %p14161_p7, %p14155_p9 }
  0x86   : > { %14165 = shalt.err (!%p14162_p4)
}
  0x87   : > { %s14266_s13 = smov 384   ;;  %s14267_s16 = smov 24  }
  0x88   : > { %12732 = dma.hbm_to_vmem [thread:$0]  (%p14349_p5), %s14657_s12, 24576, %s14659_s14, %s14661_s15, %s14266_s13, %s14266_s13, %s14267_s16  }
  0x89 PF: > { %773 = sbr.rel (%p14372_p13) target bundleno = 1341 (0x53d), region = 70 }
  0x8e   : > { %s14687_s17 = sand.u32 1, %s14254_s21   ;;  %p19367_p4 = scmp.ne.s32.totalorder %s19363_s30, 0 }
  0x8f   : > { %s12391_s18 = sshll.u32 %s14687_s17, 10  ;;  %s12727_s19 = smul.u32 1536, %s14687_s17 }
  0x90   : > { %s14691_s24 = scalar_lea.vmem [#allocation3], %s12391_s18  ;;  %s783_s27 = scalar_lea.sflag [#allocation5], %s14687_s17 }
  0x91   : > { %s14694_s26 = scalar_lea.vmem [#allocation4], %s12727_s19 }
  0x92   : > { %14233 = dma.done.wait (%p19367_p4), %s783_s27, 24576  }
  0x93   : > { %14235 = vsyncadd (%p19367_p4), %s783_s27, 4294942720  ;;  %p19368_p5 = scmp.eq.s32.totalorder %s14331_s0, 0 }
  0x95   : > { %14237 = dma.done.wait (%p19368_p5), [#allocation8], 96   ;;  %p19369_p13 = pmov %p19368_p5 }
  0x96   : > { %s12393_s29 = sshll.u32 %s14687_s17, 3  ;;  %p19370_p11 = scmp.ne.s32.totalorder %s14331_s0, 0 }
  0x97   : > { %14239 = vsyncadd (%p19369_p13), [#allocation8], 4294967200  ;;  %s14705_s8 = scalar_lea.vmem [#allocation9], %s12393_s29 }
  0x98   : > { %827 = sbr.rel (%p19370_p11) target bundleno = 159 (0x9f), region = 86 }
  0x9d   : > { %v14268_v0 = vmov 0.0  }
  0x9e   : > { %828 = vst [vmem:[#allocation10] sm:$0xff] %v14268_v0  ;;  %829 = vst [vmem:[#allocation10 + $0x8] sm:$0xf] %v14268_v0 }
  0x9f PF: > { %v836_v1 = vld [vmem:[%s14691_s24 + $0x10] sm:$0xff]  ;;  %v834_v2 = vld [vmem:[%s14691_s24] sm:$0xff]  ;;  %v837_v3 = vld [vmem:[%s14691_s24 + $0x18] sm:$0xff]  ;;  %s830_s30 = sld [smem:[#allocation2]]  ;;  %vm1731_vm0 = vcmask 400384   ;;  %vm9168_vm1 = vcmask 130112  }
  0xa0   : > { %v964_v4 = vmax.f32 %v836_v1, 1e-06  ;;  %v962_v5 = vmax.f32 %v834_v2, 1e-06  ;;  %v965_v6 = vmax.f32 %v837_v3, 1e-06 }
  0xa1   : > { %v835_v7 = vld [vmem:[%s14691_s24 + $0x8] sm:$0xff]  ;;  %v838_v9 = vld [vmem:[%s14691_s24 + $0x20] sm:$0xff]  ;;  %v841_v13 = vld [vmem:[%s14691_s24 + $0x38] sm:$0xff]  ;;  %vm9175_vm2 = vcmask 195712   ;;  %vm9182_vm3 = vcmask 261312   ;;  %vm9189_vm4 = vcmask 326912  }
  0xa2   : > { %v839_v8 = vld [vmem:[%s14691_s24 + $0x28] sm:$0xff]  ;;  %13088 = vlog2.f32 %v964_v4  ;;  %v963_v10 = vmax.f32 %v835_v7, 1e-06  ;;  %v966_v12 = vmax.f32 %v838_v9, 1e-06  ;;  %v840_v14 = vld [vmem:[%s14691_s24 + $0x30] sm:$0xff] }
  0xa3   : > { %v967_v11 = vmax.f32 %v839_v8, 1e-06  ;;  %13090 = vlog2.f32 %v962_v5  ;;  %v843_v15 = vld [vmem:[%s14691_s24 + $0x48] sm:$0xff]  ;;  %v969_v16 = vmax.f32 %v841_v13, 1e-06  ;;  %v842_v18 = vld [vmem:[%s14691_s24 + $0x40] sm:$0xff] }
  0xa4   : > { %13092 = vlog2.f32 %v965_v6  ;;  %v968_v17 = vmax.f32 %v840_v14, 1e-06  ;;  %v845_v19 = vld [vmem:[%s14691_s24 + $0x58] sm:$0xff]  ;;  %v971_v20 = vmax.f32 %v843_v15, 1e-06  ;;  %v844_v21 = vld [vmem:[%s14691_s24 + $0x50] sm:$0xff] }
  0xa5   : > { %13094 = vlog2.f32 %v963_v10  ;;  %v970_v22 = vmax.f32 %v842_v18, 1e-06  ;;  %v847_v23 = vld [vmem:[%s14691_s24 + $0x68] sm:$0xff]  ;;  %v973_v24 = vmax.f32 %v845_v19, 1e-06  ;;  %v846_v25 = vld [vmem:[%s14691_s24 + $0x60] sm:$0xff]  ;;  %v14729_v39 = vstv %s830_s30 }
  0xa6   : > { %13096 = vlog2.f32 %v967_v11  ;;  %v972_v26 = vmax.f32 %v844_v21, 1e-06  ;;  %v849_v27 = vld [vmem:[%s14691_s24 + $0x78] sm:$0xff]  ;;  %v975_v28 = vmax.f32 %v847_v23, 1e-06  ;;  %v848_v29 = vld [vmem:[%s14691_s24 + $0x70] sm:$0xff] }
  0xa7   : > { %13098 = vlog2.f32 %v966_v12  ;;  %v974_v30 = vmax.f32 %v846_v25, 1e-06  ;;  %v851_v31 = vld [vmem:[%s14691_s24 + $0x88] sm:$0xff]  ;;  %v977_v32 = vmax.f32 %v849_v27, 1e-06  ;;  %v850_v33 = vld [vmem:[%s14691_s24 + $0x80] sm:$0xff] }
  0xa8   : > { %13100 = vlog2.f32 %v969_v16  ;;  %v976_v34 = vmax.f32 %v848_v29, 1e-06  ;;  %v853_v35 = vld [vmem:[%s14691_s24 + $0x98] sm:$0xff]  ;;  %v979_v36 = vmax.f32 %v851_v31, 1e-06  ;;  %v852_v37 = vld [vmem:[%s14691_s24 + $0x90] sm:$0xff] }
  0xa9   : > { %13102 = vlog2.f32 %v968_v17  ;;  %v978_v40 = vmax.f32 %v850_v33, 1e-06  ;;  %v981_v43 = vmax.f32 %v853_v35, 1e-06  ;;  %v980_v46 = vmax.f32 %v852_v37, 1e-06 }
  0xaa   : > { %13104 = vlog2.f32 %v971_v20  ;;  %vm9196_vm5 = vcmask 392512   ;;  %vm9203_vm6 = vcmask 458112   ;;  %vm9210_vm7 = vcmask 523712   ;;  %p12715_p12 = scmp.ne.s32.totalorder %s14331_s0, 3 }
  0xab   : > { %13106 = vlog2.f32 %v970_v22  ;;  %vm9217_vm8 = vcmask 589312   ;;  %vm9224_vm9 = vcmask 654912   ;;  %vm9231_vm10 = vcmask 720512  }
  0xac   : > { %13108 = vlog2.f32 %v973_v24  ;;  %vm9238_vm11 = vcmask 786112   ;;  %vm9245_vm12 = vcmask 851712   ;;  %vm9252_vm13 = vcmask 917312  }
  0xad   : > { %13110 = vlog2.f32 %v972_v26  ;;  %vm9259_vm14 = vcmask 982912   ;;  %vm9266_vm15 = vcmask 1048512  }
  0xae   : > { %13112 = vlog2.f32 %v975_v28 }
  0xaf   : > { %v13089_v38 = vpop.eup %13088  ;;  %13114 = vlog2.f32 %v974_v30 }
  0xb0   : > { %v13091_v41 = vpop.eup %13090  ;;  %v1095_v42 = vmul.f32 0.6931472, %v13089_v38  ;;  %13116 = vlog2.f32 %v977_v32 }
  0xb1   : > { %v13093_v44 = vpop.eup %13092  ;;  %v1091_v45 = vmul.f32 0.6931472, %v13091_v41  ;;  %13118 = vlog2.f32 %v976_v34 }
  0xb2   : > { %v13095_v47 = vpop.eup %13094  ;;  %v1349_v48 = vmul.f32 %v1095_v42, %v14729_v39  ;;  %v1097_v49 = vmul.f32 0.6931472, %v13093_v44  ;;  %13120 = vlog2.f32 %v979_v36 }
  0xb3   : > { %v13097_v50 = vpop.eup %13096  ;;  %v1347_v51 = vmul.f32 %v1091_v45, %v14729_v39  ;;  %v1093_v52 = vmul.f32 0.6931472, %v13095_v47  ;;  %13122 = vlog2.f32 %v978_v40 }
  0xb4   : > { %v13099_v53 = vpop.eup %13098  ;;  %v1479_v54 = vmul.f32 1.442695, %v1349_v48  ;;  %v1350_v55 = vmul.f32 %v1097_v49, %v14729_v39  ;;  %v1101_v56 = vmul.f32 0.6931472, %v13097_v50  ;;  %13124 = vlog2.f32 %v981_v43 }
  0xb5   : > { %v13101_v57 = vpop.eup %13100  ;;  %v1475_v58 = vmul.f32 1.442695, %v1347_v51  ;;  %v1348_v59 = vmul.f32 %v1093_v52, %v14729_v39  ;;  %v1099_v60 = vmul.f32 0.6931472, %v13099_v53  ;;  %13126 = vlog2.f32 %v980_v46 }
  0xb6   : > { %v13103_v61 = vpop.eup %13102  ;;  %13128 = vpow2.f32 %v1479_v54  ;;  %v1481_v62 = vmul.f32 1.442695, %v1350_v55  ;;  %v1352_v63 = vmul.f32 %v1101_v56, %v14729_v39  ;;  %v1105_v0 = vmul.f32 0.6931472, %v13101_v57  ;;  %v855_v54 = vld [vmem:[%s14691_s24 + $0xa8] sm:$0xff] }
  0xb7   : > { %v13105_v1 = vpop.eup %13104  ;;  %13130 = vpow2.f32 %v1475_v58  ;;  %v1477_v2 = vmul.f32 1.442695, %v1348_v59  ;;  %v1351_v3 = vmul.f32 %v1099_v60, %v14729_v39  ;;  %v1103_v4 = vmul.f32 0.6931472, %v13103_v61  ;;  %v854_v59 = vld [vmem:[%s14691_s24 + $0xa0] sm:$0xff] }
  0xb8   : > { %v13107_v5 = vpop.eup %13106  ;;  %13132 = vpow2.f32 %v1481_v62  ;;  %v1485_v6 = vmul.f32 1.442695, %v1352_v63  ;;  %v1354_v7 = vmul.f32 %v1105_v0, %v14729_v39  ;;  %v1109_v8 = vmul.f32 0.6931472, %v13105_v1  ;;  %v857_v0 = vld [vmem:[%s14691_s24 + $0xb8] sm:$0xff] }
  0xb9   : > { %v13109_v9 = vpop.eup %13108  ;;  %13134 = vpow2.f32 %v1477_v2  ;;  %v1483_v10 = vmul.f32 1.442695, %v1351_v3  ;;  %v1353_v11 = vmul.f32 %v1103_v4, %v14729_v39  ;;  %v1107_v12 = vmul.f32 0.6931472, %v13107_v5  ;;  %v856_v5 = vld [vmem:[%s14691_s24 + $0xb0] sm:$0xff] }
  0xba   : > { %v13111_v13 = vpop.eup %13110  ;;  %13136 = vpow2.f32 %v1485_v6  ;;  %v1489_v14 = vmul.f32 1.442695, %v1354_v7  ;;  %v1356_v15 = vmul.f32 %v1109_v8, %v14729_v39  ;;  %v1113_v16 = vmul.f32 0.6931472, %v13109_v9 }
  0xbb   : > { %v13113_v17 = vpop.eup %13112  ;;  %13138 = vpow2.f32 %v1483_v10  ;;  %v1487_v18 = vmul.f32 1.442695, %v1353_v11  ;;  %v1355_v19 = vmul.f32 %v1107_v12, %v14729_v39  ;;  %v1111_v20 = vmul.f32 0.6931472, %v13111_v13  ;;  %v859_v10 = vld [vmem:[%s14691_s24 + $0xc8] sm:$0xff]  ;;  %v858_v13 = vld [vmem:[%s14691_s24 + $0xc0] sm:$0xff] }
  0xbc   : > { %v13115_v21 = vpop.eup %13114  ;;  %13140 = vpow2.f32 %v1489_v14  ;;  %v1493_v22 = vmul.f32 1.442695, %v1356_v15  ;;  %v1358_v23 = vmul.f32 %v1113_v16, %v14729_v39  ;;  %v1117_v24 = vmul.f32 0.6931472, %v13113_v17  ;;  %v861_v16 = vld [vmem:[%s14691_s24 + $0xd8] sm:$0xff] }
  0xbd   : > { %v13117_v25 = vpop.eup %13116  ;;  %13142 = vpow2.f32 %v1487_v18  ;;  %v1491_v26 = vmul.f32 1.442695, %v1355_v19  ;;  %v1357_v27 = vmul.f32 %v1111_v20, %v14729_v39  ;;  %v1115_v28 = vmul.f32 0.6931472, %v13115_v21  ;;  %v860_v20 = vld [vmem:[%s14691_s24 + $0xd0] sm:$0xff] }
  0xbe   : > { %v13119_v29 = vpop.eup %13118  ;;  %13144 = vpow2.f32 %v1493_v22  ;;  %v1497_v30 = vmul.f32 1.442695, %v1358_v23  ;;  %v1360_v31 = vmul.f32 %v1117_v24, %v14729_v39  ;;  %v1121_v32 = vmul.f32 0.6931472, %v13117_v25  ;;  %v863_v24 = vld [vmem:[%s14691_s24 + $0xe8] sm:$0xff] }
  0xbf   : > { %v13121_v33 = vpop.eup %13120  ;;  %13146 = vpow2.f32 %v1491_v26  ;;  %v1495_v34 = vmul.f32 1.442695, %v1357_v27  ;;  %v1359_v35 = vmul.f32 %v1115_v28, %v14729_v39  ;;  %v1119_v36 = vmul.f32 0.6931472, %v13119_v29  ;;  %v862_v27 = vld [vmem:[%s14691_s24 + $0xe0] sm:$0xff] }
  0xc0   : > { %v13123_v37 = vpop.eup %13122  ;;  %13148 = vpow2.f32 %v1497_v30  ;;  %v1501_v38 = vmul.f32 1.442695, %v1360_v31  ;;  %v1362_v40 = vmul.f32 %v1121_v32, %v14729_v39  ;;  %v1125_v41 = vmul.f32 0.6931472, %v13121_v33  ;;  %v865_v30 = vld [vmem:[%s14691_s24 + $0xf8] sm:$0xff] }
  0xc1   : > { %v13125_v42 = vpop.eup %13124  ;;  %13150 = vpow2.f32 %v1495_v34  ;;  %v1499_v43 = vmul.f32 1.442695, %v1359_v35  ;;  %v1361_v44 = vmul.f32 %v1119_v36, %v14729_v39  ;;  %v1123_v45 = vmul.f32 0.6931472, %v13123_v37  ;;  %v864_v34 = vld [vmem:[%s14691_s24 + $0xf0] sm:$0xff] }
  0xc2   : > { %v13127_v46 = vpop.eup %13126  ;;  %13152 = vpow2.f32 %v1501_v38  ;;  %v1505_v47 = vmul.f32 1.442695, %v1362_v40  ;;  %v1364_v48 = vmul.f32 %v1125_v41, %v14729_v39  ;;  %v1129_v49 = vmul.f32 0.6931472, %v13125_v42  ;;  %v867_v38 = vld [vmem:[%s14691_s24 + $0x108] sm:$0xff]  ;;  %v866_v42 = vld [vmem:[%s14691_s24 + $0x100] sm:$0xff] }
  0xc3   : > { %v13129_v50 = vpop.eup %13128  ;;  %13154 = vpow2.f32 %v1499_v43  ;;  %v1503_v51 = vmul.f32 1.442695, %v1361_v44  ;;  %v1363_v52 = vmul.f32 %v1123_v45, %v14729_v39  ;;  %v1127_v53 = vmul.f32 0.6931472, %v13127_v46  ;;  %v869_v45 = vld [vmem:[%s14691_s24 + $0x118] sm:$0xff] }
  0xc4   : > { %v13131_v55 = vpop.eup %13130  ;;  %v1738_v56 = vsel %vm1731_vm0, %v13129_v50, 0.0  ;;  %13156 = vpow2.f32 %v1505_v47  ;;  %v1509_v57 = vmul.f32 1.442695, %v1364_v48  ;;  %v1366_v58 = vmul.f32 %v1129_v49, %v14729_v39  ;;  %v868_v49 = vld [vmem:[%s14691_s24 + $0x110] sm:$0xff]  ;;  %v871_v50 = vld [vmem:[%s14691_s24 + $0x128] sm:$0xff] }
  0xc5   : > { %v13133_v60 = vpop.eup %13132  ;;  %1739 = vadd.xlane.f32.xlu1 %v1738_v56  ;;  %v1732_v61 = vsel %vm1731_vm0, %v13131_v55, 0.0  ;;  %13158 = vpow2.f32 %v1503_v51  ;;  %v1507_v62 = vmul.f32 1.442695, %v1363_v52  ;;  %v1365_v63 = vmul.f32 %v1127_v53, %v14729_v39  ;;  %v870_v51 = vld [vmem:[%s14691_s24 + $0x120] sm:$0xff]  ;;  %v873_v55 = vld [vmem:[%s14691_s24 + $0x138] sm:$0xff]  ;;  %v872_v56 = vld [vmem:[%s14691_s24 + $0x130] sm:$0xff] }
  0xc6   : > { %v13135_v1 = vpop.eup %13134  ;;  %1733 = vadd.xlane.f32.xlu0 %v1732_v61  ;;  %v1741_v2 = vsel %vm1731_vm0, %v13133_v60, 0.0  ;;  %13160 = vpow2.f32 %v1509_v57  ;;  %v1513_v3 = vmul.f32 1.442695, %v1366_v58  ;;  %v983_v4 = vmax.f32 %v855_v54, 1e-06 }
  0xc7   : > { %v13137_v6 = vpop.eup %13136  ;;  %v1735_v7 = vsel %vm1731_vm0, %v13135_v1, 0.0  ;;  %13162 = vpow2.f32 %v1507_v62  ;;  %v1511_v8 = vmul.f32 1.442695, %v1365_v63  ;;  %v982_v9 = vmax.f32 %v854_v59, 1e-06 }
  0xc8   : > { %v13139_v11 = vpop.eup %13138  ;;  %13164 = vpow2.f32 %v1513_v3  ;;  %v985_v12 = vmax.f32 %v857_v0, 1e-06  ;;  %v984_v15 = vmax.f32 %v856_v5, 1e-06  ;;  %v1747_v18 = vsel %vm1731_vm0, %v13137_v6, 0.0 }
  0xc9   : > { %v13141_v14 = vpop.eup %13140  ;;  %1742 = vadd.xlane.f32.xlu1 %v1741_v2  ;;  %13166 = vpow2.f32 %v1511_v8  ;;  %v987_v19 = vmax.f32 %v859_v10, 1e-06  ;;  %v1744_v22 = vsel %vm1731_vm0, %v13139_v11, 0.0  ;;  %v986_v23 = vmax.f32 %v858_v13, 1e-06 }
  0xca   : > { %v13143_v17 = vpop.eup %13142  ;;  %1736 = vadd.xlane.f32.xlu0 %v1735_v7  ;;  %13168 = vlog2.f32 %v983_v4  ;;  %v989_v26 = vmax.f32 %v861_v16, 1e-06  ;;  %v988_v29 = vmax.f32 %v860_v20, 1e-06  ;;  %v1753_v32 = vsel %vm1731_vm0, %v13141_v14, 0.0 }
  0xcb   : > { %v13145_v21 = vpop.eup %13144  ;;  %13170 = vlog2.f32 %v982_v9  ;;  %v991_v33 = vmax.f32 %v863_v24, 1e-06  ;;  %v1750_v36 = vsel %vm1731_vm0, %v13143_v17, 0.0  ;;  %v990_v37 = vmax.f32 %v862_v27, 1e-06 }
  0xcc   : > { %v13147_v25 = vpop.eup %13146  ;;  %13172 = vlog2.f32 %v985_v12  ;;  %v993_v41 = vmax.f32 %v865_v30, 1e-06  ;;  %v992_v44 = vmax.f32 %v864_v34, 1e-06  ;;  %v1759_v47 = vsel %vm1731_vm0, %v13145_v21, 0.0 }
  0xcd   : > { %v13149_v28 = vpop.eup %13148  ;;  %1748 = vadd.xlane.f32.xlu1 %v1747_v18  ;;  %13174 = vlog2.f32 %v984_v15  ;;  %v995_v48 = vmax.f32 %v867_v38, 1e-06  ;;  %v1756_v53 = vsel %vm1731_vm0, %v13147_v25, 0.0  ;;  %v994_v54 = vmax.f32 %v866_v42, 1e-06 }
  0xce   : > { %v13151_v31 = vpop.eup %13150  ;;  %1745 = vadd.xlane.f32.xlu0 %v1744_v22  ;;  %13176 = vlog2.f32 %v987_v19  ;;  %v997_v58 = vmax.f32 %v869_v45, 1e-06  ;;  %v996_v60 = vmax.f32 %v868_v49, 1e-06  ;;  %v999_v61 = vmax.f32 %v871_v50, 1e-06 }
  0xcf   : > { %v13153_v35 = vpop.eup %13152  ;;  %13178 = vlog2.f32 %v986_v23  ;;  %v998_v62 = vmax.f32 %v870_v51, 1e-06  ;;  %v1765_v0 = vsel %vm1731_vm0, %v13149_v28, 0.0  ;;  %v1001_v1 = vmax.f32 %v873_v55, 1e-06 }
  0xd0   : > { %v13155_v40 = vpop.eup %13154  ;;  %13180 = vlog2.f32 %v989_v26  ;;  %v1000_v2 = vmax.f32 %v872_v56, 1e-06  ;;  %v1762_v4 = vsel %vm1731_vm0, %v13151_v31, 0.0  ;;  %v1771_v5 = vsel %vm1731_vm0, %v13153_v35, 0.0 }
  0xd1   : > { %v13157_v43 = vpop.eup %13156  ;;  %1754 = vadd.xlane.f32.xlu1 %v1753_v32  ;;  %13182 = vlog2.f32 %v988_v29  ;;  %v1768_v6 = vsel %vm1731_vm0, %v13155_v40, 0.0 }
  0xd2   : > { %v13159_v46 = vpop.eup %13158  ;;  %1751 = vadd.xlane.f32.xlu0 %v1750_v36  ;;  %13184 = vlog2.f32 %v991_v33  ;;  %v1777_v8 = vsel %vm1731_vm0, %v13157_v43, 0.0 }
  0xd3   : > { %v13161_v52 = vpop.eup %13160  ;;  %13186 = vlog2.f32 %v990_v37  ;;  %v1774_v9 = vsel %vm1731_vm0, %v13159_v46, 0.0 }
  0xd4   : > { %v13163_v57 = vpop.eup %13162  ;;  %13188 = vlog2.f32 %v993_v41  ;;  %v14788_v12 = vsel %vm1731_vm0, %v13161_v52, 0.0 }
  0xd5   : > { %v13165_v59 = vpop.eup %13164  ;;  %1760 = vadd.xlane.f32.xlu1 %v1759_v47  ;;  %13190 = vlog2.f32 %v992_v44  ;;  %v14791_v13 = vsel %vm1731_vm0, %v13163_v57, 0.0 }
  0xd6   : > { %v13167_v63 = vpop.eup %13166  ;;  %1757 = vadd.xlane.f32.xlu0 %v1756_v53  ;;  %13192 = vlog2.f32 %v995_v48  ;;  %v14794_v16 = vsel %vm1731_vm0, %v13165_v59, 0.0 }
  0xd7   : > { %v13169_v3 = vpop.eup %13168  ;;  %13194 = vlog2.f32 %v994_v54  ;;  %v14798_v20 = vsel %vm1731_vm0, %v13167_v63, 0.0 }
  0xd8   : > { %v13171_v7 = vpop.eup %13170  ;;  %v1133_v10 = vmul.f32 0.6931472, %v13169_v3  ;;  %13196 = vlog2.f32 %v997_v58 }
  0xd9   : > { %v13173_v11 = vpop.eup %13172  ;;  %1766 = vadd.xlane.f32.xlu1 %v1765_v0  ;;  %v1131_v14 = vmul.f32 0.6931472, %v13171_v7  ;;  %13198 = vlog2.f32 %v996_v60 }
  0xda   : > { %v13175_v15 = vpop.eup %13174  ;;  %1763 = vadd.xlane.f32.xlu0 %v1762_v4  ;;  %v1368_v17 = vmul.f32 %v1133_v10, %v14729_v39  ;;  %v1137_v18 = vmul.f32 0.6931472, %v13173_v11  ;;  %13200 = vlog2.f32 %v999_v61 }
  0xdb   : > { %v13177_v19 = vpop.eup %13176  ;;  %v1367_v21 = vmul.f32 %v1131_v14, %v14729_v39  ;;  %v1135_v22 = vmul.f32 0.6931472, %v13175_v15  ;;  %13202 = vlog2.f32 %v998_v62 }
  0xdc   : > { %v13179_v23 = vpop.eup %13178  ;;  %v1517_v24 = vmul.f32 1.442695, %v1368_v17  ;;  %v1370_v25 = vmul.f32 %v1137_v18, %v14729_v39  ;;  %v1141_v26 = vmul.f32 0.6931472, %v13177_v19  ;;  %13204 = vlog2.f32 %v1001_v1  ;;  %v875_v17 = vld [vmem:[%s14691_s24 + $0x148] sm:$0xff] }
  0xdd   : > { %v13181_v27 = vpop.eup %13180  ;;  %1772 = vadd.xlane.f32.xlu1 %v1771_v5  ;;  %v1515_v28 = vmul.f32 1.442695, %v1367_v21  ;;  %v1369_v29 = vmul.f32 %v1135_v22, %v14729_v39  ;;  %v1139_v30 = vmul.f32 0.6931472, %v13179_v23  ;;  %13206 = vlog2.f32 %v1000_v2  ;;  %v874_v23 = vld [vmem:[%s14691_s24 + $0x140] sm:$0xff] }
  0xde   : > { %v13183_v31 = vpop.eup %13182  ;;  %1769 = vadd.xlane.f32.xlu0 %v1768_v6  ;;  %13208 = vpow2.f32 %v1517_v24  ;;  %v1521_v32 = vmul.f32 1.442695, %v1370_v25  ;;  %v1372_v33 = vmul.f32 %v1141_v26, %v14729_v39  ;;  %v1145_v34 = vmul.f32 0.6931472, %v13181_v27  ;;  %v877_v27 = vld [vmem:[%s14691_s24 + $0x158] sm:$0xff] }
  0xdf   : > { %v13185_v35 = vpop.eup %13184  ;;  %13210 = vpow2.f32 %v1515_v28  ;;  %v1519_v36 = vmul.f32 1.442695, %v1369_v29  ;;  %v1371_v37 = vmul.f32 %v1139_v30, %v14729_v39  ;;  %v1143_v38 = vmul.f32 0.6931472, %v13183_v31  ;;  %v876_v31 = vld [vmem:[%s14691_s24 + $0x150] sm:$0xff] }
  0xe0   : > { %v13187_v40 = vpop.eup %13186  ;;  %13212 = vpow2.f32 %v1521_v32  ;;  %v1525_v41 = vmul.f32 1.442695, %v1372_v33  ;;  %v1374_v42 = vmul.f32 %v1145_v34, %v14729_v39  ;;  %v1149_v43 = vmul.f32 0.6931472, %v13185_v35 }
  0xe1   : > { %v13189_v44 = vpop.eup %13188  ;;  %1778 = vadd.xlane.f32.xlu1 %v1777_v8  ;;  %13214 = vpow2.f32 %v1519_v36  ;;  %v1523_v45 = vmul.f32 1.442695, %v1371_v37  ;;  %v1373_v46 = vmul.f32 %v1143_v38, %v14729_v39  ;;  %v1147_v47 = vmul.f32 0.6931472, %v13187_v40  ;;  %v879_v36 = vld [vmem:[%s14691_s24 + $0x168] sm:$0xff] }
  0xe2   : > { %v13191_v48 = vpop.eup %13190  ;;  %1775 = vadd.xlane.f32.xlu0 %v1774_v9  ;;  %13216 = vpow2.f32 %v1525_v41  ;;  %v1529_v49 = vmul.f32 1.442695, %v1374_v42  ;;  %v1376_v50 = vmul.f32 %v1149_v43, %v14729_v39  ;;  %v1153_v51 = vmul.f32 0.6931472, %v13189_v44 }
  0xe3   : > { %v13193_v52 = vpop.eup %13192  ;;  %13218 = vpow2.f32 %v1523_v45  ;;  %v1527_v53 = vmul.f32 1.442695, %v1373_v46  ;;  %v1375_v54 = vmul.f32 %v1147_v47, %v14729_v39  ;;  %v1151_v55 = vmul.f32 0.6931472, %v13191_v48  ;;  %v878_v48 = vld [vmem:[%s14691_s24 + $0x160] sm:$0xff] }
  0xe4   : > { %v13195_v56 = vpop.eup %13194  ;;  %13220 = vpow2.f32 %v1529_v49  ;;  %v1533_v57 = vmul.f32 1.442695, %v1376_v50  ;;  %v1378_v58 = vmul.f32 %v1153_v51, %v14729_v39  ;;  %v1157_v59 = vmul.f32 0.6931472, %v13193_v52  ;;  %v881_v51 = vld [vmem:[%s14691_s24 + $0x178] sm:$0xff] }
  0xe5   : > { %v13197_v60 = vpop.eup %13196  ;;  %1784 = vadd.xlane.f32.xlu1 %v14788_v12  ;;  %13222 = vpow2.f32 %v1527_v53  ;;  %v1531_v61 = vmul.f32 1.442695, %v1375_v54  ;;  %v1377_v62 = vmul.f32 %v1151_v55, %v14729_v39  ;;  %v1155_v63 = vmul.f32 0.6931472, %v13195_v56  ;;  %v880_v55 = vld [vmem:[%s14691_s24 + $0x170] sm:$0xff] }
  0xe6   : > { %v13199_v0 = vpop.eup %13198  ;;  %1781 = vadd.xlane.f32.xlu0 %v14791_v13  ;;  %13224 = vpow2.f32 %v1533_v57  ;;  %v1537_v1 = vmul.f32 1.442695, %v1378_v58  ;;  %v1380_v2 = vmul.f32 %v1157_v59, %v14729_v39  ;;  %v1161_v3 = vmul.f32 0.6931472, %v13197_v60  ;;  %v883_v59 = vld [vmem:[%s14691_s24 + $0x188] sm:$0xff] }
  0xe7   : > { %v13201_v4 = vpop.eup %13200  ;;  %13226 = vpow2.f32 %v1531_v61  ;;  %v1535_v5 = vmul.f32 1.442695, %v1377_v62  ;;  %v1379_v6 = vmul.f32 %v1155_v63, %v14729_v39  ;;  %v1159_v7 = vmul.f32 0.6931472, %v13199_v0  ;;  %v882_v62 = vld [vmem:[%s14691_s24 + $0x180] sm:$0xff] }
  0xe8   : > { %v13203_v8 = vpop.eup %13202  ;;  %13228 = vpow2.f32 %v1537_v1  ;;  %v1541_v9 = vmul.f32 1.442695, %v1380_v2  ;;  %v1382_v10 = vmul.f32 %v1161_v3, %v14729_v39  ;;  %v1165_v11 = vmul.f32 0.6931472, %v13201_v4  ;;  %v885_v1 = vld [vmem:[%s14691_s24 + $0x198] sm:$0xff]  ;;  %v884_v2 = vld [vmem:[%s14691_s24 + $0x190] sm:$0xff] }
  0xe9   : > { %v13205_v12 = vpop.eup %13204  ;;  %1790 = vadd.xlane.f32.xlu1 %v14794_v16  ;;  %13230 = vpow2.f32 %v1535_v5  ;;  %v1539_v13 = vmul.f32 1.442695, %v1379_v6  ;;  %v1381_v14 = vmul.f32 %v1159_v7, %v14729_v39  ;;  %v1163_v15 = vmul.f32 0.6931472, %v13203_v8  ;;  %v887_v6 = vld [vmem:[%s14691_s24 + $0x1a8] sm:$0xff]  ;;  %v886_v7 = vld [vmem:[%s14691_s24 + $0x1a0] sm:$0xff] }
  0xea   : > { %v13207_v18 = vpop.eup %13206  ;;  %1787 = vadd.xlane.f32.xlu0 %v14798_v20  ;;  %13232 = vpow2.f32 %v1541_v9  ;;  %v1545_v19 = vmul.f32 1.442695, %v1382_v10  ;;  %v1384_v21 = vmul.f32 %v1165_v11, %v14729_v39  ;;  %v1169_v22 = vmul.f32 0.6931472, %v13205_v12  ;;  %v889_v8 = vld [vmem:[%s14691_s24 + $0x1b8] sm:$0xff]  ;;  %v888_v12 = vld [vmem:[%s14691_s24 + $0x1b0] sm:$0xff] }
  0xeb   : > { %v13209_v24 = vpop.eup %13208  ;;  %13234 = vpow2.f32 %v1539_v13  ;;  %v1543_v16 = vmul.f32 1.442695, %v1381_v14  ;;  %v1383_v25 = vmul.f32 %v1163_v15, %v14729_v39  ;;  %v1167_v26 = vmul.f32 0.6931472, %v13207_v18  ;;  %v891_v13 = vld [vmem:[%s14691_s24 + $0x1c8] sm:$0xff]  ;;  %v14849_v14 = vld [vmem:[%s14691_s24 + $0x1c0] sm:$0xff] }
  0xec   : > { %v13211_v28 = vpop.eup %13210  ;;  %v1795_v29 = vsel %vm1731_vm0, %v13209_v24, 0.0  ;;  %13236 = vpow2.f32 %v1545_v19  ;;  %v1549_v20 = vmul.f32 1.442695, %v1384_v21  ;;  %v1386_v30 = vmul.f32 %v1169_v22, %v14729_v39  ;;  %v14852_v19 = vld [vmem:[%s14691_s24 + $0x1d8] sm:$0xff]  ;;  %v14855_v24 = vld [vmem:[%s14691_s24 + $0x1d0] sm:$0xff] }
  0xed   : > { %v13213_v32 = vpop.eup %13212  ;;  %1796 = vadd.xlane.f32.xlu1 %v1795_v29  ;;  %v1792_v33 = vsel %vm1731_vm0, %v13211_v28, 0.0  ;;  %13238 = vpow2.f32 %v1543_v16  ;;  %v1547_v34 = vmul.f32 1.442695, %v1383_v25  ;;  %v1385_v35 = vmul.f32 %v1167_v26, %v14729_v39 }
  0xee   : > { %v13215_v37 = vpop.eup %13214  ;;  %1793 = vadd.xlane.f32.xlu0 %v1792_v33  ;;  %v1801_v38 = vsel %vm1731_vm0, %v13213_v32, 0.0  ;;  %13240 = vpow2.f32 %v1549_v20  ;;  %v1553_v40 = vmul.f32 1.442695, %v1386_v30  ;;  %v1003_v41 = vmax.f32 %v875_v17, 1e-06 }
  0xef   : > { %v13217_v42 = vpop.eup %13216  ;;  %v1798_v43 = vsel %vm1731_vm0, %v13215_v37, 0.0  ;;  %13242 = vpow2.f32 %v1547_v34  ;;  %v1551_v44 = vmul.f32 1.442695, %v1385_v35  ;;  %v1002_v45 = vmax.f32 %v874_v23, 1e-06 }
  0xf0   : > { %v13219_v46 = vpop.eup %13218  ;;  %13244 = vpow2.f32 %v1553_v40  ;;  %v1005_v47 = vmax.f32 %v877_v27, 1e-06  ;;  %v1004_v50 = vmax.f32 %v876_v31, 1e-06  ;;  %v1807_v53 = vsel %vm1731_vm0, %v13217_v42, 0.0 }
  0xf1   : > { %v13221_v49 = vpop.eup %13220  ;;  %1802 = vadd.xlane.f32.xlu1 %v1801_v38  ;;  %13246 = vpow2.f32 %v1551_v44  ;;  %v1007_v54 = vmax.f32 %v879_v36, 1e-06  ;;  %v1804_v57 = vsel %vm1731_vm0, %v13219_v46, 0.0  ;;  %v1006_v58 = vmax.f32 %v878_v48, 1e-06 }
  0xf2   : > { %v13223_v52 = vpop.eup %13222  ;;  %1799 = vadd.xlane.f32.xlu0 %v1798_v43  ;;  %13248 = vlog2.f32 %v1003_v41  ;;  %v1009_v61 = vmax.f32 %v881_v51, 1e-06  ;;  %v1008_v0 = vmax.f32 %v880_v55, 1e-06  ;;  %v1813_v4 = vsel %vm1731_vm0, %v13221_v49, 0.0 }
  0xf3   : > { %v13225_v56 = vpop.eup %13224  ;;  %13250 = vlog2.f32 %v1002_v45  ;;  %v1011_v5 = vmax.f32 %v883_v59, 1e-06  ;;  %v1810_v10 = vsel %vm1731_vm0, %v13223_v52, 0.0  ;;  %v1010_v11 = vmax.f32 %v882_v62, 1e-06 }
  0xf4   : > { %v13227_v60 = vpop.eup %13226  ;;  %13252 = vlog2.f32 %v1005_v47  ;;  %v1013_v17 = vmax.f32 %v885_v1, 1e-06  ;;  %v1012_v18 = vmax.f32 %v884_v2, 1e-06  ;;  %v1015_v22 = vmax.f32 %v887_v6, 1e-06 }
  0xf5   : > { %v13229_v63 = vpop.eup %13228  ;;  %1808 = vadd.xlane.f32.xlu1 %v1807_v53  ;;  %13254 = vlog2.f32 %v1004_v50  ;;  %v1014_v23 = vmax.f32 %v886_v7, 1e-06  ;;  %v1819_v25 = vsel %vm1731_vm0, %v13225_v56, 0.0  ;;  %v1017_v26 = vmax.f32 %v889_v8, 1e-06 }
  0xf6   : > { %v13231_v3 = vpop.eup %13230  ;;  %1805 = vadd.xlane.f32.xlu0 %v1804_v57  ;;  %13256 = vlog2.f32 %v1007_v54  ;;  %v1016_v27 = vmax.f32 %v888_v12, 1e-06  ;;  %v1816_v29 = vsel %vm1731_vm0, %v13227_v60, 0.0  ;;  %v1019_v20 = vmax.f32 %v891_v13, 1e-06 }
  0xf7   : > { %v13233_v9 = vpop.eup %13232  ;;  %13258 = vlog2.f32 %v1006_v58  ;;  %v1018_v30 = vmax.f32 %v14849_v14, 1e-06  ;;  %v1021_v32 = vmax.f32 %v14852_v19, 1e-06  ;;  %v1020_v34 = vmax.f32 %v14855_v24, 1e-06 }
  0xf8   : > { %v13235_v15 = vpop.eup %13234  ;;  %13260 = vlog2.f32 %v1009_v61  ;;  %v1825_v36 = vsel %vm1731_vm0, %v13229_v63, 0.0  ;;  %v1822_v37 = vsel %vm1731_vm0, %v13231_v3, 0.0  ;;  %v1831_v40 = vsel %vm1731_vm0, %v13233_v9, 0.0 }
  0xf9   : > { %v13237_v21 = vpop.eup %13236  ;;  %1814 = vadd.xlane.f32.xlu1 %v1813_v4  ;;  %13262 = vlog2.f32 %v1008_v0  ;;  %v1828_v41 = vsel %vm1731_vm0, %v13235_v15, 0.0 }
  0xfa   : > { %v13239_v16 = vpop.eup %13238  ;;  %1811 = vadd.xlane.f32.xlu0 %v1810_v10  ;;  %13264 = vlog2.f32 %v1011_v5  ;;  %v1837_v42 = vsel %vm1731_vm0, %v13237_v21, 0.0 }
  0xfb   : > { %v13241_v28 = vpop.eup %13240  ;;  %13266 = vlog2.f32 %v1010_v11  ;;  %v1834_v44 = vsel %vm1731_vm0, %v13239_v16, 0.0 }
  0xfc   : > { %v13243_v31 = vpop.eup %13242  ;;  %13268 = vlog2.f32 %v1013_v17  ;;  %v14872_v47 = vsel %vm1731_vm0, %v13241_v28, 0.0 }
  0xfd   : > { %v13245_v33 = vpop.eup %13244  ;;  %1820 = vadd.xlane.f32.xlu1 %v1819_v25  ;;  %13270 = vlog2.f32 %v1012_v18  ;;  %v14875_v50 = vsel %vm1731_vm0, %v13243_v31, 0.0 }
  0xfe   : > { %v14862_v35 = vpop.eup %13246  ;;  %1817 = vadd.xlane.f32.xlu0 %v1816_v29  ;;  %13272 = vlog2.f32 %v1015_v22  ;;  %v14879_v54 = vsel %vm1731_vm0, %v13245_v33, 0.0 }
  0xff   : > { %v13249_v38 = vpop.eup %13248  ;;  %13274 = vlog2.f32 %v1014_v23 }
 0x100   : > { %v13251_v43 = vpop.eup %13250  ;;  %v1173_v45 = vmul.f32 0.6931472, %v13249_v38  ;;  %13276 = vrcp.f32 %v14729_v39 }
 0x101   : > { %v13253_v46 = vpop.eup %13252  ;;  %1826 = vadd.xlane.f32.xlu1 %v1825_v36  ;;  %v1171_v48 = vmul.f32 0.6931472, %v13251_v43  ;;  %13278 = vlog2.f32 %v1017_v26 }
 0x102   : > { %v13255_v49 = vpop.eup %13254  ;;  %1823 = vadd.xlane.f32.xlu0 %v1822_v37  ;;  %v1388_v51 = vmul.f32 %v1173_v45, %v14729_v39  ;;  %v1177_v52 = vmul.f32 0.6931472, %v13253_v46  ;;  %13280 = vlog2.f32 %v1016_v27  ;;  %v1846_v37 = vsel %vm1731_vm0, %v14862_v35, 0.0 }
 0x103   : > { %v13257_v53 = vpop.eup %13256  ;;  %v1387_v55 = vmul.f32 %v1171_v48, %v14729_v39  ;;  %v1175_v56 = vmul.f32 0.6931472, %v13255_v49  ;;  %13282 = vlog2.f32 %v1019_v20 }
 0x104   : > { %v13259_v57 = vpop.eup %13258  ;;  %v1557_v58 = vmul.f32 1.442695, %v1388_v51  ;;  %v1390_v59 = vmul.f32 %v1177_v52, %v14729_v39  ;;  %v1181_v60 = vmul.f32 0.6931472, %v13257_v53  ;;  %13284 = vlog2.f32 %v1018_v30  ;;  %v895_v51 = vld [vmem:[%s14691_s24 + $0x1e8] sm:$0xff] }
 0x105   : > { %v13261_v61 = vpop.eup %13260  ;;  %1832 = vadd.xlane.f32.xlu1 %v1831_v40  ;;  %v1555_v62 = vmul.f32 1.442695, %v1387_v55  ;;  %v1389_v63 = vmul.f32 %v1175_v56, %v14729_v39  ;;  %v1179_v0 = vmul.f32 0.6931472, %v13259_v57  ;;  %13286 = vlog2.f32 %v1021_v32  ;;  %v894_v56 = vld [vmem:[%s14691_s24 + $0x1e0] sm:$0xff] }
 0x106   : > { %v13263_v1 = vpop.eup %13262  ;;  %1829 = vadd.xlane.f32.xlu0 %v1828_v41  ;;  %13288 = vpow2.f32 %v1557_v58  ;;  %v1561_v2 = vmul.f32 1.442695, %v1390_v59  ;;  %v1392_v3 = vmul.f32 %v1181_v60, %v14729_v39  ;;  %v1185_v4 = vmul.f32 0.6931472, %v13261_v61  ;;  %v897_v60 = vld [vmem:[%s14691_s24 + $0x1f8] sm:$0xff] }
 0x107   : > { %v13265_v5 = vpop.eup %13264  ;;  %13290 = vpow2.f32 %v1555_v62  ;;  %v1559_v6 = vmul.f32 1.442695, %v1389_v63  ;;  %v1391_v7 = vmul.f32 %v1179_v0, %v14729_v39  ;;  %v1183_v8 = vmul.f32 0.6931472, %v13263_v1  ;;  %v896_v1 = vld [vmem:[%s14691_s24 + $0x1f0] sm:$0xff] }
 0x108   : > { %v13267_v9 = vpop.eup %13266  ;;  %13292 = vpow2.f32 %v1561_v2  ;;  %v1565_v10 = vmul.f32 1.442695, %v1392_v3  ;;  %v1394_v11 = vmul.f32 %v1185_v4, %v14729_v39  ;;  %v1189_v12 = vmul.f32 0.6931472, %v13265_v5 }
 0x109   : > { %v13269_v13 = vpop.eup %13268  ;;  %1838 = vadd.xlane.f32.xlu1 %v1837_v42  ;;  %13294 = vpow2.f32 %v1559_v6  ;;  %v1563_v14 = vmul.f32 1.442695, %v1391_v7  ;;  %v1393_v15 = vmul.f32 %v1183_v8, %v14729_v39  ;;  %v1187_v17 = vmul.f32 0.6931472, %v13267_v9  ;;  %v899_v6 = vld [vmem:[%s14691_s24 + $0x208] sm:$0xff]  ;;  %v898_v9 = vld [vmem:[%s14691_s24 + $0x200] sm:$0xff] }
 0x10a   : > { %v13271_v18 = vpop.eup %13270  ;;  %1835 = vadd.xlane.f32.xlu0 %v1834_v44  ;;  %13296 = vpow2.f32 %v1565_v10  ;;  %v1569_v19 = vmul.f32 1.442695, %v1394_v11  ;;  %v1396_v21 = vmul.f32 %v1189_v12, %v14729_v39  ;;  %v1193_v22 = vmul.f32 0.6931472, %v13269_v13 }
 0x10b   : > { %v13273_v23 = vpop.eup %13272  ;;  %13298 = vpow2.f32 %v1563_v14  ;;  %v1567_v16 = vmul.f32 1.442695, %v1393_v15  ;;  %v1395_v25 = vmul.f32 %v1187_v17, %v14729_v39  ;;  %v1191_v26 = vmul.f32 0.6931472, %v13271_v18  ;;  %v901_v14 = vld [vmem:[%s14691_s24 + $0x218] sm:$0xff]  ;;  %v900_v15 = vld [vmem:[%s14691_s24 + $0x210] sm:$0xff] }
 0x10c   : > { %v13275_v27 = vpop.eup %13274  ;;  %13300 = vpow2.f32 %v1569_v19  ;;  %v1573_v28 = vmul.f32 1.442695, %v1396_v21  ;;  %v1398_v29 = vmul.f32 %v1193_v22, %v14729_v39  ;;  %v1197_v20 = vmul.f32 0.6931472, %v13273_v23  ;;  %v903_v19 = vld [vmem:[%s14691_s24 + $0x228] sm:$0xff]  ;;  %v902_v21 = vld [vmem:[%s14691_s24 + $0x220] sm:$0xff] }
 0x10d   : > { %v13277_v30 = vpop.eup %13276  ;;  %1844 = vadd.xlane.f32.xlu1 %v14872_v47  ;;  %13302 = vpow2.f32 %v1567_v16  ;;  %v1571_v31 = vmul.f32 1.442695, %v1395_v25  ;;  %v1397_v32 = vmul.f32 %v1191_v26, %v14729_v39  ;;  %v1195_v33 = vmul.f32 0.6931472, %v13275_v27  ;;  %v905_v16 = vld [vmem:[%s14691_s24 + $0x238] sm:$0xff] }
 0x10e   : > { %v13279_v36 = vpop.eup %13278  ;;  %1841 = vadd.xlane.f32.xlu0 %v14875_v50  ;;  %13304 = vpow2.f32 %v1573_v28  ;;  %v1577_v38 = vmul.f32 1.442695, %v1398_v29  ;;  %v1400_v40 = vmul.f32 %v1197_v20, %v14729_v39  ;;  %12728 = vpush %v13277_v30  ;;  %v1022_v13 = vmax.f32 %v894_v56, 1e-06  ;;  %v904_v28 = vld [vmem:[%s14691_s24 + $0x230] sm:$0xff] }
 0x10f   : > { %v13281_v41 = vpop.eup %13280  ;;  %13306 = vpow2.f32 %v1571_v31  ;;  %v1575_v42 = vmul.f32 1.442695, %v1397_v32  ;;  %v1399_v43 = vmul.f32 %v1195_v33, %v14729_v39  ;;  %v1201_v44 = vmul.f32 0.6931472, %v13279_v36  ;;  %v907_v31 = vld [vmem:[%s14691_s24 + $0x248] sm:$0xff] }
 0x110   : > { %v13283_v45 = vpop.eup %13282  ;;  %13308 = vpow2.f32 %v1577_v38  ;;  %v1581_v46 = vmul.f32 1.442695, %v1400_v40  ;;  %v1199_v47 = vmul.f32 0.6931472, %v13281_v41  ;;  %v1025_v18 = vmax.f32 %v897_v60, 1e-06 }
 0x111   : > { %v13285_v48 = vpop.eup %13284  ;;  %1850 = vadd.xlane.f32.xlu1 %v14879_v54  ;;  %13310 = vpow2.f32 %v1575_v42  ;;  %v1579_v35 = vmul.f32 1.442695, %v1399_v43  ;;  %v1402_v49 = vmul.f32 %v1201_v44, %v14729_v39  ;;  %v1205_v50 = vmul.f32 0.6931472, %v13283_v45  ;;  %v14927_v38 = vld [vmem:[%s14691_s24 + $0x258] sm:$0xff]  ;;  %v14930_v43 = vld [vmem:[%s14691_s24 + $0x250] sm:$0xff] }
 0x112   : > { %v13287_v52 = vpop.eup %13286  ;;  %1847 = vadd.xlane.f32.xlu0 %v1846_v37  ;;  %13312 = vpow2.f32 %v1581_v46  ;;  %v1401_v53 = vmul.f32 %v1199_v47, %v14729_v39  ;;  %v1203_v55 = vmul.f32 0.6931472, %v13285_v48  ;;  %v1024_v23 = vmax.f32 %v896_v1, 1e-06  ;;  %v906_v37 = vld [vmem:[%s14691_s24 + $0x240] sm:$0xff]  ;;  %v14934_v47 = vld [vmem:[%s14691_s24 + $0x268] sm:$0xff] }
 0x113   : > { %v13289_v57 = vpop.eup %13288  ;;  %13314 = vpow2.f32 %v1579_v35  ;;  %v1585_v58 = vmul.f32 1.442695, %v1402_v49  ;;  %v1404_v54 = vmul.f32 %v1205_v50, %v14729_v39  ;;  %v1209_v59 = vmul.f32 0.6931472, %v13287_v52  ;;  %v14938_v50 = vld [vmem:[%s14691_s24 + $0x260] sm:$0xff] }
 0x114   : > { %v13291_v61 = vpop.eup %13290  ;;  %v1855_v62 = vsel %vm1731_vm0, %v13289_v57, 0.0  ;;  %v1583_v63 = vmul.f32 1.442695, %v1401_v53  ;;  %v1403_v0 = vmul.f32 %v1203_v55, %v14729_v39  ;;  %13316 = vlog2.f32 %v1020_v34  ;;  %v14941_v53 = vld [vmem:[%s14691_s24 + $0x278] sm:$0xff] }
 0x115   : > { %v13293_v2 = vpop.eup %13292  ;;  %1856 = vadd.xlane.f32.xlu1 %v1855_v62  ;;  %v1852_v3 = vsel %vm1731_vm0, %v13291_v61, 0.0  ;;  %13318 = vpow2.f32 %v1585_v58  ;;  %v1589_v4 = vmul.f32 1.442695, %v1404_v54  ;;  %v1406_v5 = vmul.f32 %v1209_v59, %v14729_v39 }
 0x116   : > { %v13295_v7 = vpop.eup %13294  ;;  %1853 = vadd.xlane.f32.xlu0 %v1852_v3  ;;  %v1861_v8 = vsel %vm1731_vm0, %v13293_v2, 0.0  ;;  %13320 = vpow2.f32 %v1583_v63  ;;  %v1587_v24 = vmul.f32 1.442695, %v1403_v0  ;;  %v1023_v34 = vmax.f32 %v895_v51, 1e-06 }
 0x117   : > { %v13297_v10 = vpop.eup %13296  ;;  %v1858_v11 = vsel %vm1731_vm0, %v13295_v7, 0.0  ;;  %13322 = vpow2.f32 %v1589_v4  ;;  %v1593_v12 = vmul.f32 1.442695, %v1406_v5  ;;  %v1027_v27 = vmax.f32 %v899_v6, 1e-06 }
 0x118   : > { %v13299_v17 = vpop.eup %13298  ;;  %13324 = vpow2.f32 %v1587_v24  ;;  %v1867_v26 = vsel %vm1731_vm0, %v13297_v10, 0.0  ;;  %v1026_v30 = vmax.f32 %v898_v9, 1e-06  ;;  %v1029_v33 = vmax.f32 %v901_v14, 1e-06 }
 0x119   : > { %v13301_v22 = vpop.eup %13300  ;;  %1862 = vadd.xlane.f32.xlu1 %v1861_v8  ;;  %13326 = vpow2.f32 %v1593_v12  ;;  %v1864_v20 = vsel %vm1731_vm0, %v13299_v17, 0.0  ;;  %v1028_v36 = vmax.f32 %v900_v15, 1e-06  ;;  %v1031_v41 = vmax.f32 %v903_v19, 1e-06 }
 0x11a   : > { %v13303_v25 = vpop.eup %13302  ;;  %1859 = vadd.xlane.f32.xlu0 %v1858_v11  ;;  %13328 = vlog2.f32 %v1023_v34  ;;  %v1030_v42 = vmax.f32 %v902_v21, 1e-06  ;;  %v1873_v45 = vsel %vm1731_vm0, %v13301_v22, 0.0  ;;  %v1033_v46 = vmax.f32 %v905_v16, 1e-06 }
 0x11b   : > { %v13305_v29 = vpop.eup %13304  ;;  %13330 = vlog2.f32 %v1022_v13  ;;  %v1870_v35 = vsel %vm1731_vm0, %v13303_v25, 0.0  ;;  %v1032_v49 = vmax.f32 %v904_v28, 1e-06  ;;  %v1035_v52 = vmax.f32 %v907_v31, 1e-06 }
 0x11c   : > { %v13307_v32 = vpop.eup %13306  ;;  %13332 = vlog2.f32 %v1025_v18  ;;  %v1034_v56 = vmax.f32 %v906_v37, 1e-06  ;;  %v1037_v57 = vmax.f32 %v14927_v38, 1e-06  ;;  %v1879_v54 = vsel %vm1731_vm0, %v13305_v29, 0.0 }
 0x11d   : > { %v13309_v40 = vpop.eup %13308  ;;  %1868 = vadd.xlane.f32.xlu1 %v1867_v26  ;;  %13334 = vlog2.f32 %v1024_v23  ;;  %v1036_v60 = vmax.f32 %v14930_v43, 1e-06  ;;  %v1876_v62 = vsel %vm1731_vm0, %v13307_v32, 0.0  ;;  %v1039_v63 = vmax.f32 %v14934_v47, 1e-06 }
 0x11e   : > { %v13311_v44 = vpop.eup %13310  ;;  %1865 = vadd.xlane.f32.xlu0 %v1864_v20  ;;  %13336 = vlog2.f32 %v1027_v27  ;;  %v1038_v2 = vmax.f32 %v14938_v50, 1e-06  ;;  %v1885_v4 = vsel %vm1731_vm0, %v13309_v40, 0.0  ;;  %v1041_v5 = vmax.f32 %v14941_v53, 1e-06 }
 0x11f   : > { %v13313_v48 = vpop.eup %13312  ;;  %13338 = vlog2.f32 %v1026_v30  ;;  %v1882_v7 = vsel %vm1731_vm0, %v13311_v44, 0.0 }
 0x120   : > { %v13315_v51 = vpop.eup %13314  ;;  %13340 = vlog2.f32 %v1029_v33  ;;  %v1891_v34 = vsel %vm1731_vm0, %v13313_v48, 0.0 }
 0x121   : > { %v13317_v55 = vpop.eup %13316  ;;  %1874 = vadd.xlane.f32.xlu1 %v1873_v45  ;;  %13342 = vlog2.f32 %v1028_v36  ;;  %v1888_v9 = vsel %vm1731_vm0, %v13315_v51, 0.0 }
 0x122   : > { %v13319_v58 = vpop.eup %13318  ;;  %1871 = vadd.xlane.f32.xlu0 %v1870_v35  ;;  %v1207_v59 = vmul.f32 0.6931472, %v13317_v55  ;;  %13344 = vlog2.f32 %v1031_v41 }
 0x123   : > { %v13321_v61 = vpop.eup %13320  ;;  %13346 = vlog2.f32 %v1030_v42  ;;  %v1897_v10 = vsel %vm1731_vm0, %v13319_v58, 0.0 }
 0x124   : > { %v13323_v0 = vpop.eup %13322  ;;  %v1405_v1 = vmul.f32 %v1207_v59, %v14729_v39  ;;  %13348 = vlog2.f32 %v1033_v46  ;;  %v1894_v12 = vsel %vm1731_vm0, %v13321_v61, 0.0 }
 0x125   : > { %v13325_v3 = vpop.eup %13324  ;;  %1880 = vadd.xlane.f32.xlu1 %v1879_v54  ;;  %13350 = vlog2.f32 %v1032_v49  ;;  %v14958_v15 = vsel %vm1731_vm0, %v13323_v0, 0.0 }
 0x126   : > { %v13327_v6 = vpop.eup %13326  ;;  %1877 = vadd.xlane.f32.xlu0 %v1876_v62  ;;  %v1591_v8 = vmul.f32 1.442695, %v1405_v1  ;;  %13352 = vlog2.f32 %v1035_v52  ;;  %v14961_v19 = vsel %vm1731_vm0, %v13325_v3, 0.0 }
 0x127   : > { %v13329_v24 = vpop.eup %13328  ;;  %13354 = vlog2.f32 %v1034_v56  ;;  %v14965_v16 = vsel %vm1731_vm0, %v13327_v6, 0.0 }
 0x128   : > { %v13331_v11 = vpop.eup %13330  ;;  %13356 = vpow2.f32 %v1591_v8  ;;  %v1213_v13 = vmul.f32 0.6931472, %v13329_v24 }
 0x129   : > { %v13333_v14 = vpop.eup %13332  ;;  %1886 = vadd.xlane.f32.xlu1 %v1885_v4  ;;  %v1211_v17 = vmul.f32 0.6931472, %v13331_v11  ;;  %13358 = vlog2.f32 %v1037_v57 }
 0x12a   : > { %v13335_v18 = vpop.eup %13334  ;;  %1883 = vadd.xlane.f32.xlu0 %v1882_v7  ;;  %v1408_v21 = vmul.f32 %v1213_v13, %v14729_v39  ;;  %v1217_v22 = vmul.f32 0.6931472, %v13333_v14  ;;  %13360 = vlog2.f32 %v1036_v60  ;;  %v912_v60 = vld [vmem:[%s14691_s24 + $0x270] sm:$0xff] }
 0x12b   : > { %v13337_v23 = vpop.eup %13336  ;;  %v1407_v25 = vmul.f32 %v1211_v17, %v14729_v39  ;;  %v1215_v26 = vmul.f32 0.6931472, %v13335_v18  ;;  %13362 = vlog2.f32 %v1039_v63  ;;  %v1040_v13 = vmax.f32 %v912_v60, 1e-06  ;;  %v920_v60 = vld [vmem:[%s14691_s24 + $0x2b0] sm:$0xff] }
 0x12c   : > { %v13339_v27 = vpop.eup %13338  ;;  %v1597_v28 = vmul.f32 1.442695, %v1408_v21  ;;  %v1410_v29 = vmul.f32 %v1217_v22, %v14729_v39  ;;  %v1221_v20 = vmul.f32 0.6931472, %v13337_v23  ;;  %13364 = vlog2.f32 %v1038_v2 }
 0x12d   : > { %v13341_v30 = vpop.eup %13340  ;;  %1892 = vadd.xlane.f32.xlu1 %v1891_v34  ;;  %v1595_v31 = vmul.f32 1.442695, %v1407_v25  ;;  %v1409_v32 = vmul.f32 %v1215_v26, %v14729_v39  ;;  %v1219_v33 = vmul.f32 0.6931472, %v13339_v27  ;;  %13366 = vlog2.f32 %v1041_v5  ;;  %v915_v27 = vld [vmem:[%s14691_s24 + $0x288] sm:$0xff] }
 0x12e   : > { %v13343_v36 = vpop.eup %13342  ;;  %1889 = vadd.xlane.f32.xlu0 %v1888_v9  ;;  %13368 = vpow2.f32 %v1597_v28  ;;  %v1601_v37 = vmul.f32 1.442695, %v1410_v29  ;;  %v1412_v38 = vmul.f32 %v1221_v20, %v14729_v39  ;;  %v1225_v40 = vmul.f32 0.6931472, %v13341_v30  ;;  %v914_v20 = vld [vmem:[%s14691_s24 + $0x280] sm:$0xff] }
 0x12f   : > { %v13345_v41 = vpop.eup %13344  ;;  %13370 = vpow2.f32 %v1595_v31  ;;  %v1599_v42 = vmul.f32 1.442695, %v1409_v32  ;;  %v1411_v43 = vmul.f32 %v1219_v33, %v14729_v39  ;;  %v1223_v44 = vmul.f32 0.6931472, %v13343_v36  ;;  %v917_v36 = vld [vmem:[%s14691_s24 + $0x298] sm:$0xff] }
 0x130   : > { %v13347_v45 = vpop.eup %13346  ;;  %13372 = vpow2.f32 %v1601_v37  ;;  %v1605_v46 = vmul.f32 1.442695, %v1412_v38  ;;  %v1414_v47 = vmul.f32 %v1225_v40, %v14729_v39  ;;  %v1229_v48 = vmul.f32 0.6931472, %v13345_v41 }
 0x131   : > { %v13349_v35 = vpop.eup %13348  ;;  %1898 = vadd.xlane.f32.xlu1 %v1897_v10  ;;  %13374 = vpow2.f32 %v1599_v42  ;;  %v1603_v49 = vmul.f32 1.442695, %v1411_v43  ;;  %v1413_v50 = vmul.f32 %v1223_v44, %v14729_v39  ;;  %v1227_v51 = vmul.f32 0.6931472, %v13347_v45  ;;  %v916_v42 = vld [vmem:[%s14691_s24 + $0x290] sm:$0xff] }
 0x132   : > { %v13351_v52 = vpop.eup %13350  ;;  %1895 = vadd.xlane.f32.xlu0 %v1894_v12  ;;  %13376 = vpow2.f32 %v1605_v46  ;;  %v1609_v53 = vmul.f32 1.442695, %v1414_v47  ;;  %v1416_v55 = vmul.f32 %v1229_v48, %v14729_v39  ;;  %v1233_v56 = vmul.f32 0.6931472, %v13349_v35  ;;  %v919_v46 = vld [vmem:[%s14691_s24 + $0x2a8] sm:$0xff]  ;;  %v918_v35 = vld [vmem:[%s14691_s24 + $0x2a0] sm:$0xff] }
 0x133   : > { %v13353_v57 = vpop.eup %13352  ;;  %13378 = vpow2.f32 %v1603_v49  ;;  %v1607_v58 = vmul.f32 1.442695, %v1413_v50  ;;  %v1415_v54 = vmul.f32 %v1227_v51, %v14729_v39  ;;  %v1231_v59 = vmul.f32 0.6931472, %v13351_v52  ;;  %v921_v51 = vld [vmem:[%s14691_s24 + $0x2b8] sm:$0xff] }
 0x134   : > { %v13355_v61 = vpop.eup %13354  ;;  %v1613_v62 = vmul.f32 1.442695, %v1416_v55  ;;  %v1418_v63 = vmul.f32 %v1233_v56, %v14729_v39  ;;  %v1237_v0 = vmul.f32 0.6931472, %v13353_v57  ;;  %13380 = vpow2.f32 %v1609_v53 }
 0x135   : > { %v13357_v1 = vpop.eup %13356  ;;  %1904 = vadd.xlane.f32.xlu1 %v14958_v15  ;;  %v1611_v2 = vmul.f32 1.442695, %v1415_v54  ;;  %v1417_v3 = vmul.f32 %v1231_v59, %v14729_v39  ;;  %v1235_v4 = vmul.f32 0.6931472, %v13355_v61  ;;  %13382 = vpow2.f32 %v1607_v58 }
 0x136   : > { %v13359_v5 = vpop.eup %13358  ;;  %1901 = vadd.xlane.f32.xlu0 %v14961_v19  ;;  %v1906_v6 = vsel %vm1731_vm0, %v13357_v1, 0.0  ;;  %v1617_v7 = vmul.f32 1.442695, %v1418_v63  ;;  %v1420_v8 = vmul.f32 %v1237_v0, %v14729_v39  ;;  %13384 = vpow2.f32 %v1613_v62  ;;  %v923_v63 = vld [vmem:[%s14691_s24 + $0x2c8] sm:$0xff] }
 0x137   : > { %v13361_v24 = vpop.eup %13360  ;;  %v1615_v34 = vmul.f32 1.442695, %v1417_v3  ;;  %v1419_v9 = vmul.f32 %v1235_v4, %v14729_v39  ;;  %v1241_v10 = vmul.f32 0.6931472, %v13359_v5  ;;  %13386 = vpow2.f32 %v1611_v2  ;;  %v922_v3 = vld [vmem:[%s14691_s24 + $0x2c0] sm:$0xff] }
 0x138   : > { %v13363_v11 = vpop.eup %13362  ;;  %v1239_v12 = vmul.f32 0.6931472, %v13361_v24  ;;  %v1621_v15 = vmul.f32 1.442695, %v1420_v8  ;;  %13388 = vpow2.f32 %v1617_v7  ;;  %v1043_v41 = vmax.f32 %v915_v27, 1e-06 }
 0x139   : > { %v13365_v14 = vpop.eup %13364  ;;  %1910 = vadd.xlane.f32.xlu1 %v14965_v16  ;;  %v1422_v17 = vmul.f32 %v1241_v10, %v14729_v39  ;;  %v1245_v18 = vmul.f32 0.6931472, %v13363_v11  ;;  %v1619_v21 = vmul.f32 1.442695, %v1419_v9  ;;  %13390 = vpow2.f32 %v1615_v34  ;;  %v925_v7 = vld [vmem:[%s14691_s24 + $0x2d8] sm:$0xff] }
 0x13a   : > { %v13367_v19 = vpop.eup %13366  ;;  %1907 = vadd.xlane.f32.xlu0 %v1906_v6  ;;  %v1421_v22 = vmul.f32 %v1239_v12, %v14729_v39  ;;  %13392 = vlog2.f32 %v1040_v13  ;;  %v1243_v33 = vmul.f32 0.6931472, %v13365_v14  ;;  %v1042_v45 = vmax.f32 %v914_v20, 1e-06 }
 0x13b   : > { %v13369_v23 = vpop.eup %13368  ;;  %v1625_v25 = vmul.f32 1.442695, %v1422_v17  ;;  %v1424_v26 = vmul.f32 %v1245_v18, %v14729_v39  ;;  %13394 = vpow2.f32 %v1621_v15  ;;  %v1249_v40 = vmul.f32 0.6931472, %v13367_v19  ;;  %v924_v17 = vld [vmem:[%s14691_s24 + $0x2d0] sm:$0xff] }
 0x13c   : > { %v13371_v16 = vpop.eup %13370  ;;  %v1915_v28 = vsel %vm1731_vm0, %v13369_v23, 0.0  ;;  %v1623_v29 = vmul.f32 1.442695, %v1421_v22  ;;  %13396 = vpow2.f32 %v1619_v21  ;;  %v1045_v48 = vmax.f32 %v917_v36, 1e-06 }
 0x13d   : > { %v13373_v30 = vpop.eup %13372  ;;  %1916 = vadd.xlane.f32.xlu1 %v1915_v28  ;;  %v1912_v31 = vsel %vm1731_vm0, %v13371_v16, 0.0  ;;  %v1629_v32 = vmul.f32 1.442695, %v1424_v26  ;;  %13398 = vpow2.f32 %v1625_v25  ;;  %v1423_v49 = vmul.f32 %v1243_v33, %v14729_v39  ;;  %v927_v16 = vld [vmem:[%s14691_s24 + $0x2e8] sm:$0xff] }
 0x13e   : > { %v13375_v37 = vpop.eup %13374  ;;  %1913 = vadd.xlane.f32.xlu0 %v1912_v31  ;;  %v1921_v38 = vsel %vm1731_vm0, %v13373_v30, 0.0  ;;  %13400 = vpow2.f32 %v1623_v29  ;;  %v1044_v50 = vmax.f32 %v916_v42, 1e-06  ;;  %v1426_v53 = vmul.f32 %v1249_v40, %v14729_v39 }
 0x13f   : > { %v13377_v43 = vpop.eup %13376  ;;  %v1918_v44 = vsel %vm1731_vm0, %v13375_v37, 0.0  ;;  %13402 = vpow2.f32 %v1629_v32  ;;  %v1047_v55 = vmax.f32 %v919_v46, 1e-06  ;;  %v1046_v58 = vmax.f32 %v918_v35, 1e-06  ;;  %s12729_s12 = spop %12728 }
 0x140   : > { %v13379_v47 = vpop.eup %13378  ;;  %v1927_v52 = vsel %vm1731_vm0, %v13377_v43, 0.0  ;;  %13404 = vlog2.f32 %v1043_v41  ;;  %v1049_v59 = vmax.f32 %v921_v51, 1e-06  ;;  %v1627_v62 = vmul.f32 1.442695, %v1423_v49 }
 0x141   : > { %1922 = vadd.xlane.f32.xlu1 %v1921_v38  ;;  %v13381_v56 = vpop.eup %13380  ;;  %v1924_v57 = vsel %vm1731_vm0, %v13379_v47, 0.0  ;;  %13406 = vlog2.f32 %v1042_v45  ;;  %v1633_v2 = vmul.f32 1.442695, %v1426_v53  ;;  %v1048_v6 = vmax.f32 %v920_v60, 1e-06 }
 0x142   : > { %1919 = vadd.xlane.f32.xlu0 %v1918_v44  ;;  %v13383_v54 = vpop.eup %13382  ;;  %13408 = vlog2.f32 %v1045_v48  ;;  %v1933_v1 = vsel %vm1731_vm0, %v13381_v56, 0.0  ;;  %v1051_v24 = vmax.f32 %v923_v63, 1e-06  ;;  %v1050_v9 = vmax.f32 %v922_v3, 1e-06  ;;  %v15033_v63 = vld [vmem:[%s14691_s24 + $0x2f0] sm:$0xff] }
 0x143   : > { %v13385_v61 = vpop.eup %13384  ;;  %13410 = vlog2.f32 %v1044_v50  ;;  %v1930_v5 = vsel %vm1731_vm0, %v13383_v54, 0.0  ;;  %v1053_v13 = vmax.f32 %v925_v7, 1e-06  ;;  %v1052_v27 = vmax.f32 %v924_v17, 1e-06  ;;  %v15044_v7 = vld [vmem:[%s14691_s24 + $0x300] sm:$0xff] }
 0x144   : > { %v13387_v0 = vpop.eup %13386  ;;  %13412 = vlog2.f32 %v1047_v55  ;;  %v1939_v11 = vsel %vm1731_vm0, %v13385_v61, 0.0  ;;  %v1055_v37 = vmax.f32 %v927_v16, 1e-06  ;;  %v15069_v16 = vld [vmem:[%s14691_s24 + $0x328] sm:$0xff] }
 0x145   : > { %1928 = vadd.xlane.f32.xlu1 %v1927_v52  ;;  %v13389_v4 = vpop.eup %13388  ;;  %13414 = vlog2.f32 %v1046_v58  ;;  %v1936_v15 = vsel %vm1731_vm0, %v13387_v0, 0.0  ;;  %v15029_v58 = vld [vmem:[%s14691_s24 + $0x2f8] sm:$0xff] }
 0x146   : > { %1925 = vadd.xlane.f32.xlu0 %v1924_v57  ;;  %v13391_v8 = vpop.eup %13390  ;;  %13416 = vlog2.f32 %v1049_v59  ;;  %v1945_v25 = vsel %vm1731_vm0, %v13389_v4, 0.0  ;;  %v15026_v57 = vld [vmem:[%s14691_s24 + $0x2e0] sm:$0xff] }
 0x147   : > { %v13393_v34 = vpop.eup %13392  ;;  %13418 = vpow2.f32 %v1627_v62  ;;  %v1942_v20 = vsel %vm1731_vm0, %v13391_v8, 0.0  ;;  %v1054_v4 = vmax.f32 %v15026_v57, 1e-06 }
 0x148   : > { %v13395_v10 = vpop.eup %13394  ;;  %13420 = vpow2.f32 %v1633_v2  ;;  %v1247_v12 = vmul.f32 0.6931472, %v13393_v34 }
 0x149   : > { %1934 = vadd.xlane.f32.xlu1 %v1933_v1  ;;  %v13397_v14 = vpop.eup %13396  ;;  %13422 = vlog2.f32 %v1048_v6  ;;  %v1951_v33 = vsel %vm1731_vm0, %v13395_v10, 0.0  ;;  %v15041_v6 = vld [vmem:[%s14691_s24 + $0x308] sm:$0xff]  ;;  %v15051_v10 = vld [vmem:[%s14691_s24 + $0x318] sm:$0xff] }
 0x14a   : > { %1931 = vadd.xlane.f32.xlu0 %v1930_v5  ;;  %v13399_v18 = vpop.eup %13398  ;;  %v1425_v19 = vmul.f32 %v1247_v12, %v14729_v39  ;;  %13424 = vlog2.f32 %v1051_v24  ;;  %v1948_v41 = vsel %vm1731_vm0, %v13397_v14, 0.0  ;;  %v1057_v5 = vmax.f32 %v15029_v58, 1e-06 }
 0x14b   : > { %v13401_v21 = vpop.eup %13400  ;;  %13426 = vlog2.f32 %v1050_v9  ;;  %v1957_v46 = vsel %vm1731_vm0, %v13399_v18, 0.0  ;;  %v1056_v9 = vmax.f32 %v15033_v63, 1e-06 }
 0x14c   : > { %v15013_v22 = vpop.eup %13402  ;;  %v1631_v26 = vmul.f32 1.442695, %v1425_v19  ;;  %13428 = vlog2.f32 %v1053_v13  ;;  %v1954_v2 = vsel %vm1731_vm0, %v13401_v21, 0.0 }
 0x14d   : > { %1940 = vadd.xlane.f32.xlu1 %v1939_v11  ;;  %v13405_v28 = vpop.eup %13404  ;;  %v15054_v11 = vld [vmem:[%s14691_s24 + $0x310] sm:$0xff]  ;;  %v1963_v14 = vsel %vm1731_vm0, %v15013_v22, 0.0 }
 0x14e   : > { %1937 = vadd.xlane.f32.xlu0 %v1936_v15  ;;  %v1740_v23 = vpop.xlane.xlu1 %1739  ;;  %v13407_v30 = vpop.eup %13406  ;;  %v1253_v31 = vmul.f32 0.6931472, %v13405_v28 }
 0x14f   : > { %13430 = vlog2.f32 %v1740_v23  ;;  %v1734_v29 = vpop.xlane.xlu0 %1733  ;;  %v13409_v32 = vpop.eup %13408  ;;  %v1251_v36 = vmul.f32 0.6931472, %v13407_v30 }
 0x150   : > { %13432 = vlog2.f32 %v1734_v29  ;;  %v13411_v38 = vpop.eup %13410  ;;  %v1428_v42 = vmul.f32 %v1253_v31, %v14729_v39  ;;  %v1257_v43 = vmul.f32 0.6931472, %v13409_v32  ;;  %v15074_v31 = vld [vmem:[%s14691_s24 + $0x320] sm:$0xff] }
 0x151   : > { %1946 = vadd.xlane.f32.xlu1 %v1945_v25  ;;  %13434 = vpow2.f32 %v1631_v26  ;;  %v13413_v44 = vpop.eup %13412  ;;  %v1427_v47 = vmul.f32 %v1251_v36, %v14729_v39  ;;  %v1255_v48 = vmul.f32 0.6931472, %v13411_v38 }
 0x152   : > { %1943 = vadd.xlane.f32.xlu0 %v1942_v20  ;;  %v1743_v40 = vpop.xlane.xlu1 %1742  ;;  %13436 = vlog2.f32 %v1052_v27  ;;  %v13415_v35 = vpop.eup %13414  ;;  %v1637_v49 = vmul.f32 1.442695, %v1428_v42  ;;  %v1430_v50 = vmul.f32 %v1257_v43, %v14729_v39  ;;  %v1261_v51 = vmul.f32 0.6931472, %v13413_v44 }
 0x153   : > { %13438 = vlog2.f32 %v1743_v40  ;;  %v1737_v45 = vpop.xlane.xlu0 %1736  ;;  %v13417_v52 = vpop.eup %13416  ;;  %v1635_v53 = vmul.f32 1.442695, %v1427_v47  ;;  %v1429_v55 = vmul.f32 %v1255_v48, %v14729_v39  ;;  %v1259_v56 = vmul.f32 0.6931472, %v13415_v35  ;;  %v15078_v40 = vld [vmem:[%s14691_s24 + $0x338] sm:$0xff] }
 0x154   : > { %13440 = vlog2.f32 %v1737_v45  ;;  %v13419_v54 = vpop.eup %13418  ;;  %v1641_v60 = vmul.f32 1.442695, %v1430_v50  ;;  %v1432_v61 = vmul.f32 %v1261_v51, %v14729_v39  ;;  %v1265_v62 = vmul.f32 0.6931472, %v13417_v52  ;;  %v15092_v50 = vld [vmem:[%s14691_s24 + $0x340] sm:$0xff]  ;;  %v15247_v45 = vld [vmem:[%s14691_s24 + $0x3d8] sm:$0xff] }
 0x155   : > { %1952 = vadd.xlane.f32.xlu1 %v1951_v33  ;;  %13442 = vlog2.f32 %v1055_v37  ;;  %v13421_v0 = vpop.eup %13420  ;;  %v1639_v24 = vmul.f32 1.442695, %v1429_v55  ;;  %v1431_v34 = vmul.f32 %v1259_v56, %v14729_v39  ;;  %v1960_v21 = vsel %vm1731_vm0, %v13419_v54, 0.0  ;;  %v15097_v56 = vld [vmem:[%s14691_s24 + $0x358] sm:$0xff] }
 0x156   : > { %1949 = vadd.xlane.f32.xlu0 %v1948_v41  ;;  %v1749_v59 = vpop.xlane.xlu1 %1748  ;;  %13444 = vpow2.f32 %v1637_v49  ;;  %v15036_v3 = vpop.eup %13422  ;;  %v1645_v15 = vmul.f32 1.442695, %v1432_v61  ;;  %v1434_v17 = vmul.f32 %v1265_v62, %v14729_v39  ;;  %v15071_v20 = vstv %s12729_s12  ;;  %v15089_v49 = vld [vmem:[%s14691_s24 + $0x348] sm:$0xff] }
 0x157   : > { %13446 = vlog2.f32 %v1749_v59  ;;  %v1746_v1 = vpop.xlane.xlu0 %1745  ;;  %v15046_v8 = vpop.eup %13424  ;;  %19371 = vst [vmem:[#allocation16_spill] sm:$0xff] %v15071_v20  ;;  %v1643_v30 = vmul.f32 1.442695, %v1431_v34  ;;  %v1969_v37 = vsel %vm1731_vm0, %v13421_v0, 0.0 }
 0x158   : > { %13448 = vlog2.f32 %v1746_v1  ;;  %v15056_v12 = vpop.eup %13426  ;;  %v1649_v38 = vmul.f32 1.442695, %v1434_v17 }
 0x159   : > { %1958 = vadd.xlane.f32.xlu1 %v1957_v46  ;;  %13450 = vpow2.f32 %v1635_v53  ;;  %v15061_v18 = vpop.eup %13428  ;;  %v15085_v46 = vld [vmem:[%s14691_s24 + $0x330] sm:$0xff] }
 0x15a   : > { %1955 = vadd.xlane.f32.xlu0 %v1954_v2  ;;  %v1755_v13 = vpop.xlane.xlu1 %1754  ;;  %13452 = vpow2.f32 %v1641_v60 }
 0x15b   : > { %13454 = vlog2.f32 %v1755_v13  ;;  %v1752_v19 = vpop.xlane.xlu0 %1751 }
 0x15c   : > { %v13431_v26 = vpop.eup %13430  ;;  %13456 = vlog2.f32 %v1752_v19 }
 0x15d   : > { %v13433_v28 = vpop.eup %13432  ;;  %v2121_v29 = vmul.f32 0.6931472, %v13431_v26  ;;  %1964 = vadd.xlane.f32.xlu1 %v1963_v14  ;;  %13458 = vpow2.f32 %v1639_v24 }
 0x15e   : > { %v13435_v32 = vpop.eup %13434  ;;  %v2117_v33 = vmul.f32 0.6931472, %v13433_v28  ;;  %1961 = vadd.xlane.f32.xlu0 %v1960_v21  ;;  %v1761_v36 = vpop.xlane.xlu1 %1760  ;;  %13460 = vpow2.f32 %v1645_v15 }
 0x15f   : > { %v15080_v41 = vpop.eup %13436  ;;  %v12397_v42 = vadd.f32 -3.8918202, %v2121_v29  ;;  %13462 = vlog2.f32 %v1761_v36  ;;  %v1758_v43 = vpop.xlane.xlu0 %1757  ;;  %v1966_v44 = vsel %vm1731_vm0, %v13435_v32, 0.0 }
 0x160   : > { %v13439_v47 = vpop.eup %13438  ;;  %v12395_v48 = vadd.f32 -3.8918202, %v2117_v33  ;;  %13464 = vlog2.f32 %v1758_v43 }
 0x161   : > { %v13441_v51 = vpop.eup %13440  ;;  %v2123_v52 = vmul.f32 0.6931472, %v13439_v47  ;;  %v2503_v53 = vmul.f32 %v12397_v42, %v15071_v20  ;;  %1970 = vadd.xlane.f32.xlu1 %v1969_v37  ;;  %13466 = vpow2.f32 %v1643_v30 }
 0x162   : > { %v15099_v54 = vpop.eup %13442  ;;  %v2119_v59 = vmul.f32 0.6931472, %v13441_v51  ;;  %v2501_v60 = vmul.f32 %v12395_v48, %v15071_v20  ;;  %1967 = vadd.xlane.f32.xlu0 %v1966_v44  ;;  %v1767_v61 = vpop.xlane.xlu1 %1766  ;;  %13468 = vpow2.f32 %v1649_v38  ;;  %v1263_v44 = vmul.f32 0.6931472, %v15036_v3 }
 0x163   : > { %v13445_v0 = vpop.eup %13444  ;;  %v12398_v1 = vadd.f32 -3.8918202, %v2123_v52  ;;  %13470 = vlog2.f32 %v1767_v61  ;;  %v1764_v2 = vpop.xlane.xlu0 %1763  ;;  %v2633_v28 = vmul.f32 1.442695, %v2503_v53  ;;  %v1269_v48 = vmul.f32 0.6931472, %v15046_v8 }
 0x164   : > { %v13447_v13 = vpop.eup %13446  ;;  %v12396_v14 = vadd.f32 -3.8918202, %v2119_v59  ;;  %13472 = vlog2.f32 %v1764_v2  ;;  %v1975_v15 = vsel %vm1731_vm0, %v13445_v0, 0.0  ;;  %v2629_v33 = vmul.f32 1.442695, %v2501_v60 }
 0x165   : > { %v13449_v19 = vpop.eup %13448  ;;  %v2127_v21 = vmul.f32 0.6931472, %v13447_v13  ;;  %v2504_v26 = vmul.f32 %v12398_v1, %v15071_v20  ;;  %1976 = vadd.xlane.f32.xlu1 %v1975_v15  ;;  %13474 = vlog2.f32 %v1054_v4  ;;  %v1433_v13 = vmul.f32 %v1263_v44, %v14729_v39 }
 0x166   : > { %v13451_v29 = vpop.eup %13450  ;;  %v2125_v30 = vmul.f32 0.6931472, %v13449_v19  ;;  %v2502_v32 = vmul.f32 %v12396_v14, %v15071_v20  ;;  %v1773_v36 = vpop.xlane.xlu1 %1772  ;;  %13476 = vlog2.f32 %v1057_v5 }
 0x167   : > { %v13453_v37 = vpop.eup %13452  ;;  %v12400_v38 = vadd.f32 -3.8918202, %v2127_v21  ;;  %v1972_v42 = vsel %vm1731_vm0, %v13451_v29, 0.0  ;;  %13478 = vlog2.f32 %v1773_v36  ;;  %v1770_v43 = vpop.xlane.xlu0 %1769  ;;  %v2635_v5 = vmul.f32 1.442695, %v2504_v26 }
 0x168   : > { %v13455_v47 = vpop.eup %13454  ;;  %v12399_v57 = vadd.f32 -3.8918202, %v2125_v30  ;;  %1973 = vadd.xlane.f32.xlu0 %v1972_v42  ;;  %13480 = vlog2.f32 %v1770_v43  ;;  %v1981_v4 = vsel %vm1731_vm0, %v13453_v37, 0.0  ;;  %v2631_v3 = vmul.f32 1.442695, %v2502_v32 }
 0x169   : > { %v13457_v51 = vpop.eup %13456  ;;  %v2131_v52 = vmul.f32 0.6931472, %v13455_v47  ;;  %v2506_v58 = vmul.f32 %v12400_v38, %v15071_v20  ;;  %13482 = vpow2.f32 %v2633_v28  ;;  %1982 = vadd.xlane.f32.xlu1 %v1981_v4  ;;  %v1267_v21 = vmul.f32 0.6931472, %v15056_v12 }
 0x16a   : > { %v13459_v53 = vpop.eup %13458  ;;  %v2129_v59 = vmul.f32 0.6931472, %v13457_v51  ;;  %v2505_v60 = vmul.f32 %v12399_v57, %v15071_v20  ;;  %13484 = vpow2.f32 %v2629_v33  ;;  %v1779_v61 = vpop.xlane.xlu1 %1778  ;;  %v1647_v47 = vmul.f32 1.442695, %v1433_v13 }
 0x16b   : > { %v13461_v0 = vpop.eup %13460  ;;  %v12402_v1 = vadd.f32 -3.8918202, %v2131_v52  ;;  %v1978_v2 = vsel %vm1731_vm0, %v13459_v53, 0.0  ;;  %13486 = vlog2.f32 %v1779_v61  ;;  %v1776_v8 = vpop.xlane.xlu0 %1775  ;;  %v2639_v30 = vmul.f32 1.442695, %v2506_v58  ;;  %v15129_v58 = vld [vmem:[%s14691_s24 + $0x350] sm:$0xff] }
 0x16c   : > { %v13463_v14 = vpop.eup %13462  ;;  %v12401_v15 = vadd.f32 -3.8918202, %v2129_v59  ;;  %1979 = vadd.xlane.f32.xlu0 %v1978_v2  ;;  %13488 = vlog2.f32 %v1776_v8  ;;  %v1987_v19 = vsel %vm1731_vm0, %v13461_v0, 0.0  ;;  %v2637_v37 = vmul.f32 1.442695, %v2505_v60 }
 0x16d   : > { %v13465_v26 = vpop.eup %13464  ;;  %v2135_v28 = vmul.f32 0.6931472, %v13463_v14  ;;  %v2508_v29 = vmul.f32 %v12402_v1, %v15071_v20  ;;  %13490 = vpow2.f32 %v2635_v5  ;;  %1988 = vadd.xlane.f32.xlu1 %v1987_v19  ;;  %v1436_v52 = vmul.f32 %v1269_v48, %v14729_v39  ;;  %v15215_v14 = vld [vmem:[%s14691_s24 + $0x3b8] sm:$0xff] }
 0x16e   : > { %v13467_v32 = vpop.eup %13466  ;;  %v2133_v33 = vmul.f32 0.6931472, %v13465_v26  ;;  %v2507_v36 = vmul.f32 %v12401_v15, %v15071_v20  ;;  %13492 = vpow2.f32 %v2631_v3  ;;  %v1785_v38 = vpop.xlane.xlu1 %1784  ;;  %v1435_v13 = vmul.f32 %v1267_v21, %v14729_v39 }
 0x16f   : > { %v13469_v42 = vpop.eup %13468  ;;  %v12404_v43 = vadd.f32 -3.8918202, %v2135_v28  ;;  %v1984_v44 = vsel %vm1731_vm0, %v13467_v32, 0.0  ;;  %13494 = vlog2.f32 %v1785_v38  ;;  %v1782_v12 = vpop.xlane.xlu0 %1781  ;;  %v2643_v59 = vmul.f32 1.442695, %v2508_v29 }
 0x170   : > { %v13471_v57 = vpop.eup %13470  ;;  %v12403_v4 = vadd.f32 -3.8918202, %v2133_v33  ;;  %1985 = vadd.xlane.f32.xlu0 %v1984_v44  ;;  %13496 = vlog2.f32 %v1782_v12  ;;  %v1993_v51 = vsel %vm1731_vm0, %v13469_v42, 0.0  ;;  %v2641_v0 = vmul.f32 1.442695, %v2507_v36 }
 0x171   : > { %v13473_v5 = vpop.eup %13472  ;;  %v2510_v53 = vmul.f32 %v12404_v43, %v15071_v20  ;;  %13498 = vpow2.f32 %v2639_v30  ;;  %v2139_v60 = vmul.f32 0.6931472, %v13471_v57  ;;  %1994 = vadd.xlane.f32.xlu1 %v1993_v51  ;;  %v1653_v28 = vmul.f32 1.442695, %v1436_v52 }
 0x172   : > { %v13475_v3 = vpop.eup %13474  ;;  %v2509_v61 = vmul.f32 %v12403_v4, %v15071_v20  ;;  %13500 = vpow2.f32 %v2637_v37  ;;  %v2137_v1 = vmul.f32 0.6931472, %v13473_v5  ;;  %v1791_v2 = vpop.xlane.xlu1 %1790  ;;  %v1273_v29 = vmul.f32 0.6931472, %v15061_v18  ;;  %v15140_v37 = vld [vmem:[%s14691_s24 + $0x368] sm:$0xff] }
 0x173   : > { %v15133_v8 = vpop.eup %13476  ;;  %v12406_v48 = vadd.f32 -3.8918202, %v2139_v60  ;;  %13502 = vpow2.f32 %v1647_v47  ;;  %v1788_v26 = vpop.xlane.xlu0 %1787  ;;  %v2647_v32 = vmul.f32 1.442695, %v2510_v53  ;;  %v1651_v18 = vmul.f32 1.442695, %v1435_v13 }
 0x174   : > { %v13479_v15 = vpop.eup %13478  ;;  %v12405_v19 = vadd.f32 -3.8918202, %v2137_v1  ;;  %13504 = vlog2.f32 %v1791_v2  ;;  %v2645_v21 = vmul.f32 1.442695, %v2509_v61  ;;  %v1271_v47 = vmul.f32 0.6931472, %v15080_v41 }
 0x175   : > { %v13481_v30 = vpop.eup %13480  ;;  %13506 = vpow2.f32 %v2643_v59  ;;  %v2512_v33 = vmul.f32 %v12406_v48, %v15071_v20  ;;  %v2143_v36 = vmul.f32 0.6931472, %v13479_v15  ;;  %v1438_v51 = vmul.f32 %v1273_v29, %v14729_v39 }
 0x176   : > { %v15142_v38 = vpop.eup %13482  ;;  %13508 = vpow2.f32 %v2641_v0  ;;  %v2511_v42 = vmul.f32 %v12405_v19, %v15071_v20  ;;  %v2141_v43 = vmul.f32 0.6931472, %v13481_v30  ;;  %v1797_v61 = vpop.xlane.xlu1 %1796  ;;  %v1437_v19 = vmul.f32 %v1271_v47, %v14729_v39 }
 0x177   : > { %19372 = vst [vmem:[#allocation17_spill] sm:$0xff] %v15142_v38  ;;  %v15145_v44 = vpop.eup %13484  ;;  %v12408_v12 = vadd.f32 -3.8918202, %v2143_v36  ;;  %13510 = vlog2.f32 %v1788_v26  ;;  %v2651_v53 = vmul.f32 1.442695, %v2512_v33  ;;  %v1794_v15 = vpop.xlane.xlu0 %1793 }
 0x178   : > { %19373 = vst [vmem:[#allocation18_spill] sm:$0xff] %v15145_v44  ;;  %v13487_v57 = vpop.eup %13486  ;;  %v12407_v4 = vadd.f32 -3.8918202, %v2141_v43  ;;  %13512 = vpow2.f32 %v1653_v28  ;;  %v2649_v1 = vmul.f32 1.442695, %v2511_v42  ;;  %v15159_v28 = vld [vmem:[%s14691_s24 + $0x360] sm:$0xff] }
 0x179   : > { %v13489_v5 = vpop.eup %13488  ;;  %13514 = vpow2.f32 %v2647_v32  ;;  %v2514_v59 = vmul.f32 %v12408_v12, %v15071_v20  ;;  %v2147_v60 = vmul.f32 0.6931472, %v13487_v57  ;;  %v1277_v26 = vmul.f32 0.6931472, %v15099_v54 }
 0x17a   : > { %v15151_v0 = vpop.eup %13490  ;;  %13516 = vpow2.f32 %v2645_v21  ;;  %v2513_v41 = vmul.f32 %v12407_v4, %v15071_v20  ;;  %v2145_v2 = vmul.f32 0.6931472, %v13489_v5  ;;  %v1657_v32 = vmul.f32 1.442695, %v1438_v51 }
 0x17b   : > { %19374 = vst [vmem:[#allocation19_spill] sm:$0xff] %v15151_v0  ;;  %v15154_v48 = vpop.eup %13492  ;;  %v12410_v13 = vadd.f32 -3.8918202, %v2147_v60  ;;  %13518 = vpow2.f32 %v1651_v18  ;;  %v1275_v33 = vmul.f32 0.6931472, %v13475_v3 }
 0x17c   : > { %19375 = vst [vmem:[#allocation20_spill] sm:$0xff] %v15154_v48  ;;  %v13495_v29 = vpop.eup %13494  ;;  %v12409_v30 = vadd.f32 -3.8918202, %v2145_v2  ;;  %13520 = vlog2.f32 %v1797_v61  ;;  %v2655_v21 = vmul.f32 1.442695, %v2514_v59  ;;  %v1440_v59 = vmul.f32 %v1277_v26, %v14729_v39 }
 0x17d   : > { %v13497_v36 = vpop.eup %13496  ;;  %13522 = vpow2.f32 %v2651_v53  ;;  %v2516_v42 = vmul.f32 %v12410_v13, %v15071_v20  ;;  %v2151_v43 = vmul.f32 0.6931472, %v13495_v29  ;;  %v2653_v18 = vmul.f32 1.442695, %v2513_v41  ;;  %v1803_v53 = vpop.xlane.xlu1 %1802  ;;  %v15175_v41 = vld [vmem:[%s14691_s24 + $0x370] sm:$0xff] }
 0x17e   : > { %v15162_v12 = vpop.eup %13498  ;;  %13524 = vpow2.f32 %v2649_v1  ;;  %v2515_v54 = vmul.f32 %v12409_v30, %v15071_v20  ;;  %v2149_v47 = vmul.f32 0.6931472, %v13497_v36  ;;  %v1655_v3 = vmul.f32 1.442695, %v1437_v19  ;;  %v15172_v1 = vld [vmem:[%s14691_s24 + $0x378] sm:$0xff]  ;;  %v1800_v29 = vpop.xlane.xlu0 %1799  ;;  %v15197_v36 = vld [vmem:[%s14691_s24 + $0x390] sm:$0xff] }
 0x17f   : > { %19376 = vst [vmem:[#allocation21_spill] sm:$0xff] %v15162_v12  ;;  %v15165_v57 = vpop.eup %13500  ;;  %v12412_v4 = vadd.f32 -3.8918202, %v2151_v43  ;;  %13526 = vlog2.f32 %v1794_v15  ;;  %v1439_v60 = vmul.f32 %v1275_v33, %v14729_v39  ;;  %v1281_v61 = vmul.f32 0.6931472, %v15133_v8 }
 0x180   : > { %19377 = vst [vmem:[#allocation22_spill] sm:$0xff] %v15165_v57  ;;  %v13503_v5 = vpop.eup %13502  ;;  %13528 = vpow2.f32 %v1657_v32  ;;  %v2659_v13 = vmul.f32 1.442695, %v2516_v42  ;;  %v12411_v15 = vadd.f32 -3.8918202, %v2149_v47  ;;  %v15186_v42 = vld [vmem:[%s14691_s24 + $0x388] sm:$0xff] }
 0x181   : > { %v13505_v2 = vpop.eup %13504  ;;  %13530 = vpow2.f32 %v2655_v21  ;;  %v1990_v19 = vsel %vm1731_vm0, %v13503_v5, 0.0  ;;  %v2657_v26 = vmul.f32 1.442695, %v2515_v54  ;;  %v2518_v8 = vmul.f32 %v12412_v4, %v15071_v20  ;;  %v15192_v54 = vld [vmem:[%s14691_s24 + $0x398] sm:$0xff]  ;;  %v1809_v51 = vpop.xlane.xlu1 %1808 }
 0x182   : > { %v15178_v30 = vpop.eup %13506  ;;  %13532 = vpow2.f32 %v2653_v18  ;;  %1991 = vadd.xlane.f32.xlu0 %v1990_v19  ;;  %v2155_v32 = vmul.f32 0.6931472, %v13505_v2  ;;  %v1661_v47 = vmul.f32 1.442695, %v1440_v59  ;;  %v1659_v5 = vmul.f32 1.442695, %v1439_v60 }
 0x183   : > { %19378 = vst [vmem:[#allocation23_spill] sm:$0xff] %v15178_v30  ;;  %v15181_v33 = vpop.eup %13508  ;;  %13534 = vpow2.f32 %v1655_v3  ;;  %v15189_v18 = vld [vmem:[%s14691_s24 + $0x380] sm:$0xff]  ;;  %v2517_v2 = vmul.f32 %v12411_v15, %v15071_v20  ;;  %v1442_v3 = vmul.f32 %v1281_v61, %v14729_v39  ;;  %v15219_v15 = vld [vmem:[%s14691_s24 + $0x3b0] sm:$0xff] }
 0x184   : > { %19379 = vst [vmem:[#allocation24_spill] sm:$0xff] %v15181_v33  ;;  %v13511_v43 = vpop.eup %13510  ;;  %13536 = vlog2.f32 %v1803_v53  ;;  %v2663_v53 = vmul.f32 1.442695, %v2518_v8  ;;  %v12414_v59 = vadd.f32 -3.8918202, %v2155_v32  ;;  %v15209_v32 = vld [vmem:[%s14691_s24 + $0x3a8] sm:$0xff] }
 0x185   : > { %v13513_v4 = vpop.eup %13512  ;;  %13538 = vpow2.f32 %v2659_v13  ;;  %v2153_v19 = vmul.f32 0.6931472, %v13511_v43  ;;  %v1806_v13 = vpop.xlane.xlu0 %1805  ;;  %v1665_v34 = vmul.f32 1.442695, %v1442_v3 }
 0x186   : > { %v15199_v21 = vpop.eup %13514  ;;  %13540 = vpow2.f32 %v2657_v26  ;;  %v1999_v60 = vsel %vm1731_vm0, %v13513_v4, 0.0  ;;  %v15212_v4 = vld [vmem:[%s14691_s24 + $0x3a0] sm:$0xff]  ;;  %v1815_v62 = vpop.xlane.xlu1 %1814 }
 0x187   : > { %19380 = vst [vmem:[#allocation25_spill] sm:$0xff] %v15199_v21  ;;  %v15202_v52 = vpop.eup %13516  ;;  %2000 = vadd.xlane.f32.xlu1 %v1999_v60  ;;  %13542 = vlog2.f32 %v1800_v29  ;;  %v2661_v29 = vmul.f32 1.442695, %v2517_v2  ;;  %v12413_v17 = vadd.f32 -3.8918202, %v2153_v19  ;;  %v15235_v2 = vld [vmem:[%s14691_s24 + $0x3c0] sm:$0xff] }
 0x188   : > { %19381 = vst [vmem:[#allocation26_spill] sm:$0xff] %v15202_v52  ;;  %v13519_v26 = vpop.eup %13518  ;;  %13544 = vpow2.f32 %v1661_v47  ;;  %v2520_v47 = vmul.f32 %v12414_v59, %v15071_v20 }
 0x189   : > { %v13521_v60 = vpop.eup %13520  ;;  %v1996_v61 = vsel %vm1731_vm0, %v13519_v26, 0.0  ;;  %13546 = vpow2.f32 %v1659_v5  ;;  %v15229_v26 = vld [vmem:[%s14691_s24 + $0x3c8] sm:$0xff]  ;;  %v2519_v3 = vmul.f32 %v12413_v17, %v15071_v20 }
 0x18a   : > { %v15221_v43 = vpop.eup %13522  ;;  %13548 = vpow2.f32 %v2663_v53  ;;  %1997 = vadd.xlane.f32.xlu0 %v1996_v61  ;;  %v2159_v8 = vmul.f32 0.6931472, %v13521_v60  ;;  %v2667_v55 = vmul.f32 1.442695, %v2520_v47  ;;  %v15250_v47 = vld [vmem:[%s14691_s24 + $0x3d0] sm:$0xff]  ;;  %v1821_v17 = vpop.xlane.xlu1 %1820 }
 0x18b   : > { %19382 = vst [vmem:[#allocation27_spill] sm:$0xff] %v15221_v43  ;;  %v15224_v24 = vpop.eup %13524  ;;  %13550 = vlog2.f32 %v1809_v51  ;;  %v1812_v51 = vpop.xlane.xlu0 %1811  ;;  %19386 = vst [vmem:[#allocation31_spill] sm:$0xff] %v15250_v47 }
 0x18c   : > { %19383 = vst [vmem:[#allocation28_spill] sm:$0xff] %v15224_v24  ;;  %v13527_v5 = vpop.eup %13526  ;;  %13552 = vlog2.f32 %v1806_v13  ;;  %v12416_v35 = vadd.f32 -3.8918202, %v2159_v8  ;;  %v14269_v8 = vmov 269488144  }
 0x18d   : > { %v13529_v61 = vpop.eup %13528  ;;  %13554 = vpow2.f32 %v2661_v29  ;;  %v2157_v60 = vmul.f32 0.6931472, %v13527_v5  ;;  %v14271_v29 = vmov 1414812756  }
 0x18e   : > { %v15237_v19 = vpop.eup %13530  ;;  %v2005_v13 = vsel %vm1731_vm0, %v13529_v61, 0.0  ;;  %13556 = vpow2.f32 %v1665_v34  ;;  %v3014_v61 = vunpack.c.l.s4 %v14269_v8  ;;  %v14270_v34 = vmov 842150450  }
 0x18f   : > { %19384 = vst [vmem:[#allocation29_spill] sm:$0xff] %v15237_v19  ;;  %v15240_v53 = vpop.eup %13532  ;;  %2006 = vadd.xlane.f32.xlu1 %v2005_v13  ;;  %13558 = vlog2.f32 %v1056_v9  ;;  %v3021_v27 = vunpack.c.l.s4 %v14270_v34  ;;  %v2665_v13 = vmul.f32 1.442695, %v2519_v3  ;;  %v12415_v25 = vadd.f32 -3.8918202, %v2157_v60  ;;  %v1818_v3 = vpop.xlane.xlu0 %1817 }
 0x190   : > { %19385 = vst [vmem:[#allocation30_spill] sm:$0xff] %v15240_v53  ;;  %v13535_v5 = vpop.eup %13534  ;;  %13560 = vlog2.f32 %v1815_v62  ;;  %v2522_v62 = vmul.f32 %v12416_v35, %v15071_v20  ;;  %v3028_v23 = vunpack.c.l.s4 %v14271_v29  ;;  %v19389_v34 = vmax.f32 %v15041_v6, 1e-06 }
 0x191   : > { %v13537_v22 = vpop.eup %13536  ;;  %v2002_v63 = vsel %vm1731_vm0, %v13535_v5, 0.0  ;;  %13562 = vlog2.f32 %v1812_v51  ;;  %v19390_v5 = vlaneseq  ;;  %v3015_v53 = vunpack.c.0.s8 %v3014_v61 }
 0x192   : > { %v15253_v9 = vpop.eup %13538  ;;  %13564 = vpow2.f32 %v2667_v55  ;;  %2003 = vadd.xlane.f32.xlu0 %v2002_v63  ;;  %v2163_v59 = vmul.f32 0.6931472, %v13537_v22  ;;  %v19392_v22 = vmax.f32 %v15044_v7, 1e-06  ;;  %v3022_v24 = vunpack.c.0.s8 %v3021_v27 }
 0x193   : > { %19387 = vst [vmem:[#allocation32_spill] sm:$0xff] %v15253_v9  ;;  %v15256_v8 = vpop.eup %13540  ;;  %13566 = vlog2.f32 %v19389_v34  ;;  %v15263_v55 = vshrl.u32 %v19390_v5, 7  ;;  %v15269_v34 = vld [vmem:[%s14691_s24 + $0x3e8] sm:$0xff]  ;;  %v2671_v52 = vmul.f32 1.442695, %v2522_v62  ;;  %v3029_v5 = vunpack.c.0.s8 %v3028_v23  ;;  %v1827_v62 = vpop.xlane.xlu1 %1826 }
 0x194   : > { %19388 = vst [vmem:[#allocation33_spill] sm:$0xff] %v15256_v8  ;;  %v13543_v35 = vpop.eup %13542  ;;  %v12418_v63 = vadd.f32 -3.8918202, %v2163_v59  ;;  %13568 = vlog2.f32 %v19392_v22  ;;  %v2521_v8 = vmul.f32 %v12415_v25, %v15071_v20  ;;  %19393 = vst [vmem:[#allocation35_spill] sm:$0xff] %v15269_v34  ;;  %v14272_v61 = vmov 1987475062  }
 0x195   : > { %19391 = vst [vmem:[#allocation34_spill] sm:$0xff] %v15263_v55  ;;  %v13545_v29 = vpop.eup %13544  ;;  %13570 = vpow2.f32 %v2665_v13  ;;  %v2161_v6 = vmul.f32 0.6931472, %v13543_v35  ;;  %v3035_v13 = vunpack.c.l.s4 %v14272_v61  ;;  %v19395_v27 = vmax.f32 %v15051_v10, 1e-06 }
 0x196   : > { %v13547_v60 = vpop.eup %13546  ;;  %v2011_v51 = vsel %vm1731_vm0, %v13545_v29, 0.0  ;;  %13572 = vlog2.f32 %v1821_v17  ;;  %v2524_v35 = vmul.f32 %v12418_v63, %v15071_v20  ;;  %v15280_v23 = vsub.s32 %v3015_v53, %v15263_v55 }
 0x197   : > { %v15272_v30 = vpop.eup %13548  ;;  %v12417_v59 = vadd.f32 -3.8918202, %v2161_v6  ;;  %2012 = vadd.xlane.f32.xlu1 %v2011_v51  ;;  %v2008_v7 = vsel %vm1731_vm0, %v13547_v60, 0.0  ;;  %13574 = vlog2.f32 %v1818_v3  ;;  %v2669_v51 = vmul.f32 1.442695, %v2521_v8  ;;  %v1824_v60 = vpop.xlane.xlu0 %1823 }
 0x198   : > { %19394 = vst [vmem:[#allocation36_spill] sm:$0xff] %v15272_v30  ;;  %v13551_v25 = vpop.eup %13550  ;;  %2009 = vadd.xlane.f32.xlu0 %v2008_v7  ;;  %13576 = vlog2.f32 %v19395_v27  ;;  %19396 = vst [vmem:[#allocation37_spill] sm:$0xff] %v15280_v23  ;;  %v19397_v3 = vmax.f32 %v15054_v11, 1e-06  ;;  %v15285_v6 = vsub.s32 %v3022_v24, %v15263_v55  ;;  %v15293_v8 = vsub.s32 %v3029_v5, %v15263_v55 }
 0x199   : > { %v13553_v22 = vpop.eup %13552  ;;  %v2167_v29 = vmul.f32 0.6931472, %v13551_v25  ;;  %v2523_v10 = vmul.f32 %v12417_v59, %v15071_v20  ;;  %v3036_v11 = vunpack.c.0.s8 %v3035_v13  ;;  %v19401_v13 = vmax.f32 %v15069_v16, 1e-06 }
 0x19a   : > { %13578 = vlog2.f32 %v19397_v3  ;;  %19398 = vst [vmem:[#allocation38_spill] sm:$0xff] %v15285_v6  ;;  %v15287_v63 = vpop.eup %13554  ;;  %v2165_v7 = vmul.f32 0.6931472, %v13553_v22  ;;  %19400 = vst [vmem:[#allocation40_spill] sm:$0xff] %v15293_v8  ;;  %v2675_v3 = vmul.f32 1.442695, %v2524_v35  ;;  %v1833_v35 = vpop.xlane.xlu1 %1832 }
 0x19b   : > { %19399 = vst [vmem:[#allocation39_spill] sm:$0xff] %v15287_v63  ;;  %13580 = vpow2.f32 %v2671_v52  ;;  %v13557_v61 = vpop.eup %13556  ;;  %v12420_v27 = vadd.f32 -3.8918202, %v2167_v29  ;;  %v2673_v53 = vmul.f32 1.442695, %v2523_v10  ;;  %v15308_v10 = vsub.s32 %v3036_v11, %v15263_v55 }
 0x19c   : > { %13582 = vlog2.f32 %v1827_v62  ;;  %v13559_v25 = vpop.eup %13558  ;;  %v12419_v24 = vadd.f32 -3.8918202, %v2165_v7  ;;  %v2017_v17 = vsel %vm1731_vm0, %v13557_v61, 0.0 }
 0x19d   : > { %13584 = vlog2.f32 %v1824_v60  ;;  %v13561_v52 = vpop.eup %13560  ;;  %v2526_v59 = vmul.f32 %v12420_v27, %v15071_v20  ;;  %2018 = vadd.xlane.f32.xlu1 %v2017_v17  ;;  %v1279_v22 = vmul.f32 0.6931472, %v13559_v25  ;;  %v19403_v17 = vmax.f32 %v15074_v31, 1e-06  ;;  %19404 = vst [vmem:[#allocation42_spill] sm:$0xff] %v15308_v10 }
 0x19e   : > { %13586 = vpow2.f32 %v2669_v51  ;;  %v13563_v62 = vpop.eup %13562  ;;  %v2171_v5 = vmul.f32 0.6931472, %v13561_v52  ;;  %v2525_v60 = vmul.f32 %v12419_v24, %v15071_v20  ;;  %v3061_v31 = vrot.slane %v15154_v48, %v15293_v8  ;;  %v1839_v9 = vpop.xlane.xlu1 %1838 }
 0x19f   : > { %13588 = vlog2.f32 %v19401_v13  ;;  %v15301_v7 = vpop.eup %13564  ;;  %v1441_v51 = vmul.f32 %v1279_v22, %v14729_v39  ;;  %v2169_v61 = vmul.f32 0.6931472, %v13563_v62  ;;  %v2679_v25 = vmul.f32 1.442695, %v2526_v59 }
 0x1a0   : > { %19402 = vst [vmem:[#allocation41_spill] sm:$0xff] %v15301_v7  ;;  %13590 = vlog2.f32 %v19403_v17  ;;  %v13567_v27 = vpop.eup %13566  ;;  %v12422_v29 = vadd.f32 -3.8918202, %v2171_v5  ;;  %v14273_v22 = vmov 1983009808  }
 0x1a1   : > { %13592 = vpow2.f32 %v2675_v3  ;;  %v13569_v16 = vpop.eup %13568  ;;  %v1663_v52 = vmul.f32 1.442695, %v1441_v51  ;;  %v12421_v13 = vadd.f32 -3.8918202, %v2169_v61  ;;  %v1285_v63 = vmul.f32 0.6931472, %v13567_v27  ;;  %v1830_v51 = vpop.xlane.xlu0 %1829 }
 0x1a2   : > { %13594 = vlog2.f32 %v1833_v35  ;;  %v15310_v7 = vpop.eup %13570  ;;  %v1283_v24 = vmul.f32 0.6931472, %v13569_v16  ;;  %v15314_v62 = vunpack.c.l.s4 %v14273_v22  ;;  %v2677_v59 = vmul.f32 1.442695, %v2525_v60  ;;  %v15323_v60 = vld [vmem:[%s14691_s24 + $0x3e0] sm:$0xff] }
 0x1a3   : > { %19405 = vst [vmem:[#allocation43_spill] sm:$0xff] %v15310_v7  ;;  %13596 = vpow2.f32 %v2673_v53  ;;  %v13573_v3 = vpop.eup %13572  ;;  %v2528_v11 = vmul.f32 %v12422_v29, %v15071_v20  ;;  %v1444_v5 = vmul.f32 %v1285_v63, %v14729_v39  ;;  %v2527_v53 = vmul.f32 %v12421_v13, %v15071_v20 }
 0x1a4   : > { %13598 = vpow2.f32 %v1663_v52  ;;  %v13575_v35 = vpop.eup %13574  ;;  %v1443_v61 = vmul.f32 %v1283_v24, %v14729_v39  ;;  %v2175_v17 = vmul.f32 0.6931472, %v13573_v3  ;;  %v19406_v7 = vmax.f32 %v15078_v40, 1e-06 }
 0x1a5   : > { %13600 = vpow2.f32 %v2679_v25  ;;  %v13577_v27 = vpop.eup %13576  ;;  %v1669_v16 = vmul.f32 1.442695, %v1444_v5  ;;  %v2173_v22 = vmul.f32 0.6931472, %v13575_v35  ;;  %v3068_v29 = vrot.slane %v15154_v48, %v15308_v10 }
 0x1a6   : > { %13602 = vlog2.f32 %v19406_v7  ;;  %v1667_v52 = vmul.f32 1.442695, %v1443_v61  ;;  %v12424_v30 = vadd.f32 -3.8918202, %v2175_v17  ;;  %v1289_v25 = vmul.f32 0.6931472, %v13577_v27 }
 0x1a7   : > { %v13579_v63 = vpop.eup %13578  ;;  %13604 = vlog2.f32 %v1830_v51  ;;  %v2683_v24 = vmul.f32 1.442695, %v2528_v11  ;;  %v12423_v3 = vadd.f32 -3.8918202, %v2173_v22  ;;  %v2681_v34 = vmul.f32 1.442695, %v2527_v53 }
 0x1a8   : > { %v15327_v13 = vpop.eup %13580  ;;  %13606 = vpow2.f32 %v2677_v59  ;;  %v1287_v5 = vmul.f32 0.6931472, %v13579_v63  ;;  %v2530_v40 = vmul.f32 %v12424_v30, %v15071_v20  ;;  %v1446_v7 = vmul.f32 %v1289_v25, %v14729_v39  ;;  %v1836_v25 = vpop.xlane.xlu0 %1835 }
 0x1a9   : > { %19407 = vst [vmem:[#allocation44_spill] sm:$0xff] %v15327_v13  ;;  %v13583_v35 = vpop.eup %13582  ;;  %13608 = vpow2.f32 %v1669_v16  ;;  %v2529_v61 = vmul.f32 %v12423_v3, %v15071_v20  ;;  %v19409_v22 = vmax.f32 %v15085_v46, 1e-06 }
 0x1aa   : > { %v13585_v47 = vpop.eup %13584  ;;  %13610 = vpow2.f32 %v1667_v52  ;;  %v1445_v51 = vmul.f32 %v1287_v5, %v14729_v39  ;;  %v2179_v17 = vmul.f32 0.6931472, %v13583_v35  ;;  %v1673_v59 = vmul.f32 1.442695, %v1446_v7 }
 0x1ab   : > { %v15333_v27 = vpop.eup %13586  ;;  %v2177_v11 = vmul.f32 0.6931472, %v13585_v47  ;;  %13612 = vlog2.f32 %v19409_v22  ;;  %v6601_v52 = vunpack.c.0.s8 %v15314_v62  ;;  %v19410_v35 = vrot.slane %v15154_v48, %v15285_v6 }
 0x1ac   : > { %19408 = vst [vmem:[#allocation45_spill] sm:$0xff] %v15333_v27  ;;  %v13589_v30 = vpop.eup %13588  ;;  %13614 = vpow2.f32 %v2683_v24  ;;  %v1671_v16 = vmul.f32 1.442695, %v1445_v51  ;;  %v12426_v63 = vadd.f32 -3.8918202, %v2179_v17  ;;  %v19411_v47 = vrot.slane %v15154_v48, %v15280_v23  ;;  %v1845_v27 = vpop.xlane.xlu1 %1844 }
 0x1ad   : > { %v13591_v3 = vpop.eup %13590  ;;  %13616 = vpow2.f32 %v2681_v34  ;;  %v1293_v5 = vmul.f32 0.6931472, %v13589_v30  ;;  %v15347_v7 = vcombine.low %v3061_v31, %v3068_v29  ;;  %v2687_v24 = vmul.f32 1.442695, %v2530_v40 }
 0x1ae   : > { %v15345_v46 = vcombine.low %v19411_v47, %v19410_v35  ;;  %v15349_v22 = vpop.eup %13592  ;;  %v2685_v51 = vmul.f32 1.442695, %v2529_v61  ;;  %v1291_v17 = vmul.f32 0.6931472, %v13591_v3  ;;  %13618 = vlog2.f32 %v1839_v9  ;;  %v1842_v35 = vpop.xlane.xlu0 %1841 }
 0x1af   : > { %19412 = vst [vmem:[#allocation46_spill] sm:$0xff] %v15349_v22  ;;  %v13595_v62 = vpop.eup %13594  ;;  %13620 = vpow2.f32 %v1673_v59  ;;  %v2532_v34 = vmul.f32 %v12426_v63, %v15071_v20  ;;  %v12425_v30 = vadd.f32 -3.8918202, %v2177_v11  ;;  %v1448_v53 = vmul.f32 %v1293_v5, %v14729_v39 }
 0x1b0   : > { %v15353_v13 = vpop.eup %13596  ;;  %13622 = vpow2.f32 %v1671_v16  ;;  %v1447_v31 = vmul.f32 %v1291_v17, %v14729_v39  ;;  %v3075_v29 = vrot.slane %v15142_v38, %v15280_v23  ;;  %v3082_v40 = vrot.slane %v15142_v38, %v15285_v6 }
 0x1b1   : > { %19413 = vst [vmem:[#allocation47_spill] sm:$0xff] %v15353_v13  ;;  %v13599_v9 = vpop.eup %13598  ;;  %v1677_v61 = vmul.f32 1.442695, %v1448_v53  ;;  %13624 = vlog2.f32 %v1836_v25  ;;  %v3089_v59 = vrot.slane %v15142_v38, %v15293_v8  ;;  %v3096_v11 = vrot.slane %v15142_v38, %v15308_v10 }
 0x1b2   : > { %v15364_v63 = vpop.eup %13600  ;;  %v2014_v16 = vsel %vm1731_vm0, %v13599_v9, 0.0  ;;  %13626 = vpow2.f32 %v2687_v24  ;;  %v1675_v3 = vmul.f32 1.442695, %v1447_v31  ;;  %v2183_v5 = vmul.f32 0.6931472, %v13595_v62  ;;  %v15375_v62 = vpop.xlane.xlu1 %1850 }
 0x1b3   : > { %v13603_v47 = vpop.eup %13602  ;;  %2015 = vadd.xlane.f32.xlu0 %v2014_v16  ;;  %13628 = vpow2.f32 %v2685_v51  ;;  %v2691_v17 = vmul.f32 1.442695, %v2532_v34  ;;  %v2531_v53 = vmul.f32 %v12425_v30, %v15071_v20  ;;  %v14274_v13 = vmov 0  }
 0x1b4   : > { %v13605_v25 = vpop.eup %13604  ;;  %13630 = vpow2.f32 %v1677_v61  ;;  %v1297_v48 = vmul.f32 0.6931472, %v13603_v47  ;;  %12799 = vset.pattern.permute.xlu1 %v14274_v13  ;;  %v15369_v38 = vsub.s32 %v6601_v52, %v15263_v55  ;;  %12798 = vset.pattern.permute.xlu0 %v14274_v13  ;;  %v15371_v9 = vcombine.low %v3075_v29, %v3082_v40 }
 0x1b5   : > { %v15373_v24 = vpop.eup %13606  ;;  %13632 = vpow2.f32 %v1675_v3  ;;  %v15377_v51 = vcombine.low %v3089_v59, %v3096_v11  ;;  %v3019_v34 = vrot.slane %v15145_v44, %v15280_v23  ;;  %v3026_v30 = vrot.slane %v15145_v44, %v15285_v6 }
 0x1b6   : > { %19414 = vst [vmem:[#allocation48_spill] sm:$0xff] %v15369_v38  ;;  %19415 = vst [vmem:[#allocation49_spill] sm:$0xff] %v15373_v24  ;;  %v13609_v31 = vpop.eup %13608  ;;  %v12428_v61 = vadd.f32 -3.8918202, %v2183_v5  ;;  %v1450_v52 = vmul.f32 %v1297_v48, %v14729_v39  ;;  %v19416_v13 = vmax.f32 %v15089_v49, 1e-06  ;;  %v3033_v29 = vrot.slane %v15145_v44, %v15293_v8  ;;  %v1848_v48 = vpop.xlane.xlu0 %1847 }
 0x1b7   : > { %v13611_v40 = vpop.eup %13610  ;;  %v2023_v59 = vsel %vm1731_vm0, %v13609_v31, 0.0  ;;  %v2689_v11 = vmul.f32 1.442695, %v2531_v53  ;;  %v2181_v16 = vmul.f32 0.6931472, %v13605_v25  ;;  %v3040_v49 = vrot.slane %v15145_v44, %v15308_v10 }
 0x1b8   : > { %13634 = vlog2.f32 %v19416_v13  ;;  %v13613_v3 = vpop.eup %13612  ;;  %2024 = vadd.xlane.f32.xlu1 %v2023_v59  ;;  %v2020_v47 = vsel %vm1731_vm0, %v13611_v40, 0.0  ;;  %v1681_v55 = vmul.f32 1.442695, %v1450_v52  ;;  %v19417_v5 = vmax.f32 %v15092_v50, 1e-06  ;;  %v1857_v59 = vpop.xlane.xlu1 %1856 }
 0x1b9   : > { %13636 = vpow2.f32 %v2691_v17  ;;  %v15394_v13 = vpop.eup %13614  ;;  %2021 = vadd.xlane.f32.xlu0 %v2020_v47  ;;  %v1295_v24 = vmul.f32 0.6931472, %v13613_v3  ;;  %v6622_v17 = vrot.slane %v15345_v46, %v15369_v38  ;;  %v6629_v53 = vrot.slane %v15347_v7, %v15369_v38  ;;  %v15411_v47 = vld [vmem:[%s14691_s24 + $0x3f8] sm:$0xff] }
 0x1ba   : > { %13638 = vlog2.f32 %v19417_v5  ;;  %v15400_v25 = vpop.eup %13616  ;;  %v2534_v50 = vmul.f32 %v12428_v61, %v15071_v20  ;;  %v6639_v31 = vrot.slane %v15371_v9, %v15369_v38  ;;  %v6646_v52 = vrot.slane %v15377_v51, %v15369_v38  ;;  %v1854_v44 = vpop.xlane.xlu0 %1853 }
 0x1bb   : > { %13640 = vlog2.f32 %v1845_v27  ;;  %19418 = vst [vmem:[#allocation50_spill] sm:$0xff] %v15400_v25  ;;  %v13619_v40 = vpop.eup %13618  ;;  %v12427_v27 = vadd.f32 -3.8918202, %v2181_v16  ;;  %v1449_v46 = vmul.f32 %v1295_v24, %v14729_v39  ;;  %v15408_v3 = vcombine.low %v3019_v34, %v3026_v30  ;;  %v15423_v34 = vld [vmem:[%s14691_s24 + $0x3f0] sm:$0xff] }
 0x1bc   : > { %13642 = vpow2.f32 %v1681_v55  ;;  %v13621_v7 = vpop.eup %13620  ;;  %v15413_v55 = vcombine.low %v3033_v29, %v3040_v49  ;;  %v3103_v9 = vrot.slane %v15151_v0, %v15280_v23  ;;  %v3110_v51 = vrot.slane %v15151_v0, %v15285_v6 }
 0x1bd   : > { %13644 = vpow2.f32 %v2689_v11  ;;  %v13623_v61 = vpop.eup %13622  ;;  %v2029_v11 = vsel %vm1731_vm0, %v13621_v7, 0.0  ;;  %v1679_v16 = vmul.f32 1.442695, %v1449_v46  ;;  %v19419_v24 = vmax.f32 %v15097_v56, 1e-06 }
 0x1be   : > { %13646 = vlog2.f32 %v1842_v35  ;;  %v3117_v35 = vrot.slane %v15151_v0, %v15293_v8  ;;  %v13625_v30 = vpop.eup %13624  ;;  %2030 = vadd.xlane.f32.xlu1 %v2029_v11  ;;  %v2026_v29 = vsel %vm1731_vm0, %v13623_v61, 0.0  ;;  %v2695_v5 = vmul.f32 1.442695, %v2534_v50 }
 0x1bf   : > { %13648 = vlog2.f32 %v19419_v24  ;;  %v19420_v49 = vmax.f32 %v15129_v58, 1e-06  ;;  %v3124_v46 = vrot.slane %v15151_v0, %v15308_v10  ;;  %v15432_v7 = vpop.eup %13626  ;;  %2027 = vadd.xlane.f32.xlu0 %v2026_v29  ;;  %v2533_v56 = vmul.f32 %v12427_v27, %v15071_v20  ;;  %v1863_v29 = vpop.xlane.xlu1 %1862 }
 0x1c0   : > { %19421 = vst [vmem:[#allocation51_spill] sm:$0xff] %v15432_v7  ;;  %v2187_v24 = vmul.f32 0.6931472, %v13619_v40  ;;  %v15436_v11 = vpop.eup %13628  ;;  %v15440_v50 = vcombine.low %v6622_v17, %v6629_v53  ;;  %v15442_v61 = vcombine.low %v3103_v9, %v3110_v51  ;;  %v2185_v0 = vmul.f32 0.6931472, %v13625_v30 }
 0x1c1   : > { %13650 = vlog2.f32 %v19420_v49  ;;  %19422 = vst [vmem:[#allocation52_spill] sm:$0xff] %v15436_v11  ;;  %v13631_v49 = vpop.eup %13630  ;;  %v15444_v7 = vcombine.low %v6639_v31, %v6646_v52  ;;  %v15451_v17 = vcombine.low %v3117_v35, %v3124_v46  ;;  %v19423_v31 = vmax.f32 %v15140_v37, 1e-06 }
 0x1c2   : > { %13652 = vpow2.f32 %v1679_v16  ;;  %v13633_v27 = vpop.eup %13632  ;;  %v2035_v16 = vsel %vm1731_vm0, %v13631_v49, 0.0  ;;  %v12430_v51 = vadd.f32 -3.8918202, %v2187_v24  ;;  %v1860_v49 = vpop.xlane.xlu0 %1859  ;;  %v3271_v46 = vrot.slane %v15199_v21, %v15280_v23 }
 0x1c3   : > { %13654 = vlog2.f32 %v15375_v62  ;;  %2036 = vadd.xlane.f32.xlu1 %v2035_v16  ;;  %v2032_v9 = vsel %vm1731_vm0, %v13633_v27, 0.0  ;;  %v3278_v37 = vrot.slane %v15199_v21, %v15285_v6  ;;  %v3285_v24 = vrot.slane %v15199_v21, %v15293_v8 }
 0x1c4   : > { %13656 = vlog2.f32 %v1848_v48  ;;  %v2693_v48 = vmul.f32 1.442695, %v2533_v56  ;;  %2033 = vadd.xlane.f32.xlu0 %v2032_v9  ;;  %v12429_v56 = vadd.f32 -3.8918202, %v2185_v0  ;;  %v3292_v9 = vrot.slane %v15199_v21, %v15308_v10 }
 0x1c5   : > { %13658 = vpow2.f32 %v2695_v5  ;;  %v13635_v53 = vpop.eup %13634  ;;  %v19424_v5 = vmax.f32 %v15159_v28, 1e-06  ;;  %v15485_v62 = vcombine.low %v3271_v46, %v3278_v37 }
 0x1c6   : > { %13660 = vlog2.f32 %v19423_v31  ;;  %v15456_v52 = vpop.eup %13636  ;;  %v1301_v30 = vmul.f32 0.6931472, %v13635_v53 }
 0x1c7   : > { %13662 = vlog2.f32 %v19424_v5  ;;  %v13639_v27 = vpop.eup %13638  ;;  %v2536_v5 = vmul.f32 %v12430_v51, %v15071_v20 }
 0x1c8   : > { %13664 = vlog2.f32 %v1857_v59  ;;  %v13641_v16 = vpop.eup %13640  ;;  %v1452_v28 = vmul.f32 %v1301_v30, %v14729_v39  ;;  %v1299_v53 = vmul.f32 0.6931472, %v13639_v27  ;;  %v15472_v59 = vpop.xlane.xlu1 %1868  ;;  %v19426_v27 = vmax.f32 %v15172_v1, 1e-06 }
 0x1c9   : > { %13666 = vlog2.f32 %v1854_v44  ;;  %v13643_v31 = vpop.eup %13642  ;;  %v2191_v0 = vmul.f32 0.6931472, %v13641_v16  ;;  %v19427_v16 = vmax.f32 %v15175_v41, 1e-06 }
 0x1ca   : > { %13668 = vpow2.f32 %v2693_v48  ;;  %v15476_v25 = vpop.eup %13644  ;;  %v2041_v35 = vsel %vm1731_vm0, %v13643_v31, 0.0  ;;  %v1685_v30 = vmul.f32 1.442695, %v1452_v28  ;;  %v1451_v44 = vmul.f32 %v1299_v53, %v14729_v39  ;;  %v15487_v28 = vpop.xlane.xlu0 %1865 }
 0x1cb   : > { %19425 = vst [vmem:[#allocation53_spill] sm:$0xff] %v15476_v25  ;;  %13670 = vlog2.f32 %v19426_v27  ;;  %v13647_v40 = vpop.eup %13646  ;;  %2042 = vadd.xlane.f32.xlu1 %v2041_v35  ;;  %v2535_v48 = vmul.f32 %v12429_v56, %v15071_v20  ;;  %v12432_v51 = vadd.f32 -3.8918202, %v2191_v0  ;;  %v15489_v53 = vcombine.low %v3285_v24, %v3292_v9 }
 0x1cc   : > { %13672 = vlog2.f32 %v19427_v16  ;;  %v13649_v58 = vpop.eup %13648  ;;  %v1683_v21 = vmul.f32 1.442695, %v1451_v44  ;;  %v2189_v31 = vmul.f32 0.6931472, %v13647_v40  ;;  %v2699_v27 = vmul.f32 1.442695, %v2536_v5  ;;  %v15496_v9 = vpop.xlane.xlu1 %1874 }
 0x1cd   : > { %13674 = vpow2.f32 %v1685_v30  ;;  %v1305_v25 = vmul.f32 0.6931472, %v13649_v58  ;;  %v2538_v41 = vmul.f32 %v12432_v51, %v15071_v20  ;;  %v2697_v30 = vmul.f32 1.442695, %v2535_v48 }
 0x1ce   : > { %v13651_v1 = vpop.eup %13650  ;;  %13676 = vlog2.f32 %v1863_v29  ;;  %v12431_v46 = vadd.f32 -3.8918202, %v2189_v31  ;;  %v19428_v44 = vmax.f32 %v15186_v42, 1e-06 }
 0x1cf   : > { %v13653_v56 = vpop.eup %13652  ;;  %13678 = vpow2.f32 %v1683_v21  ;;  %v1303_v37 = vmul.f32 0.6931472, %v13651_v1  ;;  %v1454_v24 = vmul.f32 %v1305_v25, %v14729_v39  ;;  %v2703_v31 = vmul.f32 1.442695, %v2538_v41 }
 0x1d0   : > { %v13655_v0 = vpop.eup %13654  ;;  %v2038_v40 = vsel %vm1731_vm0, %v13653_v56, 0.0  ;;  %13680 = vlog2.f32 %v1860_v49  ;;  %v2537_v29 = vmul.f32 %v12431_v46, %v15071_v20  ;;  %v19430_v46 = vmax.f32 %v15189_v18, 1e-06 }
 0x1d1   : > { %v13657_v58 = vpop.eup %13656  ;;  %2039 = vadd.xlane.f32.xlu0 %v2038_v40  ;;  %v1453_v5 = vmul.f32 %v1303_v37, %v14729_v39  ;;  %v2195_v21 = vmul.f32 0.6931472, %v13655_v0  ;;  %13682 = vlog2.f32 %v19428_v44  ;;  %v1689_v16 = vmul.f32 1.442695, %v1454_v24  ;;  %v15508_v37 = vpop.xlane.xlu0 %1871 }
 0x1d2   : > { %v15502_v51 = vpop.eup %13658  ;;  %13684 = vpow2.f32 %v2699_v27  ;;  %v2193_v48 = vmul.f32 0.6931472, %v13657_v58  ;;  %v2701_v42 = vmul.f32 1.442695, %v2537_v29  ;;  %v3138_v41 = vrot.slane %v15165_v57, %v15285_v6  ;;  %v15516_v29 = vpop.xlane.xlu1 %1880 }
 0x1d3   : > { %19429 = vst [vmem:[#allocation54_spill] sm:$0xff] %v15502_v51  ;;  %v13661_v49 = vpop.eup %13660  ;;  %v1687_v1 = vmul.f32 1.442695, %v1453_v5  ;;  %v12434_v56 = vadd.f32 -3.8918202, %v2195_v21  ;;  %13686 = vlog2.f32 %v19430_v46 }
 0x1d4   : > { %v13663_v0 = vpop.eup %13662  ;;  %13688 = vpow2.f32 %v1689_v16  ;;  %v12433_v40 = vadd.f32 -3.8918202, %v2193_v48  ;;  %v1309_v44 = vmul.f32 0.6931472, %v13661_v49 }
 0x1d5   : > { %v13665_v27 = vpop.eup %13664  ;;  %13690 = vpow2.f32 %v2697_v30  ;;  %v1307_v24 = vmul.f32 0.6931472, %v13663_v0  ;;  %v2540_v18 = vmul.f32 %v12434_v56, %v15071_v20  ;;  %v15525_v35 = vpop.xlane.xlu0 %1877 }
 0x1d6   : > { %v13667_v5 = vpop.eup %13666  ;;  %13692 = vpow2.f32 %v1687_v1  ;;  %v1456_v21 = vmul.f32 %v1309_v44, %v14729_v39  ;;  %v2199_v46 = vmul.f32 0.6931472, %v13665_v27  ;;  %v2539_v30 = vmul.f32 %v12433_v40, %v15071_v20  ;;  %v15534_v51 = vpop.xlane.xlu1 %1886 }
 0x1d7   : > { %v15518_v16 = vpop.eup %13668  ;;  %13694 = vpow2.f32 %v2703_v31  ;;  %v1455_v48 = vmul.f32 %v1307_v24, %v14729_v39  ;;  %v2197_v49 = vmul.f32 0.6931472, %v13667_v5  ;;  %v3145_v1 = vrot.slane %v15165_v57, %v15293_v8 }
 0x1d8   : > { %19431 = vst [vmem:[#allocation55_spill] sm:$0xff] %v15518_v16  ;;  %v13671_v0 = vpop.eup %13670  ;;  %13696 = vpow2.f32 %v2701_v42  ;;  %v1693_v25 = vmul.f32 1.442695, %v1456_v21  ;;  %v12436_v58 = vadd.f32 -3.8918202, %v2199_v46  ;;  %v3152_v31 = vrot.slane %v15165_v57, %v15308_v10 }
 0x1d9   : > { %v13673_v56 = vpop.eup %13672  ;;  %v1691_v44 = vmul.f32 1.442695, %v1455_v48  ;;  %v1313_v27 = vmul.f32 0.6931472, %v13671_v0  ;;  %13698 = vlog2.f32 %v15472_v59  ;;  %v2707_v24 = vmul.f32 1.442695, %v2540_v18 }
 0x1da   : > { %v13675_v40 = vpop.eup %13674  ;;  %v12435_v5 = vadd.f32 -3.8918202, %v2197_v49  ;;  %v1311_v16 = vmul.f32 0.6931472, %v13673_v56  ;;  %13700 = vlog2.f32 %v15487_v28  ;;  %v2705_v46 = vmul.f32 1.442695, %v2539_v30 }
 0x1db   : > { %v13677_v42 = vpop.eup %13676  ;;  %v2047_v21 = vsel %vm1731_vm0, %v13675_v40, 0.0  ;;  %13702 = vpow2.f32 %v1693_v25  ;;  %v1458_v48 = vmul.f32 %v1313_v27, %v14729_v39  ;;  %v2542_v59 = vmul.f32 %v12436_v58, %v15071_v20 }
 0x1dc   : > { %v13679_v0 = vpop.eup %13678  ;;  %2048 = vadd.xlane.f32.xlu1 %v2047_v21  ;;  %13704 = vpow2.f32 %v1691_v44  ;;  %v1457_v11 = vmul.f32 %v1311_v16, %v14729_v39  ;;  %v19432_v18 = vrot.slane %v15165_v57, %v15280_v23  ;;  %v2203_v25 = vmul.f32 0.6931472, %v13677_v42 }
 0x1dd   : > { %v13681_v49 = vpop.eup %13680  ;;  %v2044_v56 = vsel %vm1731_vm0, %v13679_v0, 0.0  ;;  %v1697_v30 = vmul.f32 1.442695, %v1458_v48  ;;  %v19433_v27 = vmax.f32 %v15192_v54, 1e-06  ;;  %v2541_v58 = vmul.f32 %v12435_v5, %v15071_v20 }
 0x1de   : > { %v6665_v28 = vcombine.low %v19432_v18, %v3138_v41  ;;  %v13683_v40 = vpop.eup %13682  ;;  %2045 = vadd.xlane.f32.xlu0 %v2044_v56  ;;  %v1695_v16 = vmul.f32 1.442695, %v1457_v11  ;;  %v2201_v44 = vmul.f32 0.6931472, %v13681_v49  ;;  %v15545_v41 = vpop.xlane.xlu0 %1883  ;;  %v6666_v18 = vcombine.low %v3145_v1, %v3152_v31 }
 0x1df   : > { %13706 = vlog2.f32 %v19433_v27  ;;  %v15543_v21 = vpop.eup %13684  ;;  %v1317_v57 = vmul.f32 0.6931472, %v13683_v40  ;;  %v3327_v42 = vrot.slane %v15221_v43, %v15280_v23  ;;  %v2711_v54 = vmul.f32 1.442695, %v2542_v59 }
 0x1e0   : > { %13708 = vpow2.f32 %v2707_v24  ;;  %19434 = vst [vmem:[#allocation56_spill] sm:$0xff] %v15543_v21  ;;  %v13687_v48 = vpop.eup %13686  ;;  %v6673_v0 = vrot.slane %v6665_v28, %v15369_v38  ;;  %v3334_v24 = vrot.slane %v15221_v43, %v15285_v6  ;;  %v12438_v5 = vadd.f32 -3.8918202, %v2203_v25 }
 0x1e1   : > { %13710 = vpow2.f32 %v2705_v46  ;;  %v13689_v11 = vpop.eup %13688  ;;  %v1460_v46 = vmul.f32 %v1317_v57, %v14729_v39  ;;  %v1315_v49 = vmul.f32 0.6931472, %v13687_v48  ;;  %v2709_v31 = vmul.f32 1.442695, %v2541_v58 }
 0x1e2   : > { %13712 = vpow2.f32 %v1697_v30  ;;  %v15553_v56 = vpop.eup %13690  ;;  %v2053_v1 = vsel %vm1731_vm0, %v13689_v11, 0.0  ;;  %v12437_v27 = vadd.f32 -3.8918202, %v2201_v44  ;;  %v19436_v59 = vmax.f32 %v15197_v36, 1e-06  ;;  %v15558_v30 = vpop.xlane.xlu1 %1892 }
 0x1e3   : > { %13714 = vpow2.f32 %v1695_v16  ;;  %19435 = vst [vmem:[#allocation57_spill] sm:$0xff] %v15553_v56  ;;  %v13693_v28 = vpop.eup %13692  ;;  %2054 = vadd.xlane.f32.xlu1 %v2053_v1  ;;  %v1701_v40 = vmul.f32 1.442695, %v1460_v46  ;;  %v1459_v16 = vmul.f32 %v1315_v49, %v14729_v39  ;;  %v6680_v57 = vrot.slane %v6666_v18, %v15369_v38  ;;  %v15573_v46 = vpop.xlane.xlu0 %1889  ;;  %v12818_v56 = vld [vmem:[%s14694_s26 + $0x34] ss:$24 sps:$4 sm:$0xff]  }
 0x1e4   : > { %13716 = vlog2.f32 %v19436_v59  ;;  %v15563_v25 = vpop.eup %13694  ;;  %v2050_v48 = vsel %vm1731_vm0, %v13693_v28, 0.0  ;;  %v3341_v36 = vrot.slane %v15221_v43, %v15293_v8  ;;  %v3348_v58 = vrot.slane %v15221_v43, %v15308_v10 }
 0x1e5   : > { %13718 = vlog2.f32 %v15496_v9  ;;  %19437 = vst [vmem:[#allocation58_spill] sm:$0xff] %v15563_v25  ;;  %v15570_v44 = vpop.eup %13696  ;;  %2051 = vadd.xlane.f32.xlu0 %v2050_v48  ;;  %v2544_v11 = vmul.f32 %v12438_v5, %v15071_v20  ;;  %v1699_v9 = vmul.f32 1.442695, %v1459_v16  ;;  %v19439_v18 = vrot.slane %v15413_v55, %v15369_v38 }
 0x1e6   : > { %13720 = vpow2.f32 %v2711_v54  ;;  %19438 = vst [vmem:[#allocation59_spill] sm:$0xff] %v15570_v44  ;;  %v19440_v54 = vrot.slane %v15408_v3, %v15369_v38  ;;  %v13699_v1 = vpop.eup %13698  ;;  %v2543_v59 = vmul.f32 %v12437_v27, %v15071_v20  ;;  %v19441_v28 = vrot.slane %v15451_v17, %v15369_v38 }
 0x1e7   : > { %13722 = vpow2.f32 %v1701_v40  ;;  %v19442_v5 = vrot.slane %v15442_v61, %v15369_v38  ;;  %v19443_v55 = vrot.slane %v15489_v53, %v15369_v38  ;;  %v19444_v3 = vrot.slane %v15485_v62, %v15369_v38  ;;  %v13701_v48 = vpop.eup %13700 }
 0x1e8   : > { %v15581_v49 = vcombine.low %v19440_v54, %v19439_v18  ;;  %13724 = vpow2.f32 %v2709_v31  ;;  %v15600_v31 = vcombine.low %v6673_v0, %v6680_v57  ;;  %v15602_v27 = vcombine.low %v3327_v42, %v3334_v24  ;;  %v13703_v61 = vpop.eup %13702  ;;  %v15607_v18 = vpop.xlane.xlu1 %1898 }
 0x1e9   : > { %v15590_v40 = vcombine.low %v19442_v5, %v19441_v28  ;;  %v15598_v16 = vcombine.low %v19444_v3, %v19443_v55  ;;  %13726 = vpow2.f32 %v1699_v9  ;;  %v3159_v17 = vrot.slane %v15162_v12, %v15280_v23  ;;  %v13705_v0 = vpop.eup %13704 }
 0x1ea   : > { %13728 = vlog2.f32 %v15508_v37  ;;  %v15609_v53 = vcombine.low %v3341_v36, %v3348_v58  ;;  %v3166_v62 = vrot.slane %v15162_v12, %v15285_v6  ;;  %v3173_v9 = vrot.slane %v15162_v12, %v15293_v8 }
 0x1eb   : > { %v2059_v42 = vsel %vm1731_vm0, %v13703_v61, 0.0  ;;  %v2715_v24 = vmul.f32 1.442695, %v2544_v11  ;;  %v2207_v57 = vmul.f32 0.6931472, %v13699_v1  ;;  %v2056_v37 = vsel %vm1731_vm0, %v13705_v0, 0.0 }
 0x1ec   : > { %v19445_v54 = vmax.f32 %v15209_v32, 1e-06  ;;  %v13707_v28 = vpop.eup %13706  ;;  %2060 = vadd.xlane.f32.xlu1 %v2059_v42  ;;  %v2713_v36 = vmul.f32 1.442695, %v2543_v59  ;;  %v19446_v58 = vmax.f32 %v15212_v4, 1e-06  ;;  %v3180_v5 = vrot.slane %v15162_v12, %v15308_v10  ;;  %2057 = vadd.xlane.f32.xlu0 %v2056_v37  ;;  %v15626_v32 = vpop.xlane.xlu0 %1895 }
 0x1ed   : > { %v15623_v55 = vpop.eup %13708  ;;  %v2205_v11 = vmul.f32 0.6931472, %v13701_v48  ;;  %v1321_v1 = vmul.f32 0.6931472, %v13707_v28  ;;  %v3383_v3 = vrot.slane %v15237_v19, %v15280_v23  ;;  %v3390_v4 = vrot.slane %v15237_v19, %v15285_v6  ;;  %v12800_v0 = vld [vmem:[%s14694_s26 + $0x154] ss:$24 sps:$4 sm:$0xff]   ;;  %v15645_v43 = vpop.xlane.xlu1 %1904 }
 0x1ee   : > { %13730 = vlog2.f32 %v19445_v54  ;;  %19447 = vst [vmem:[#allocation60_spill] sm:$0xff] %v15623_v55  ;;  %v15630_v59 = vpop.eup %13710  ;;  %v3397_v61 = vrot.slane %v15237_v19, %v15293_v8  ;;  %v3404_v48 = vrot.slane %v15237_v19, %v15308_v10  ;;  %v12440_v42 = vadd.f32 -3.8918202, %v2207_v57  ;;  %v12802_v37 = vld [vmem:[%s14694_s26 + $0x150] ss:$24 sps:$4 sm:$0xff]   ;;  %11899 = vmatprep.subr.bf16.mxu0 %v12800_v0 }
 0x1ef   : > { %13732 = vlog2.f32 %v19446_v58  ;;  %19448 = vst [vmem:[#allocation61_spill] sm:$0xff] %v15630_v59  ;;  %v1462_v54 = vmul.f32 %v1321_v1, %v14729_v39  ;;  %v15647_v12 = vcombine.low %v3159_v17, %v3166_v62  ;;  %v15649_v19 = vcombine.low %v3173_v9, %v3180_v5  ;;  %11900 = vmatpush1.bf16.msra.mxu0 %v12802_v37  ;;  %v12803_v5 = vld [vmem:[%s14694_s26 + $0x124] ss:$24 sps:$4 sm:$0xff]   ;;  %v12805_v37 = vld [vmem:[%s14694_s26 + $0x120] ss:$24 sps:$4 sm:$0xff]  }
 0x1f0   : > { %13734 = vlog2.f32 %v15516_v29  ;;  %v13713_v29 = vpop.eup %13712  ;;  %v12439_v1 = vadd.f32 -3.8918202, %v2205_v11  ;;  %v19449_v28 = vmax.f32 %v15215_v14, 1e-06  ;;  %v19450_v17 = vmax.f32 %v15219_v15, 1e-06  ;;  %11901 = vmatprep.subr.bf16.mxu0 %v12803_v5 }
 0x1f1   : > { %13736 = vlog2.f32 %v15525_v35  ;;  %v13715_v35 = vpop.eup %13714  ;;  %v2065_v58 = vsel %vm1731_vm0, %v13713_v29, 0.0  ;;  %v1705_v59 = vmul.f32 1.442695, %v1462_v54  ;;  %v15656_v62 = vcombine.low %v3383_v3, %v3390_v4  ;;  %v15664_v54 = vpop.xlane.xlu0 %1901 }
 0x1f2   : > { %13738 = vpow2.f32 %v2715_v24  ;;  %v13717_v24 = vpop.eup %13716  ;;  %2066 = vadd.xlane.f32.xlu1 %v2065_v58  ;;  %v2062_v57 = vsel %vm1731_vm0, %v13715_v35, 0.0  ;;  %v15658_v9 = vcombine.low %v3397_v61, %v3404_v48  ;;  %v2546_v11 = vmul.f32 %v12440_v42, %v15071_v20 }
 0x1f3   : > { %13740 = vpow2.f32 %v2713_v36  ;;  %v13719_v36 = vpop.eup %13718  ;;  %2063 = vadd.xlane.f32.xlu0 %v2062_v57  ;;  %v1319_v29 = vmul.f32 0.6931472, %v13717_v24  ;;  %v2545_v48 = vmul.f32 %v12439_v1, %v15071_v20  ;;  %11902 = vmatpush1.bf16.msra.mxu0 %v12805_v37  ;;  %v19453_v24 = vmax.f32 %v15229_v26, 1e-06  ;;  %v15682_v57 = vpop.xlane.xlu1 %1910  ;;  %v12806_v1 = vld [vmem:[%s14694_s26 + $0xf4] ss:$24 sps:$4 sm:$0xff]  }
 0x1f4   : > { %13742 = vlog2.f32 %v19449_v28  ;;  %v15661_v0 = vpop.eup %13720  ;;  %v2211_v14 = vmul.f32 0.6931472, %v13719_v36  ;;  %v19454_v37 = vmax.f32 %v15235_v2, 1e-06  ;;  %v12808_v26 = vld [vmem:[%s14694_s26 + $0xf0] ss:$24 sps:$4 sm:$0xff]   ;;  %11903 = vmatprep.subr.bf16.mxu0 %v12806_v1 }
 0x1f5   : > { %13744 = vlog2.f32 %v19450_v17  ;;  %19451 = vst [vmem:[#allocation62_spill] sm:$0xff] %v15661_v0  ;;  %v13723_v35 = vpop.eup %13722  ;;  %v1461_v15 = vmul.f32 %v1319_v29, %v14729_v39  ;;  %v15699_v2 = vpop.xlane.xlu0 %1907  ;;  %v12809_v1 = vld [vmem:[%s14694_s26 + $0xc4] ss:$24 sps:$4 sm:$0xff]  }
 0x1f6   : > { %13746 = vpow2.f32 %v1705_v59  ;;  %v15675_v59 = vpop.eup %13724  ;;  %v2071_v61 = vsel %vm1731_vm0, %v13723_v35, 0.0  ;;  %v12442_v42 = vadd.f32 -3.8918202, %v2211_v14 }
 0x1f7   : > { %13748 = vlog2.f32 %v15534_v51  ;;  %19452 = vst [vmem:[#allocation63_spill] sm:$0xff] %v15675_v59  ;;  %v13727_v51 = vpop.eup %13726  ;;  %2072 = vadd.xlane.f32.xlu1 %v2071_v61  ;;  %v1703_v58 = vmul.f32 1.442695, %v1461_v15  ;;  %v3187_v61 = vrot.slane %v15181_v33, %v15280_v23  ;;  %11904 = vmatpush1.bf16.msra.mxu0 %v12808_v26  ;;  %v15714_v4 = vpop.xlane.xlu1 %1916 }
 0x1f8   : > { %13750 = vlog2.f32 %v15545_v41  ;;  %v13729_v17 = vpop.eup %13728  ;;  %v2068_v5 = vsel %vm1731_vm0, %v13727_v51, 0.0  ;;  %v2719_v41 = vmul.f32 1.442695, %v2546_v11  ;;  %v2548_v14 = vmul.f32 %v12442_v42, %v15071_v20  ;;  %11905 = vmatprep.subr.bf16.mxu0 %v12809_v1  ;;  %v19458_v42 = vld [vmem:[#allocation31_spill] sm:$0xff] }
 0x1f9   : > { %13752 = vlog2.f32 %v19453_v24  ;;  %2069 = vadd.xlane.f32.xlu0 %v2068_v5  ;;  %v2209_v15 = vmul.f32 0.6931472, %v13729_v17  ;;  %v3194_v24 = vrot.slane %v15181_v33, %v15285_v6  ;;  %v2717_v11 = vmul.f32 1.442695, %v2545_v48 }
 0x1fa   : > { %13754 = vlog2.f32 %v19454_v37  ;;  %v2723_v48 = vmul.f32 1.442695, %v2548_v14 }
 0x1fb   : > { %v13731_v35 = vpop.eup %13730  ;;  %13756 = vpow2.f32 %v1703_v58  ;;  %v12441_v17 = vadd.f32 -3.8918202, %v2209_v15 }
 0x1fc   : > { %v13733_v51 = vpop.eup %13732  ;;  %v1325_v36 = vmul.f32 0.6931472, %v13731_v35  ;;  %13758 = vlog2.f32 %v15558_v30 }
 0x1fd   : > { %v13735_v58 = vpop.eup %13734  ;;  %v1323_v5 = vmul.f32 0.6931472, %v13733_v51  ;;  %13760 = vlog2.f32 %v15573_v46  ;;  %v2547_v26 = vmul.f32 %v12441_v17, %v15071_v20  ;;  %v19456_v46 = vmax.f32 %v15247_v45, 1e-06  ;;  %v12811_v17 = vld [vmem:[%s14694_s26 + $0xc0] ss:$24 sps:$4 sm:$0xff]  }
 0x1fe   : > { %v13737_v29 = vpop.eup %13736  ;;  %13762 = vpow2.f32 %v2719_v41  ;;  %v1464_v30 = vmul.f32 %v1325_v36, %v14729_v39  ;;  %v2215_v35 = vmul.f32 0.6931472, %v13735_v58  ;;  %v19459_v36 = vmax.f32 %v19458_v42, 1e-06  ;;  %v19460_v45 = vld [vmem:[#allocation32_spill] sm:$0xff]  ;;  %11906 = vmatpush1.bf16.msra.mxu0 %v12811_v17  ;;  %v15738_v17 = vpop.xlane.xlu1 %1922 }
 0x1ff   : > { %v15708_v3 = vpop.eup %13738  ;;  %v1463_v15 = vmul.f32 %v1323_v5, %v14729_v39  ;;  %v2213_v51 = vmul.f32 0.6931472, %v13737_v29  ;;  %13764 = vlog2.f32 %v19456_v46  ;;  %v15720_v58 = vcombine.low %v3187_v61, %v3194_v24  ;;  %v12812_v42 = vld [vmem:[%s14694_s26 + $0x94] ss:$24 sps:$4 sm:$0xff]  }
 0x200   : > { %19455 = vst [vmem:[#allocation64_spill] sm:$0xff] %v15708_v3  ;;  %v15716_v28 = vpop.eup %13740  ;;  %v1709_v41 = vmul.f32 1.442695, %v1464_v30  ;;  %v12444_v14 = vadd.f32 -3.8918202, %v2215_v35  ;;  %13766 = vlog2.f32 %v19459_v36  ;;  %11907 = vmatprep.subr.bf16.mxu0 %v12812_v42 }
 0x201   : > { %19457 = vst [vmem:[#allocation65_spill] sm:$0xff] %v15716_v28  ;;  %v13743_v37 = vpop.eup %13742  ;;  %13768 = vpow2.f32 %v2717_v11  ;;  %v1707_v29 = vmul.f32 1.442695, %v1463_v15  ;;  %v12443_v5 = vadd.f32 -3.8918202, %v2213_v51  ;;  %v15726_v28 = vpop.xlane.xlu0 %1913 }
 0x202   : > { %v13745_v59 = vpop.eup %13744  ;;  %v2721_v1 = vmul.f32 1.442695, %v2547_v26  ;;  %13770 = vpow2.f32 %v1709_v41  ;;  %v2550_v30 = vmul.f32 %v12444_v14, %v15071_v20  ;;  %v1329_v35 = vmul.f32 0.6931472, %v13743_v37  ;;  %v12814_v15 = vld [vmem:[%s14694_s26 + $0x90] ss:$24 sps:$4 sm:$0xff]  }
 0x203   : > { %v13747_v61 = vpop.eup %13746  ;;  %13772 = vpow2.f32 %v2723_v48  ;;  %v1327_v24 = vmul.f32 0.6931472, %v13745_v59  ;;  %v2549_v37 = vmul.f32 %v12443_v5, %v15071_v20  ;;  %v3460_v5 = vrot.slane %v19460_v45, %v15308_v10  ;;  %11908 = vmatpush1.bf16.msra.mxu0 %v12814_v15 }
 0x204   : > { %v13749_v51 = vpop.eup %13748  ;;  %v2077_v26 = vsel %vm1731_vm0, %v13747_v61, 0.0  ;;  %13774 = vpow2.f32 %v1707_v29  ;;  %v1466_v41 = vmul.f32 %v1329_v35, %v14729_v39  ;;  %v2727_v59 = vmul.f32 1.442695, %v2550_v30  ;;  %v12815_v35 = vld [vmem:[%s14694_s26 + $0x64] ss:$24 sps:$4 sm:$0xff]  }
 0x205   : > { %v13751_v14 = vpop.eup %13750  ;;  %2078 = vadd.xlane.f32.xlu1 %v2077_v26  ;;  %v1465_v48 = vmul.f32 %v1327_v24, %v14729_v39  ;;  %v2219_v36 = vmul.f32 0.6931472, %v13749_v51  ;;  %13776 = vlog2.f32 %v15607_v18  ;;  %v2725_v24 = vmul.f32 1.442695, %v2549_v37  ;;  %11909 = vmatprep.subr.bf16.mxu0 %v12815_v35 }
 0x206   : > { %v13753_v46 = vpop.eup %13752  ;;  %13778 = vpow2.f32 %v2721_v1  ;;  %v1713_v29 = vmul.f32 1.442695, %v1466_v41  ;;  %v2217_v61 = vmul.f32 0.6931472, %v13751_v14  ;;  %v15745_v41 = vpop.xlane.xlu0 %1919 }
 0x207   : > { %v13755_v42 = vpop.eup %13754  ;;  %v1711_v11 = vmul.f32 1.442695, %v1465_v48  ;;  %v12446_v26 = vadd.f32 -3.8918202, %v2219_v36  ;;  %v1333_v30 = vmul.f32 0.6931472, %v13753_v46  ;;  %13780 = vlog2.f32 %v15626_v32 }
 0x208   : > { %v13757_v18 = vpop.eup %13756  ;;  %13782 = vpow2.f32 %v1713_v29  ;;  %v12445_v51 = vadd.f32 -3.8918202, %v2217_v61  ;;  %v1331_v1 = vmul.f32 0.6931472, %v13755_v42  ;;  %v12817_v36 = vld [vmem:[%s14694_s26 + $0x60] ss:$24 sps:$4 sm:$0xff]  }
 0x209   : > { %v13759_v14 = vpop.eup %13758  ;;  %v2074_v44 = vsel %vm1731_vm0, %v13757_v18, 0.0  ;;  %13784 = vpow2.f32 %v1711_v11  ;;  %v2552_v48 = vmul.f32 %v12446_v26, %v15071_v20  ;;  %v1468_v46 = vmul.f32 %v1333_v30, %v14729_v39  ;;  %v19461_v61 = vld [vmem:[#allocation35_spill] sm:$0xff]  ;;  %v15760_v30 = vpop.xlane.xlu1 %1928  ;;  %11910 = vmatpush1.bf16.msra.mxu0 %v12817_v36 }
 0x20a   : > { %v13761_v32 = vpop.eup %13760  ;;  %2075 = vadd.xlane.f32.xlu0 %v2074_v44  ;;  %v2551_v15 = vmul.f32 %v12445_v51, %v15071_v20  ;;  %v1467_v37 = vmul.f32 %v1331_v1, %v14729_v39  ;;  %v2223_v29 = vmul.f32 0.6931472, %v13759_v14  ;;  %v19462_v42 = vmax.f32 %v19461_v61, 1e-06  ;;  %11911 = vmatprep.subr.bf16.mxu0 %v12818_v56 }
 0x20b   : > { %v15756_v35 = vpop.eup %13762  ;;  %v1717_v18 = vmul.f32 1.442695, %v1468_v46  ;;  %v2221_v11 = vmul.f32 0.6931472, %v13761_v32  ;;  %v19464_v26 = vmax.f32 %v15323_v60, 1e-06  ;;  %v19465_v44 = vrot.slane %v15181_v33, %v15308_v10 }
 0x20c   : > { %13786 = vlog2.f32 %v19462_v42  ;;  %19463 = vst [vmem:[#allocation31_spill] sm:$0xff] %v15756_v35  ;;  %v19466_v51 = vrot.slane %v15181_v33, %v15293_v8  ;;  %v13765_v14 = vpop.eup %13764  ;;  %v1715_v61 = vmul.f32 1.442695, %v1467_v37  ;;  %v12448_v42 = vadd.f32 -3.8918202, %v2223_v29 }
 0x20d   : > { %13788 = vlog2.f32 %v19464_v26  ;;  %v6707_v46 = vrot.slane %v15720_v58, %v15369_v38  ;;  %v13767_v60 = vpop.eup %13766  ;;  %v1337_v32 = vmul.f32 0.6931472, %v13765_v14  ;;  %v19467_v26 = vrot.slane %v19460_v45, %v15285_v6 }
 0x20e   : > { %v15768_v1 = vcombine.low %v19466_v51, %v19465_v44  ;;  %13790 = vpow2.f32 %v2727_v59  ;;  %v19468_v33 = vrot.slane %v19460_v45, %v15280_v23  ;;  %v19469_v59 = vrot.slane %v19460_v45, %v15293_v8  ;;  %v15783_v37 = vpop.eup %13768 }
 0x20f   : > { %13792 = vpow2.f32 %v2725_v24  ;;  %19470 = vst [vmem:[#allocation35_spill] sm:$0xff] %v15783_v37  ;;  %v2731_v58 = vmul.f32 1.442695, %v2552_v48  ;;  %v2729_v56 = vmul.f32 1.442695, %v2551_v15  ;;  %v15786_v24 = vpop.xlane.xlu0 %1925  ;;  %v13771_v51 = vpop.eup %13770  ;;  %v2554_v14 = vmul.f32 %v12448_v42, %v15071_v20  ;;  %v19472_v42 = vld [vmem:[#allocation23_spill] sm:$0xff] }
 0x210   : > { %v15778_v44 = vcombine.low %v19468_v33, %v19467_v26  ;;  %v6853_v36 = vcombine.low %v19469_v59, %v3460_v5  ;;  %v1335_v29 = vmul.f32 0.6931472, %v13767_v60  ;;  %13794 = vlog2.f32 %v15645_v43  ;;  %v15790_v35 = vpop.eup %13772  ;;  %v12820_v15 = vld [vmem:[%s14694_s26 + $0x30] ss:$24 sps:$4 sm:$0xff]  }
 0x211   : > { %13796 = vpow2.f32 %v1717_v18  ;;  %v12447_v33 = vadd.f32 -3.8918202, %v2221_v11  ;;  %v1470_v26 = vmul.f32 %v1337_v32, %v14729_v39  ;;  %19471 = vst [vmem:[#allocation66_spill] sm:$0xff] %v15790_v35  ;;  %v2083_v5 = vsel %vm1731_vm0, %v13771_v51, 0.0  ;;  %v13775_v60 = vpop.eup %13774  ;;  %v15798_v11 = vpop.xlane.xlu1 %1934  ;;  %11912 = vmatpush1.bf16.msra.mxu0 %v12820_v15 }
 0x212   : > { %13798 = vpow2.f32 %v1715_v61  ;;  %v1469_v48 = vmul.f32 %v1335_v29, %v14729_v39  ;;  %v6714_v43 = vrot.slane %v15768_v1, %v15369_v38  ;;  %2084 = vadd.xlane.f32.xlu1 %v2083_v5  ;;  %v3215_v32 = vrot.slane %v19472_v42, %v15280_v23  ;;  %v13777_v59 = vpop.eup %13776 }
 0x213   : > { %v1721_v18 = vmul.f32 1.442695, %v1470_v26  ;;  %13800 = vlog2.f32 %v15664_v54  ;;  %v3222_v61 = vrot.slane %v19472_v42, %v15285_v6  ;;  %v2080_v29 = vsel %vm1731_vm0, %v13775_v60, 0.0  ;;  %v12821_v26 = vld [vmem:[%s14694_s26 + $0x4] ss:$24 sps:$4 sm:$0xff]   ;;  %v15808_v5 = vpop.eup %13778  ;;  %v15812_v3 = vpop.xlane.xlu0 %1931 }
 0x214   : > { %13802 = vpow2.f32 %v2731_v58  ;;  %v1719_v51 = vmul.f32 1.442695, %v1469_v48  ;;  %v6860_v1 = vrot.slane %v15778_v44, %v15369_v38  ;;  %19473 = vst [vmem:[#allocation67_spill] sm:$0xff] %v15808_v5  ;;  %2081 = vadd.xlane.f32.xlu0 %v2080_v29  ;;  %v2735_v54 = vmul.f32 1.442695, %v2554_v14  ;;  %v13781_v35 = vpop.eup %13780  ;;  %11913 = vmatprep.subr.bf16.mxu0 %v12821_v26 }
 0x215   : > { %13804 = vpow2.f32 %v2729_v56  ;;  %v2553_v45 = vmul.f32 %v12447_v33, %v15071_v20  ;;  %v6867_v37 = vrot.slane %v6853_v36, %v15369_v38  ;;  %v19474_v58 = vrot.slane %v15609_v53, %v15369_v38  ;;  %v13783_v36 = vpop.eup %13782 }
 0x216   : > { %13806 = vpow2.f32 %v1721_v18  ;;  %v19475_v44 = vrot.slane %v15602_v27, %v15369_v38  ;;  %v3229_v56 = vrot.slane %v19472_v42, %v15293_v8  ;;  %v3236_v14 = vrot.slane %v19472_v42, %v15308_v10  ;;  %v13785_v18 = vpop.eup %13784 }
 0x217   : > { %13808 = vpow2.f32 %v1719_v51  ;;  %v2227_v33 = vmul.f32 0.6931472, %v13777_v59  ;;  %v19476_v15 = vrot.slane %v15649_v19, %v15369_v38  ;;  %v19477_v53 = vrot.slane %v15647_v12, %v15369_v38 }
 0x218   : > { %v15820_v48 = vcombine.low %v19475_v44, %v19474_v58  ;;  %v15834_v27 = vcombine.low %v3215_v32, %v3222_v61  ;;  %v2089_v29 = vsel %vm1731_vm0, %v13783_v36, 0.0  ;;  %v19478_v58 = vmax.f32 %v15411_v47, 1e-06  ;;  %v15850_v44 = vpop.xlane.xlu1 %1940 }
 0x219   : > { %v15832_v60 = vcombine.low %v19477_v53, %v19476_v15  ;;  %v19479_v51 = vrot.slane %v15658_v9, %v15369_v38  ;;  %v19480_v59 = vrot.slane %v15656_v62, %v15369_v38  ;;  %v15847_v26 = vcombine.low %v6707_v46, %v6714_v43  ;;  %v13787_v12 = vpop.eup %13786  ;;  %2090 = vadd.xlane.f32.xlu1 %v2089_v29  ;;  %v19482_v46 = vld [vmem:[#allocation36_spill] sm:$0xff] }
 0x21a   : > { %13810 = vlog2.f32 %v19478_v58  ;;  %v2086_v32 = vsel %vm1731_vm0, %v13785_v18, 0.0  ;;  %v2733_v61 = vmul.f32 1.442695, %v2553_v45  ;;  %v15852_v47 = vcombine.low %v6860_v1, %v6867_v37  ;;  %v13789_v36 = vpop.eup %13788  ;;  %v15869_v1 = vpop.xlane.xlu0 %1937  ;;  %v19485_v58 = vld [vmem:[#allocation26_spill] sm:$0xff] }
 0x21b   : > { %v15845_v19 = vcombine.low %v19480_v59, %v19479_v51  ;;  %13812 = vpow2.f32 %v2735_v54  ;;  %2087 = vadd.xlane.f32.xlu0 %v2086_v32  ;;  %v1341_v9 = vmul.f32 0.6931472, %v13787_v12  ;;  %v19481_v15 = vmax.f32 %v15423_v34, 1e-06  ;;  %v15860_v53 = vpop.eup %13790 }
 0x21c   : > { %v15856_v62 = vcombine.low %v3229_v56, %v3236_v14  ;;  %v3495_v43 = vrot.slane %v19482_v46, %v15280_v23  ;;  %19483 = vst [vmem:[#allocation68_spill] sm:$0xff] %v15860_v53  ;;  %v12450_v18 = vadd.f32 -3.8918202, %v2227_v33  ;;  %v1339_v54 = vmul.f32 0.6931472, %v13789_v36  ;;  %v15865_v37 = vpop.eup %13792  ;;  %v15887_v45 = vpop.xlane.xlu1 %1946 }
 0x21d   : > { %13814 = vlog2.f32 %v19481_v15  ;;  %19484 = vst [vmem:[#allocation69_spill] sm:$0xff] %v15865_v37  ;;  %v1472_v34 = vmul.f32 %v1341_v9, %v14729_v39  ;;  %v3502_v56 = vrot.slane %v19482_v46, %v15285_v6  ;;  %v3509_v14 = vrot.slane %v19482_v46, %v15293_v8  ;;  %v13795_v33 = vpop.eup %13794  ;;  %v12823_v36 = vld [vmem:[%s14694_s26] ss:$24 sps:$4 sm:$0xff]   ;;  %v12824_v37 = vld [vmem:[%s14694_s26 + $0x2d4] ss:$24 sps:$4 sm:$0xff]  }
 0x21e   : > { %13816 = vlog2.f32 %v15682_v57  ;;  %v1471_v57 = vmul.f32 %v1339_v54, %v14729_v39  ;;  %v3516_v29 = vrot.slane %v19482_v46, %v15308_v10  ;;  %v3243_v51 = vrot.slane %v19485_v58, %v15280_v23  ;;  %11914 = vmatpush1.bf16.msra.mxu0 %v12823_v36 }
 0x21f   : > { %13818 = vlog2.f32 %v15699_v2  ;;  %v13797_v2 = vpop.eup %13796  ;;  %v2225_v59 = vmul.f32 0.6931472, %v13781_v35  ;;  %v1725_v12 = vmul.f32 1.442695, %v1472_v34  ;;  %v3250_v32 = vrot.slane %v19485_v58, %v15285_v6  ;;  %11915 = vmatprep.subr.bf16.mxu0 %v12824_v37  ;;  %v19488_v37 = vld [vmem:[#allocation41_spill] sm:$0xff] }
 0x220   : > { %13820 = vpow2.f32 %v2733_v61  ;;  %v13799_v9 = vpop.eup %13798  ;;  %v2095_v61 = vsel %vm1731_vm0, %v13797_v2, 0.0  ;;  %v2556_v15 = vmul.f32 %v12450_v18, %v15071_v20  ;;  %v1723_v54 = vmul.f32 1.442695, %v1471_v57 }
 0x221   : > { %13822 = vlog2.f32 %v15714_v4  ;;  %v13801_v42 = vpop.eup %13800  ;;  %2096 = vadd.xlane.f32.xlu1 %v2095_v61  ;;  %v2092_v35 = vsel %vm1731_vm0, %v13799_v9, 0.0  ;;  %v2231_v4 = vmul.f32 0.6931472, %v13795_v33  ;;  %v15895_v57 = vcombine.low %v3495_v43, %v3502_v56 }
 0x222   : > { %13824 = vlog2.f32 %v15726_v28  ;;  %v15893_v5 = vpop.eup %13802  ;;  %2093 = vadd.xlane.f32.xlu0 %v2092_v35  ;;  %v2229_v18 = vmul.f32 0.6931472, %v13801_v42  ;;  %v15897_v28 = vcombine.low %v3509_v14, %v3516_v29  ;;  %v3257_v33 = vrot.slane %v19485_v58, %v15293_v8 }
 0x223   : > { %13826 = vpow2.f32 %v1725_v12  ;;  %19486 = vst [vmem:[#allocation70_spill] sm:$0xff] %v15893_v5  ;;  %v15899_v2 = vpop.eup %13804  ;;  %v15902_v12 = vpop.xlane.xlu0 %1943  ;;  %v3264_v36 = vrot.slane %v19485_v58, %v15308_v10  ;;  %v15908_v9 = vcombine.low %v3243_v51, %v3250_v32  ;;  %v2739_v43 = vmul.f32 1.442695, %v2556_v15 }
 0x224   : > { %13828 = vpow2.f32 %v1723_v54  ;;  %19487 = vst [vmem:[#allocation71_spill] sm:$0xff] %v15899_v2  ;;  %v13807_v42 = vpop.eup %13806  ;;  %v12449_v56 = vadd.f32 -3.8918202, %v2225_v59  ;;  %v12452_v61 = vadd.f32 -3.8918202, %v2231_v4  ;;  %v3558_v35 = vrot.slane %v19488_v37, %v15285_v6  ;;  %v15918_v59 = vpop.xlane.xlu1 %1952 }
 0x225   : > { %13830 = vlog2.f32 %v15738_v17  ;;  %v3551_v17 = vrot.slane %v19488_v37, %v15280_v23  ;;  %v13809_v14 = vpop.eup %13808  ;;  %v2101_v29 = vsel %vm1731_vm0, %v13807_v42, 0.0  ;;  %v12451_v54 = vadd.f32 -3.8918202, %v2229_v18  ;;  %v12826_v42 = vld [vmem:[%s14694_s26 + $0x2d0] ss:$24 sps:$4 sm:$0xff]  }
 0x226   : > { %13832 = vlog2.f32 %v15745_v41  ;;  %2102 = vadd.xlane.f32.xlu1 %v2101_v29  ;;  %v2098_v32 = vsel %vm1731_vm0, %v13809_v14, 0.0  ;;  %v12827_v4 = vld [vmem:[%s14694_s26 + $0x2a4] ss:$24 sps:$4 sm:$0xff]   ;;  %v15929_v29 = vcombine.low %v3257_v33, %v3264_v36  ;;  %v2555_v2 = vmul.f32 %v12449_v56, %v15071_v20  ;;  %11916 = vmatpush2.bf16.msra.mxu0 %v12826_v42 }
 0x227   : > { %v13811_v51 = vpop.eup %13810  ;;  %13834 = vlog2.f32 %v15760_v30  ;;  %2099 = vadd.xlane.f32.xlu0 %v2098_v32  ;;  %v3565_v41 = vrot.slane %v19488_v37, %v15293_v8  ;;  %v3572_v15 = vrot.slane %v19488_v37, %v15308_v10  ;;  %v15941_v36 = vpop.xlane.xlu0 %1949  ;;  %v15943_v32 = vcombine.low %v3551_v17, %v3558_v35  ;;  %11917 = vmatprep.subr.bf16.mxu0 %v12827_v4 }
 0x228   : > { %v15926_v18 = vpop.eup %13812  ;;  %v1345_v34 = vmul.f32 0.6931472, %v13811_v51  ;;  %13836 = vlog2.f32 %v15786_v24  ;;  %v2558_v56 = vmul.f32 %v12452_v61, %v15071_v20  ;;  %v2557_v30 = vmul.f32 %v12451_v54, %v15071_v20  ;;  %v12830_v54 = vld [vmem:[%s14694_s26 + $0x274] ss:$24 sps:$4 sm:$0xff]  }
 0x229   : > { %19489 = vst [vmem:[#allocation72_spill] sm:$0xff] %v15926_v18  ;;  %13838 = vlog2.f32 %v15798_v11  ;;  %v2737_v35 = vmul.f32 1.442695, %v2555_v2  ;;  %v15955_v61 = vcombine.low %v3565_v41, %v3572_v15 }
 0x22a   : > { %v13815_v14 = vpop.eup %13814  ;;  %v1474_v24 = vmul.f32 %v1345_v34, %v14729_v39  ;;  %13840 = vlog2.f32 %v15812_v3  ;;  %v12829_v3 = vld [vmem:[%s14694_s26 + $0x2a0] ss:$24 sps:$4 sm:$0xff]   ;;  %v2741_v41 = vmul.f32 1.442695, %v2557_v30 }
 0x22b   : > { %v13817_v51 = vpop.eup %13816  ;;  %v1343_v33 = vmul.f32 0.6931472, %v13815_v14  ;;  %13842 = vpow2.f32 %v2739_v43  ;;  %v15953_v43 = vpop.xlane.xlu1 %1958  ;;  %11918 = vmatpush2.bf16.msra.mxu0 %v12829_v3 }
 0x22c   : > { %v13819_v11 = vpop.eup %13818  ;;  %v2235_v42 = vmul.f32 0.6931472, %v13817_v51  ;;  %v1729_v34 = vmul.f32 1.442695, %v1474_v24  ;;  %13844 = vlog2.f32 %v15850_v44  ;;  %11919 = vmatprep.subr.bf16.mxu0 %v12830_v54 }
 0x22d   : > { %v15947_v58 = vpop.eup %13820  ;;  %v1473_v14 = vmul.f32 %v1343_v33, %v14729_v39  ;;  %v2233_v37 = vmul.f32 0.6931472, %v13819_v11  ;;  %13846 = vlog2.f32 %v15869_v1  ;;  %v2743_v33 = vmul.f32 1.442695, %v2558_v56 }
 0x22e   : > { %19490 = vst [vmem:[#allocation73_spill] sm:$0xff] %v15947_v58  ;;  %v13823_v17 = vpop.eup %13822  ;;  %v12454_v4 = vadd.f32 -3.8918202, %v2235_v42  ;;  %13848 = vpow2.f32 %v1729_v34  ;;  %v15961_v42 = vpop.xlane.xlu0 %1955 }
 0x22f   : > { %v13825_v51 = vpop.eup %13824  ;;  %v1727_v58 = vmul.f32 1.442695, %v1473_v14  ;;  %v12453_v24 = vadd.f32 -3.8918202, %v2233_v37  ;;  %v2239_v46 = vmul.f32 0.6931472, %v13823_v17  ;;  %13850 = vlog2.f32 %v15887_v45 }
 0x230   : > { %v13827_v39 = vpop.eup %13826  ;;  %v2560_v44 = vmul.f32 %v12454_v4, %v15071_v20  ;;  %v2237_v11 = vmul.f32 0.6931472, %v13825_v51  ;;  %v19491_v4 = vld [vmem:[#allocation28_spill] sm:$0xff] }
 0x231   : > { %v13829_v1 = vpop.eup %13828  ;;  %v2107_v2 = vsel %vm1731_vm0, %v13827_v39, 0.0  ;;  %13852 = vpow2.f32 %v1727_v58  ;;  %v12456_v15 = vadd.f32 -3.8918202, %v2239_v46  ;;  %v2559_v56 = vmul.f32 %v12453_v24, %v15071_v20  ;;  %v15967_v58 = vpop.xlane.xlu1 %1964  ;;  %v12832_v51 = vld [vmem:[%s14694_s26 + $0x270] ss:$24 sps:$4 sm:$0xff]  }
 0x232   : > { %v13831_v34 = vpop.eup %13830  ;;  %13854 = vpow2.f32 %v2737_v35  ;;  %2108 = vadd.xlane.f32.xlu1 %v2107_v2  ;;  %v2104_v37 = vsel %vm1731_vm0, %v13829_v1, 0.0  ;;  %v12455_v14 = vadd.f32 -3.8918202, %v2237_v11  ;;  %v2747_v3 = vmul.f32 1.442695, %v2560_v44  ;;  %11920 = vmatpush2.bf16.msra.mxu0 %v12832_v51 }
 0x233   : > { %v13833_v45 = vpop.eup %13832  ;;  %2105 = vadd.xlane.f32.xlu0 %v2104_v37  ;;  %v2562_v17 = vmul.f32 %v12456_v15, %v15071_v20  ;;  %v2243_v30 = vmul.f32 0.6931472, %v13831_v34  ;;  %13856 = vlog2.f32 %v15902_v12  ;;  %v12833_v24 = vld [vmem:[%s14694_s26 + $0x244] ss:$24 sps:$4 sm:$0xff]   ;;  %v2745_v1 = vmul.f32 1.442695, %v2559_v56 }
 0x234   : > { %13858 = vpow2.f32 %v2743_v33  ;;  %v2241_v46 = vmul.f32 0.6931472, %v13833_v45  ;;  %v13835_v39 = vpop.eup %13834  ;;  %v2561_v2 = vmul.f32 %v12455_v14, %v15071_v20  ;;  %11921 = vmatprep.subr.bf16.mxu0 %v12833_v24 }
 0x235   : > { %13860 = vpow2.f32 %v2741_v41  ;;  %v12458_v44 = vadd.f32 -3.8918202, %v2243_v30  ;;  %v13837_v33 = vpop.eup %13836  ;;  %v2247_v34 = vmul.f32 0.6931472, %v13835_v39  ;;  %v2751_v45 = vmul.f32 1.442695, %v2562_v17  ;;  %v15981_v41 = vpop.xlane.xlu0 %1961 }
 0x236   : > { %v12457_v15 = vadd.f32 -3.8918202, %v2241_v46  ;;  %v13839_v37 = vpop.eup %13838  ;;  %v2245_v35 = vmul.f32 0.6931472, %v13837_v33  ;;  %13862 = vlog2.f32 %v15918_v59  ;;  %v2749_v33 = vmul.f32 1.442695, %v2561_v2  ;;  %v15991_v12 = vpop.xlane.xlu1 %1970 }
 0x237   : > { %v13841_v11 = vpop.eup %13840  ;;  %13864 = vpow2.f32 %v2747_v3  ;;  %v2564_v56 = vmul.f32 %v12458_v44, %v15071_v20  ;;  %v12460_v54 = vadd.f32 -3.8918202, %v2247_v34  ;;  %v2251_v14 = vmul.f32 0.6931472, %v13839_v37 }
 0x238   : > { %v15986_v46 = vpop.eup %13842  ;;  %v2563_v51 = vmul.f32 %v12457_v15, %v15071_v20  ;;  %v12459_v17 = vadd.f32 -3.8918202, %v2245_v35  ;;  %v2249_v39 = vmul.f32 0.6931472, %v13841_v11  ;;  %13866 = vlog2.f32 %v15941_v36 }
 0x239   : > { %19492 = vst [vmem:[#allocation74_spill] sm:$0xff] %v15986_v46  ;;  %v13845_v59 = vpop.eup %13844  ;;  %13868 = vpow2.f32 %v2745_v1  ;;  %v2566_v30 = vmul.f32 %v12460_v54, %v15071_v20  ;;  %v12462_v24 = vadd.f32 -3.8918202, %v2251_v14  ;;  %v2755_v15 = vmul.f32 1.442695, %v2564_v56 }
 0x23a   : > { %v13847_v3 = vpop.eup %13846  ;;  %13870 = vpow2.f32 %v2751_v45  ;;  %v2565_v44 = vmul.f32 %v12459_v17, %v15071_v20  ;;  %v12461_v34 = vadd.f32 -3.8918202, %v2249_v39  ;;  %v2255_v37 = vmul.f32 0.6931472, %v13845_v59  ;;  %v15998_v45 = vpop.xlane.xlu0 %1967 }
 0x23b   : > { %v13849_v46 = vpop.eup %13848  ;;  %v2568_v35 = vmul.f32 %v12462_v24, %v15071_v20  ;;  %v2253_v11 = vmul.f32 0.6931472, %v13847_v3  ;;  %13872 = vlog2.f32 %v15953_v43  ;;  %v2753_v54 = vmul.f32 1.442695, %v2563_v51  ;;  %v12835_v3 = vld [vmem:[%s14694_s26 + $0x240] ss:$24 sps:$4 sm:$0xff]  }
 0x23c   : > { %v13851_v36 = vpop.eup %13850  ;;  %v2113_v1 = vsel %vm1731_vm0, %v13849_v46, 0.0  ;;  %v12464_v2 = vadd.f32 -3.8918202, %v2255_v37  ;;  %13874 = vlog2.f32 %v15961_v42  ;;  %v2759_v17 = vmul.f32 1.442695, %v2566_v30  ;;  %11922 = vmatpush2.bf16.msra.mxu0 %v12835_v3 }
 0x23d   : > { %2114 = vadd.xlane.f32.xlu1 %v2113_v1  ;;  %v2567_v56 = vmul.f32 %v12461_v34, %v15071_v20  ;;  %v12463_v39 = vadd.f32 -3.8918202, %v2253_v11  ;;  %v2259_v59 = vmul.f32 0.6931472, %v13851_v36  ;;  %13876 = vpow2.f32 %v2749_v33  ;;  %v16006_v1 = vpop.xlane.xlu1 %1976  ;;  %v12836_v11 = vld [vmem:[%s14694_s26 + $0x214] ss:$24 sps:$4 sm:$0xff]  }
 0x23e   : > { %v13853_v14 = vpop.eup %13852  ;;  %v2757_v46 = vmul.f32 1.442695, %v2565_v44  ;;  %v2570_v51 = vmul.f32 %v12464_v2, %v15071_v20  ;;  %13878 = vpow2.f32 %v2755_v15  ;;  %v2763_v37 = vmul.f32 1.442695, %v2568_v35  ;;  %11923 = vmatprep.subr.bf16.mxu0 %v12836_v11  ;;  %v1974_v3 = vpop.xlane.xlu0 %1973 }
 0x23f   : > { %v16001_v24 = vpop.eup %13854  ;;  %v2110_v43 = vsel %vm1731_vm0, %v13853_v14, 0.0  ;;  %v3313_v30 = vrot.slane %v19491_v4, %v15293_v8  ;;  %v3320_v34 = vrot.slane %v19491_v4, %v15308_v10  ;;  %13880 = vpow2.f32 %v2753_v54 }
 0x240   : > { %19493 = vst [vmem:[#allocation75_spill] sm:$0xff] %v16001_v24  ;;  %v13857_v42 = vpop.eup %13856  ;;  %2111 = vadd.xlane.f32.xlu0 %v2110_v43  ;;  %v2569_v33 = vmul.f32 %v12463_v39, %v15071_v20  ;;  %v19495_v44 = vrot.slane %v15856_v62, %v15369_v38  ;;  %v19496_v15 = vrot.slane %v15834_v27, %v15369_v38  ;;  %13882 = vpow2.f32 %v2759_v17 }
 0x241   : > { %v16013_v36 = vpop.eup %13858  ;;  %v19497_v2 = vrot.slane %v19491_v4, %v15285_v6  ;;  %v19498_v14 = vrot.slane %v19491_v4, %v15280_v23  ;;  %v2761_v39 = vmul.f32 1.442695, %v2567_v56  ;;  %v12466_v24 = vadd.f32 -3.8918202, %v2259_v59 }
 0x242   : > { %19494 = vst [vmem:[#allocation76_spill] sm:$0xff] %v16013_v36  ;;  %v16022_v35 = vcombine.low %v19496_v15, %v19495_v44  ;;  %v16032_v54 = vpop.eup %13860  ;;  %v19500_v62 = vrot.slane %v15897_v28, %v15369_v38  ;;  %v19501_v27 = vrot.slane %v15895_v57, %v15369_v38  ;;  %13884 = vpow2.f32 %v2757_v46 }
 0x243   : > { %v16030_v43 = vcombine.low %v19498_v14, %v19497_v2  ;;  %19499 = vst [vmem:[#allocation77_spill] sm:$0xff] %v16032_v54  ;;  %v2767_v15 = vmul.f32 1.442695, %v2570_v51  ;;  %v2257_v2 = vmul.f32 0.6931472, %v13857_v42  ;;  %v19502_v17 = vrot.slane %v15929_v29, %v15369_v38  ;;  %v13863_v28 = vpop.eup %13862  ;;  %v19506_v42 = vld [vmem:[#allocation44_spill] sm:$0xff] }
 0x244   : > { %v16040_v44 = vcombine.low %v19501_v27, %v19500_v62  ;;  %v19503_v56 = vrot.slane %v15908_v9, %v15369_v38  ;;  %13886 = vpow2.f32 %v2763_v37  ;;  %v19504_v57 = vrot.slane %v15955_v61, %v15369_v38  ;;  %v16062_v14 = vpop.eup %13864  ;;  %v12838_v62 = vld [vmem:[%s14694_s26 + $0x210] ss:$24 sps:$4 sm:$0xff]  }
 0x245   : > { %v19505_v46 = vrot.slane %v15943_v32, %v15369_v38  ;;  %v16058_v51 = vcombine.low %v3313_v30, %v3320_v34  ;;  %v3607_v29 = vrot.slane %v19506_v42, %v15280_v23  ;;  %19507 = vst [vmem:[#allocation78_spill] sm:$0xff] %v16062_v14  ;;  %v2765_v9 = vmul.f32 1.442695, %v2569_v33  ;;  %v12839_v32 = vld [vmem:[%s14694_s26 + $0x1e4] ss:$24 sps:$4 sm:$0xff]   ;;  %v13867_v27 = vpop.eup %13866  ;;  %v1983_v34 = vpop.xlane.xlu1 %1982  ;;  %11924 = vmatpush2.bf16.msra.mxu0 %v12838_v62 }
 0x246   : > { %v16048_v59 = vcombine.low %v19503_v56, %v19502_v17  ;;  %13888 = vlog2.f32 %v15967_v58  ;;  %v3614_v61 = vrot.slane %v19506_v42, %v15285_v6  ;;  %v2572_v30 = vmul.f32 %v12466_v24, %v15071_v20  ;;  %v16076_v58 = vpop.eup %13868  ;;  %11925 = vmatprep.subr.bf16.mxu0 %v12839_v32 }
 0x247   : > { %v16056_v11 = vcombine.low %v19505_v46, %v19504_v57  ;;  %13890 = vpow2.f32 %v2761_v39  ;;  %v3621_v17 = vrot.slane %v19506_v42, %v15293_v8  ;;  %v3628_v33 = vrot.slane %v19506_v42, %v15308_v10  ;;  %19508 = vst [vmem:[#allocation79_spill] sm:$0xff] %v16076_v58  ;;  %v19509_v46 = vld [vmem:[#allocation30_spill] sm:$0xff]  ;;  %v16080_v54 = vpop.eup %13870 }
 0x248   : > { %13892 = vpow2.f32 %v2767_v15  ;;  %v12465_v56 = vadd.f32 -3.8918202, %v2257_v2  ;;  %v2263_v57 = vmul.f32 0.6931472, %v13863_v28  ;;  %v3355_v37 = vrot.slane %v19509_v46, %v15280_v23  ;;  %19510 = vst [vmem:[#allocation80_spill] sm:$0xff] %v16080_v54  ;;  %v13873_v15 = vpop.eup %13872  ;;  %v1980_v28 = vpop.xlane.xlu0 %1979 }
 0x249   : > { %13894 = vlog2.f32 %v15981_v41  ;;  %v3362_v24 = vrot.slane %v19509_v46, %v15285_v6  ;;  %v3369_v39 = vrot.slane %v19509_v46, %v15293_v8  ;;  %v3376_v58 = vrot.slane %v19509_v46, %v15308_v10  ;;  %v13875_v54 = vpop.eup %13874 }
 0x24a   : > { %13896 = vpow2.f32 %v2765_v9  ;;  %v2261_v2 = vmul.f32 0.6931472, %v13867_v27  ;;  %v3663_v62 = vrot.slane %v15349_v22, %v15280_v23  ;;  %v3670_v41 = vrot.slane %v15349_v22, %v15285_v6  ;;  %v16102_v4 = vpop.eup %13876 }
 0x24b   : > { %v2771_v14 = vmul.f32 1.442695, %v2572_v30  ;;  %13898 = vlog2.f32 %v15991_v12  ;;  %v3677_v36 = vrot.slane %v15349_v22, %v15293_v8  ;;  %v3684_v32 = vrot.slane %v15349_v22, %v15308_v10  ;;  %19511 = vst [vmem:[#allocation81_spill] sm:$0xff] %v16102_v4  ;;  %v1989_v22 = vpop.xlane.xlu1 %1988  ;;  %v16109_v18 = vpop.eup %13878 }
 0x24c   : > { %v2571_v9 = vmul.f32 %v12465_v56, %v15071_v20  ;;  %v12468_v27 = vadd.f32 -3.8918202, %v2263_v57  ;;  %13900 = vlog2.f32 %v15998_v45  ;;  %v2267_v30 = vmul.f32 0.6931472, %v13873_v15  ;;  %19512 = vst [vmem:[#allocation82_spill] sm:$0xff] %v16109_v18  ;;  %v16115_v46 = vpop.eup %13880 }
 0x24d   : > { %13902 = vlog2.f32 %v16006_v1  ;;  %v16105_v12 = vcombine.low %v3607_v29, %v3614_v61  ;;  %v16107_v42 = vcombine.low %v3621_v17, %v3628_v33  ;;  %v12467_v56 = vadd.f32 -3.8918202, %v2261_v2  ;;  %19513 = vst [vmem:[#allocation83_spill] sm:$0xff] %v16115_v46  ;;  %v12841_v29 = vld [vmem:[%s14694_s26 + $0x1e0] ss:$24 sps:$4 sm:$0xff]   ;;  %v16123_v17 = vpop.eup %13882 }
 0x24e   : > { %13904 = vlog2.f32 %v1974_v3  ;;  %v16111_v45 = vcombine.low %v3355_v37, %v3362_v24  ;;  %v16113_v57 = vcombine.low %v3369_v39, %v3376_v58  ;;  %v2265_v15 = vmul.f32 0.6931472, %v13875_v54  ;;  %v12842_v61 = vld [vmem:[%s14694_s26 + $0x1b4] ss:$24 sps:$4 sm:$0xff]   ;;  %19514 = vst [vmem:[#allocation84_spill] sm:$0xff] %v16123_v17  ;;  %8777 = vperm.xlu1 %12799, %v15440_v50   ;;  %v1986_v37 = vpop.xlane.xlu0 %1985  ;;  %11926 = vmatpush2.bf16.msra.mxu0 %v12841_v29 }
 0x24f   : > { %13906 = vpow2.f32 %v2771_v14  ;;  %v16117_v4 = vcombine.low %v3663_v62, %v3670_v41  ;;  %v16119_v1 = vcombine.low %v3677_v36, %v3684_v32  ;;  %v2769_v33 = vmul.f32 1.442695, %v2571_v9  ;;  %v19515_v58 = vld [vmem:[#allocation33_spill] sm:$0xff]  ;;  %v16129_v14 = vpop.eup %13884  ;;  %11927 = vmatprep.subr.bf16.mxu0 %v12842_v61  ;;  %v12845_v46 = vld [vmem:[%s14694_s26 + $0x184] ss:$24 sps:$4 sm:$0xff]  }
 0x250   : > { %v2574_v3 = vmul.f32 %v12468_v27, %v15071_v20  ;;  %13908 = vlog2.f32 %v1983_v34  ;;  %v3411_v24 = vrot.slane %v19515_v58, %v15280_v23  ;;  %19516 = vst [vmem:[#allocation85_spill] sm:$0xff] %v16129_v14  ;;  %v12470_v54 = vadd.f32 -3.8918202, %v2267_v30  ;;  %v12844_v61 = vld [vmem:[%s14694_s26 + $0x1b0] ss:$24 sps:$4 sm:$0xff]  }
 0x251   : > { %v3418_v36 = vrot.slane %v19515_v58, %v15285_v6  ;;  %v3425_v39 = vrot.slane %v19515_v58, %v15293_v8  ;;  %v3432_v50 = vrot.slane %v19515_v58, %v15308_v10  ;;  %v16137_v2 = vpop.eup %13886  ;;  %v2573_v34 = vmul.f32 %v12467_v56, %v15071_v20  ;;  %v1995_v56 = vpop.xlane.xlu1 %1994 }
 0x252   : > { %19517 = vst [vmem:[#allocation86_spill] sm:$0xff] %v16137_v2  ;;  %13910 = vlog2.f32 %v1980_v28  ;;  %v6962_v62 = vrot.slane %v16105_v12, %v15369_v38  ;;  %v6969_v41 = vrot.slane %v16107_v42, %v15369_v38  ;;  %v12469_v9 = vadd.f32 -3.8918202, %v2265_v15  ;;  %8780 = vperm.xlu1 %12799, %v15444_v7   ;;  %11928 = vmatpush2.bf16.msra.mxu0 %v12844_v61 }
 0x253   : > { %v13889_v32 = vpop.eup %13888  ;;  %13912 = vlog2.f32 %v1989_v22  ;;  %v6809_v27 = vrot.slane %v16111_v45, %v15369_v38  ;;  %v6816_v30 = vrot.slane %v16113_v57, %v15369_v38  ;;  %v2775_v12 = vmul.f32 1.442695, %v2574_v3  ;;  %11929 = vmatprep.subr.bf16.mxu0 %v12845_v46 }
 0x254   : > { %v16148_v28 = vpop.eup %13890  ;;  %13914 = vpow2.f32 %v2769_v33  ;;  %v6996_v42 = vrot.slane %v16117_v4, %v15369_v38  ;;  %v7003_v22 = vrot.slane %v16119_v1, %v15369_v38  ;;  %v2576_v45 = vmul.f32 %v12470_v54, %v15071_v20  ;;  %v1992_v33 = vpop.xlane.xlu0 %1991 }
 0x255   : > { %19518 = vst [vmem:[#allocation87_spill] sm:$0xff] %v16148_v28  ;;  %v16155_v15 = vpop.eup %13892  ;;  %13916 = vlog2.f32 %v1986_v37  ;;  %v6835_v29 = vcombine.low %v3411_v24, %v3418_v36  ;;  %v6836_v57 = vcombine.low %v3425_v39, %v3432_v50  ;;  %v2773_v2 = vmul.f32 1.442695, %v2573_v34 }
 0x256   : > { %19519 = vst [vmem:[#allocation88_spill] sm:$0xff] %v16155_v15  ;;  %v13895_v18 = vpop.eup %13894  ;;  %v2271_v7 = vmul.f32 0.6931472, %v13889_v32  ;;  %v3719_v3 = vrot.slane %v15364_v63, %v15280_v23  ;;  %v3726_v4 = vrot.slane %v15364_v63, %v15285_v6  ;;  %8774 = vperm.xlu0 %12798, %v15581_v49   ;;  %v2575_v37 = vmul.f32 %v12469_v9, %v15071_v20 }
 0x257   : > { %v16164_v1 = vpop.eup %13896  ;;  %13918 = vlog2.f32 %v1995_v56  ;;  %v3733_v24 = vrot.slane %v15364_v63, %v15293_v8  ;;  %v3740_v54 = vrot.slane %v15364_v63, %v15308_v10  ;;  %8783 = vperm.xlu1 %12799, %v15590_v40   ;;  %v19521_v39 = vrot.slane %v16058_v51, %v15369_v38  ;;  %v2001_v51 = vpop.xlane.xlu1 %2000 }
 0x258   : > { %19520 = vst [vmem:[#allocation89_spill] sm:$0xff] %v16164_v1  ;;  %v13899_v36 = vpop.eup %13898  ;;  %13920 = vpow2.f32 %v2775_v12  ;;  %v19522_v49 = vrot.slane %v16030_v43, %v15369_v38  ;;  %v16181_v34 = vcombine.low %v6962_v62, %v6969_v41  ;;  %v16183_v32 = vcombine.low %v6809_v27, %v6816_v30  ;;  %v12847_v62 = vld [vmem:[%s14694_s26 + $0x180] ss:$24 sps:$4 sm:$0xff]   ;;  %v12848_v30 = vld [vmem:[%s14694_s26 + $0x454] ss:$24 sps:$4 sm:$0xff]  }
 0x259   : > { %v13901_v9 = vpop.eup %13900  ;;  %v2779_v56 = vmul.f32 1.442695, %v2576_v45  ;;  %v2269_v61 = vmul.f32 0.6931472, %v13895_v18  ;;  %v6843_v40 = vrot.slane %v6835_v29, %v15369_v38  ;;  %v6850_v12 = vrot.slane %v6836_v57, %v15369_v38  ;;  %11930 = vmatpush2.bf16.msra.mxu0 %v12847_v62  ;;  %11940 = vmatprep.subr.bf16.mxu1 %v12848_v30 }
 0x25a   : > { %v16179_v50 = vcombine.low %v19522_v49, %v19521_v39  ;;  %v13903_v15 = vpop.eup %13902  ;;  %13922 = vpow2.f32 %v2773_v2  ;;  %v12472_v43 = vadd.f32 -3.8918202, %v2271_v7  ;;  %v16187_v1 = vcombine.low %v6996_v42, %v7003_v22  ;;  %8801 = vperm.xlu0 %12798, %v15598_v16   ;;  %v1998_v2 = vpop.xlane.xlu0 %1997  ;;  %v19524_v42 = vld [vmem:[#allocation39_spill] sm:$0xff] }
 0x25b   : > { %v7022_v39 = vcombine.low %v3719_v3, %v3726_v4  ;;  %v13905_v41 = vpop.eup %13904  ;;  %v2777_v46 = vmul.f32 1.442695, %v2575_v37  ;;  %v2275_v27 = vmul.f32 0.6931472, %v13899_v36  ;;  %13924 = vlog2.f32 %v1992_v33  ;;  %8786 = vperm.xlu1 %12799, %v15600_v31   ;;  %v12852_v4 = vld [vmem:[%s14694_s26 + $0x15c] ss:$24 sps:$4 sm:$0xff]  }
 0x25c   : > { %v7023_v18 = vcombine.low %v3733_v24, %v3740_v54  ;;  %v16192_v45 = vpop.eup %13906  ;;  %v2273_v29 = vmul.f32 0.6931472, %v13901_v9  ;;  %13926 = vlog2.f32 %v2001_v51  ;;  %v3467_v22 = vrot.slane %v19524_v42, %v15280_v23  ;;  %11981 = vmatprep.subr.bf16.mxu0 %v12852_v4 }
 0x25d   : > { %19523 = vst [vmem:[#allocation90_spill] sm:$0xff] %v16192_v45  ;;  %v3474_v57 = vrot.slane %v19524_v42, %v15285_v6  ;;  %v13909_v16 = vpop.eup %13908  ;;  %13928 = vpow2.f32 %v2779_v56  ;;  %v12471_v7 = vadd.f32 -3.8918202, %v2269_v61  ;;  %v2279_v33 = vmul.f32 0.6931472, %v13903_v15 }
 0x25e   : > { %v16199_v3 = vcombine.low %v6843_v40, %v6850_v12  ;;  %v2578_v31 = vmul.f32 %v12472_v43, %v15071_v20  ;;  %v2277_v37 = vmul.f32 0.6931472, %v13905_v41  ;;  %v7030_v24 = vrot.slane %v7022_v39, %v15369_v38  ;;  %8807 = vperm.xlu0 %12798, %v15820_v48  }
 0x25f   : > { %v3481_v54 = vrot.slane %v19524_v42, %v15293_v8  ;;  %v13911_v36 = vpop.eup %13910  ;;  %v12474_v49 = vadd.f32 -3.8918202, %v2275_v27  ;;  %v7037_v9 = vrot.slane %v7023_v18, %v15369_v38  ;;  %13930 = vlog2.f32 %v1998_v2  ;;  %8789 = vperm.xlu1 %12799, %v15832_v60  }
 0x260   : > { %v3488_v15 = vrot.slane %v19524_v42, %v15308_v10  ;;  %v13913_v56 = vpop.eup %13912  ;;  %v12473_v61 = vadd.f32 -3.8918202, %v2273_v29  ;;  %v2283_v40 = vmul.f32 0.6931472, %v13909_v16  ;;  %v16211_v12 = vcombine.low %v3467_v22, %v3474_v57 }
 0x261   : > { %v3775_v51 = vrot.slane %v15394_v13, %v15280_v23  ;;  %v16215_v43 = vpop.eup %13914  ;;  %v2577_v48 = vmul.f32 %v12471_v7, %v15071_v20  ;;  %v12476_v39 = vadd.f32 -3.8918202, %v2279_v33  ;;  %v3782_v62 = vrot.slane %v15394_v13, %v15285_v6 }
 0x262   : > { %19525 = vst [vmem:[#allocation39_spill] sm:$0xff] %v16215_v43  ;;  %v3789_v41 = vrot.slane %v15394_v13, %v15293_v8  ;;  %v13917_v27 = vpop.eup %13916  ;;  %v2783_v60 = vmul.f32 1.442695, %v2578_v31  ;;  %v12475_v18 = vadd.f32 -3.8918202, %v2277_v37  ;;  %v3796_v29 = vrot.slane %v15394_v13, %v15308_v10  ;;  %8813 = vperm.xlu0 %12798, %v15845_v19   ;;  %v2007_v37 = vpop.xlane.xlu1 %2006 }
 0x263   : > { %v2281_v30 = vmul.f32 0.6931472, %v13911_v36  ;;  %13932 = vpow2.f32 %v2777_v46  ;;  %v2580_v2 = vmul.f32 %v12474_v49, %v15071_v20  ;;  %v2287_v22 = vmul.f32 0.6931472, %v13913_v56  ;;  %8792 = vperm.xlu1 %12799, %v15847_v26  }
 0x264   : > { %v16226_v57 = vcombine.low %v7030_v24, %v7037_v9  ;;  %v13919_v16 = vpop.eup %13918  ;;  %v2579_v7 = vmul.f32 %v12473_v61, %v15071_v20  ;;  %v12478_v33 = vadd.f32 -3.8918202, %v2283_v40  ;;  %v16230_v4 = vcombine.low %v3481_v54, %v3488_v15  ;;  %v2004_v9 = vpop.xlane.xlu0 %2003 }
 0x265   : > { %v6877_v31 = vrot.slane %v16211_v12, %v15369_v38  ;;  %v16234_v46 = vpop.eup %13920  ;;  %v2781_v19 = vmul.f32 1.442695, %v2577_v48  ;;  %v2582_v36 = vmul.f32 %v12476_v39, %v15071_v20  ;;  %v2285_v49 = vmul.f32 0.6931472, %v13917_v27  ;;  %v19528_v39 = vld [vmem:[#allocation43_spill] sm:$0xff] }
 0x266   : > { %19526 = vst [vmem:[#allocation91_spill] sm:$0xff] %v16234_v46  ;;  %v16237_v24 = vcombine.low %v3775_v51, %v3782_v62  ;;  %13934 = vpow2.f32 %v2783_v60  ;;  %v2581_v26 = vmul.f32 %v12475_v18, %v15071_v20  ;;  %v12477_v56 = vadd.f32 -3.8918202, %v2281_v30  ;;  %8819 = vperm.xlu0 %12798, %v15852_v47  }
 0x267   : > { %v7057_v61 = vcombine.low %v3789_v41, %v3796_v29  ;;  %v16240_v54 = vpop.eup %13922  ;;  %v2787_v15 = vmul.f32 1.442695, %v2580_v2  ;;  %v12480_v40 = vadd.f32 -3.8918202, %v2287_v22  ;;  %v2291_v12 = vmul.f32 0.6931472, %v13919_v16  ;;  %8795 = vperm.xlu1 %12799, %v16022_v35  }
 0x268   : > { %19527 = vst [vmem:[#allocation92_spill] sm:$0xff] %v16240_v54  ;;  %13936 = vlog2.f32 %v2007_v37  ;;  %v13925_v48 = vpop.eup %13924  ;;  %v2785_v46 = vmul.f32 1.442695, %v2579_v7  ;;  %v2584_v51 = vmul.f32 %v12478_v33, %v15071_v20  ;;  %v3523_v62 = vrot.slane %v19528_v39, %v15280_v23 }
 0x269   : > { %13938 = vlog2.f32 %v2004_v9  ;;  %v13927_v27 = vpop.eup %13926  ;;  %v2791_v41 = vmul.f32 1.442695, %v2582_v36  ;;  %v12479_v60 = vadd.f32 -3.8918202, %v2285_v49  ;;  %v3530_v47 = vrot.slane %v19528_v39, %v15285_v6 }
 0x26a   : > { %13940 = vpow2.f32 %v2781_v19  ;;  %v16249_v18 = vpop.eup %13928  ;;  %v2789_v30 = vmul.f32 1.442695, %v2581_v26  ;;  %v2583_v29 = vmul.f32 %v12477_v56, %v15071_v20  ;;  %v3537_v35 = vrot.slane %v19528_v39, %v15293_v8  ;;  %8825 = vperm.xlu0 %12798, %v16040_v44  }
 0x26b   : > { %19529 = vst [vmem:[#allocation43_spill] sm:$0xff] %v16249_v18  ;;  %v3544_v2 = vrot.slane %v19528_v39, %v15308_v10  ;;  %13942 = vpow2.f32 %v2787_v15  ;;  %v2586_v22 = vmul.f32 %v12480_v40, %v15071_v20  ;;  %v12482_v16 = vadd.f32 -3.8918202, %v2291_v12  ;;  %8798 = vperm.xlu1 %12799, %v16048_v59  }
 0x26c   : > { %v2289_v7 = vmul.f32 0.6931472, %v13925_v48  ;;  %v13931_v33 = vpop.eup %13930  ;;  %13944 = vpow2.f32 %v2785_v46  ;;  %v2795_v37 = vmul.f32 1.442695, %v2584_v51  ;;  %v2295_v19 = vmul.f32 0.6931472, %v13927_v27 }
 0x26d   : > { %v6884_v36 = vrot.slane %v16230_v4, %v15369_v38  ;;  %13946 = vpow2.f32 %v2791_v41  ;;  %v2585_v49 = vmul.f32 %v12479_v60, %v15071_v20  ;;  %v7064_v9 = vrot.slane %v16237_v24, %v15369_v38  ;;  %v19531_v48 = vld [vmem:[#allocation51_spill] sm:$0xff] }
 0x26e   : > { %v7071_v44 = vrot.slane %v7057_v61, %v15369_v38  ;;  %13948 = vpow2.f32 %v2789_v30  ;;  %v2793_v26 = vmul.f32 1.442695, %v2583_v29  ;;  %v16265_v56 = vcombine.low %v3523_v62, %v3530_v47  ;;  %8831 = vperm.xlu0 %12798, %v16056_v11  }
 0x26f   : > { %v16267_v46 = vcombine.low %v3537_v35, %v3544_v2  ;;  %v2799_v59 = vmul.f32 1.442695, %v2586_v22  ;;  %v2588_v15 = vmul.f32 %v12482_v16, %v15071_v20  ;;  %v12481_v4 = vadd.f32 -3.8918202, %v2289_v7  ;;  %8804 = vperm.xlu1 %12799, %v16179_v50   ;;  %v19533_v22 = vld [vmem:[#allocation45_spill] sm:$0xff] }
 0x270   : > { %v2293_v40 = vmul.f32 0.6931472, %v13931_v33  ;;  %v16271_v12 = vpop.eup %13932  ;;  %13950 = vpow2.f32 %v2795_v37  ;;  %v12484_v24 = vadd.f32 -3.8918202, %v2295_v19  ;;  %v6885_v61 = vcombine.low %v6877_v31, %v6884_v36 }
 0x271   : > { %19530 = vst [vmem:[#allocation93_spill] sm:$0xff] %v16271_v12  ;;  %v3831_v51 = vrot.slane %v19531_v48, %v15280_v23  ;;  %v2797_v62 = vmul.f32 1.442695, %v2585_v49  ;;  %v3838_v27 = vrot.slane %v19531_v48, %v15285_v6  ;;  %v3845_v11 = vrot.slane %v19531_v48, %v15293_v8 }
 0x272   : > { %v3852_v41 = vrot.slane %v19531_v48, %v15308_v10  ;;  %13952 = vpow2.f32 %v2793_v26  ;;  %v16282_v60 = vcombine.low %v7064_v9, %v7071_v44  ;;  %v6918_v31 = vrot.slane %v16267_v46, %v15369_v38  ;;  %8837 = vperm.xlu0 %12798, %v16181_v34  }
 0x273   : > { %v16288_v47 = vpop.eup %13934  ;;  %13954 = vpow2.f32 %v2799_v59  ;;  %v2803_v30 = vmul.f32 1.442695, %v2588_v15  ;;  %v2587_v29 = vmul.f32 %v12481_v4, %v15071_v20  ;;  %v12483_v35 = vadd.f32 -3.8918202, %v2293_v40  ;;  %8810 = vperm.xlu1 %12799, %v16183_v32   ;;  %v2013_v32 = vpop.xlane.xlu1 %2012 }
 0x274   : > { %19532 = vst [vmem:[#allocation51_spill] sm:$0xff] %v16288_v47  ;;  %v3579_v16 = vrot.slane %v19533_v22, %v15280_v23  ;;  %v3586_v7 = vrot.slane %v19533_v22, %v15285_v6  ;;  %v3593_v33 = vrot.slane %v19533_v22, %v15293_v8  ;;  %v3600_v34 = vrot.slane %v19533_v22, %v15308_v10 }
 0x275   : > { %v13937_v2 = vpop.eup %13936  ;;  %13956 = vpow2.f32 %v2797_v62  ;;  %v16302_v19 = vmul.f32 %v12484_v24, %v15071_v20  ;;  %v7090_v36 = vcombine.low %v3831_v51, %v3838_v27  ;;  %v7091_v49 = vcombine.low %v3845_v11, %v3852_v41 }
 0x276   : > { %v13939_v37 = vpop.eup %13938  ;;  %v3887_v44 = vrot.slane %v15456_v52, %v15280_v23  ;;  %v3894_v26 = vrot.slane %v15456_v52, %v15285_v6  ;;  %v3901_v46 = vrot.slane %v15456_v52, %v15293_v8  ;;  %v3908_v59 = vrot.slane %v15456_v52, %v15308_v10  ;;  %8843 = vperm.xlu0 %12798, %v16187_v1   ;;  %v19537_v1 = vld [vmem:[#allocation47_spill] sm:$0xff] }
 0x277   : > { %v16304_v9 = vpop.eup %13940  ;;  %13958 = vpow2.f32 %v2803_v30  ;;  %v2801_v15 = vmul.f32 1.442695, %v2587_v29  ;;  %v16316_v4 = vmul.f32 %v12483_v35, %v15071_v20  ;;  %v16318_v40 = vmul.f32 0.6931472, %v13937_v2  ;;  %8816 = vperm.xlu1 %12799, %v16199_v3  }
 0x278   : > { %19534 = vst [vmem:[#allocation45_spill] sm:$0xff] %v16304_v9  ;;  %v16320_v24 = vpop.eup %13942  ;;  %v16323_v51 = vmul.f32 0.6931472, %v13939_v37  ;;  %13960 = vlog2.f32 %v2013_v32  ;;  %v6937_v62 = vcombine.low %v3579_v16, %v3586_v7  ;;  %v6938_v27 = vcombine.low %v3593_v33, %v3600_v34  ;;  %v2010_v37 = vpop.xlane.xlu0 %2009  ;;  %v19540_v32 = vld [vmem:[#allocation54_spill] sm:$0xff] }
 0x279   : > { %19535 = vst [vmem:[#allocation94_spill] sm:$0xff] %v16320_v24  ;;  %v16325_v11 = vpop.eup %13944  ;;  %v3635_v41 = vrot.slane %v19537_v1, %v15280_v23  ;;  %v3642_v30 = vrot.slane %v19537_v1, %v15285_v6  ;;  %v3649_v29 = vrot.slane %v19537_v1, %v15293_v8  ;;  %v3656_v35 = vrot.slane %v19537_v1, %v15308_v10 }
 0x27a   : > { %19536 = vst [vmem:[#allocation95_spill] sm:$0xff] %v16325_v11  ;;  %v16335_v3 = vpop.eup %13946  ;;  %v7098_v2 = vrot.slane %v7090_v36, %v15369_v38  ;;  %v7105_v16 = vrot.slane %v7091_v49, %v15369_v38  ;;  %v7124_v7 = vcombine.low %v3887_v44, %v3894_v26  ;;  %v7125_v33 = vcombine.low %v3901_v46, %v3908_v59 }
 0x27b   : > { %19538 = vst [vmem:[#allocation47_spill] sm:$0xff] %v16335_v3  ;;  %v16339_v34 = vpop.eup %13948  ;;  %8849 = vperm.xlu0 %12798, %v16226_v57   ;;  %v3943_v50 = vrot.slane %v19540_v32, %v15280_v23  ;;  %v3950_v24 = vrot.slane %v19540_v32, %v15285_v6  ;;  %v3957_v11 = vrot.slane %v19540_v32, %v15293_v8  ;;  %v19541_v57 = vld [vmem:[#allocation49_spill] sm:$0xff]  ;;  %13962 = vlog2.f32 %v2010_v37 }
 0x27c   : > { %19539 = vst [vmem:[#allocation96_spill] sm:$0xff] %v16339_v34  ;;  %v3964_v36 = vrot.slane %v19540_v32, %v15308_v10  ;;  %8822 = vperm.xlu1 %12799, %v6885_v61   ;;  %v6945_v49 = vrot.slane %v6937_v62, %v15369_v38  ;;  %v6952_v44 = vrot.slane %v6938_v27, %v15369_v38  ;;  %13964 = vpow2.f32 %v2801_v15 }
 0x27d   : > { %v3691_v26 = vrot.slane %v19541_v57, %v15280_v23  ;;  %v3698_v46 = vrot.slane %v19541_v57, %v15285_v6  ;;  %v16356_v59 = vpop.eup %13950  ;;  %v6971_v47 = vcombine.low %v3635_v41, %v3642_v30  ;;  %v6972_v9 = vcombine.low %v3649_v29, %v3656_v35  ;;  %v2019_v30 = vpop.xlane.xlu1 %2018 }
 0x27e   : > { %19542 = vst [vmem:[#allocation49_spill] sm:$0xff] %v16356_v59  ;;  %v3705_v18 = vrot.slane %v19541_v57, %v15293_v8  ;;  %v3712_v61 = vrot.slane %v19541_v57, %v15308_v10  ;;  %v19543_v62 = vrot.slane %v16265_v56, %v15369_v38  ;;  %v7106_v32 = vcombine.low %v7098_v2, %v7105_v16 }
 0x27f   : > { %v7132_v12 = vrot.slane %v7124_v7, %v15369_v38  ;;  %v16366_v54 = vpop.eup %13952  ;;  %8855 = vperm.xlu0 %12798, %v16282_v60   ;;  %v7139_v41 = vrot.slane %v7125_v33, %v15369_v38  ;;  %v7158_v29 = vcombine.low %v3943_v50, %v3950_v24  ;;  %v7159_v35 = vcombine.low %v3957_v11, %v3964_v36  ;;  %v19547_v33 = vld [vmem:[#allocation50_spill] sm:$0xff] }
 0x280   : > { %v6919_v27 = vcombine.low %v19543_v62, %v6918_v31  ;;  %19544 = vst [vmem:[#allocation97_spill] sm:$0xff] %v16366_v54  ;;  %v3999_v45 = vrot.slane %v15543_v21, %v15280_v23  ;;  %v16372_v43 = vpop.eup %13954  ;;  %v7005_v56 = vcombine.low %v3691_v26, %v3698_v46  ;;  %v4006_v31 = vrot.slane %v15543_v21, %v15285_v6 }
 0x281   : > { %19545 = vst [vmem:[#allocation98_spill] sm:$0xff] %v16372_v43  ;;  %v4013_v2 = vrot.slane %v15543_v21, %v15293_v8  ;;  %v4020_v60 = vrot.slane %v15543_v21, %v15308_v10  ;;  %v6953_v16 = vcombine.low %v6945_v49, %v6952_v44  ;;  %v6979_v50 = vrot.slane %v6971_v47, %v15369_v38  ;;  %v2025_v17 = vpop.xlane.xlu1 %2024 }
 0x282   : > { %8828 = vperm.xlu1 %12799, %v6919_v27   ;;  %v6986_v24 = vrot.slane %v6972_v9, %v15369_v38  ;;  %v7006_v11 = vcombine.low %v3705_v18, %v3712_v61  ;;  %v16382_v7 = vpop.eup %13956  ;;  %v3747_v37 = vrot.slane %v19547_v33, %v15280_v23  ;;  %v3754_v36 = vrot.slane %v19547_v33, %v15285_v6  ;;  %v2016_v18 = vpop.xlane.xlu0 %2015 }
 0x283   : > { %19546 = vst [vmem:[#allocation99_spill] sm:$0xff] %v16382_v7  ;;  %v3761_v26 = vrot.slane %v19547_v33, %v15293_v8  ;;  %v3768_v46 = vrot.slane %v19547_v33, %v15308_v10  ;;  %v2807_v47 = vmul.f32 1.442695, %v16302_v19  ;;  %8861 = vperm.xlu0 %12798, %v7106_v32   ;;  %v7140_v9 = vcombine.low %v7132_v12, %v7139_v41 }
 0x284   : > { %v7166_v49 = vrot.slane %v7158_v29, %v15369_v38  ;;  %v16394_v44 = vpop.eup %13958  ;;  %v7173_v61 = vrot.slane %v7159_v35, %v15369_v38  ;;  %v7013_v62 = vrot.slane %v7005_v56, %v15369_v38  ;;  %v7192_v27 = vcombine.low %v3999_v45, %v4006_v31 }
 0x285   : > { %19548 = vst [vmem:[#allocation50_spill] sm:$0xff] %v16394_v44  ;;  %v7193_v21 = vcombine.low %v4013_v2, %v4020_v60  ;;  %v13961_v28 = vpop.eup %13960  ;;  %v7020_v15 = vrot.slane %v7006_v11, %v15369_v38  ;;  %v4055_v19 = vrot.slane %v15563_v25, %v15280_v23  ;;  %v4062_v12 = vrot.slane %v15563_v25, %v15285_v6 }
 0x286   : > { %8834 = vperm.xlu1 %12799, %v6953_v16   ;;  %v4069_v32 = vrot.slane %v15563_v25, %v15293_v8  ;;  %13966 = vlog2.f32 %v2019_v30  ;;  %v6987_v41 = vcombine.low %v6979_v50, %v6986_v24  ;;  %v7039_v29 = vcombine.low %v3747_v37, %v3754_v36  ;;  %v2022_v50 = vpop.xlane.xlu0 %2021  ;;  %v19549_v36 = vld [vmem:[#allocation52_spill] sm:$0xff] }
 0x287   : > { %v7040_v35 = vcombine.low %v3761_v26, %v3768_v46  ;;  %v2805_v45 = vmul.f32 1.442695, %v16316_v4  ;;  %v12486_v56 = vadd.f32 -3.8918202, %v16318_v40  ;;  %8867 = vperm.xlu0 %12798, %v7140_v9   ;;  %13968 = vlog2.f32 %v2016_v18 }
 0x288   : > { %v4076_v31 = vrot.slane %v15563_v25, %v15308_v10  ;;  %v12485_v2 = vadd.f32 -3.8918202, %v16323_v51  ;;  %13970 = vlog2.f32 %v2025_v17  ;;  %v7200_v60 = vrot.slane %v7192_v27, %v15369_v38  ;;  %v13963_v17 = vpop.eup %13962 }
 0x289   : > { %v7207_v30 = vrot.slane %v7193_v21, %v15369_v38  ;;  %v7174_v16 = vcombine.low %v7166_v49, %v7173_v61  ;;  %v7021_v24 = vcombine.low %v7013_v62, %v7020_v15  ;;  %v7226_v11 = vcombine.low %v4055_v19, %v4062_v12 }
 0x28a   : > { %8840 = vperm.xlu1 %12799, %v6987_v41   ;;  %v7227_v4 = vcombine.low %v4069_v32, %v4076_v31  ;;  %v7047_v40 = vrot.slane %v7039_v29, %v15369_v38  ;;  %v7054_v37 = vrot.slane %v7040_v35, %v15369_v38  ;;  %v3803_v26 = vrot.slane %v19549_v36, %v15280_v23  ;;  %v2031_v32 = vpop.xlane.xlu1 %2030 }
 0x28b   : > { %v3810_v51 = vrot.slane %v19549_v36, %v15285_v6  ;;  %13972 = vpow2.f32 %v2807_v47  ;;  %8873 = vperm.xlu0 %12798, %v7174_v16   ;;  %v3817_v21 = vrot.slane %v19549_v36, %v15293_v8  ;;  %v2592_v46 = vmul.f32 %v12486_v56, %v15071_v20  ;;  %v16433_v56 = vpop.eup %13964 }
 0x28c   : > { %13974 = vlog2.f32 %v2022_v50  ;;  %v7208_v9 = vcombine.low %v7200_v60, %v7207_v30  ;;  %v3824_v18 = vrot.slane %v19549_v36, %v15308_v10  ;;  %v7234_v49 = vrot.slane %v7226_v11, %v15369_v38  ;;  %19550 = vst [vmem:[#allocation52_spill] sm:$0xff] %v16433_v56  ;;  %v19551_v50 = vld [vmem:[#allocation53_spill] sm:$0xff] }
 0x28d   : > { %v7241_v61 = vrot.slane %v7227_v4, %v15369_v38  ;;  %v7073_v62 = vcombine.low %v3803_v26, %v3810_v51  ;;  %v4111_v47 = vrot.slane %v15623_v55, %v15280_v23  ;;  %13976 = vpow2.f32 %v2805_v45  ;;  %v2028_v45 = vpop.xlane.xlu0 %2027 }
 0x28e   : > { %8846 = vperm.xlu1 %12799, %v7021_v24   ;;  %v2591_v27 = vmul.f32 %v12485_v2, %v15071_v20  ;;  %v7055_v15 = vcombine.low %v7047_v40, %v7054_v37  ;;  %v7074_v19 = vcombine.low %v3817_v21, %v3824_v18  ;;  %v2303_v12 = vmul.f32 0.6931472, %v13961_v28 }
 0x28f   : > { %8879 = vperm.xlu0 %12798, %v7208_v9   ;;  %v7081_v41 = vrot.slane %v7073_v62, %v15369_v38  ;;  %v4118_v29 = vrot.slane %v15623_v55, %v15285_v6  ;;  %v4125_v35 = vrot.slane %v15623_v55, %v15293_v8  ;;  %v2811_v31 = vmul.f32 1.442695, %v2592_v46 }
 0x290   : > { %v2301_v60 = vmul.f32 0.6931472, %v13963_v17  ;;  %v7088_v2 = vrot.slane %v7074_v19, %v15369_v38  ;;  %v4132_v28 = vrot.slane %v15623_v55, %v15308_v10  ;;  %v7242_v30 = vcombine.low %v7234_v49, %v7241_v61  ;;  %v19556_v55 = vld [vmem:[#allocation57_spill] sm:$0xff] }
 0x291   : > { %v7260_v16 = vcombine.low %v4111_v47, %v4118_v29  ;;  %v3859_v24 = vrot.slane %v19551_v50, %v15280_v23  ;;  %v3866_v11 = vrot.slane %v19551_v50, %v15285_v6  ;;  %v2809_v4 = vmul.f32 1.442695, %v2591_v27  ;;  %v2037_v47 = vpop.xlane.xlu1 %2036 }
 0x292   : > { %8852 = vperm.xlu1 %12799, %v7055_v15   ;;  %13978 = vlog2.f32 %v2031_v32  ;;  %v7089_v40 = vcombine.low %v7081_v41, %v7088_v2  ;;  %v7261_v37 = vcombine.low %v4125_v35, %v4132_v28  ;;  %v12488_v51 = vadd.f32 -3.8918202, %v2303_v12  ;;  %v16454_v41 = vpop.xlane.xlu0 %2033 }
 0x293   : > { %v13967_v26 = vpop.eup %13966  ;;  %8885 = vperm.xlu0 %12798, %v7242_v30   ;;  %v7268_v17 = vrot.slane %v7260_v16, %v15369_v38  ;;  %v3873_v21 = vrot.slane %v19551_v50, %v15293_v8  ;;  %v3880_v46 = vrot.slane %v19551_v50, %v15308_v10  ;;  %v12487_v18 = vadd.f32 -3.8918202, %v2301_v60 }
 0x294   : > { %v13969_v9 = vpop.eup %13968  ;;  %13980 = vlog2.f32 %v2028_v45  ;;  %v7275_v49 = vrot.slane %v7261_v37, %v15369_v38  ;;  %v7107_v61 = vcombine.low %v3859_v24, %v3866_v11  ;;  %v4167_v15 = vrot.slane %v15661_v0, %v15280_v23 }
 0x295   : > { %v13971_v62 = vpop.eup %13970  ;;  %v7108_v27 = vcombine.low %v3873_v21, %v3880_v46  ;;  %v4174_v19 = vrot.slane %v15661_v0, %v15285_v6  ;;  %v4181_v12 = vrot.slane %v15661_v0, %v15293_v8  ;;  %13982 = vpow2.f32 %v2811_v31  ;;  %v19553_v31 = vld [vmem:[#allocation55_spill] sm:$0xff] }
 0x296   : > { %8858 = vperm.xlu1 %12799, %v7089_v40   ;;  %v2307_v32 = vmul.f32 0.6931472, %v13967_v26  ;;  %v7276_v29 = vcombine.low %v7268_v17, %v7275_v49  ;;  %v7115_v35 = vrot.slane %v7107_v61, %v15369_v38  ;;  %v2594_v60 = vmul.f32 %v12488_v51, %v15071_v20 }
 0x297   : > { %v7122_v45 = vrot.slane %v7108_v27, %v15369_v38  ;;  %v4188_v2 = vrot.slane %v15661_v0, %v15308_v10  ;;  %v7294_v28 = vcombine.low %v4167_v15, %v4174_v19  ;;  %v2593_v16 = vmul.f32 %v12487_v18, %v15071_v20  ;;  %v16475_v27 = vpop.xlane.xlu1 %2042  ;;  %v19555_v19 = vld [vmem:[#allocation64_spill] sm:$0xff] }
 0x298   : > { %v16461_v30 = vpop.eup %13972  ;;  %v2305_v24 = vmul.f32 0.6931472, %v13969_v9  ;;  %8891 = vperm.xlu0 %12798, %v7276_v29   ;;  %v3915_v11 = vrot.slane %v19553_v31, %v15280_v23  ;;  %v3922_v40 = vrot.slane %v19553_v31, %v15285_v6  ;;  %v3929_v21 = vrot.slane %v19553_v31, %v15293_v8 }
 0x299   : > { %19552 = vst [vmem:[#allocation53_spill] sm:$0xff] %v16461_v30  ;;  %v13975_v37 = vpop.eup %13974  ;;  %v7123_v26 = vcombine.low %v7115_v35, %v7122_v45  ;;  %v7295_v51 = vcombine.low %v4181_v12, %v4188_v2  ;;  %v7302_v17 = vrot.slane %v7294_v28, %v15369_v38  ;;  %v12490_v46 = vadd.f32 -3.8918202, %v2307_v32  ;;  %v16484_v45 = vpop.xlane.xlu0 %2039 }
 0x29a   : > { %v2311_v49 = vmul.f32 0.6931472, %v13971_v62  ;;  %v3936_v9 = vrot.slane %v19553_v31, %v15308_v10  ;;  %v7141_v18 = vcombine.low %v3915_v11, %v3922_v40  ;;  %v16473_v61 = vpop.eup %13976  ;;  %v4223_v12 = vrot.slane %v19555_v19, %v15280_v23 }
 0x29b   : > { %19554 = vst [vmem:[#allocation100_spill] sm:$0xff] %v16473_v61  ;;  %8864 = vperm.xlu1 %12799, %v7123_v26   ;;  %v7309_v15 = vrot.slane %v7295_v51, %v15369_v38  ;;  %v4230_v29 = vrot.slane %v19555_v19, %v15285_v6  ;;  %v4237_v62 = vrot.slane %v19555_v19, %v15293_v8  ;;  %v12489_v32 = vadd.f32 -3.8918202, %v2305_v24 }
 0x29c   : > { %v2309_v35 = vmul.f32 0.6931472, %v13975_v37  ;;  %v7142_v2 = vcombine.low %v3929_v21, %v3936_v9  ;;  %v7149_v28 = vrot.slane %v7141_v18, %v15369_v38  ;;  %13984 = vlog2.f32 %v2037_v47 }
 0x29d   : > { %v7310_v11 = vcombine.low %v7302_v17, %v7309_v15  ;;  %v4244_v40 = vrot.slane %v19555_v19, %v15308_v10  ;;  %v7328_v26 = vcombine.low %v4223_v12, %v4230_v29  ;;  %13986 = vpow2.f32 %v2809_v4  ;;  %v16499_v29 = vpop.xlane.xlu1 %2048 }
 0x29e   : > { %v12492_v51 = vadd.f32 -3.8918202, %v2311_v49  ;;  %v7156_v0 = vrot.slane %v7142_v2, %v15369_v38  ;;  %v3971_v25 = vrot.slane %v19556_v55, %v15280_v23  ;;  %v2815_v37 = vmul.f32 1.442695, %v2594_v60  ;;  %v19557_v2 = vld [vmem:[#allocation31_spill] sm:$0xff] }
 0x29f   : > { %v13979_v24 = vpop.eup %13978  ;;  %v2813_v31 = vmul.f32 1.442695, %v2593_v16  ;;  %8897 = vperm.xlu0 %12798, %v7310_v11   ;;  %v7329_v21 = vcombine.low %v4237_v62, %v4244_v40  ;;  %v7336_v9 = vrot.slane %v7328_v26, %v15369_v38  ;;  %v2596_v47 = vmul.f32 %v12490_v46, %v15071_v20  ;;  %v16505_v46 = vpop.xlane.xlu0 %2045 }
 0x2a0   : > { %v7157_v17 = vcombine.low %v7149_v28, %v7156_v0  ;;  %v3978_v18 = vrot.slane %v19556_v55, %v15285_v6  ;;  %v3985_v4 = vrot.slane %v19556_v55, %v15293_v8  ;;  %v2595_v15 = vmul.f32 %v12489_v32, %v15071_v20 }
 0x2a1   : > { %v13981_v49 = vpop.eup %13980  ;;  %v12491_v12 = vadd.f32 -3.8918202, %v2309_v35  ;;  %v7343_v60 = vrot.slane %v7329_v21, %v15369_v38  ;;  %v3992_v16 = vrot.slane %v19556_v55, %v15308_v10  ;;  %v2598_v0 = vmul.f32 %v12492_v51, %v15071_v20 }
 0x2a2   : > { %8870 = vperm.xlu1 %12799, %v7157_v17   ;;  %v7175_v62 = vcombine.low %v3971_v25, %v3978_v18  ;;  %v4279_v28 = vrot.slane %v19557_v2, %v15280_v23  ;;  %v4286_v32 = vrot.slane %v19557_v2, %v15285_v6  ;;  %v16511_v35 = vpop.eup %13982  ;;  %v2315_v11 = vmul.f32 0.6931472, %v13979_v24  ;;  %v12853_v18 = vld [vmem:[%s14694_s26 + $0x450] ss:$24 sps:$4 sm:$0xff]   ;;  %v12854_v24 = vld [vmem:[%s14694_s26 + $0x424] ss:$24 sps:$4 sm:$0xff]  }
 0x2a3   : > { %19558 = vst [vmem:[#allocation101_spill] sm:$0xff] %v16511_v35  ;;  %13988 = vlog2.f32 %v16454_v41  ;;  %v7344_v40 = vcombine.low %v7336_v9, %v7343_v60  ;;  %v7176_v26 = vcombine.low %v3985_v4, %v3992_v16  ;;  %v4293_v21 = vrot.slane %v19557_v2, %v15293_v8  ;;  %11941 = vmatpush1.bf16.msra.mxu1 %v12853_v18 }
 0x2a4   : > { %v7183_v51 = vrot.slane %v7175_v62, %v15369_v38  ;;  %v4300_v25 = vrot.slane %v19557_v2, %v15308_v10  ;;  %v7362_v17 = vcombine.low %v4279_v28, %v4286_v32  ;;  %13990 = vpow2.f32 %v2815_v37  ;;  %v16524_v62 = vpop.xlane.xlu1 %2054  ;;  %11942 = vmatprep.subr.bf16.mxu1 %v12854_v24 }
 0x2a5   : > { %v2313_v19 = vmul.f32 0.6931472, %v13981_v49  ;;  %8903 = vperm.xlu0 %12798, %v7344_v40   ;;  %v7190_v55 = vrot.slane %v7176_v26, %v15369_v38  ;;  %13992 = vpow2.f32 %v2813_v31  ;;  %v2819_v4 = vmul.f32 1.442695, %v2596_v47  ;;  %v16526_v49 = vpop.xlane.xlu0 %2051  ;;  %v19559_v31 = vld [vmem:[#allocation59_spill] sm:$0xff] }
 0x2a6   : > { %v7363_v41 = vcombine.low %v4293_v21, %v4300_v25  ;;  %v7370_v9 = vrot.slane %v7362_v17, %v15369_v38  ;;  %v2597_v60 = vmul.f32 %v12491_v12, %v15071_v20  ;;  %v12494_v16 = vadd.f32 -3.8918202, %v2315_v11  ;;  %v19560_v11 = vld [vmem:[#allocation66_spill] sm:$0xff] }
 0x2a7   : > { %v7191_v2 = vcombine.low %v7183_v51, %v7190_v55  ;;  %v2817_v28 = vmul.f32 1.442695, %v2595_v15  ;;  %v2823_v37 = vmul.f32 1.442695, %v2598_v0  ;;  %v4027_v40 = vrot.slane %v19559_v31, %v15280_v23 }
 0x2a8   : > { %v7377_v32 = vrot.slane %v7363_v41, %v15369_v38  ;;  %v12493_v26 = vadd.f32 -3.8918202, %v2313_v19  ;;  %13994 = vlog2.f32 %v16475_v27  ;;  %v4034_v47 = vrot.slane %v19559_v31, %v15285_v6 }
 0x2a9   : > { %8876 = vperm.xlu1 %12799, %v7191_v2   ;;  %v4041_v55 = vrot.slane %v19559_v31, %v15293_v8  ;;  %v13985_v12 = vpop.eup %13984  ;;  %13996 = vlog2.f32 %v16484_v45  ;;  %v4048_v0 = vrot.slane %v19559_v31, %v15308_v10  ;;  %v4335_v51 = vrot.slane %v19560_v11, %v15280_v23  ;;  %v12866_v31 = vld [vmem:[%s14694_s26 + $0x3c4] ss:$24 sps:$4 sm:$0xff]  }
 0x2aa   : > { %v7378_v15 = vcombine.low %v7370_v9, %v7377_v32  ;;  %v16541_v19 = vpop.eup %13986  ;;  %v2821_v27 = vmul.f32 1.442695, %v2597_v60  ;;  %v2600_v2 = vmul.f32 %v12494_v16, %v15071_v20  ;;  %v7209_v21 = vcombine.low %v4027_v40, %v4034_v47  ;;  %v16551_v9 = vpop.xlane.xlu1 %2060 }
 0x2ab   : > { %19561 = vst [vmem:[#allocation102_spill] sm:$0xff] %v16541_v19  ;;  %v4342_v25 = vrot.slane %v19560_v11, %v15285_v6  ;;  %13998 = vpow2.f32 %v2819_v4  ;;  %v7210_v17 = vcombine.low %v4041_v55, %v4048_v0  ;;  %v4349_v45 = vrot.slane %v19560_v11, %v15293_v8  ;;  %v16554_v16 = vpop.xlane.xlu0 %2057  ;;  %v12859_v0 = vld [vmem:[%s14694_s26 + $0x420] ss:$24 sps:$4 sm:$0xff]  }
 0x2ac   : > { %8909 = vperm.xlu0 %12798, %v7378_v15   ;;  %v4356_v18 = vrot.slane %v19560_v11, %v15308_v10  ;;  %14000 = vpow2.f32 %v2817_v28  ;;  %v2599_v24 = vmul.f32 %v12493_v26, %v15071_v20  ;;  %v2319_v41 = vmul.f32 0.6931472, %v13985_v12  ;;  %v19562_v28 = vld [vmem:[#allocation61_spill] sm:$0xff]  ;;  %11943 = vmatpush1.bf16.msra.mxu1 %v12859_v0 }
 0x2ad   : > { %v7217_v60 = vrot.slane %v7209_v21, %v15369_v38  ;;  %14002 = vpow2.f32 %v2823_v37  ;;  %v7224_v4 = vrot.slane %v7210_v17, %v15369_v38  ;;  %v7396_v32 = vcombine.low %v4335_v51, %v4342_v25 }
 0x2ae   : > { %v7397_v40 = vcombine.low %v4349_v45, %v4356_v18  ;;  %14004 = vpow2.f32 %v2821_v27  ;;  %v2827_v47 = vmul.f32 1.442695, %v2600_v2  ;;  %v4083_v55 = vrot.slane %v19562_v28, %v15280_v23  ;;  %v12860_v2 = vld [vmem:[%s14694_s26 + $0x3f4] ss:$24 sps:$4 sm:$0xff]  }
 0x2af   : > { %14006 = vlog2.f32 %v16499_v29  ;;  %v7225_v12 = vcombine.low %v7217_v60, %v7224_v4  ;;  %v7404_v15 = vrot.slane %v7396_v32, %v15369_v38  ;;  %v2825_v21 = vmul.f32 1.442695, %v2599_v24  ;;  %v16579_v60 = vpop.xlane.xlu1 %2066  ;;  %11944 = vmatprep.subr.bf16.mxu1 %v12860_v2 }
 0x2b0   : > { %v13989_v26 = vpop.eup %13988  ;;  %v7411_v37 = vrot.slane %v7397_v40, %v15369_v38  ;;  %v12496_v11 = vadd.f32 -3.8918202, %v2319_v41  ;;  %v4090_v51 = vrot.slane %v19562_v28, %v15285_v6  ;;  %v4097_v27 = vrot.slane %v19562_v28, %v15293_v8  ;;  %v16584_v40 = vpop.xlane.xlu0 %2063 }
 0x2b1   : > { %v16568_v25 = vpop.eup %13990  ;;  %8882 = vperm.xlu1 %12799, %v7225_v12   ;;  %v4104_v29 = vrot.slane %v19562_v28, %v15308_v10  ;;  %v4391_v45 = vrot.slane %v15860_v53, %v15280_v23  ;;  %v4398_v18 = vrot.slane %v15860_v53, %v15285_v6  ;;  %v2317_v41 = vmul.f32 0.6931472, %v13989_v26 }
 0x2b2   : > { %19563 = vst [vmem:[#allocation103_spill] sm:$0xff] %v16568_v25  ;;  %v7412_v17 = vcombine.low %v7404_v15, %v7411_v37  ;;  %v16576_v24 = vpop.eup %13992  ;;  %14008 = vlog2.f32 %v16505_v46  ;;  %v7243_v4 = vcombine.low %v4083_v55, %v4090_v51  ;;  %v4405_v32 = vrot.slane %v15860_v53, %v15293_v8  ;;  %v19565_v55 = vld [vmem:[#allocation63_spill] sm:$0xff] }
 0x2b3   : > { %19564 = vst [vmem:[#allocation104_spill] sm:$0xff] %v16576_v24  ;;  %14010 = vlog2.f32 %v16524_v62  ;;  %v7244_v12 = vcombine.low %v4097_v27, %v4104_v29  ;;  %v4412_v15 = vrot.slane %v15860_v53, %v15308_v10  ;;  %v7430_v26 = vcombine.low %v4391_v45, %v4398_v18  ;;  %v12865_v45 = vld [vmem:[%s14694_s26 + $0x3f0] ss:$24 sps:$4 sm:$0xff]  }
 0x2b4   : > { %8915 = vperm.xlu0 %12798, %v7412_v17   ;;  %14012 = vlog2.f32 %v16526_v49  ;;  %v7251_v46 = vrot.slane %v7243_v4, %v15369_v38  ;;  %v4139_v37 = vrot.slane %v19565_v55, %v15280_v23  ;;  %v4146_v62 = vrot.slane %v19565_v55, %v15285_v6  ;;  %11945 = vmatpush1.bf16.msra.mxu1 %v12865_v45  ;;  %v12871_v45 = vld [vmem:[%s14694_s26 + $0x3c0] ss:$24 sps:$4 sm:$0xff]  }
 0x2b5   : > { %v13995_v0 = vpop.eup %13994  ;;  %14014 = vpow2.f32 %v2827_v47  ;;  %v7258_v51 = vrot.slane %v7244_v12, %v15369_v38  ;;  %v7431_v27 = vcombine.low %v4405_v32, %v4412_v15  ;;  %v7438_v2 = vrot.slane %v7430_v26, %v15369_v38  ;;  %11946 = vmatprep.subr.bf16.mxu1 %v12866_v31  ;;  %v19570_v31 = vld [vmem:[#allocation65_spill] sm:$0xff] }
 0x2b6   : > { %v13997_v17 = vpop.eup %13996  ;;  %14016 = vpow2.f32 %v2825_v21  ;;  %v4153_v49 = vrot.slane %v19565_v55, %v15293_v8  ;;  %v4160_v29 = vrot.slane %v19565_v55, %v15308_v10  ;;  %v2602_v18 = vmul.f32 %v12496_v11, %v15071_v20  ;;  %v2073_v21 = vpop.xlane.xlu1 %2072 }
 0x2b7   : > { %v12495_v4 = vadd.f32 -3.8918202, %v2317_v41  ;;  %v7259_v28 = vcombine.low %v7251_v46, %v7258_v51  ;;  %v7445_v47 = vrot.slane %v7431_v27, %v15369_v38  ;;  %v2323_v32 = vmul.f32 0.6931472, %v13995_v0  ;;  %v2070_v41 = vpop.xlane.xlu0 %2069 }
 0x2b8   : > { %v16604_v12 = vpop.eup %13998  ;;  %v7277_v15 = vcombine.low %v4139_v37, %v4146_v62  ;;  %v7278_v26 = vcombine.low %v4153_v49, %v4160_v29  ;;  %v4447_v53 = vrot.slane %v15893_v5, %v15280_v23  ;;  %v2321_v55 = vmul.f32 0.6931472, %v13997_v17  ;;  %11947 = vmatpush1.bf16.msra.mxu1 %v12871_v45 }
 0x2b9   : > { %19566 = vst [vmem:[#allocation105_spill] sm:$0xff] %v16604_v12  ;;  %v16608_v14 = vpop.eup %14000  ;;  %14018 = vlog2.f32 %v16551_v9  ;;  %8888 = vperm.xlu1 %12799, %v7259_v28   ;;  %v7446_v11 = vcombine.low %v7438_v2, %v7445_v47  ;;  %v4454_v46 = vrot.slane %v15893_v5, %v15285_v6  ;;  %v4461_v51 = vrot.slane %v15893_v5, %v15293_v8  ;;  %v12872_v47 = vld [vmem:[%s14694_s26 + $0x394] ss:$24 sps:$4 sm:$0xff]  }
 0x2ba   : > { %19567 = vst [vmem:[#allocation106_spill] sm:$0xff] %v16608_v14  ;;  %v16613_v37 = vpop.eup %14002  ;;  %v7285_v62 = vrot.slane %v7277_v15, %v15369_v38  ;;  %v7292_v0 = vrot.slane %v7278_v26, %v15369_v38  ;;  %v4468_v9 = vrot.slane %v15893_v5, %v15308_v10  ;;  %14020 = vlog2.f32 %v2073_v21  ;;  %11948 = vmatprep.subr.bf16.mxu1 %v12872_v47 }
 0x2bb   : > { %19568 = vst [vmem:[#allocation107_spill] sm:$0xff] %v16613_v37  ;;  %v16621_v28 = vpop.eup %14004  ;;  %8921 = vperm.xlu0 %12798, %v7446_v11   ;;  %v7464_v27 = vcombine.low %v4447_v53, %v4454_v46  ;;  %v4195_v17 = vrot.slane %v19570_v31, %v15280_v23  ;;  %14022 = vlog2.f32 %v2070_v41  ;;  %v16627_v15 = vmul.f32 1.442695, %v2602_v18  ;;  %v2079_v41 = vpop.xlane.xlu1 %2078 }
 0x2bc   : > { %19569 = vst [vmem:[#allocation108_spill] sm:$0xff] %v16621_v28  ;;  %v14007_v2 = vpop.eup %14006  ;;  %v7293_v49 = vcombine.low %v7285_v62, %v7292_v0  ;;  %v7465_v29 = vcombine.low %v4461_v51, %v4468_v9  ;;  %v16630_v26 = vmul.f32 %v12495_v4, %v15071_v20  ;;  %v4202_v21 = vrot.slane %v19570_v31, %v15285_v6  ;;  %v19571_v9 = vld [vmem:[#allocation72_spill] sm:$0xff] }
 0x2bd   : > { %v7472_v37 = vrot.slane %v7464_v27, %v15369_v38  ;;  %v12498_v53 = vadd.f32 -3.8918202, %v2323_v32  ;;  %v12497_v11 = vadd.f32 -3.8918202, %v2321_v55  ;;  %v4209_v62 = vrot.slane %v19570_v31, %v15293_v8 }
 0x2be   : > { %8894 = vperm.xlu1 %12799, %v7293_v49   ;;  %v7479_v46 = vrot.slane %v7465_v29, %v15369_v38  ;;  %v2327_v0 = vmul.f32 0.6931472, %v14007_v2  ;;  %v4216_v4 = vrot.slane %v19570_v31, %v15308_v10  ;;  %v7311_v51 = vcombine.low %v4195_v17, %v4202_v21 }
 0x2bf   : > { %v14009_v18 = vpop.eup %14008  ;;  %v4503_v27 = vrot.slane %v19571_v9, %v15280_v23  ;;  %14024 = vlog2.f32 %v16554_v16  ;;  %v4510_v49 = vrot.slane %v19571_v9, %v15285_v6  ;;  %v4517_v29 = vrot.slane %v19571_v9, %v15293_v8 }
 0x2c0   : > { %v14011_v32 = vpop.eup %14010  ;;  %v7480_v55 = vcombine.low %v7472_v37, %v7479_v46  ;;  %14026 = vlog2.f32 %v2079_v41  ;;  %v7312_v2 = vcombine.low %v4209_v62, %v4216_v4  ;;  %v7319_v28 = vrot.slane %v7311_v51, %v15369_v38  ;;  %v19573_v37 = vld [vmem:[#allocation35_spill] sm:$0xff] }
 0x2c1   : > { %v14013_v45 = vpop.eup %14012  ;;  %v4524_v17 = vrot.slane %v19571_v9, %v15308_v10  ;;  %v2325_v47 = vmul.f32 0.6931472, %v14009_v18  ;;  %14028 = vlog2.f32 %v16579_v60  ;;  %v7498_v16 = vcombine.low %v4503_v27, %v4510_v49 }
 0x2c2   : > { %v16650_v21 = vpop.eup %14014  ;;  %8927 = vperm.xlu0 %12798, %v7480_v55   ;;  %v4251_v46 = vrot.slane %v19573_v37, %v15280_v23  ;;  %v2604_v41 = vmul.f32 %v12498_v53, %v15071_v20  ;;  %14030 = vlog2.f32 %v16584_v40  ;;  %v7326_v62 = vrot.slane %v7312_v2, %v15369_v38 }
 0x2c3   : > { %19572 = vst [vmem:[#allocation109_spill] sm:$0xff] %v16650_v21  ;;  %v16655_v31 = vpop.eup %14016  ;;  %v7499_v4 = vcombine.low %v4517_v29, %v4524_v17  ;;  %v2331_v51 = vmul.f32 0.6931472, %v14011_v32  ;;  %v2329_v9 = vmul.f32 0.6931472, %v14013_v45  ;;  %v2076_v21 = vpop.xlane.xlu0 %2075  ;;  %v7506_v18 = vrot.slane %v7498_v16, %v15369_v38  ;;  %v19575_v16 = vld [vmem:[#allocation74_spill] sm:$0xff] }
 0x2c4   : > { %19574 = vst [vmem:[#allocation110_spill] sm:$0xff] %v16655_v31  ;;  %v4258_v60 = vrot.slane %v19573_v37, %v15285_v6  ;;  %v2603_v27 = vmul.f32 %v12497_v11, %v15071_v20  ;;  %v7327_v55 = vcombine.low %v7319_v28, %v7326_v62  ;;  %v4265_v40 = vrot.slane %v19573_v37, %v15293_v8  ;;  %v12877_v62 = vld [vmem:[%s14694_s26 + $0x390] ss:$24 sps:$4 sm:$0xff]  }
 0x2c5   : > { %v7513_v53 = vrot.slane %v7499_v4, %v15369_v38  ;;  %v12500_v29 = vadd.f32 -3.8918202, %v2327_v0  ;;  %v12499_v32 = vadd.f32 -3.8918202, %v2325_v47  ;;  %v4272_v45 = vrot.slane %v19573_v37, %v15308_v10  ;;  %v12878_v4 = vld [vmem:[%s14694_s26 + $0x364] ss:$24 sps:$4 sm:$0xff]   ;;  %11949 = vmatpush1.bf16.msra.mxu1 %v12877_v62 }
 0x2c6   : > { %v14019_v49 = vpop.eup %14018  ;;  %v7345_v2 = vcombine.low %v4251_v46, %v4258_v60  ;;  %8900 = vperm.xlu1 %12799, %v7327_v55   ;;  %v4559_v31 = vrot.slane %v19575_v16, %v15280_v23  ;;  %v4566_v28 = vrot.slane %v19575_v16, %v15285_v6  ;;  %v4573_v11 = vrot.slane %v19575_v16, %v15293_v8  ;;  %v2085_v60 = vpop.xlane.xlu1 %2084  ;;  %v12883_v8 = vld [vmem:[%s14694_s26 + $0x360] ss:$24 sps:$4 sm:$0xff]  }
 0x2c7   : > { %v7514_v17 = vcombine.low %v7506_v18, %v7513_v53  ;;  %v14021_v0 = vpop.eup %14020  ;;  %v12502_v47 = vadd.f32 -3.8918202, %v2331_v51  ;;  %v12501_v5 = vadd.f32 -3.8918202, %v2329_v9  ;;  %14032 = vlog2.f32 %v2076_v21  ;;  %v2082_v21 = vpop.xlane.xlu0 %2081  ;;  %11950 = vmatprep.subr.bf16.mxu1 %v12878_v4  ;;  %v12889_v4 = vld [vmem:[%s14694_s26 + $0x330] ss:$24 sps:$4 sm:$0xff]  }
 0x2c8   : > { %v7346_v37 = vcombine.low %v4265_v40, %v4272_v45  ;;  %v14023_v46 = vpop.eup %14022  ;;  %v2829_v18 = vmul.f32 1.442695, %v16630_v26  ;;  %v7353_v55 = vrot.slane %v7345_v2, %v15369_v38  ;;  %v4580_v53 = vrot.slane %v19575_v16, %v15308_v10  ;;  %v12884_v26 = vld [vmem:[%s14694_s26 + $0x334] ss:$24 sps:$4 sm:$0xff]  }
 0x2c9   : > { %8933 = vperm.xlu0 %12798, %v7514_v17   ;;  %v7532_v58 = vcombine.low %v4559_v31, %v4566_v28  ;;  %v2835_v6 = vmul.f32 1.442695, %v2604_v41  ;;  %v2606_v51 = vmul.f32 %v12500_v29, %v15071_v20  ;;  %v2335_v9 = vmul.f32 0.6931472, %v14019_v49  ;;  %11951 = vmatpush1.bf16.msra.mxu1 %v12883_v8 }
 0x2ca   : > { %v7360_v40 = vrot.slane %v7346_v37, %v15369_v38  ;;  %v2605_v45 = vmul.f32 %v12499_v32, %v15071_v20  ;;  %v2343_v17 = vmul.f32 0.6931472, %v14021_v0  ;;  %v7533_v2 = vcombine.low %v4573_v11, %v4580_v53  ;;  %11952 = vmatprep.subr.bf16.mxu1 %v12884_v26  ;;  %v12890_v0 = vld [vmem:[%s14694_s26 + $0x304] ss:$24 sps:$4 sm:$0xff]  }
 0x2cb   : > { %v7540_v23 = vrot.slane %v7532_v58, %v15369_v38  ;;  %v2608_v31 = vmul.f32 %v12502_v47, %v15071_v20  ;;  %v2607_v41 = vmul.f32 %v12501_v5, %v15071_v20  ;;  %v2341_v28 = vmul.f32 0.6931472, %v14023_v46 }
 0x2cc   : > { %14034 = vlog2.f32 %v2085_v60  ;;  %v14025_v49 = vpop.eup %14024  ;;  %v2833_v29 = vmul.f32 1.442695, %v2603_v27  ;;  %v7361_v37 = vcombine.low %v7353_v55, %v7360_v40  ;;  %v7547_v62 = vrot.slane %v7533_v2, %v15369_v38 }
 0x2cd   : > { %14036 = vlog2.f32 %v2082_v21  ;;  %v14027_v32 = vpop.eup %14026  ;;  %v2839_v11 = vmul.f32 1.442695, %v2606_v51  ;;  %v12504_v58 = vadd.f32 -3.8918202, %v2335_v9  ;;  %v2837_v5 = vmul.f32 1.442695, %v2605_v45  ;;  %11953 = vmatpush1.bf16.msra.mxu1 %v12889_v4 }
 0x2ce   : > { %14038 = vpow2.f32 %v16627_v15  ;;  %v14029_v47 = vpop.eup %14028  ;;  %v12508_v46 = vadd.f32 -3.8918202, %v2343_v17  ;;  %8906 = vperm.xlu1 %12799, %v7361_v37   ;;  %v7548_v27 = vcombine.low %v7540_v23, %v7547_v62  ;;  %v2843_v55 = vmul.f32 1.442695, %v2608_v31  ;;  %v12895_v51 = vld [vmem:[%s14694_s26 + $0x300] ss:$24 sps:$4 sm:$0xff]   ;;  %11954 = vmatprep.subr.bf16.mxu1 %v12890_v0  ;;  %v2091_v17 = vpop.xlane.xlu1 %2090 }
 0x2cf   : > { %14040 = vpow2.f32 %v2829_v18  ;;  %v14031_v60 = vpop.eup %14030  ;;  %v2841_v8 = vmul.f32 1.442695, %v2607_v41  ;;  %v12507_v53 = vadd.f32 -3.8918202, %v2341_v28  ;;  %v2333_v21 = vmul.f32 0.6931472, %v14025_v49  ;;  %v2088_v31 = vpop.xlane.xlu0 %2087 }
 0x2d0   : > { %14042 = vpow2.f32 %v2835_v6  ;;  %v2347_v15 = vmul.f32 0.6931472, %v14027_v32  ;;  %8939 = vperm.xlu0 %12798, %v7548_v27   ;;  %v2610_v9 = vmul.f32 %v12504_v58, %v15071_v20  ;;  %v19576_v18 = vlaneseq  ;;  %v12896_v23 = vld [vmem:[%s14694_s26 + $0x5d4] ss:$24 sps:$4 sm:$0xff]   ;;  %v12902_v4 = vld [vmem:[%s14694_s26 + $0x5a4] ss:$24 sps:$4 sm:$0xff]  }
 0x2d1   : > { %14044 = vpow2.f32 %v2833_v29  ;;  %v2339_v6 = vmul.f32 0.6931472, %v14029_v47  ;;  %v2337_v26 = vmul.f32 0.6931472, %v14031_v60  ;;  %v2614_v45 = vmul.f32 %v12508_v46, %v15071_v20  ;;  %11955 = vmatpush1.bf16.msra.mxu1 %v12895_v51  ;;  %v12901_v29 = vld [vmem:[%s14694_s26 + $0x5d0] ss:$24 sps:$4 sm:$0xff]  }
 0x2d2   : > { %14046 = vpow2.f32 %v2839_v11  ;;  %v16696_v40 = vand.u32 127, %v19576_v18  ;;  %v2613_v2 = vmul.f32 %v12507_v53, %v15071_v20  ;;  %v16701_v28 = vadd.f32 -3.8918202, %v2333_v21  ;;  %11956 = vmatprep.subr.bf16.mxu1 %v12896_v23 }
 0x2d3   : > { %14048 = vpow2.f32 %v2837_v5  ;;  %v12510_v49 = vadd.f32 -3.8918202, %v2347_v15  ;;  %v16704_v37 = vmul.f32 1.442695, %v2610_v9  ;;  %v16708_v32 = vadd.f32 -3.8918202, %v2339_v6 }
 0x2d4   : > { %14050 = vpow2.f32 %v2843_v55  ;;  %v14033_v41 = vpop.eup %14032  ;;  %19577 = vst [vmem:[#allocation111_spill] sm:$0xff] %v16701_v28  ;;  %v9163_v62 = vadd.s32 4294967288, %v16696_v40  ;;  %v16710_v11 = vadd.f32 -3.8918202, %v2337_v26  ;;  %v16712_v58 = vmul.f32 1.442695, %v2614_v45 }
 0x2d5   : > { %14052 = vpow2.f32 %v2841_v8  ;;  %19578 = vst [vmem:[#allocation112_spill] sm:$0xff] %v16704_v37  ;;  %19579 = vst [vmem:[#allocation113_spill] sm:$0xff] %v16708_v32  ;;  %v16714_v0 = vmul.f32 1.442695, %v2613_v2  ;;  %v16716_v47 = vmul.f32 0.6931472, %v14033_v41  ;;  %v16724_v55 = vmul.f32 %v12510_v49, %v15071_v20  ;;  %11957 = vmatpush2.bf16.msra.mxu1 %v12901_v29 }
 0x2d6   : > { %14054 = vlog2.f32 %v2091_v17  ;;  %19580 = vst [vmem:[#allocation114_spill] sm:$0xff] %v16710_v11  ;;  %19581 = vst [vmem:[#allocation115_spill] sm:$0xff] %v16712_v58  ;;  %v19583_v5 = vld [vmem:[#allocation34_spill] sm:$0xff]  ;;  %v9170_v27 = vadd.s32 4294967280, %v16696_v40  ;;  %v9177_v8 = vadd.s32 4294967272, %v16696_v40  ;;  %v9184_v53 = vadd.s32 4294967264, %v16696_v40  ;;  %11958 = vmatprep.subr.bf16.mxu1 %v12902_v4 }
 0x2d7   : > { %14056 = vlog2.f32 %v2088_v31  ;;  %19582 = vst [vmem:[#allocation116_spill] sm:$0xff] %v16714_v0  ;;  %v16720_v46 = vsub.s32 %v16696_v40, %v19583_v5  ;;  %19584 = vst [vmem:[#allocation117_spill] sm:$0xff] %v16724_v55  ;;  %v9191_v21 = vadd.s32 4294967256, %v16696_v40  ;;  %v12907_v15 = vld [vmem:[%s14694_s26 + $0x5a0] ss:$24 sps:$4 sm:$0xff]   ;;  %v16731_v9 = vsub.s32 %v9163_v62, %v19583_v5 }
 0x2d8   : > { %v9198_v18 = vadd.s32 4294967248, %v16696_v40  ;;  %v9205_v23 = vadd.s32 4294967240, %v16696_v40  ;;  %v9212_v6 = vadd.s32 4294967232, %v16696_v40  ;;  %v12908_v26 = vld [vmem:[%s14694_s26 + $0x574] ss:$24 sps:$4 sm:$0xff]   ;;  %v9219_v17 = vadd.s32 4294967224, %v16696_v40 }
 0x2d9   : > { %v14035_v60 = vpop.eup %14034  ;;  %v9226_v2 = vadd.s32 4294967216, %v16696_v40  ;;  %v9233_v31 = vadd.s32 4294967208, %v16696_v40  ;;  %v9240_v41 = vadd.s32 4294967200, %v16696_v40  ;;  %v16748_v62 = vsub.s32 %v9170_v27, %v19583_v5  ;;  %11959 = vmatpush2.bf16.msra.mxu1 %v12907_v15 }
 0x2da   : > { %v14037_v51 = vpop.eup %14036  ;;  %v16745_v29 = vmul.f32 0.6931472, %v14035_v60  ;;  %v9247_v4 = vadd.s32 4294967192, %v16696_v40  ;;  %v16757_v11 = vsub.s32 %v9177_v8, %v19583_v5  ;;  %v16763_v60 = vsub.s32 %v9191_v21, %v19583_v5  ;;  %11960 = vmatprep.subr.bf16.mxu1 %v12908_v26 }
 0x2db   : > { %v16737_v45 = vpop.eup %14038  ;;  %v16754_v37 = vmul.f32 0.6931472, %v14037_v51  ;;  %v16768_v32 = vsub.s32 %v9198_v18, %v19583_v5  ;;  %v16774_v51 = vsub.s32 %v9212_v6, %v19583_v5  ;;  %v9261_v8 = vadd.s32 4294967176, %v16696_v40  ;;  %v12914_v6 = vld [vmem:[%s14694_s26 + $0x544] ss:$24 sps:$4 sm:$0xff]  }
 0x2dc   : > { %19585 = vst [vmem:[#allocation118_spill] sm:$0xff] %v16737_v45  ;;  %v16743_v49 = vpop.eup %14040  ;;  %19587 = vst [vmem:[#allocation120_spill] sm:$0xff] %v16745_v29  ;;  %v9254_v45 = vadd.s32 4294967184, %v16696_v40  ;;  %v16781_v21 = vsub.s32 %v9219_v17, %v19583_v5  ;;  %v16784_v15 = vsub.s32 %v9226_v2, %v19583_v5  ;;  %v16787_v18 = vsub.s32 %v9233_v31, %v19583_v5  ;;  %v19606_v2 = vld [vmem:[#allocation36_spill] sm:$0xff] }
 0x2dd   : > { %19586 = vst [vmem:[#allocation119_spill] sm:$0xff] %v16743_v49  ;;  %v16752_v16 = vpop.eup %14042  ;;  %19589 = vst [vmem:[#allocation122_spill] sm:$0xff] %v16754_v37  ;;  %v16760_v49 = vsub.s32 %v9184_v53, %v19583_v5  ;;  %v12913_v53 = vld [vmem:[%s14694_s26 + $0x570] ss:$24 sps:$4 sm:$0xff]   ;;  %v16796_v40 = vsub.s32 %v9247_v4, %v19583_v5  ;;  %v16802_v17 = vsub.s32 %v9261_v8, %v19583_v5  ;;  %vm9821_vm0 = vcmask 1041409  }
 0x2de   : > { %19588 = vst [vmem:[#allocation121_spill] sm:$0xff] %v16752_v16  ;;  %19590 = vst [vmem:[#allocation123_spill] sm:$0xff] %v16757_v11  ;;  %v16765_v27 = vpop.eup %14044  ;;  %v16771_v16 = vsub.s32 %v9205_v23, %v19583_v5  ;;  %v16790_v23 = vsub.s32 %v9240_v41, %v19583_v5  ;;  %v16799_v26 = vsub.s32 %v9254_v45, %v19583_v5  ;;  %v19608_v41 = vld [vmem:[#allocation41_spill] sm:$0xff]  ;;  %v19610_v45 = vld [vmem:[#allocation46_spill] sm:$0xff]  ;;  %11961 = vmatpush2.bf16.msra.mxu1 %v12913_v53 }
 0x2df   : > { %19591 = vst [vmem:[#allocation124_spill] sm:$0xff] %v16760_v49  ;;  %19592 = vst [vmem:[#allocation125_spill] sm:$0xff] %v16763_v60  ;;  %v16778_v28 = vpop.eup %14046  ;;  %v16812_v0 = vpack.c.bf16 %v19608_v41, %v19528_v39  ;;  %v16820_v58 = vpack.c.bf16 %v19610_v45, %v19537_v1  ;;  %v16824_v5 = vpack.c.bf16 %v15364_v63, %v19541_v57  ;;  %11962 = vmatprep.subr.bf16.mxu1 %v12914_v6 }
 0x2e0   : > { %19593 = vst [vmem:[#allocation126_spill] sm:$0xff] %v16765_v27  ;;  %19594 = vst [vmem:[#allocation127_spill] sm:$0xff] %v16768_v32  ;;  %v16793_v27 = vpop.eup %14048  ;;  %v16831_v39 = vpack.c.bf16 %v15394_v13, %v19547_v33  ;;  %v16839_v1 = vpack.c.bf16 %v15456_v52, %v19551_v50  ;;  %v16843_v63 = vpack.c.bf16 %v16335_v3, %v16339_v34  ;;  %v12931_v3 = vld [vmem:[%s14694_s26 + $0x4e0] ss:$24 sps:$4 sm:$0xff]  }
 0x2e1   : > { %19595 = vst [vmem:[#allocation128_spill] sm:$0xff] %v16771_v16  ;;  %19596 = vst [vmem:[#allocation129_spill] sm:$0xff] %v16774_v51  ;;  %v16808_v31 = vpop.eup %14050  ;;  %v16849_v13 = vpack.c.bf16 %v16356_v59, %v16366_v54  ;;  %v16857_v52 = vpack.c.bf16 %v16394_v44, %v16433_v56  ;;  %v16861_v33 = vpack.c.bf16 %v16461_v30, %v16473_v61  ;;  %v10185_v41 = vunpack.c.l.b16 %v16812_v0  ;;  %v12920_v61 = vld [vmem:[%s14694_s26 + $0x514] ss:$24 sps:$4 sm:$0xff]  }
 0x2e2   : > { %19597 = vst [vmem:[#allocation130_spill] sm:$0xff] %v16778_v28  ;;  %19598 = vst [vmem:[#allocation131_spill] sm:$0xff] %v16781_v21  ;;  %v16806_v28 = vpack.c.bf16 %v19606_v2, %v19524_v42  ;;  %v12919_v42 = vld [vmem:[%s14694_s26 + $0x540] ss:$24 sps:$4 sm:$0xff]   ;;  %v16827_v8 = vpop.eup %14052  ;;  %v16867_v50 = vpack.c.bf16 %v16511_v35, %v16541_v19  ;;  %v16875_v53 = vpack.c.bf16 %v16604_v12, %v16608_v14  ;;  %v10186_v45 = vunpack.c.h.b16 %v16812_v0 }
 0x2e3   : > { %19599 = vst [vmem:[#allocation132_spill] sm:$0xff] %v16784_v15  ;;  %19600 = vst [vmem:[#allocation133_spill] sm:$0xff] %v16787_v18  ;;  %v16845_v57 = vpop.eup %14054  ;;  %11963 = vmatpush2.bf16.msra.mxu1 %v12919_v42  ;;  %v10189_v56 = vunpack.c.l.b16 %v16820_v58  ;;  %v10190_v14 = vunpack.c.h.b16 %v16820_v58  ;;  %v10191_v12 = vunpack.c.l.b16 %v16824_v5  ;;  %v10194_v0 = vunpack.c.h.b16 %v16831_v39 }
 0x2e4   : > { %19601 = vst [vmem:[#allocation134_spill] sm:$0xff] %v16790_v23  ;;  %19602 = vst [vmem:[#allocation135_spill] sm:$0xff] %v16793_v27  ;;  %v19609_v27 = vld [vmem:[#allocation44_spill] sm:$0xff]  ;;  %v10183_v6 = vunpack.c.l.b16 %v16806_v28  ;;  %v10184_v2 = vunpack.c.h.b16 %v16806_v28  ;;  %v10192_v28 = vunpack.c.h.b16 %v16824_v5  ;;  %11964 = vmatprep.subr.bf16.mxu1 %v12920_v61  ;;  %v10197_v54 = vunpack.c.l.b16 %v16839_v1 }
 0x2e5   : > { %19603 = vst [vmem:[#allocation136_spill] sm:$0xff] %v16796_v40  ;;  %19604 = vst [vmem:[#allocation137_spill] sm:$0xff] %v16799_v26  ;;  %v16816_v4 = vpack.c.bf16 %v19609_v27, %v19533_v22  ;;  %v16835_v22 = vpack.c.bf16 %v19531_v48, %v19549_v36  ;;  %v16853_v48 = vpack.c.bf16 %v16372_v43, %v16382_v7  ;;  %v16863_v36 = vpop.eup %14056  ;;  %v12925_v7 = vld [vmem:[%s14694_s26 + $0x510] ss:$24 sps:$4 sm:$0xff]   ;;  %v10198_v58 = vunpack.c.h.b16 %v16839_v1 }
 0x2e6   : > { %19605 = vst [vmem:[#allocation138_spill] sm:$0xff] %v16802_v17  ;;  %19607 = vst [vmem:[#allocation36_spill] sm:$0xff] %v16808_v31  ;;  %v16871_v27 = vpack.c.bf16 %v16568_v25, %v16576_v24  ;;  %v10193_v25 = vunpack.c.l.b16 %v16831_v39  ;;  %v10247_v35 = vunpack.c.l.b16 %v16843_v63  ;;  %v10248_v5 = vunpack.c.h.b16 %v16843_v63 }
 0x2e7   : > { %19611 = vst [vmem:[#allocation41_spill] sm:$0xff] %v16827_v8  ;;  %19612 = vst [vmem:[#allocation44_spill] sm:$0xff] %v16845_v57  ;;  %v10187_v19 = vunpack.c.l.b16 %v16816_v4  ;;  %v10188_v24 = vunpack.c.h.b16 %v16816_v4  ;;  %v10195_v42 = vunpack.c.l.b16 %v16835_v22  ;;  %v10196_v4 = vunpack.c.h.b16 %v16835_v22  ;;  %11965 = vmatpush2.bf16.msra.mxu1 %v12925_v7  ;;  %v12926_v8 = vld [vmem:[%s14694_s26 + $0x4e4] ss:$24 sps:$4 sm:$0xff]  }
 0x2e8   : > { %19613 = vst [vmem:[#allocation46_spill] sm:$0xff] %v16863_v36  ;;  %v10249_v34 = vunpack.c.l.b16 %v16849_v13  ;;  %v10250_v39 = vunpack.c.h.b16 %v16849_v13  ;;  %v10251_v30 = vunpack.c.l.b16 %v16853_v48  ;;  %v10252_v61 = vunpack.c.h.b16 %v16853_v48  ;;  %11966 = vmatprep.subr.bf16.mxu1 %v12926_v8 }
 0x2e9   : > { %v10253_v22 = vunpack.c.l.b16 %v16857_v52  ;;  %v10254_v1 = vunpack.c.h.b16 %v16857_v52  ;;  %v10255_v31 = vunpack.c.l.b16 %v16861_v33  ;;  %v10256_v63 = vunpack.c.h.b16 %v16861_v33  ;;  %v12932_v33 = vld [vmem:[%s14694_s26 + $0x4b4] ss:$24 sps:$4 sm:$0xff]  }
 0x2ea   : > { %v10257_v44 = vunpack.c.l.b16 %v16867_v50  ;;  %v10258_v13 = vunpack.c.h.b16 %v16867_v50  ;;  %v10260_v48 = vunpack.c.h.b16 %v16871_v27  ;;  %v10377_v43 = vrot.slane %v10183_v6, %v16720_v46 }
 0x2eb   : > { %v10381_v59 = vrot.slane %v10184_v2, %v16731_v9  ;;  %v10386_v52 = vrot.slane %v10185_v41, %v16748_v62  ;;  %v10391_v50 = vrot.slane %v10186_v45, %v16757_v11  ;;  %v10396_v7 = vrot.slane %v10187_v19, %v16760_v49  ;;  %11967 = vmatpush2.bf16.msra.mxu1 %v12931_v3 }
 0x2ec   : > { %v10401_v6 = vrot.slane %v10188_v24, %v16763_v60  ;;  %v10406_v2 = vrot.slane %v10189_v56, %v16768_v32  ;;  %v10411_v8 = vrot.slane %v10190_v14, %v16771_v16  ;;  %v10416_v36 = vrot.slane %v10191_v12, %v16774_v51  ;;  %11968 = vmatprep.subr.bf16.mxu1 %v12932_v33 }
 0x2ed   : > { %v10382_v57 = vsel %vm9168_vm1, %v10381_v59, %v10377_v43  ;;  %v10421_v45 = vrot.slane %v10192_v28, %v16781_v21  ;;  %v10426_v19 = vrot.slane %v10193_v25, %v16784_v15  ;;  %v10431_v59 = vrot.slane %v10194_v0, %v16787_v18  ;;  %v12937_v25 = vld [vmem:[%s14694_s26 + $0x4b0] ss:$24 sps:$4 sm:$0xff]  }
 0x2ee   : > { %v10387_v41 = vsel %vm9175_vm2, %v10386_v52, %v10382_v57  ;;  %v10436_v56 = vrot.slane %v10195_v42, %v16790_v23  ;;  %v10441_v14 = vrot.slane %v10196_v4, %v16796_v40  ;;  %v10693_v24 = vrot.slane %v10247_v35, %v16720_v46 }
 0x2ef   : > { %v10392_v43 = vsel %vm9182_vm3, %v10391_v50, %v10387_v41  ;;  %v10697_v12 = vrot.slane %v10248_v5, %v16731_v9  ;;  %v10702_v57 = vrot.slane %v10249_v34, %v16748_v62  ;;  %v10446_v0 = vrot.slane %v10197_v54, %v16799_v26  ;;  %11969 = vmatpush2.bf16.msra.mxu1 %v12937_v25 }
 0x2f0   : > { %v10397_v3 = vsel %vm9189_vm4, %v10396_v7, %v10392_v43  ;;  %v10707_v42 = vrot.slane %v10250_v39, %v16757_v11  ;;  %v10712_v4 = vrot.slane %v10251_v30, %v16760_v49  ;;  %v10451_v35 = vrot.slane %v10198_v58, %v16802_v17 }
 0x2f1   : > { %v10402_v28 = vsel %vm9196_vm5, %v10401_v6, %v10397_v3  ;;  %v10698_v5 = vsel %vm9168_vm1, %v10697_v12, %v10693_v24  ;;  %v10717_v34 = vrot.slane %v10252_v61, %v16763_v60  ;;  %v10722_v54 = vrot.slane %v10253_v22, %v16768_v32  ;;  %v12938_v61 = vld [vmem:[%s14694_s26 + $0x484] ss:$24 sps:$4 sm:$0xff]   ;;  %v19615_v12 = vld [vmem:[#allocation37_spill] sm:$0xff] }
 0x2f2   : > { %v10407_v7 = vsel %vm9203_vm6, %v10406_v2, %v10402_v28  ;;  %v10703_v33 = vsel %vm9175_vm2, %v10702_v57, %v10698_v5  ;;  %v10727_v39 = vrot.slane %v10254_v1, %v16771_v16  ;;  %v10732_v58 = vrot.slane %v10255_v31, %v16774_v51  ;;  %11970 = vmatprep.subr.bf16.mxu1 %v12938_v61  ;;  %v19618_v28 = vld [vmem:[#allocation40_spill] sm:$0xff] }
 0x2f3   : > { %v10412_v52 = vsel %vm9210_vm7, %v10411_v8, %v10407_v7  ;;  %v10708_v50 = vsel %vm9182_vm3, %v10707_v42, %v10703_v33  ;;  %v10737_v6 = vrot.slane %v10256_v63, %v16781_v21  ;;  %v10742_v41 = vrot.slane %v10257_v44, %v16784_v15  ;;  %v12943_v63 = vld [vmem:[%s14694_s26 + $0x480] ss:$24 sps:$4 sm:$0xff]  }
 0x2f4   : > { %v10417_v30 = vsel %vm9217_vm8, %v10416_v36, %v10412_v52  ;;  %v10713_v8 = vsel %vm9189_vm4, %v10712_v4, %v10708_v50  ;;  %v10747_v22 = vrot.slane %v10258_v13, %v16787_v18  ;;  %v19614_v36 = vunpack.c.l.b16 %v16871_v27  ;;  %v19616_v44 = vld [vmem:[#allocation67_spill] sm:$0xff]  ;;  %v19617_v13 = vld [vmem:[#allocation38_spill] sm:$0xff]  ;;  %11971 = vmatpush2.bf16.msra.mxu1 %v12943_v63 }
 0x2f5   : > { %v10422_v2 = vsel %vm9224_vm9, %v10421_v45, %v10417_v30  ;;  %v10718_v1 = vsel %vm9196_vm5, %v10717_v34, %v10713_v8  ;;  %v10757_v31 = vrot.slane %v10260_v48, %v16796_v40  ;;  %v4307_v57 = vrot.slane %v19616_v44, %v19615_v12  ;;  %v19621_v50 = vld [vmem:[#allocation18_spill] sm:$0xff]  ;;  %v19624_v8 = vld [vmem:[#allocation19_spill] sm:$0xff] }
 0x2f6   : > { %v10427_v43 = vsel %vm9231_vm10, %v10426_v19, %v10422_v2  ;;  %v10752_v3 = vrot.slane %v19614_v36, %v16790_v23  ;;  %v10723_v24 = vsel %vm9203_vm6, %v10722_v54, %v10718_v1  ;;  %v4314_v19 = vrot.slane %v19616_v44, %v19617_v13  ;;  %v19623_v2 = vld [vmem:[#allocation17_spill] sm:$0xff] }
 0x2f7   : > { %v10432_v45 = vsel %vm9238_vm11, %v10431_v59, %v10427_v43  ;;  %v10728_v27 = vsel %vm9210_vm7, %v10727_v39, %v10723_v24  ;;  %v4321_v48 = vrot.slane %v19616_v44, %v19618_v28  ;;  %v4328_v42 = vrot.slane %v19616_v44, %v15308_v10  ;;  %v19626_v36 = vld [vmem:[#allocation21_spill] sm:$0xff]  ;;  %v19628_v24 = vld [vmem:[#allocation23_spill] sm:$0xff] }
 0x2f8   : > { %v10437_v25 = vsel %vm9245_vm12, %v10436_v56, %v10432_v45  ;;  %v10733_v4 = vsel %vm9217_vm8, %v10732_v58, %v10728_v27  ;;  %v19619_v7 = vunpack.c.l.b16 %v16875_v53  ;;  %v7379_v34 = vcombine.low %v4307_v57, %v4314_v19  ;;  %v19622_v58 = vld [vmem:[#allocation20_spill] sm:$0xff]  ;;  %v19629_v19 = vld [vmem:[#allocation26_spill] sm:$0xff] }
 0x2f9   : > { %v10442_v59 = vsel %vm9252_vm13, %v10441_v14, %v10437_v25  ;;  %v10738_v52 = vsel %vm9224_vm9, %v10737_v6, %v10733_v4  ;;  %v19620_v33 = vunpack.c.h.b16 %v16875_v53  ;;  %v7380_v39 = vcombine.low %v4321_v48, %v4328_v42  ;;  %v19625_v53 = vld [vmem:[#allocation22_spill] sm:$0xff]  ;;  %v19627_v45 = vld [vmem:[#allocation24_spill] sm:$0xff]  ;;  %v19630_v25 = vld [vmem:[#allocation25_spill] sm:$0xff] }
 0x2fa   : > { %v10762_v5 = vrot.slane %v19619_v7, %v16799_v26  ;;  %v10447_v56 = vsel %vm9259_vm14, %v10446_v0, %v10442_v59  ;;  %v10743_v30 = vsel %vm9231_vm10, %v10742_v41, %v10738_v52  ;;  %v7387_v14 = vrot.slane %v7379_v34, %v15369_v38  ;;  %v19631_v48 = vld [vmem:[#allocation28_spill] sm:$0xff]  ;;  %v19632_v42 = vld [vmem:[#allocation27_spill] sm:$0xff]  ;;  %v19633_v4 = vld [vmem:[#allocation30_spill] sm:$0xff] }
 0x2fb   : > { %v10767_v54 = vrot.slane %v19620_v33, %v16802_v17  ;;  %v9847_v61 = vpack.c.bf16 %v19622_v58, %v19621_v50  ;;  %v16992_v43 = vpack.c.bf16 %v19624_v8, %v19623_v2  ;;  %v10452_v0 = vsel %vm9266_vm15, %v10451_v35, %v10447_v56  ;;  %v19634_v7 = vld [vmem:[#allocation29_spill] sm:$0xff]  ;;  %v19636_v56 = vld [vmem:[#allocation32_spill] sm:$0xff]  ;;  %v19639_v58 = vld [vmem:[#allocation87_spill] sm:$0xff] }
 0x2fc   : > { %v10748_v6 = vsel %vm9238_vm11, %v10747_v22, %v10743_v30  ;;  %v7394_v1 = vrot.slane %v7380_v39, %v15369_v38  ;;  %v9849_v63 = vpack.c.bf16 %v19626_v36, %v19625_v53  ;;  %v17002_v57 = vpack.c.bf16 %v19628_v24, %v19627_v45  ;;  %v19637_v39 = vld [vmem:[#allocation85_spill] sm:$0xff]  ;;  %v19638_v30 = vld [vmem:[#allocation84_spill] sm:$0xff]  ;;  %v19640_v2 = vld [vmem:[#allocation86_spill] sm:$0xff] }
 0x2fd   : > { %v10753_v41 = vsel %vm9245_vm12, %v10752_v3, %v10748_v6  ;;  %v17006_v27 = vpack.c.bf16 %v19630_v25, %v19629_v19  ;;  %v17010_v35 = vpack.c.bf16 %v19632_v42, %v19631_v48  ;;  %v17015_v34 = vpack.c.bf16 %v19634_v7, %v19633_v4  ;;  %v19635_v3 = vld [vmem:[#allocation33_spill] sm:$0xff]  ;;  %v19643_v53 = vld [vmem:[#allocation39_spill] sm:$0xff]  ;;  %v19644_v36 = vld [vmem:[#allocation90_spill] sm:$0xff] }
 0x2fe   : > { %v10758_v22 = vsel %vm9252_vm13, %v10757_v31, %v10753_v41  ;;  %v7395_v59 = vcombine.low %v7387_v14, %v7394_v1  ;;  %v17019_v52 = vpack.c.bf16 %v19636_v56, %v19635_v3  ;;  %v17024_v50 = vpack.c.bf16 %v19638_v30, %v19637_v39  ;;  %v19641_v31 = vld [vmem:[#allocation89_spill] sm:$0xff]  ;;  %v19642_v14 = vld [vmem:[#allocation88_spill] sm:$0xff]  ;;  %v19646_v45 = vld [vmem:[#allocation91_spill] sm:$0xff] }
 0x2ff   : > { %v10763_v33 = vsel %vm9259_vm14, %v10762_v5, %v10758_v22  ;;  %v17028_v8 = vpack.c.bf16 %v19640_v2, %v19639_v58  ;;  %v17032_v6 = vpack.c.bf16 %v19642_v14, %v19641_v31  ;;  %v17037_v41 = vpack.c.bf16 %v19644_v36, %v19643_v53  ;;  %v19645_v5 = vld [vmem:[#allocation92_spill] sm:$0xff]  ;;  %v19647_v19 = vld [vmem:[#allocation93_spill] sm:$0xff]  ;;  %v19648_v25 = vld [vmem:[#allocation43_spill] sm:$0xff] }
 0x300   : > { %v10768_v1 = vsel %vm9266_vm15, %v10767_v54, %v10763_v33  ;;  %8912 = vperm.xlu1 %12799, %v7395_v59   ;;  %v17041_v24 = vpack.c.bf16 %v19646_v45, %v19645_v5  ;;  %v17045_v48 = vpack.c.bf16 %v19648_v25, %v19647_v19  ;;  %v19649_v22 = vld [vmem:[#allocation45_spill] sm:$0xff]  ;;  %v19650_v4 = vld [vmem:[#allocation51_spill] sm:$0xff]  ;;  %v19652_v59 = vld [vmem:[#allocation94_spill] sm:$0xff]  ;;  %v10167_v56 = vunpack.c.l.b16 %v9847_v61 }
 0x301   : > { %v10928_v42 = vsel %vm9821_vm0, %v10768_v1, %v10452_v0  ;;  %v17050_v7 = vpack.c.bf16 %v19650_v4, %v19649_v22  ;;  %v19651_v54 = vld [vmem:[#allocation95_spill] sm:$0xff]  ;;  %v10168_v44 = vunpack.c.h.b16 %v9847_v61  ;;  %v10169_v5 = vunpack.c.l.b16 %v16992_v43 }
 0x302   : > { %v17054_v3 = vpack.c.bf16 %v19652_v59, %v19651_v54  ;;  %v17056_v33 = vpack.c.b16 %v10928_v42, %v10928_v42  ;;  %v10170_v53 = vunpack.c.h.b16 %v16992_v43  ;;  %v10171_v19 = vunpack.c.l.b16 %v9849_v63 }
 0x303   : > { %v10172_v31 = vunpack.c.h.b16 %v9849_v63  ;;  %v10173_v0 = vunpack.c.l.b16 %v17002_v57  ;;  %v10174_v1 = vunpack.c.h.b16 %v17002_v57  ;;  %v10175_v22 = vunpack.c.l.b16 %v17006_v27 }
 0x304   : > { %19653 = vst [vmem:[#allocation37_spill] sm:$0xff] %v17056_v33  ;;  %11931 = vmatprep.mubr.bf16.mxu0 %v17056_v33  ;;  %v10176_v54 = vunpack.c.h.b16 %v17006_v27  ;;  %v10177_v42 = vunpack.c.l.b16 %v17010_v35  ;;  %v10178_v61 = vunpack.c.h.b16 %v17010_v35  ;;  %v10179_v59 = vunpack.c.l.b16 %v17015_v34 }
 0x305   : > { %v10180_v43 = vunpack.c.h.b16 %v17015_v34  ;;  %v10181_v63 = vunpack.c.l.b16 %v17019_v52  ;;  %v10182_v4 = vunpack.c.h.b16 %v17019_v52  ;;  %v10231_v57 = vunpack.c.l.b16 %v17024_v50 }
 0x306   : > { %v10232_v58 = vunpack.c.h.b16 %v17024_v50  ;;  %v10233_v25 = vunpack.c.l.b16 %v17028_v8  ;;  %v10234_v27 = vunpack.c.h.b16 %v17028_v8  ;;  %v10235_v39 = vunpack.c.l.b16 %v17032_v6 }
 0x307   : > { %v10236_v35 = vunpack.c.h.b16 %v17032_v6  ;;  %v10237_v45 = vunpack.c.l.b16 %v17037_v41  ;;  %v10238_v34 = vunpack.c.h.b16 %v17037_v41  ;;  %v10239_v36 = vunpack.c.l.b16 %v17041_v24 }
 0x308   : > { %v10240_v52 = vunpack.c.h.b16 %v17041_v24  ;;  %v10241_v14 = vunpack.c.l.b16 %v17045_v48  ;;  %v10242_v50 = vunpack.c.h.b16 %v17045_v48  ;;  %v10243_v2 = vunpack.c.l.b16 %v17050_v7 }
 0x309   : > { %v10244_v8 = vunpack.c.h.b16 %v17050_v7  ;;  %v10298_v30 = vrot.slane %v10167_v56, %v16720_v46  ;;  %v10302_v6 = vrot.slane %v10168_v44, %v16731_v9  ;;  %v10245_v20 = vunpack.c.l.b16 %v17054_v3 }
 0x30a   : > { %v10246_v41 = vunpack.c.h.b16 %v17054_v3  ;;  %v10307_v37 = vrot.slane %v10169_v5, %v16748_v62  ;;  %v10317_v24 = vrot.slane %v10171_v19, %v16760_v49  ;;  %v10312_v48 = vrot.slane %v10170_v53, %v16757_v11 }
 0x30b   : > { %v10303_v29 = vsel %vm9168_vm1, %v10302_v6, %v10298_v30  ;;  %v10322_v55 = vrot.slane %v10172_v31, %v16763_v60  ;;  %v10327_v7 = vrot.slane %v10173_v0, %v16768_v32  ;;  %v10332_v44 = vrot.slane %v10174_v1, %v16771_v16 }
 0x30c   : > { %v10308_v56 = vsel %vm9175_vm2, %v10307_v37, %v10303_v29  ;;  %v10337_v33 = vrot.slane %v10175_v22, %v16774_v51  ;;  %v10342_v3 = vrot.slane %v10176_v54, %v16781_v21  ;;  %v10347_v19 = vrot.slane %v10177_v42, %v16784_v15 }
 0x30d   : > { %v10313_v5 = vsel %vm9182_vm3, %v10312_v48, %v10308_v56  ;;  %v10352_v30 = vrot.slane %v10178_v61, %v16787_v18  ;;  %v10357_v53 = vrot.slane %v10179_v59, %v16790_v23  ;;  %v10362_v0 = vrot.slane %v10180_v43, %v16796_v40 }
 0x30e   : > { %v10318_v31 = vsel %vm9189_vm4, %v10317_v24, %v10313_v5  ;;  %v10614_v37 = vrot.slane %v10231_v57, %v16720_v46  ;;  %v10618_v29 = vrot.slane %v10232_v58, %v16731_v9  ;;  %v10623_v54 = vrot.slane %v10233_v25, %v16748_v62  ;;  %v19654_v5 = vld [vmem:[#allocation76_spill] sm:$0xff] }
 0x30f   : > { %v10323_v22 = vsel %vm9196_vm5, %v10322_v55, %v10318_v31  ;;  %v10628_v1 = vrot.slane %v10234_v27, %v16757_v11  ;;  %v10633_v42 = vrot.slane %v10235_v39, %v16760_v49  ;;  %v10367_v59 = vrot.slane %v10181_v63, %v16799_v26  ;;  %v12940_v49 = vld [vmem:[%s14694_s26 + $0x188] ss:$24 sps:$4 sm:$0xff]  }
 0x310   : > { %v10328_v61 = vsel %vm9203_vm6, %v10327_v7, %v10323_v22  ;;  %v10619_v6 = vsel %vm9168_vm1, %v10618_v29, %v10614_v37  ;;  %v10638_v43 = vrot.slane %v10236_v35, %v16763_v60  ;;  %v10372_v58 = vrot.slane %v10182_v4, %v16802_v17 }
 0x311   : > { %v10333_v57 = vsel %vm9210_vm7, %v10332_v44, %v10328_v61  ;;  %v10624_v55 = vsel %vm9175_vm2, %v10623_v54, %v10619_v6  ;;  %v10643_v25 = vrot.slane %v10237_v45, %v16768_v32  ;;  %v10648_v24 = vrot.slane %v10238_v34, %v16771_v16  ;;  %v19655_v6 = vld [vmem:[#allocation69_spill] sm:$0xff]  ;;  %v19713_v32 = vld [vmem:[#allocation47_spill] sm:$0xff] }
 0x312   : > { %v10338_v27 = vsel %vm9217_vm8, %v10337_v33, %v10333_v57  ;;  %v10629_v39 = vsel %vm9182_vm3, %v10628_v1, %v10624_v55  ;;  %v10653_v63 = vrot.slane %v10239_v36, %v16774_v51  ;;  %v10658_v7 = vrot.slane %v10240_v52, %v16781_v21  ;;  %v2097_v52 = vpop.xlane.xlu1 %2096  ;;  %v12930_v51 = vld [vmem:[%s14694_s26 + $0x1ec] ss:$24 sps:$4 sm:$0xff]  }
 0x313   : > { %v10343_v48 = vsel %vm9224_vm9, %v10342_v3, %v10338_v27  ;;  %v10634_v35 = vsel %vm9189_vm4, %v10633_v42, %v10629_v39  ;;  %v10663_v4 = vrot.slane %v10241_v14, %v16784_v15  ;;  %v10668_v33 = vrot.slane %v10242_v50, %v16787_v18  ;;  %v19656_v39 = vld [vmem:[#allocation78_spill] sm:$0xff] }
 0x314   : > { %v10348_v56 = vsel %vm9231_vm10, %v10347_v19, %v10343_v48  ;;  %v10639_v45 = vsel %vm9196_vm5, %v10638_v43, %v10634_v35  ;;  %v10673_v44 = vrot.slane %v10243_v2, %v16790_v23  ;;  %v10678_v3 = vrot.slane %v10244_v8, %v16796_v40  ;;  %v2094_v48 = vpop.xlane.xlu0 %2093  ;;  %v19693_v23 = vld [vmem:[#allocation91_spill] sm:$0xff] }
 0x315   : > { %v10353_v34 = vsel %vm9238_vm11, %v10352_v30, %v10348_v56  ;;  %v10644_v36 = vsel %vm9203_vm6, %v10643_v25, %v10639_v45  ;;  %v4615_v31 = vrot.slane %v19654_v5, %v19615_v12  ;;  %v4622_v50 = vrot.slane %v19654_v5, %v19617_v13 }
 0x316   : > { %v10358_v14 = vsel %vm9245_vm12, %v10357_v53, %v10353_v34  ;;  %v10649_v19 = vsel %vm9210_vm7, %v10648_v24, %v10644_v36  ;;  %v4629_v2 = vrot.slane %v19654_v5, %v19618_v28  ;;  %v10683_v37 = vrot.slane %v10245_v20, %v16799_v26  ;;  %v12946_v20 = vld [vmem:[%s14694_s26 + $0x45c] ss:$24 sps:$4 sm:$0xff]  }
 0x317   : > { %v10654_v30 = vsel %vm9217_vm8, %v10653_v63, %v10649_v19  ;;  %v10688_v8 = vrot.slane %v10246_v41, %v16802_v17  ;;  %v4636_v29 = vrot.slane %v19654_v5, %v15308_v10  ;;  %v10363_v53 = vsel %vm9252_vm13, %v10362_v0, %v10358_v14  ;;  %12022 = vmatprep.subr.bf16.mxu1 %v12946_v20 }
 0x318   : > { %v10659_v22 = vsel %vm9224_vm9, %v10658_v7, %v10654_v30  ;;  %v7566_v54 = vcombine.low %v4615_v31, %v4622_v50  ;;  %14058 = vlog2.f32 %v2097_v52  ;;  %v10368_v1 = vsel %vm9259_vm14, %v10367_v59, %v10363_v53  ;;  %v12850_v52 = vld [vmem:[%s14694_s26 + $0x158] ss:$24 sps:$4 sm:$0xff]  }
 0x319   : > { %v10664_v42 = vsel %vm9231_vm10, %v10663_v4, %v10659_v22  ;;  %v7567_v61 = vcombine.low %v4629_v2, %v4636_v29  ;;  %v4363_v43 = vrot.slane %v19655_v6, %v19615_v12  ;;  %v4370_v0 = vrot.slane %v19655_v6, %v19617_v13  ;;  %v2103_v2 = vpop.xlane.xlu1 %2102 }
 0x31a   : > { %v10669_v41 = vsel %vm9238_vm11, %v10668_v33, %v10664_v42  ;;  %v7574_v57 = vrot.slane %v7566_v54, %v15369_v38  ;;  %v4377_v55 = vrot.slane %v19655_v6, %v19618_v28  ;;  %v4384_v27 = vrot.slane %v19655_v6, %v15308_v10 }
 0x31b   : > { %v10674_v25 = vsel %vm9245_vm12, %v10673_v44, %v10669_v41  ;;  %v7581_v59 = vrot.slane %v7567_v61, %v15369_v38  ;;  %v4671_v24 = vrot.slane %v19656_v39, %v19615_v12  ;;  %v7413_v35 = vcombine.low %v4363_v43, %v4370_v0  ;;  %v19658_v43 = vld [vmem:[#allocation80_spill] sm:$0xff] }
 0x31c   : > { %v10679_v63 = vsel %vm9252_vm13, %v10678_v3, %v10674_v25  ;;  %v4678_v7 = vrot.slane %v19656_v39, %v19617_v13  ;;  %v4685_v4 = vrot.slane %v19656_v39, %v19618_v28  ;;  %v7414_v33 = vcombine.low %v4377_v55, %v4384_v27  ;;  %v19659_v55 = vld [vmem:[#allocation37_spill] sm:$0xff] }
 0x31d   : > { %v10684_v56 = vsel %vm9259_vm14, %v10683_v37, %v10679_v63  ;;  %v7582_v45 = vcombine.low %v7574_v57, %v7581_v59  ;;  %v4692_v44 = vrot.slane %v19656_v39, %v15308_v10  ;;  %v10373_v34 = vsel %vm9266_vm15, %v10372_v58, %v10368_v1  ;;  %v12858_v37 = vld [vmem:[%s14694_s26 + $0x12c] ss:$24 sps:$4 sm:$0xff]   ;;  %v12856_v25 = vld [vmem:[%s14694_s26 + $0x128] ss:$24 sps:$4 sm:$0xff]  }
 0x31e   : > { %v10689_v36 = vsel %vm9266_vm15, %v10688_v8, %v10684_v56  ;;  %v7421_v3 = vrot.slane %v7413_v35, %v15369_v38  ;;  %v7600_v31 = vcombine.low %v4671_v24, %v4678_v7  ;;  %14060 = vlog2.f32 %v2094_v48  ;;  %v19657_v8 = vld [vmem:[#allocation71_spill] sm:$0xff]  ;;  %v19660_v63 = vld [vmem:[#allocation117_spill] sm:$0xff] }
 0x31f   : > { %v10927_v14 = vsel %vm9821_vm0, %v10689_v36, %v10373_v34  ;;  %8945 = vperm.xlu0 %12798, %v7582_v45   ;;  %v7428_v19 = vrot.slane %v7414_v33, %v15369_v38  ;;  %v7601_v50 = vcombine.low %v4685_v4, %v4692_v44  ;;  %v4419_v29 = vrot.slane %v19657_v8, %v19615_v12  ;;  %v12864_v7 = vld [vmem:[%s14694_s26 + $0xfc] ss:$24 sps:$4 sm:$0xff]   ;;  %v19661_v56 = vld [vmem:[#allocation73_spill] sm:$0xff]  ;;  %v19662_v33 = vld [vmem:[#allocation120_spill] sm:$0xff] }
 0x320   : > { %v17180_v30 = vpack.c.b16 %v10927_v14, %v10927_v14  ;;  %v7608_v58 = vrot.slane %v7600_v31, %v15369_v38  ;;  %v4426_v53 = vrot.slane %v19657_v8, %v19617_v13  ;;  %v4433_v1 = vrot.slane %v19657_v8, %v19618_v28 }
 0x321   : > { %v7429_v22 = vcombine.low %v7421_v3, %v7428_v19  ;;  %v7615_v54 = vrot.slane %v7601_v50, %v15369_v38  ;;  %v4440_v42 = vrot.slane %v19657_v8, %v15308_v10  ;;  %v4727_v20 = vrot.slane %v19658_v43, %v19615_v12  ;;  %v17214_v3 = vpop.xlane.xlu1 %2108  ;;  %v2100_v19 = vpop.xlane.xlu0 %2099 }
 0x322   : > { %11932 = vmatmul.mubr.bf16.vlgmr.msra.gmra.mxu0 %v17180_v30  ;;  %v7447_v61 = vcombine.low %v4419_v29, %v4426_v53  ;;  %v4734_v41 = vrot.slane %v19658_v43, %v19617_v13  ;;  %v4741_v57 = vrot.slane %v19658_v43, %v19618_v28  ;;  %v12509_v0 = vadd.f32 -3.8918202, %v16716_v47  ;;  %v12862_v53 = vld [vmem:[%s14694_s26 + $0xf8] ss:$24 sps:$4 sm:$0xff]  }
 0x323   : > { %11982 = vmatpush1.bf16.msra.mxu0 %v12850_v52  ;;  %12013 = vmatprep.mubr.bf16.mxu0 %v19659_v55  ;;  %v7616_v59 = vcombine.low %v7608_v58, %v7615_v54  ;;  %v7448_v27 = vcombine.low %v4433_v1, %v4440_v42  ;;  %v4748_v24 = vrot.slane %v19658_v43, %v15308_v10  ;;  %v2859_v48 = vmul.f32 1.442695, %v19660_v63  ;;  %v19663_v52 = vld [vmem:[#allocation122_spill] sm:$0xff]  ;;  %v19664_v1 = vld [vmem:[#allocation16_spill] sm:$0xff] }
 0x324   : > { %8918 = vperm.xlu1 %12799, %v7429_v22   ;;  %11983 = vmatprep.subr.bf16.mxu0 %v12858_v37  ;;  %v7455_v35 = vrot.slane %v7447_v61, %v15369_v38  ;;  %v7634_v4 = vcombine.low %v4727_v20, %v4734_v41  ;;  %v4475_v47 = vrot.slane %v19661_v56, %v19615_v12  ;;  %v12512_v44 = vadd.f32 -3.8918202, %v19662_v33  ;;  %v12870_v20 = vld [vmem:[%s14694_s26 + $0xcc] ss:$24 sps:$4 sm:$0xff]   ;;  %v19665_v41 = vld [vmem:[#allocation82_spill] sm:$0xff] }
 0x325   : > { %v17210_v45 = vpop.eup %14058  ;;  %8951 = vperm.xlu0 %12798, %v7616_v59   ;;  %v7462_v34 = vrot.slane %v7448_v27, %v15369_v38  ;;  %v7635_v36 = vcombine.low %v4741_v57, %v4748_v24  ;;  %v4482_v31 = vrot.slane %v19661_v56, %v19617_v13  ;;  %v12511_v14 = vadd.f32 -3.8918202, %v19663_v52  ;;  %v12868_v33 = vld [vmem:[%s14694_s26 + $0xc8] ss:$24 sps:$4 sm:$0xff]  }
 0x326   : > { %v7642_v50 = vrot.slane %v7634_v4, %v15369_v38  ;;  %v4489_v37 = vrot.slane %v19661_v56, %v19618_v28  ;;  %v4496_v58 = vrot.slane %v19661_v56, %v15308_v10  ;;  %14062 = vlog2.f32 %v2103_v2  ;;  %v19666_v4 = vld [vmem:[#allocation44_spill] sm:$0xff] }
 0x327   : > { %11984 = vmatpush1.bf16.msra.mxu0 %v12856_v25  ;;  %v7463_v29 = vcombine.low %v7455_v35, %v7462_v34  ;;  %v7649_v22 = vrot.slane %v7635_v36, %v15369_v38  ;;  %v7481_v54 = vcombine.low %v4475_v47, %v4482_v31  ;;  %v2615_v42 = vmul.f32 %v12509_v0, %v19664_v1  ;;  %v17242_v34 = vpop.xlane.xlu1 %2114  ;;  %v19667_v36 = vld [vmem:[#allocation75_spill] sm:$0xff] }
 0x328   : > { %11985 = vmatprep.subr.bf16.mxu0 %v12864_v7  ;;  %v7482_v61 = vcombine.low %v4489_v37, %v4496_v58  ;;  %v4783_v57 = vrot.slane %v19665_v41, %v19615_v12  ;;  %v4790_v59 = vrot.slane %v19665_v41, %v19617_v13  ;;  %14064 = vlog2.f32 %v2100_v19  ;;  %v19668_v19 = vld [vmem:[#allocation115_spill] sm:$0xff] }
 0x329   : > { %8924 = vperm.xlu1 %12799, %v7463_v29   ;;  %v7650_v2 = vcombine.low %v7642_v50, %v7649_v22  ;;  %v7489_v25 = vrot.slane %v7481_v54, %v15369_v38  ;;  %v4797_v27 = vrot.slane %v19665_v41, %v19618_v28  ;;  %v2618_v0 = vmul.f32 %v12512_v44, %v19664_v1  ;;  %v19669_v50 = vld [vmem:[#allocation46_spill] sm:$0xff] }
 0x32a   : > { %v7496_v24 = vrot.slane %v7482_v61, %v15369_v38  ;;  %v4804_v63 = vrot.slane %v19665_v41, %v15308_v10  ;;  %v7668_v35 = vcombine.low %v4783_v57, %v4790_v59  ;;  %v2617_v7 = vmul.f32 %v12511_v14, %v19664_v1  ;;  %v12876_v29 = vld [vmem:[%s14694_s26 + $0x9c] ss:$24 sps:$4 sm:$0xff]  }
 0x32b   : > { %v2355_v47 = vmul.f32 0.6931472, %v19666_v4  ;;  %11986 = vmatpush1.bf16.msra.mxu0 %v12862_v53  ;;  %8957 = vperm.xlu0 %12798, %v7650_v2   ;;  %v4531_v31 = vrot.slane %v19667_v36, %v19615_v12  ;;  %v4538_v44 = vrot.slane %v19667_v36, %v19617_v13  ;;  %v14061_v52 = vpop.eup %14060  ;;  %14066 = vpow2.f32 %v19668_v19  ;;  %v19670_v53 = vld [vmem:[#allocation116_spill] sm:$0xff] }
 0x32c   : > { %v2353_v37 = vmul.f32 0.6931472, %v19669_v50  ;;  %v7497_v58 = vcombine.low %v7489_v25, %v7496_v24  ;;  %11987 = vmatprep.subr.bf16.mxu0 %v12870_v20  ;;  %v7669_v14 = vcombine.low %v4797_v27, %v4804_v63  ;;  %14068 = vpow2.f32 %v19670_v53  ;;  %v12874_v24 = vld [vmem:[%s14694_s26 + $0x98] ss:$24 sps:$4 sm:$0xff]  }
 0x32d   : > { %v2857_v22 = vmul.f32 1.442695, %v2615_v42  ;;  %v7676_v54 = vrot.slane %v7668_v35, %v15369_v38  ;;  %v4545_v61 = vrot.slane %v19667_v36, %v19618_v28  ;;  %14070 = vpow2.f32 %v2859_v48  ;;  %v19671_v42 = vld [vmem:[#allocation84_spill] sm:$0xff] }
 0x32e   : > { %v2863_v57 = vmul.f32 1.442695, %v2618_v0  ;;  %8930 = vperm.xlu1 %12799, %v7497_v58   ;;  %v7683_v59 = vrot.slane %v7669_v14, %v15369_v38  ;;  %v4552_v20 = vrot.slane %v19667_v36, %v15308_v10  ;;  %v2861_v2 = vmul.f32 1.442695, %v2617_v7  ;;  %v12882_v0 = vld [vmem:[%s14694_s26 + $0x6c] ss:$24 sps:$4 sm:$0xff]  }
 0x32f   : > { %v12514_v25 = vadd.f32 -3.8918202, %v2355_v47  ;;  %11988 = vmatpush1.bf16.msra.mxu0 %v12868_v33  ;;  %v7515_v27 = vcombine.low %v4531_v31, %v4538_v44  ;;  %v4839_v63 = vrot.slane %v19671_v42, %v19615_v12  ;;  %v12513_v35 = vadd.f32 -3.8918202, %v2353_v37  ;;  %v17268_v33 = vpop.permute.xlu1 %8777  ;;  %v2106_v44 = vpop.xlane.xlu0 %2105 }
 0x330   : > { %v7684_v4 = vcombine.low %v7676_v54, %v7683_v59  ;;  %v7516_v19 = vcombine.low %v4545_v61, %v4552_v20  ;;  %11989 = vmatprep.subr.bf16.mxu0 %v12876_v29  ;;  %v4846_v48 = vrot.slane %v19671_v42, %v19617_v13  ;;  %14072 = vpow2.f32 %v2857_v22  ;;  %19672 = vst [vmem:[#allocation38_spill] sm:$0xff] %v17268_v33  ;;  %v19673_v29 = vld [vmem:[#allocation77_spill] sm:$0xff]  ;;  %v12888_v59 = vld [vmem:[%s14694_s26 + $0x3c] ss:$24 sps:$4 sm:$0xff]  }
 0x331   : > { %v2359_v50 = vmul.f32 0.6931472, %v17210_v45  ;;  %v7523_v7 = vrot.slane %v7515_v27, %v15369_v38  ;;  %v4853_v47 = vrot.slane %v19671_v42, %v19618_v28  ;;  %14074 = vpow2.f32 %v2863_v57  ;;  %v12880_v22 = vld [vmem:[%s14694_s26 + $0x68] ss:$24 sps:$4 sm:$0xff]  }
 0x332   : > { %v2357_v31 = vmul.f32 0.6931472, %v14061_v52  ;;  %8963 = vperm.xlu0 %12798, %v7684_v4   ;;  %v7530_v37 = vrot.slane %v7516_v19, %v15369_v38  ;;  %v4860_v58 = vrot.slane %v19671_v42, %v15308_v10  ;;  %14076 = vpow2.f32 %v2861_v2 }
 0x333   : > { %v2620_v45 = vmul.f32 %v12514_v25, %v19664_v1  ;;  %11990 = vmatpush1.bf16.msra.mxu0 %v12874_v24  ;;  %v7702_v14 = vcombine.low %v4839_v63, %v4846_v48  ;;  %v4587_v53 = vrot.slane %v19673_v29, %v19615_v12  ;;  %v14063_v54 = vpop.eup %14062  ;;  %v2619_v52 = vmul.f32 %v12513_v35, %v19664_v1  ;;  %v19674_v48 = vld [vmem:[#allocation86_spill] sm:$0xff] }
 0x334   : > { %14078 = vlog2.f32 %v17214_v3  ;;  %v7531_v61 = vcombine.low %v7523_v7, %v7530_v37  ;;  %v7703_v57 = vcombine.low %v4853_v47, %v4860_v58  ;;  %11991 = vmatprep.subr.bf16.mxu0 %v12882_v0  ;;  %v12516_v20 = vadd.f32 -3.8918202, %v2359_v50  ;;  %v17290_v50 = vpop.permute.xlu1 %8780  ;;  %v12886_v7 = vld [vmem:[%s14694_s26 + $0x38] ss:$24 sps:$4 sm:$0xff]   ;;  %v12894_v58 = vld [vmem:[%s14694_s26 + $0xc] ss:$24 sps:$4 sm:$0xff]  }
 0x335   : > { %14080 = vlog2.f32 %v2106_v44  ;;  %v7710_v2 = vrot.slane %v7702_v14, %v15369_v38  ;;  %v4594_v25 = vrot.slane %v19673_v29, %v19617_v13  ;;  %v14065_v27 = vpop.eup %14064  ;;  %v12515_v24 = vadd.f32 -3.8918202, %v2357_v31  ;;  %19675 = vst [vmem:[#allocation40_spill] sm:$0xff] %v17290_v50  ;;  %v2112_v50 = vpop.xlane.xlu0 %2111 }
 0x336   : > { %8936 = vperm.xlu1 %12799, %v7531_v61   ;;  %v7717_v42 = vrot.slane %v7703_v57, %v15369_v38  ;;  %v4601_v3 = vrot.slane %v19673_v29, %v19618_v28  ;;  %v4608_v63 = vrot.slane %v19673_v29, %v15308_v10  ;;  %v2867_v35 = vmul.f32 1.442695, %v2620_v45 }
 0x337   : > { %v2363_v4 = vmul.f32 0.6931472, %v14063_v54  ;;  %v7549_v19 = vcombine.low %v4587_v53, %v4594_v25  ;;  %11992 = vmatpush1.bf16.msra.mxu0 %v12880_v22  ;;  %v4895_v0 = vrot.slane %v19674_v48, %v19615_v12  ;;  %v2865_v47 = vmul.f32 1.442695, %v2619_v52 }
 0x338   : > { %v7718_v31 = vcombine.low %v7710_v2, %v7717_v42  ;;  %v7550_v44 = vcombine.low %v4601_v3, %v4608_v63  ;;  %v4902_v37 = vrot.slane %v19674_v48, %v19617_v13  ;;  %11993 = vmatprep.subr.bf16.mxu0 %v12888_v59  ;;  %v17296_v14 = vpop.eup %14066  ;;  %v2622_v45 = vmul.f32 %v12516_v20, %v19664_v1  ;;  %v12892_v63 = vld [vmem:[%s14694_s26 + $0x8] ss:$24 sps:$4 sm:$0xff]   ;;  %v17321_v17 = vpop.permute.xlu1 %8783 }
 0x339   : > { %19676 = vst [vmem:[#allocation18_spill] sm:$0xff] %v17296_v14  ;;  %v2361_v53 = vmul.f32 0.6931472, %v14065_v27  ;;  %v7557_v22 = vrot.slane %v7549_v19, %v15369_v38  ;;  %v4909_v54 = vrot.slane %v19674_v48, %v19618_v28  ;;  %v17302_v61 = vpop.eup %14068  ;;  %v2621_v52 = vmul.f32 %v12515_v24, %v19664_v1  ;;  %v19679_v27 = vld [vmem:[#allocation79_spill] sm:$0xff]  ;;  %19680 = vst [vmem:[#allocation19_spill] sm:$0xff] %v17321_v17 }
 0x33a   : > { %19677 = vst [vmem:[#allocation20_spill] sm:$0xff] %v17302_v61  ;;  %8969 = vperm.xlu0 %12798, %v7718_v31   ;;  %v7564_v57 = vrot.slane %v7550_v44, %v15369_v38  ;;  %v4916_v59 = vrot.slane %v19674_v48, %v15308_v10  ;;  %v7736_v2 = vcombine.low %v4895_v0, %v4902_v37  ;;  %v17308_v20 = vpop.eup %14070  ;;  %v12518_v25 = vadd.f32 -3.8918202, %v2363_v4  ;;  %v12900_v4 = vld [vmem:[%s14694_s26 + $0x2dc] ss:$24 sps:$4 sm:$0xff]  }
 0x33b   : > { %19678 = vst [vmem:[#allocation17_spill] sm:$0xff] %v17308_v20  ;;  %v4643_v42 = vrot.slane %v19679_v27, %v19615_v12  ;;  %v4650_v3 = vrot.slane %v19679_v27, %v19617_v13  ;;  %v4657_v24 = vrot.slane %v19679_v27, %v19618_v28  ;;  %11994 = vmatpush1.bf16.msra.mxu0 %v12886_v7  ;;  %14082 = vpow2.f32 %v2867_v35  ;;  %v12912_v17 = vld [vmem:[%s14694_s26 + $0x27c] ss:$24 sps:$4 sm:$0xff]  }
 0x33c   : > { %v7565_v19 = vcombine.low %v7557_v22, %v7564_v57  ;;  %v7737_v31 = vcombine.low %v4909_v54, %v4916_v59  ;;  %v7744_v44 = vrot.slane %v7736_v2, %v15369_v38  ;;  %v4664_v48 = vrot.slane %v19679_v27, %v15308_v10  ;;  %11995 = vmatprep.subr.bf16.mxu0 %v12894_v58  ;;  %v19682_v54 = vld [vmem:[#allocation88_spill] sm:$0xff] }
 0x33d   : > { %v2871_v0 = vmul.f32 1.442695, %v2622_v45  ;;  %v12517_v37 = vadd.f32 -3.8918202, %v2361_v53  ;;  %v7583_v33 = vcombine.low %v4643_v42, %v4650_v3  ;;  %v17323_v26 = vpop.eup %14072  ;;  %14084 = vpow2.f32 %v2865_v47  ;;  %v12898_v47 = vld [vmem:[%s14694_s26 + $0x2d8] ss:$24 sps:$4 sm:$0xff]  }
 0x33e   : > { %19681 = vst [vmem:[#allocation22_spill] sm:$0xff] %v17323_v26  ;;  %8942 = vperm.xlu1 %12799, %v7565_v19   ;;  %v7751_v7 = vrot.slane %v7737_v31, %v15369_v38  ;;  %v7584_v22 = vcombine.low %v4657_v24, %v4664_v48  ;;  %v4951_v57 = vrot.slane %v19682_v54, %v19615_v12  ;;  %v17328_v58 = vpop.eup %14074  ;;  %v2869_v35 = vmul.f32 1.442695, %v2621_v52  ;;  %v17342_v24 = vpop.permute.xlu0 %8774  ;;  %v12906_v31 = vld [vmem:[%s14694_s26 + $0x2ac] ss:$24 sps:$4 sm:$0xff]  }
 0x33f   : > { %19683 = vst [vmem:[#allocation21_spill] sm:$0xff] %v17328_v58  ;;  %14086 = vlog2.f32 %v17242_v34  ;;  %v7591_v45 = vrot.slane %v7583_v33, %v15369_v38  ;;  %v4958_v53 = vrot.slane %v19682_v54, %v19617_v13  ;;  %11996 = vmatpush1.bf16.msra.mxu0 %v12892_v63  ;;  %v17335_v59 = vpop.eup %14076  ;;  %v2624_v2 = vmul.f32 %v12518_v25, %v19664_v1  ;;  %v19686_v48 = vld [vmem:[#allocation81_spill] sm:$0xff] }
 0x340   : > { %19684 = vst [vmem:[#allocation24_spill] sm:$0xff] %v17335_v59  ;;  %v7752_v42 = vcombine.low %v7744_v44, %v7751_v7  ;;  %v7598_v3 = vrot.slane %v7584_v22, %v15369_v38  ;;  %v4965_v52 = vrot.slane %v19682_v54, %v19618_v28  ;;  %11997 = vmatprep.subr.bf16.mxu0 %v12900_v4  ;;  %14088 = vpow2.f32 %v2871_v0 }
 0x341   : > { %v14079_v34 = vpop.eup %14078  ;;  %v2623_v33 = vmul.f32 %v12517_v37, %v19664_v1  ;;  %19685 = vst [vmem:[#allocation23_spill] sm:$0xff] %v17342_v24  ;;  %v4972_v63 = vrot.slane %v19682_v54, %v15308_v10  ;;  %v7770_v19 = vcombine.low %v4951_v57, %v4958_v53  ;;  %v4699_v7 = vrot.slane %v19686_v48, %v19615_v12  ;;  %v17356_v57 = vpop.permute.xlu1 %8786 }
 0x342   : > { %v14081_v25 = vpop.eup %14080  ;;  %8975 = vperm.xlu0 %12798, %v7752_v42   ;;  %v7599_v44 = vcombine.low %v7591_v45, %v7598_v3  ;;  %v4706_v4 = vrot.slane %v19686_v48, %v19617_v13  ;;  %v4713_v0 = vrot.slane %v19686_v48, %v19618_v28  ;;  %14090 = vpow2.f32 %v2869_v35  ;;  %19687 = vst [vmem:[#allocation26_spill] sm:$0xff] %v17356_v57  ;;  %v12904_v45 = vld [vmem:[%s14694_s26 + $0x2a8] ss:$24 sps:$4 sm:$0xff]  }
 0x343   : > { %v7771_v37 = vcombine.low %v4965_v52, %v4972_v63  ;;  %v7778_v22 = vrot.slane %v7770_v19, %v15369_v38  ;;  %v4720_v54 = vrot.slane %v19686_v48, %v15308_v10  ;;  %11998 = vmatpush2.bf16.msra.mxu0 %v12898_v47  ;;  %v2875_v53 = vmul.f32 1.442695, %v2624_v2  ;;  %v19688_v52 = vld [vmem:[#allocation90_spill] sm:$0xff] }
 0x344   : > { %v2367_v42 = vmul.f32 0.6931472, %v14079_v34  ;;  %14092 = vlog2.f32 %v2112_v50  ;;  %8948 = vperm.xlu1 %12799, %v7599_v44   ;;  %v7617_v3 = vcombine.low %v4699_v7, %v4706_v4  ;;  %v2365_v24 = vmul.f32 0.6931472, %v14081_v25  ;;  %11999 = vmatprep.subr.bf16.mxu0 %v12906_v31  ;;  %v17369_v25 = vpop.permute.xlu0 %8801  ;;  %v19690_v31 = vld [vmem:[#allocation83_spill] sm:$0xff] }
 0x345   : > { %v7785_v40 = vrot.slane %v7771_v37, %v15369_v38  ;;  %v7618_v35 = vcombine.low %v4713_v0, %v4720_v54  ;;  %v5007_v63 = vrot.slane %v19688_v52, %v19615_v12  ;;  %v2873_v19 = vmul.f32 1.442695, %v2623_v33  ;;  %19689 = vst [vmem:[#allocation25_spill] sm:$0xff] %v17369_v25  ;;  %v12910_v37 = vld [vmem:[%s14694_s26 + $0x278] ss:$24 sps:$4 sm:$0xff]  }
 0x346   : > { %v7625_v57 = vrot.slane %v7617_v3, %v15369_v38  ;;  %v5014_v47 = vrot.slane %v19688_v52, %v19617_v13  ;;  %v5021_v50 = vrot.slane %v19688_v52, %v19618_v28  ;;  %v5028_v44 = vrot.slane %v19688_v52, %v15308_v10 }
 0x347   : > { %v7786_v2 = vcombine.low %v7778_v22, %v7785_v40  ;;  %v7632_v34 = vrot.slane %v7618_v35, %v15369_v38  ;;  %v4755_v33 = vrot.slane %v19690_v31, %v19615_v12  ;;  %12000 = vmatpush2.bf16.msra.mxu0 %v12904_v45  ;;  %v4762_v4 = vrot.slane %v19690_v31, %v19617_v13  ;;  %v17382_v35 = vpop.permute.xlu1 %8789  ;;  %v12918_v45 = vld [vmem:[%s14694_s26 + $0x24c] ss:$24 sps:$4 sm:$0xff]  }
 0x348   : > { %v7804_v7 = vcombine.low %v5007_v63, %v5014_v47  ;;  %v4769_v0 = vrot.slane %v19690_v31, %v19618_v28  ;;  %v4776_v40 = vrot.slane %v19690_v31, %v15308_v10  ;;  %12001 = vmatprep.subr.bf16.mxu0 %v12912_v17  ;;  %14094 = vpow2.f32 %v2875_v53  ;;  %19691 = vst [vmem:[#allocation28_spill] sm:$0xff] %v17382_v35  ;;  %v17385_v52 = vpop.eup %14082 }
 0x349   : > { %v12520_v22 = vadd.f32 -3.8918202, %v2367_v42  ;;  %8981 = vperm.xlu0 %12798, %v7786_v2   ;;  %v7633_v54 = vcombine.low %v7625_v57, %v7632_v34  ;;  %v7805_v3 = vcombine.low %v5021_v50, %v5028_v44  ;;  %19692 = vst [vmem:[#allocation27_spill] sm:$0xff] %v17385_v52  ;;  %v7651_v47 = vcombine.low %v4755_v33, %v4762_v4  ;;  %v17403_v4 = vpop.permute.xlu0 %8807 }
 0x34a   : > { %v7812_v63 = vrot.slane %v7804_v7, %v15369_v38  ;;  %v7652_v25 = vcombine.low %v4769_v0, %v4776_v40  ;;  %v5063_v18 = vrot.slane %v19693_v23, %v19615_v12  ;;  %v17390_v15 = vpop.eup %14084  ;;  %v12519_v17 = vadd.f32 -3.8918202, %v2365_v24  ;;  %v19695_v24 = vld [vmem:[#allocation85_spill] sm:$0xff]  ;;  %19696 = vst [vmem:[#allocation29_spill] sm:$0xff] %v17403_v4  ;;  %v19698_v4 = vld [vmem:[#allocation43_spill] sm:$0xff] }
 0x34b   : > { %19694 = vst [vmem:[#allocation30_spill] sm:$0xff] %v17390_v15  ;;  %8954 = vperm.xlu1 %12799, %v7633_v54   ;;  %v7819_v57 = vrot.slane %v7805_v3, %v15369_v38  ;;  %v5070_v53 = vrot.slane %v19693_v23, %v19617_v13  ;;  %v5077_v42 = vrot.slane %v19693_v23, %v19618_v28  ;;  %v12916_v3 = vld [vmem:[%s14694_s26 + $0x248] ss:$24 sps:$4 sm:$0xff]   ;;  %14096 = vpow2.f32 %v2873_v19 }
 0x34c   : > { %v14087_v50 = vpop.eup %14086  ;;  %v7659_v2 = vrot.slane %v7651_v47, %v15369_v38  ;;  %v7666_v34 = vrot.slane %v7652_v25, %v15369_v38  ;;  %v5084_v44 = vrot.slane %v19693_v23, %v15308_v10  ;;  %v4811_v33 = vrot.slane %v19695_v24, %v19615_v12  ;;  %12002 = vmatpush2.bf16.msra.mxu0 %v12910_v37 }
 0x34d   : > { %v7820_v7 = vcombine.low %v7812_v63, %v7819_v57  ;;  %v7838_v0 = vcombine.low %v5063_v18, %v5070_v53  ;;  %v4818_v40 = vrot.slane %v19695_v24, %v19617_v13  ;;  %v4825_v54 = vrot.slane %v19695_v24, %v19618_v28  ;;  %12003 = vmatprep.subr.bf16.mxu0 %v12918_v45  ;;  %v17410_v25 = vpop.eup %14088  ;;  %v12924_v63 = vld [vmem:[%s14694_s26 + $0x21c] ss:$24 sps:$4 sm:$0xff]   ;;  %v17419_v45 = vpop.permute.xlu1 %8792 }
 0x34e   : > { %19697 = vst [vmem:[#allocation33_spill] sm:$0xff] %v17410_v25  ;;  %v7667_v23 = vcombine.low %v7659_v2, %v7666_v34  ;;  %v7839_v47 = vcombine.low %v5077_v42, %v5084_v44  ;;  %v4832_v37 = vrot.slane %v19695_v24, %v15308_v10  ;;  %v2626_v57 = vmul.f32 %v12520_v22, %v19664_v1 }
 0x34f   : > { %8987 = vperm.xlu0 %12798, %v7820_v7   ;;  %v7846_v18 = vrot.slane %v7838_v0, %v15369_v38  ;;  %v7685_v53 = vcombine.low %v4811_v33, %v4818_v40  ;;  %v5119_v35 = vrot.slane %v19698_v4, %v19615_v12  ;;  %19699 = vst [vmem:[#allocation32_spill] sm:$0xff] %v17419_v45  ;;  %v17421_v21 = vpop.eup %14090  ;;  %v2371_v19 = vmul.f32 0.6931472, %v14087_v50  ;;  %v19701_v7 = vld [vmem:[#allocation87_spill] sm:$0xff] }
 0x350   : > { %19700 = vst [vmem:[#allocation76_spill] sm:$0xff] %v17421_v21  ;;  %8960 = vperm.xlu1 %12799, %v7667_v23   ;;  %v7853_v42 = vrot.slane %v7839_v47, %v15369_v38  ;;  %v7686_v2 = vcombine.low %v4825_v54, %v4832_v37  ;;  %v5126_v22 = vrot.slane %v19698_v4, %v19617_v13  ;;  %v12922_v0 = vld [vmem:[%s14694_s26 + $0x218] ss:$24 sps:$4 sm:$0xff]  }
 0x351   : > { %v14093_v34 = vpop.eup %14092  ;;  %v7693_v44 = vrot.slane %v7685_v53, %v15369_v38  ;;  %v5133_v24 = vrot.slane %v19698_v4, %v19618_v28  ;;  %v5140_v33 = vrot.slane %v19698_v4, %v15308_v10  ;;  %v4867_v50 = vrot.slane %v19701_v7, %v19615_v12  ;;  %12004 = vmatpush2.bf16.msra.mxu0 %v12916_v3  ;;  %v17438_v53 = vpop.permute.xlu0 %8813 }
 0x352   : > { %v7854_v40 = vcombine.low %v7846_v18, %v7853_v42  ;;  %v7700_v54 = vrot.slane %v7686_v2, %v15369_v38  ;;  %v7872_v23 = vcombine.low %v5119_v35, %v5126_v22  ;;  %v4874_v47 = vrot.slane %v19701_v7, %v19617_v13  ;;  %12005 = vmatprep.subr.bf16.mxu0 %v12924_v63 }
 0x353   : > { %v2625_v37 = vmul.f32 %v12519_v17, %v19664_v1  ;;  %19702 = vst [vmem:[#allocation69_spill] sm:$0xff] %v17438_v53  ;;  %v7873_v45 = vcombine.low %v5133_v24, %v5140_v33  ;;  %v4881_v4 = vrot.slane %v19701_v7, %v19618_v28  ;;  %v4888_v3 = vrot.slane %v19701_v7, %v15308_v10  ;;  %v19703_v24 = vld [vmem:[#allocation51_spill] sm:$0xff]  ;;  %v17449_v53 = vpop.permute.xlu1 %8795 }
 0x354   : > { %v12522_v18 = vadd.f32 -3.8918202, %v2371_v19  ;;  %8993 = vperm.xlu0 %12798, %v7854_v40   ;;  %v7701_v35 = vcombine.low %v7693_v44, %v7700_v54  ;;  %v7880_v42 = vrot.slane %v7872_v23, %v15369_v38  ;;  %v7719_v2 = vcombine.low %v4867_v50, %v4874_v47  ;;  %19704 = vst [vmem:[#allocation78_spill] sm:$0xff] %v17449_v53  ;;  %v12928_v7 = vld [vmem:[%s14694_s26 + $0x1e8] ss:$24 sps:$4 sm:$0xff]  }
 0x355   : > { %v2369_v63 = vmul.f32 0.6931472, %v14093_v34  ;;  %v7887_v17 = vrot.slane %v7873_v45, %v15369_v38  ;;  %v7720_v22 = vcombine.low %v4881_v4, %v4888_v3  ;;  %v5175_v33 = vrot.slane %v19703_v24, %v19615_v12  ;;  %12006 = vmatpush2.bf16.msra.mxu0 %v12922_v0  ;;  %v17451_v16 = vpop.eup %14094  ;;  %v19706_v0 = vld [vmem:[#allocation89_spill] sm:$0xff] }
 0x356   : > { %19705 = vst [vmem:[#allocation71_spill] sm:$0xff] %v17451_v16  ;;  %8966 = vperm.xlu1 %12799, %v7701_v35   ;;  %v7727_v19 = vrot.slane %v7719_v2, %v15369_v38  ;;  %v5182_v44 = vrot.slane %v19703_v24, %v19617_v13  ;;  %v5189_v34 = vrot.slane %v19703_v24, %v19618_v28  ;;  %v12936_v2 = vld [vmem:[%s14694_s26 + $0x1bc] ss:$24 sps:$4 sm:$0xff]  }
 0x357   : > { %v5196_v45 = vrot.slane %v19703_v24, %v15308_v10  ;;  %v7888_v50 = vcombine.low %v7880_v42, %v7887_v17  ;;  %v7734_v40 = vrot.slane %v7720_v22, %v15369_v38  ;;  %v4923_v54 = vrot.slane %v19706_v0, %v19615_v12  ;;  %12007 = vmatprep.subr.bf16.mxu0 %v12930_v51  ;;  %v17472_v22 = vpop.permute.xlu0 %8819 }
 0x358   : > { %v4930_v23 = vrot.slane %v19706_v0, %v19617_v13  ;;  %v7906_v47 = vcombine.low %v5175_v33, %v5182_v44  ;;  %v4937_v3 = vrot.slane %v19706_v0, %v19618_v28  ;;  %v4944_v35 = vrot.slane %v19706_v0, %v15308_v10  ;;  %19707 = vst [vmem:[#allocation80_spill] sm:$0xff] %v17472_v22  ;;  %v17478_v0 = vpop.eup %14096 }
 0x359   : > { %v7907_v4 = vcombine.low %v5189_v34, %v5196_v45  ;;  %v2879_v24 = vmul.f32 1.442695, %v2626_v57  ;;  %v2628_v42 = vmul.f32 %v12522_v18, %v19664_v1  ;;  %8999 = vperm.xlu0 %12798, %v7888_v50   ;;  %v7735_v17 = vcombine.low %v7727_v19, %v7734_v40  ;;  %v19708_v34 = vld [vmem:[#allocation94_spill] sm:$0xff]  ;;  %12008 = vmatpush2.bf16.msra.mxu0 %v12928_v7  ;;  %v17485_v40 = vpop.permute.xlu1 %8798 }
 0x35a   : > { %v7753_v53 = vcombine.low %v4923_v54, %v4930_v23  ;;  %v7914_v51 = vrot.slane %v7906_v47, %v15369_v38  ;;  %v7754_v44 = vcombine.low %v4937_v3, %v4944_v35  ;;  %v5231_v45 = vrot.slane %v19708_v34, %v19615_v12  ;;  %19709 = vst [vmem:[#allocation37_spill] sm:$0xff] %v17478_v0  ;;  %v12934_v54 = vld [vmem:[%s14694_s26 + $0x1b8] ss:$24 sps:$4 sm:$0xff]  }
 0x35b   : > { %v7921_v33 = vrot.slane %v7907_v4, %v15369_v38  ;;  %v12521_v57 = vadd.f32 -3.8918202, %v2369_v63  ;;  %8972 = vperm.xlu1 %12799, %v7735_v17   ;;  %v5238_v19 = vrot.slane %v19708_v34, %v19617_v13  ;;  %v5245_v50 = vrot.slane %v19708_v34, %v19618_v28  ;;  %19710 = vst [vmem:[#allocation117_spill] sm:$0xff] %v17485_v40  ;;  %v19711_v63 = vld [vmem:[#allocation39_spill] sm:$0xff]  ;;  %v17500_v40 = vpop.permute.xlu0 %8825 }
 0x35c   : > { %v7761_v18 = vrot.slane %v7753_v53, %v15369_v38  ;;  %v7768_v47 = vrot.slane %v7754_v44, %v15369_v38  ;;  %v5252_v7 = vrot.slane %v19708_v34, %v15308_v10  ;;  %v4979_v4 = vrot.slane %v19711_v63, %v19615_v12  ;;  %12009 = vmatprep.subr.bf16.mxu0 %v12936_v2 }
 0x35d   : > { %v7922_v23 = vcombine.low %v7914_v51, %v7921_v33  ;;  %v7940_v53 = vcombine.low %v5231_v45, %v5238_v19  ;;  %v4986_v3 = vrot.slane %v19711_v63, %v19617_v13  ;;  %v4993_v35 = vrot.slane %v19711_v63, %v19618_v28  ;;  %v12942_v51 = vld [vmem:[%s14694_s26 + $0x18c] ss:$24 sps:$4 sm:$0xff]   ;;  %19712 = vst [vmem:[#allocation73_spill] sm:$0xff] %v17500_v40 }
 0x35e   : > { %v5000_v17 = vrot.slane %v19711_v63, %v15308_v10  ;;  %v2877_v33 = vmul.f32 1.442695, %v2625_v37  ;;  %v2883_v44 = vmul.f32 1.442695, %v2628_v42  ;;  %v7769_v34 = vcombine.low %v7761_v18, %v7768_v47  ;;  %12010 = vmatpush2.bf16.msra.mxu0 %v12934_v54  ;;  %v19714_v47 = vld [vmem:[#allocation92_spill] sm:$0xff] }
 0x35f   : > { %9005 = vperm.xlu0 %12798, %v7922_v23   ;;  %v7941_v22 = vcombine.low %v5245_v50, %v5252_v7  ;;  %v7948_v2 = vrot.slane %v7940_v53, %v15369_v38  ;;  %v7787_v45 = vcombine.low %v4979_v4, %v4986_v3  ;;  %v5287_v60 = vrot.slane %v19713_v32, %v19615_v12  ;;  %v17518_v7 = vpop.permute.xlu1 %8804 }
 0x360   : > { %v7788_v19 = vcombine.low %v4993_v35, %v5000_v17  ;;  %v2627_v11 = vmul.f32 %v12521_v57, %v19664_v1  ;;  %8978 = vperm.xlu1 %12799, %v7769_v34   ;;  %v5294_v42 = vrot.slane %v19713_v32, %v19617_v13  ;;  %v5301_v18 = vrot.slane %v19713_v32, %v19618_v28  ;;  %v12949_v17 = vld [vmem:[%s14694_s26 + $0x164] ss:$24 sps:$4 sm:$0xff]  }
 0x361   : > { %v7955_v37 = vrot.slane %v7941_v22, %v15369_v38  ;;  %v7795_v50 = vrot.slane %v7787_v45, %v15369_v38  ;;  %v5308_v54 = vrot.slane %v19713_v32, %v15308_v10  ;;  %v5035_v57 = vrot.slane %v19714_v47, %v19615_v12  ;;  %19715 = vst [vmem:[#allocation120_spill] sm:$0xff] %v17518_v7  ;;  %v17529_v45 = vpop.permute.xlu0 %8831 }
 0x362   : > { %v7802_v23 = vrot.slane %v7788_v19, %v15369_v38  ;;  %12011 = vmatprep.subr.bf16.mxu0 %v12942_v51  ;;  %v7974_v63 = vcombine.low %v5287_v60, %v5294_v42  ;;  %v5042_v4 = vrot.slane %v19714_v47, %v19617_v13  ;;  %v5049_v53 = vrot.slane %v19714_v47, %v19618_v28 }
 0x363   : > { %v7956_v22 = vcombine.low %v7948_v2, %v7955_v37  ;;  %14098 = vpow2.f32 %v2879_v24  ;;  %v7975_v35 = vcombine.low %v5301_v18, %v5308_v54  ;;  %v5056_v32 = vrot.slane %v19714_v47, %v15308_v10  ;;  %12012 = vmatpush2.bf16.msra.mxu0 %v12940_v49  ;;  %v12947_v2 = vld [vmem:[%s14694_s26 + $0x160] ss:$24 sps:$4 sm:$0xff]   ;;  %19716 = vst [vmem:[#allocation122_spill] sm:$0xff] %v17529_v45  ;;  %v19717_v37 = vld [vmem:[#allocation49_spill] sm:$0xff] }
 0x364   : > { %v7803_v3 = vcombine.low %v7795_v50, %v7802_v23  ;;  %14100 = vpow2.f32 %v2877_v33  ;;  %v2881_v34 = vmul.f32 1.442695, %v2627_v11  ;;  %v7982_v51 = vrot.slane %v7974_v63, %v15369_v38  ;;  %v19718_v47 = vld [vmem:[#allocation93_spill] sm:$0xff]  ;;  %12063 = vmatprep.subr.bf16.mxu0 %v12949_v17 }
 0x365   : > { %9011 = vperm.xlu0 %12798, %v7956_v22   ;;  %v7821_v60 = vcombine.low %v5035_v57, %v5042_v4  ;;  %v7989_v19 = vrot.slane %v7975_v35, %v15369_v38  ;;  %v7822_v24 = vcombine.low %v5049_v53, %v5056_v32  ;;  %v5343_v42 = vrot.slane %v19717_v37, %v19615_v12  ;;  %v19720_v35 = vld [vmem:[#allocation111_spill] sm:$0xff]  ;;  %v12991_v45 = vld [vmem:[%s14694_s26 + $0x14] ss:$24 sps:$4 sm:$0xff]  }
 0x366   : > { %8984 = vperm.xlu1 %12799, %v7803_v3   ;;  %v5350_v49 = vrot.slane %v19717_v37, %v19617_v13  ;;  %14102 = vpow2.f32 %v2883_v44  ;;  %v5357_v33 = vrot.slane %v19717_v37, %v19618_v28  ;;  %v5364_v18 = vrot.slane %v19717_v37, %v15308_v10  ;;  %12014 = vmatmul.mubr.bf16.vlgmr.msra.gmra.mxu0 %v17180_v30  ;;  %v17545_v44 = vpop.permute.xlu1 %8810  ;;  %v12955_v3 = vld [vmem:[%s14694_s26 + $0x134] ss:$24 sps:$4 sm:$0xff]  }
 0x367   : > { %v7829_v11 = vrot.slane %v7821_v60, %v15369_v38  ;;  %v7990_v50 = vcombine.low %v7982_v51, %v7989_v19  ;;  %v7836_v23 = vrot.slane %v7822_v24, %v15369_v38  ;;  %v5091_v57 = vrot.slane %v19718_v47, %v19615_v12  ;;  %19719 = vst [vmem:[#allocation16_spill] sm:$0xff] %v17545_v44  ;;  %v12953_v60 = vld [vmem:[%s14694_s26 + $0x130] ss:$24 sps:$4 sm:$0xff]  }
 0x368   : > { %v8008_v54 = vcombine.low %v5343_v42, %v5350_v49  ;;  %v8009_v22 = vcombine.low %v5357_v33, %v5364_v18  ;;  %v5098_v63 = vrot.slane %v19718_v47, %v19617_v13  ;;  %v5105_v4 = vrot.slane %v19718_v47, %v19618_v28  ;;  %12064 = vmatpush1.bf16.msra.mxu0 %v12947_v2  ;;  %v19721_v19 = vld [vmem:[#allocation113_spill] sm:$0xff]  ;;  %v19722_v2 = vld [vmem:[#allocation114_spill] sm:$0xff] }
 0x369   : > { %v5112_v53 = vrot.slane %v19718_v47, %v15308_v10  ;;  %v2609_v32 = vmul.f32 %v19720_v35, %v19664_v1  ;;  %14104 = vpow2.f32 %v2881_v34  ;;  %9017 = vperm.xlu0 %12798, %v7990_v50   ;;  %v7837_v51 = vcombine.low %v7829_v11, %v7836_v23  ;;  %12095 = vmatprep.mubr.bf16.mxu0 %v19659_v55  ;;  %v17564_v34 = vpop.permute.xlu0 %8837  ;;  %v19724_v11 = vld [vmem:[#allocation98_spill] sm:$0xff] }
 0x36a   : > { %v8016_v17 = vrot.slane %v8008_v54, %v15369_v38  ;;  %v2612_v24 = vmul.f32 %v19721_v19, %v19664_v1  ;;  %v8023_v37 = vrot.slane %v8009_v22, %v15369_v38  ;;  %v7855_v42 = vcombine.low %v5091_v57, %v5098_v63  ;;  %19723 = vst [vmem:[#allocation82_spill] sm:$0xff] %v17564_v34  ;;  %v12961_v54 = vld [vmem:[%s14694_s26 + $0x104] ss:$24 sps:$4 sm:$0xff]   ;;  %v19725_v63 = vld [vmem:[#allocation45_spill] sm:$0xff] }
 0x36b   : > { %v7856_v49 = vcombine.low %v5105_v4, %v5112_v53  ;;  %v2611_v33 = vmul.f32 %v19722_v2, %v19664_v1  ;;  %8990 = vperm.xlu1 %12799, %v7837_v51   ;;  %v5399_v18 = vrot.slane %v19724_v11, %v19615_v12  ;;  %v5406_v50 = vrot.slane %v19724_v11, %v19617_v13  ;;  %v17583_v51 = vpop.permute.xlu1 %8816 }
 0x36c   : > { %v5413_v23 = vrot.slane %v19724_v11, %v19618_v28  ;;  %v8024_v47 = vcombine.low %v8016_v17, %v8023_v37  ;;  %v7863_v55 = vrot.slane %v7855_v42, %v15369_v38  ;;  %v5420_v57 = vrot.slane %v19724_v11, %v15308_v10  ;;  %12065 = vmatprep.subr.bf16.mxu0 %v12955_v3  ;;  %v12959_v17 = vld [vmem:[%s14694_s26 + $0x100] ss:$24 sps:$4 sm:$0xff]  }
 0x36d   : > { %v7870_v1 = vrot.slane %v7856_v49, %v15369_v38  ;;  %v8042_v22 = vcombine.low %v5399_v18, %v5406_v50  ;;  %v5147_v4 = vrot.slane %v19725_v63, %v19615_v12  ;;  %v5154_v53 = vrot.slane %v19725_v63, %v19617_v13  ;;  %19726 = vst [vmem:[#allocation44_spill] sm:$0xff] %v17583_v51  ;;  %v12967_v49 = vld [vmem:[%s14694_s26 + $0xd4] ss:$24 sps:$4 sm:$0xff]  }
 0x36e   : > { %v5161_v35 = vrot.slane %v19725_v63, %v19618_v28  ;;  %12066 = vmatpush1.bf16.msra.mxu0 %v12953_v60  ;;  %v2845_v19 = vmul.f32 1.442695, %v2609_v32  ;;  %9023 = vperm.xlu0 %12798, %v8024_v47   ;;  %v8043_v42 = vcombine.low %v5413_v23, %v5420_v57  ;;  %v5168_v3 = vrot.slane %v19725_v63, %v15308_v10  ;;  %v19728_v47 = vld [vmem:[#allocation50_spill] sm:$0xff] }
 0x36f   : > { %v7871_v37 = vcombine.low %v7863_v55, %v7870_v1  ;;  %v2851_v2 = vmul.f32 1.442695, %v2612_v24  ;;  %v2849_v11 = vmul.f32 1.442695, %v2611_v33  ;;  %v8050_v18 = vrot.slane %v8042_v22, %v15369_v38  ;;  %12067 = vmatprep.subr.bf16.mxu0 %v12961_v54  ;;  %v19730_v24 = vld [vmem:[#allocation112_spill] sm:$0xff]  ;;  %v17600_v33 = vpop.permute.xlu0 %8843 }
 0x370   : > { %v7889_v50 = vcombine.low %v5147_v4, %v5154_v53  ;;  %v17590_v44 = vpop.eup %14098  ;;  %v8057_v60 = vrot.slane %v8043_v42, %v15369_v38  ;;  %v7890_v32 = vcombine.low %v5161_v35, %v5168_v3  ;;  %v5455_v23 = vrot.slane %v19728_v47, %v19615_v12  ;;  %19731 = vst [vmem:[#allocation46_spill] sm:$0xff] %v17600_v33  ;;  %v12965_v63 = vld [vmem:[%s14694_s26 + $0xd0] ss:$24 sps:$4 sm:$0xff]   ;;  %v17611_v3 = vpop.permute.xlu1 %8822  ;;  %v12983_v33 = vld [vmem:[%s14694_s26 + $0x40] ss:$24 sps:$4 sm:$0xff]  }
 0x371   : > { %19727 = vst [vmem:[#allocation75_spill] sm:$0xff] %v17590_v44  ;;  %8996 = vperm.xlu1 %12799, %v7871_v37   ;;  %v5462_v55 = vrot.slane %v19728_v47, %v19617_v13  ;;  %v17597_v1 = vpop.eup %14100  ;;  %14106 = vpow2.f32 %v19730_v24  ;;  %v5469_v57 = vrot.slane %v19728_v47, %v19618_v28  ;;  %v5476_v22 = vrot.slane %v19728_v47, %v15308_v10  ;;  %v12971_v24 = vld [vmem:[%s14694_s26 + $0xa0] ss:$24 sps:$4 sm:$0xff]  }
 0x372   : > { %19729 = vst [vmem:[#allocation115_spill] sm:$0xff] %v17597_v1  ;;  %v7897_v54 = vrot.slane %v7889_v50, %v15369_v38  ;;  %12068 = vmatpush1.bf16.msra.mxu0 %v12959_v17  ;;  %14108 = vpow2.f32 %v2845_v19  ;;  %v8058_v4 = vcombine.low %v8050_v18, %v8057_v60  ;;  %v7904_v53 = vrot.slane %v7890_v32, %v15369_v38  ;;  %v12973_v50 = vld [vmem:[%s14694_s26 + $0xa4] ss:$24 sps:$4 sm:$0xff]   ;;  %v19735_v60 = vld [vmem:[#allocation70_spill] sm:$0xff] }
 0x373   : > { %v8076_v35 = vcombine.low %v5455_v23, %v5462_v55  ;;  %12069 = vmatprep.subr.bf16.mxu0 %v12967_v49  ;;  %v17609_v37 = vpop.eup %14102  ;;  %14110 = vpow2.f32 %v2851_v2  ;;  %v8077_v42 = vcombine.low %v5469_v57, %v5476_v22  ;;  %19733 = vst [vmem:[#allocation84_spill] sm:$0xff] %v17611_v3  ;;  %v19734_v19 = vld [vmem:[#allocation68_spill] sm:$0xff]  ;;  %v17622_v32 = vpack.c.bf16 %v19735_v60, %v19657_v8  ;;  %v12979_v57 = vld [vmem:[%s14694_s26 + $0x74] ss:$24 sps:$4 sm:$0xff]   ;;  %v17652_v22 = vpop.permute.xlu0 %8849 }
 0x374   : > { %19732 = vst [vmem:[#allocation116_spill] sm:$0xff] %v17609_v37  ;;  %14112 = vpow2.f32 %v2849_v11  ;;  %9029 = vperm.xlu0 %12798, %v8058_v4   ;;  %v7905_v47 = vcombine.low %v7897_v54, %v7904_v53  ;;  %v17617_v18 = vpack.c.bf16 %v19734_v19, %v19655_v6  ;;  %v19736_v2 = vld [vmem:[#allocation72_spill] sm:$0xff]  ;;  %v19737_v11 = vld [vmem:[#allocation74_spill] sm:$0xff]  ;;  %v17637_v6 = vpack.c.bf16 %v19654_v5, %v19673_v29 }
 0x375   : > { %v8084_v17 = vrot.slane %v8076_v35, %v15369_v38  ;;  %v8091_v49 = vrot.slane %v8077_v42, %v15369_v38  ;;  %v17626_v23 = vpack.c.bf16 %v19736_v2, %v19661_v56  ;;  %v17630_v55 = vpack.c.bf16 %v19737_v11, %v19667_v36  ;;  %19739 = vst [vmem:[#allocation86_spill] sm:$0xff] %v17652_v22  ;;  %v17689_v42 = vpop.permute.xlu1 %8828  ;;  %v12985_v60 = vld [vmem:[%s14694_s26 + $0x44] ss:$24 sps:$4 sm:$0xff]  }
 0x376   : > { %12070 = vmatpush1.bf16.msra.mxu0 %v12965_v63  ;;  %v17633_v54 = vpop.eup %14104  ;;  %9002 = vperm.xlu1 %12799, %v7905_v47   ;;  %v17641_v8 = vpack.c.bf16 %v19656_v39, %v19679_v27  ;;  %v17645_v56 = vpack.c.bf16 %v19658_v43, %v19686_v48  ;;  %v17649_v36 = vpack.c.bf16 %v19665_v41, %v19690_v31  ;;  %v10215_v4 = vunpack.c.l.b16 %v17617_v18 }
 0x377   : > { %19738 = vst [vmem:[#allocation77_spill] sm:$0xff] %v17633_v54  ;;  %v8092_v63 = vcombine.low %v8084_v17, %v8091_v49  ;;  %v17656_v5 = vpack.c.bf16 %v17296_v14, %v17302_v61  ;;  %v17660_v39 = vpack.c.bf16 %v17308_v20, %v17323_v26  ;;  %v17664_v43 = vpack.c.bf16 %v17328_v58, %v17335_v59  ;;  %v12989_v58 = vld [vmem:[%s14694_s26 + $0x10] ss:$24 sps:$4 sm:$0xff]   ;;  %v12997_v20 = vld [vmem:[%s14694_s26 + $0x2e4] ss:$24 sps:$4 sm:$0xff]  }
 0x378   : > { %12071 = vmatprep.subr.bf16.mxu0 %v12973_v50  ;;  %v17668_v41 = vpack.c.bf16 %v17385_v52, %v17390_v15  ;;  %v17672_v29 = vpack.c.bf16 %v17410_v25, %v17421_v21  ;;  %v17676_v27 = vpack.c.bf16 %v17451_v16, %v17478_v0  ;;  %v17680_v48 = vpack.c.bf16 %v17590_v44, %v17597_v1  ;;  %v12977_v50 = vld [vmem:[%s14694_s26 + $0x70] ss:$24 sps:$4 sm:$0xff]  }
 0x379   : > { %9035 = vperm.xlu0 %12798, %v8092_v63   ;;  %v17684_v31 = vpack.c.bf16 %v17609_v37, %v17633_v54  ;;  %v10216_v53 = vunpack.c.h.b16 %v17617_v18  ;;  %v10217_v35 = vunpack.c.l.b16 %v17622_v32  ;;  %19740 = vst [vmem:[#allocation79_spill] sm:$0xff] %v17689_v42  ;;  %v10218_v47 = vunpack.c.h.b16 %v17622_v32  ;;  %v19747_v42 = vld [vmem:[#allocation123_spill] sm:$0xff]  ;;  %v19749_v1 = vld [vmem:[#allocation125_spill] sm:$0xff] }
 0x37a   : > { %12072 = vmatpush1.bf16.msra.mxu0 %v12971_v24  ;;  %v10219_v17 = vunpack.c.l.b16 %v17626_v23  ;;  %v10220_v19 = vunpack.c.h.b16 %v17626_v23  ;;  %v10221_v49 = vunpack.c.l.b16 %v17630_v55  ;;  %v10222_v2 = vunpack.c.h.b16 %v17630_v55 }
 0x37b   : > { %12073 = vmatprep.subr.bf16.mxu0 %v12979_v57  ;;  %v10223_v18 = vunpack.c.l.b16 %v17637_v6  ;;  %v10224_v11 = vunpack.c.h.b16 %v17637_v6  ;;  %v10225_v24 = vunpack.c.l.b16 %v17641_v8  ;;  %v10226_v63 = vunpack.c.h.b16 %v17641_v8  ;;  %v17709_v6 = vpop.permute.xlu0 %8855 }
 0x37c   : > { %v10227_v32 = vunpack.c.l.b16 %v17645_v56  ;;  %v10279_v22 = vunpack.c.l.b16 %v17656_v5  ;;  %v10280_v55 = vunpack.c.h.b16 %v17656_v5  ;;  %v10281_v7 = vunpack.c.l.b16 %v17660_v39  ;;  %19741 = vst [vmem:[#allocation88_spill] sm:$0xff] %v17709_v6 }
 0x37d   : > { %v10282_v34 = vunpack.c.h.b16 %v17660_v39  ;;  %v10283_v23 = vunpack.c.l.b16 %v17664_v43  ;;  %v10284_v51 = vunpack.c.h.b16 %v17664_v43  ;;  %v10285_v57 = vunpack.c.l.b16 %v17668_v41  ;;  %v17725_v39 = vpop.permute.xlu1 %8834 }
 0x37e   : > { %12074 = vmatpush1.bf16.msra.mxu0 %v12977_v50  ;;  %v17712_v8 = vpop.eup %14106  ;;  %v10286_v5 = vunpack.c.h.b16 %v17668_v41  ;;  %v10287_v50 = vunpack.c.l.b16 %v17672_v29  ;;  %v10288_v6 = vunpack.c.h.b16 %v17672_v29  ;;  %19744 = vst [vmem:[#allocation83_spill] sm:$0xff] %v17725_v39  ;;  %v10539_v37 = vrot.slane %v10216_v53, %v16731_v9  ;;  %v19748_v39 = vld [vmem:[#allocation124_spill] sm:$0xff]  ;;  %v19750_v29 = vld [vmem:[#allocation127_spill] sm:$0xff] }
 0x37f   : > { %19742 = vst [vmem:[#allocation81_spill] sm:$0xff] %v17712_v8  ;;  %12075 = vmatprep.subr.bf16.mxu0 %v12985_v60  ;;  %v17719_v40 = vpop.eup %14108  ;;  %v10535_v60 = vrot.slane %v10215_v4, %v16720_v46  ;;  %v10544_v41 = vrot.slane %v10217_v35, %v16748_v62  ;;  %v10549_v52 = vrot.slane %v10218_v47, %v19747_v42  ;;  %v19751_v47 = vld [vmem:[#allocation128_spill] sm:$0xff]  ;;  %v17749_v0 = vpop.permute.xlu0 %8861  ;;  %v19754_v4 = vld [vmem:[#allocation131_spill] sm:$0xff] }
 0x380   : > { %19743 = vst [vmem:[#allocation90_spill] sm:$0xff] %v17719_v40  ;;  %v17727_v3 = vpop.eup %14110  ;;  %v10554_v44 = vrot.slane %v10219_v17, %v19748_v39  ;;  %v10559_v35 = vrot.slane %v10220_v19, %v19749_v1  ;;  %v10564_v16 = vrot.slane %v10221_v49, %v19750_v29  ;;  %v10569_v14 = vrot.slane %v10222_v2, %v19751_v47  ;;  %v19752_v17 = vld [vmem:[#allocation129_spill] sm:$0xff] }
 0x381   : > { %19745 = vst [vmem:[#allocation91_spill] sm:$0xff] %v17727_v3  ;;  %v17733_v25 = vpop.eup %14112  ;;  %v10540_v53 = vsel %vm9168_vm1, %v10539_v37, %v10535_v60  ;;  %19753 = vst [vmem:[#allocation43_spill] sm:$0xff] %v17749_v0  ;;  %v10579_v37 = vrot.slane %v10224_v11, %v19754_v4  ;;  %v19755_v60 = vld [vmem:[#allocation132_spill] sm:$0xff]  ;;  %v10855_v49 = vrot.slane %v10280_v55, %v16731_v9 }
 0x382   : > { %19746 = vst [vmem:[#allocation85_spill] sm:$0xff] %v17733_v25  ;;  %12076 = vmatpush1.bf16.msra.mxu0 %v12983_v33  ;;  %v10545_v54 = vsel %vm9175_vm2, %v10544_v41, %v10540_v53  ;;  %v10574_v33 = vrot.slane %v10223_v18, %v19752_v17  ;;  %v10584_v19 = vrot.slane %v10225_v24, %v19755_v60  ;;  %v17759_v18 = vpop.permute.xlu1 %8840  ;;  %v12995_v53 = vld [vmem:[%s14694_s26 + $0x2e0] ss:$24 sps:$4 sm:$0xff]  }
 0x383   : > { %12077 = vmatprep.subr.bf16.mxu0 %v12991_v45  ;;  %v10550_v43 = vsel %vm9182_vm3, %v10549_v52, %v10545_v54  ;;  %v19756_v45 = vld [vmem:[#allocation133_spill] sm:$0xff]  ;;  %v10851_v41 = vrot.slane %v10279_v22, %v16720_v46  ;;  %v10860_v2 = vrot.slane %v10281_v7, %v16748_v62  ;;  %19757 = vst [vmem:[#allocation87_spill] sm:$0xff] %v17759_v18  ;;  %v19758_v54 = vld [vmem:[#allocation134_spill] sm:$0xff]  ;;  %v19759_v55 = vld [vmem:[#allocation136_spill] sm:$0xff]  ;;  %v19760_v7 = vunpack.c.h.b16 %v17645_v56 }
 0x384   : > { %v10589_v21 = vrot.slane %v10226_v63, %v19756_v45  ;;  %v10555_v15 = vsel %vm9189_vm4, %v10554_v44, %v10550_v43  ;;  %v10594_v11 = vrot.slane %v10227_v32, %v19758_v54  ;;  %v10865_v24 = vrot.slane %v10282_v34, %v19747_v42  ;;  %v13003_v44 = vld [vmem:[%s14694_s26 + $0x2b4] ss:$24 sps:$4 sm:$0xff]  }
 0x385   : > { %v10560_v52 = vsel %vm9196_vm5, %v10559_v35, %v10555_v15  ;;  %v10870_v63 = vrot.slane %v10283_v23, %v19748_v39  ;;  %v10599_v43 = vrot.slane %v19760_v7, %v19759_v55  ;;  %v10875_v0 = vrot.slane %v10284_v51, %v19749_v1  ;;  %v19761_v32 = vld [vmem:[#allocation137_spill] sm:$0xff] }
 0x386   : > { %12078 = vmatpush1.bf16.msra.mxu0 %v12989_v58  ;;  %v10565_v22 = vsel %vm9203_vm6, %v10564_v16, %v10560_v52  ;;  %v10856_v58 = vsel %vm9168_vm1, %v10855_v49, %v10851_v41  ;;  %v19762_v34 = vunpack.c.l.b16 %v17649_v36  ;;  %v10880_v35 = vrot.slane %v10285_v57, %v19750_v29  ;;  %v19763_v52 = vld [vmem:[#allocation138_spill] sm:$0xff] }
 0x387   : > { %12079 = vmatprep.subr.bf16.mxu0 %v12997_v20  ;;  %v10570_v15 = vsel %vm9210_vm7, %v10569_v14, %v10565_v22  ;;  %v10861_v20 = vsel %vm9175_vm2, %v10860_v2, %v10856_v58  ;;  %v19764_v56 = vunpack.c.h.b16 %v17649_v36  ;;  %v10885_v51 = vrot.slane %v10286_v5, %v19751_v47  ;;  %v17785_v14 = vpop.permute.xlu0 %8867  ;;  %v13001_v49 = vld [vmem:[%s14694_s26 + $0x2b0] ss:$24 sps:$4 sm:$0xff]   ;;  %v13009_v36 = vld [vmem:[%s14694_s26 + $0x284] ss:$24 sps:$4 sm:$0xff]  }
 0x388   : > { %v10604_v23 = vrot.slane %v19762_v34, %v19761_v32  ;;  %v10575_v16 = vsel %vm9217_vm8, %v10574_v33, %v10570_v15  ;;  %v10866_v41 = vsel %vm9182_vm3, %v10865_v24, %v10861_v20  ;;  %19765 = vst [vmem:[#allocation51_spill] sm:$0xff] %v17785_v14  ;;  %v10890_v57 = vrot.slane %v10287_v50, %v19752_v17 }
 0x389   : > { %v10609_v7 = vrot.slane %v19764_v56, %v19763_v52  ;;  %v10580_v22 = vsel %vm9224_vm9, %v10579_v37, %v10575_v16  ;;  %v10871_v2 = vsel %vm9189_vm4, %v10870_v63, %v10866_v41  ;;  %v10895_v33 = vrot.slane %v10288_v6, %v19754_v4  ;;  %v17801_v63 = vpop.permute.xlu1 %8846 }
 0x38a   : > { %12080 = vmatpush2.bf16.msra.mxu0 %v12995_v53  ;;  %v10585_v58 = vsel %vm9231_vm10, %v10584_v19, %v10580_v22  ;;  %v10876_v24 = vsel %vm9196_vm5, %v10875_v0, %v10871_v2  ;;  %v19766_v5 = vunpack.c.l.b16 %v17676_v27  ;;  %v19767_v37 = vunpack.c.h.b16 %v17676_v27  ;;  %19768 = vst [vmem:[#allocation89_spill] sm:$0xff] %v17801_v63  ;;  %v13019_v63 = vld [vmem:[%s14694_s26 + $0x220] ss:$24 sps:$4 sm:$0xff]  }
 0x38b   : > { %12081 = vmatprep.subr.bf16.mxu0 %v13003_v44  ;;  %v10590_v6 = vsel %vm9238_vm11, %v10589_v21, %v10585_v58  ;;  %v10881_v50 = vsel %vm9203_vm6, %v10880_v35, %v10876_v24  ;;  %v19769_v44 = vld [vmem:[#allocation95_spill] sm:$0xff]  ;;  %v19770_v41 = vunpack.c.l.b16 %v17680_v48  ;;  %v19771_v24 = vunpack.c.h.b16 %v17680_v48 }
 0x38c   : > { %v10900_v53 = vrot.slane %v19766_v5, %v19755_v60  ;;  %v10905_v15 = vrot.slane %v19767_v37, %v19756_v45  ;;  %v5203_v19 = vrot.slane %v19769_v44, %v19615_v12  ;;  %v5210_v0 = vrot.slane %v19769_v44, %v19617_v13  ;;  %v13007_v21 = vld [vmem:[%s14694_s26 + $0x280] ss:$24 sps:$4 sm:$0xff]  }
 0x38d   : > { %v10595_v34 = vsel %vm9245_vm12, %v10594_v11, %v10590_v6  ;;  %v10886_v20 = vsel %vm9210_vm7, %v10885_v51, %v10881_v50  ;;  %v5217_v27 = vrot.slane %v19769_v44, %v19618_v28  ;;  %v5224_v16 = vrot.slane %v19769_v44, %v15308_v10  ;;  %v13015_v11 = vld [vmem:[%s14694_s26 + $0x254] ss:$24 sps:$4 sm:$0xff]  }
 0x38e   : > { %12082 = vmatpush2.bf16.msra.mxu0 %v13001_v49  ;;  %v10600_v35 = vsel %vm9252_vm13, %v10599_v43, %v10595_v34  ;;  %v10891_v56 = vsel %vm9217_vm8, %v10890_v57, %v10886_v20  ;;  %v10910_v22 = vrot.slane %v19770_v41, %v19758_v54  ;;  %v7923_v2 = vcombine.low %v5203_v19, %v5210_v0  ;;  %v17827_v43 = vpop.permute.xlu0 %8873  ;;  %v19775_v19 = vld [vmem:[#allocation55_spill] sm:$0xff]  ;;  %v19776_v0 = vld [vmem:[#allocation54_spill] sm:$0xff]  ;;  %v19778_v20 = vld [vmem:[#allocation57_spill] sm:$0xff] }
 0x38f   : > { %12083 = vmatprep.subr.bf16.mxu0 %v13009_v36  ;;  %v10605_v51 = vsel %vm9259_vm14, %v10604_v23, %v10600_v35  ;;  %v10896_v58 = vsel %vm9224_vm9, %v10895_v33, %v10891_v56  ;;  %v10915_v49 = vrot.slane %v19771_v24, %v19759_v55  ;;  %v7924_v5 = vcombine.low %v5217_v27, %v5224_v16  ;;  %v19779_v27 = vld [vmem:[#allocation56_spill] sm:$0xff]  ;;  %v19781_v35 = vld [vmem:[#allocation58_spill] sm:$0xff]  ;;  %v19782_v56 = vld [vmem:[#allocation61_spill] sm:$0xff] }
 0x390   : > { %19772 = vst [vmem:[#allocation94_spill] sm:$0xff] %v17827_v43  ;;  %v10610_v57 = vsel %vm9266_vm15, %v10609_v7, %v10605_v51  ;;  %v10901_v37 = vsel %vm9231_vm10, %v10900_v53, %v10896_v58  ;;  %v19773_v36 = vunpack.c.l.b16 %v17684_v31  ;;  %v7931_v23 = vrot.slane %v7923_v2, %v15369_v38  ;;  %v17844_v53 = vpop.permute.xlu1 %8852  ;;  %v19783_v41 = vld [vmem:[#allocation60_spill] sm:$0xff] }
 0x391   : > { %v10906_v33 = vsel %vm9238_vm11, %v10905_v15, %v10901_v37  ;;  %v19774_v48 = vunpack.c.h.b16 %v17684_v31  ;;  %v7938_v44 = vrot.slane %v7924_v5, %v15369_v38  ;;  %v17842_v7 = vpack.c.bf16 %v19776_v0, %v19775_v19  ;;  %19777 = vst [vmem:[#allocation39_spill] sm:$0xff] %v17844_v53  ;;  %v19780_v15 = vld [vmem:[#allocation59_spill] sm:$0xff]  ;;  %v13013_v51 = vld [vmem:[%s14694_s26 + $0x250] ss:$24 sps:$4 sm:$0xff]  }
 0x392   : > { %v10920_v6 = vrot.slane %v19773_v36, %v19761_v32  ;;  %12084 = vmatpush2.bf16.msra.mxu0 %v13007_v21  ;;  %v10911_v34 = vsel %vm9245_vm12, %v10910_v22, %v10906_v33  ;;  %v17849_v16 = vpack.c.bf16 %v19779_v27, %v19778_v20  ;;  %v17853_v31 = vpack.c.bf16 %v19781_v35, %v19780_v15  ;;  %v19784_v21 = vld [vmem:[#allocation63_spill] sm:$0xff]  ;;  %v19785_v5 = vld [vmem:[#allocation62_spill] sm:$0xff]  ;;  %v19786_v37 = vld [vmem:[#allocation65_spill] sm:$0xff] }
 0x393   : > { %v10925_v50 = vrot.slane %v19774_v48, %v19763_v52  ;;  %v17857_v2 = vpack.c.bf16 %v19783_v41, %v19782_v56  ;;  %12085 = vmatprep.subr.bf16.mxu0 %v13015_v11  ;;  %v10916_v58 = vsel %vm9252_vm13, %v10915_v49, %v10911_v34  ;;  %v7939_v24 = vcombine.low %v7931_v23, %v7938_v44  ;;  %v19787_v36 = vld [vmem:[#allocation64_spill] sm:$0xff]  ;;  %v19788_v0 = vld [vmem:[#allocation35_spill] sm:$0xff]  ;;  %v19791_v15 = vld [vmem:[#allocation66_spill] sm:$0xff] }
 0x394   : > { %v17863_v22 = vpack.c.bf16 %v19785_v5, %v19784_v21  ;;  %v17867_v33 = vpack.c.bf16 %v19787_v36, %v19786_v37  ;;  %v13021_v48 = vld [vmem:[%s14694_s26 + $0x224] ss:$24 sps:$4 sm:$0xff]   ;;  %v10921_v19 = vsel %vm9259_vm14, %v10920_v6, %v10916_v58  ;;  %v19794_v56 = vld [vmem:[#allocation110_spill] sm:$0xff]  ;;  %v19795_v41 = vld [vmem:[#allocation109_spill] sm:$0xff]  ;;  %v17909_v53 = vpack.c.bf16 %v17712_v8, %v17719_v40 }
 0x395   : > { %v19789_v20 = vld [vmem:[#allocation31_spill] sm:$0xff]  ;;  %v19792_v23 = vld [vmem:[#allocation108_spill] sm:$0xff]  ;;  %v10926_v35 = vsel %vm9266_vm15, %v10925_v50, %v10921_v19  ;;  %9008 = vperm.xlu1 %12799, %v7939_v24   ;;  %v17886_v21 = vpack.c.bf16 %v19795_v41, %v19794_v56  ;;  %v19797_v58 = vld [vmem:[#allocation118_spill] sm:$0xff]  ;;  %v10201_v8 = vunpack.c.l.b16 %v17849_v16  ;;  %v10204_v40 = vunpack.c.h.b16 %v17853_v31 }
 0x396   : > { %v17873_v27 = vpack.c.bf16 %v19789_v20, %v19788_v0  ;;  %v19790_v11 = vld [vmem:[#allocation67_spill] sm:$0xff]  ;;  %v19798_v37 = vld [vmem:[#allocation126_spill] sm:$0xff]  ;;  %v19799_v36 = vld [vmem:[#allocation121_spill] sm:$0xff]  ;;  %v17896_v20 = vpop.permute.xlu0 %8879  ;;  %12086 = vmatpush2.bf16.msra.mxu0 %v13013_v51  ;;  %v10202_v51 = vunpack.c.h.b16 %v17849_v16 }
 0x397   : > { %v17877_v49 = vpack.c.bf16 %v19791_v15, %v19790_v11  ;;  %v19793_v44 = vld [vmem:[#allocation107_spill] sm:$0xff]  ;;  %v17894_v0 = vpack.c.bf16 %v19799_v36, %v19798_v37  ;;  %19800 = vst [vmem:[#allocation47_spill] sm:$0xff] %v17896_v20  ;;  %v10930_v11 = vsel %vm9821_vm0, %v10926_v35, %v10610_v57  ;;  %v19802_v50 = vld [vmem:[#allocation130_spill] sm:$0xff]  ;;  %v19803_v19 = vld [vmem:[#allocation41_spill] sm:$0xff]  ;;  %v17916_v20 = vpack.c.bf16 %v17727_v3, %v17733_v25 }
 0x398   : > { %v17881_v34 = vpack.c.bf16 %v19793_v44, %v19792_v23  ;;  %v19796_v6 = vld [vmem:[#allocation119_spill] sm:$0xff]  ;;  %v19804_v43 = vld [vmem:[#allocation36_spill] sm:$0xff]  ;;  %v17912_v18 = vpack.c.b16 %v10930_v11, %v10930_v11  ;;  %v10199_v57 = vunpack.c.l.b16 %v17842_v7  ;;  %v10200_v35 = vunpack.c.h.b16 %v17842_v7  ;;  %12087 = vmatprep.subr.bf16.mxu0 %v13021_v48 }
 0x399   : > { %v17890_v5 = vpack.c.bf16 %v19797_v58, %v19796_v6  ;;  %v19801_v15 = vld [vmem:[#allocation135_spill] sm:$0xff]  ;;  %v17905_v14 = vpack.c.bf16 %v19804_v43, %v19803_v19  ;;  %v13027_v43 = vld [vmem:[%s14694_s26 + $0x1f4] ss:$24 sps:$4 sm:$0xff]   ;;  %v10203_v11 = vunpack.c.l.b16 %v17853_v31  ;;  %v10205_v3 = vunpack.c.l.b16 %v17857_v2  ;;  %v13025_v31 = vld [vmem:[%s14694_s26 + $0x1f0] ss:$24 sps:$4 sm:$0xff]  }
 0x39a   : > { %v17901_v24 = vpack.c.bf16 %v19802_v50, %v19801_v15  ;;  %19805 = vst [vmem:[#allocation92_spill] sm:$0xff] %v17912_v18  ;;  %v17920_v15 = vpop.permute.xlu1 %8858  ;;  %11972 = vmatprep.mubr.bf16.mxu1 %v17912_v18  ;;  %v10206_v7 = vunpack.c.h.b16 %v17857_v2  ;;  %v10208_v48 = vunpack.c.h.b16 %v17863_v22  ;;  %v10209_v25 = vunpack.c.l.b16 %v17867_v33  ;;  %12088 = vmatpush2.bf16.msra.mxu0 %v13019_v63  ;;  %v17941_v56 = vpop.permute.xlu0 %8885 }
 0x39b   : > { %19806 = vst [vmem:[#allocation49_spill] sm:$0xff] %v17920_v15  ;;  %v10207_v15 = vunpack.c.l.b16 %v17863_v22  ;;  %v10210_v19 = vunpack.c.h.b16 %v17867_v33  ;;  %v10211_v16 = vunpack.c.l.b16 %v17873_v27  ;;  %v10212_v37 = vunpack.c.h.b16 %v17873_v27  ;;  %19807 = vst [vmem:[#allocation93_spill] sm:$0xff] %v17941_v56  ;;  %12089 = vmatprep.subr.bf16.mxu0 %v13027_v43  ;;  %v13033_v22 = vld [vmem:[%s14694_s26 + $0x1c4] ss:$24 sps:$4 sm:$0xff]  }
 0x39c   : > { %v10213_v59 = vunpack.c.l.b16 %v17877_v49  ;;  %v10214_v6 = vunpack.c.h.b16 %v17877_v49  ;;  %v10263_v2 = vunpack.c.l.b16 %v17881_v34  ;;  %v10264_v26 = vunpack.c.h.b16 %v17881_v34 }
 0x39d   : > { %v10265_v33 = vunpack.c.l.b16 %v17886_v21  ;;  %v10266_v61 = vunpack.c.h.b16 %v17886_v21  ;;  %v10267_v63 = vunpack.c.l.b16 %v17890_v5  ;;  %v10268_v27 = vunpack.c.h.b16 %v17890_v5  ;;  %v13031_v5 = vld [vmem:[%s14694_s26 + $0x1c0] ss:$24 sps:$4 sm:$0xff]  }
 0x39e   : > { %v10269_v23 = vunpack.c.l.b16 %v17894_v0  ;;  %v10270_v49 = vunpack.c.h.b16 %v17894_v0  ;;  %v10271_v34 = vunpack.c.l.b16 %v17901_v24  ;;  %v10272_v56 = vunpack.c.h.b16 %v17901_v24  ;;  %v17952_v43 = vpop.permute.xlu1 %8864  ;;  %12090 = vmatpush2.bf16.msra.mxu0 %v13025_v31 }
 0x39f   : > { %19808 = vst [vmem:[#allocation111_spill] sm:$0xff] %v17952_v43  ;;  %v10273_v50 = vunpack.c.l.b16 %v17905_v14  ;;  %v10274_v36 = vunpack.c.h.b16 %v17905_v14  ;;  %v10275_v21 = vunpack.c.l.b16 %v17909_v53  ;;  %v10276_v58 = vunpack.c.h.b16 %v17909_v53  ;;  %12091 = vmatprep.subr.bf16.mxu0 %v13033_v22  ;;  %v13039_v43 = vld [vmem:[%s14694_s26 + $0x194] ss:$24 sps:$4 sm:$0xff]  }
 0x3a0   : > { %v10277_v41 = vunpack.c.l.b16 %v17916_v20  ;;  %v10456_v0 = vrot.slane %v10199_v57, %v16720_v46  ;;  %v10460_v44 = vrot.slane %v10200_v35, %v16731_v9  ;;  %v10465_v24 = vrot.slane %v10201_v8, %v16748_v62  ;;  %v17972_v8 = vpop.permute.xlu0 %8891 }
 0x3a1   : > { %v10470_v14 = vrot.slane %v10202_v51, %v19747_v42  ;;  %v10475_v38 = vrot.slane %v10203_v11, %v19748_v39  ;;  %v10480_v53 = vrot.slane %v10204_v40, %v19749_v1  ;;  %v10485_v10 = vrot.slane %v10205_v3, %v19750_v29  ;;  %19809 = vst [vmem:[#allocation113_spill] sm:$0xff] %v17972_v8  ;;  %v13037_v40 = vld [vmem:[%s14694_s26 + $0x190] ss:$24 sps:$4 sm:$0xff]  }
 0x3a2   : > { %v10461_v31 = vsel %vm9168_vm1, %v10460_v44, %v10456_v0  ;;  %v10490_v57 = vrot.slane %v10206_v7, %v19751_v47  ;;  %v10495_v35 = vrot.slane %v10207_v15, %v19752_v17  ;;  %v10500_v18 = vrot.slane %v10208_v48, %v19754_v4  ;;  %12092 = vmatpush2.bf16.msra.mxu0 %v13031_v5  ;;  %v17983_v0 = vpop.permute.xlu1 %8870 }
 0x3a3   : > { %v10466_v22 = vsel %vm9175_vm2, %v10465_v24, %v10461_v31  ;;  %v10505_v51 = vrot.slane %v10209_v25, %v19755_v60  ;;  %v10510_v11 = vrot.slane %v10210_v19, %v19756_v45  ;;  %v10515_v3 = vrot.slane %v10211_v16, %v19758_v54  ;;  %12093 = vmatprep.subr.bf16.mxu0 %v13039_v43 }
 0x3a4   : > { %v10471_v44 = vsel %vm9182_vm3, %v10470_v14, %v10466_v22  ;;  %v10520_v7 = vrot.slane %v10212_v37, %v19759_v55  ;;  %v10525_v15 = vrot.slane %v10213_v59, %v19761_v32  ;;  %v10772_v48 = vrot.slane %v10263_v2, %v16720_v46 }
 0x3a5   : > { %v10476_v24 = vsel %vm9189_vm4, %v10475_v38, %v10471_v44  ;;  %v10776_v25 = vrot.slane %v10264_v26, %v16731_v9  ;;  %v10781_v19 = vrot.slane %v10265_v33, %v16748_v62  ;;  %v10530_v14 = vrot.slane %v10214_v6, %v19763_v52 }
 0x3a6   : > { %v10481_v5 = vsel %vm9196_vm5, %v10480_v53, %v10476_v24  ;;  %v10786_v16 = vrot.slane %v10266_v61, %v19747_v42  ;;  %v10791_v37 = vrot.slane %v10267_v63, %v19748_v39  ;;  %v10796_v38 = vrot.slane %v10268_v27, %v19749_v1  ;;  %12094 = vmatpush2.bf16.msra.mxu0 %v13037_v40  ;;  %v18001_v61 = vpop.permute.xlu0 %8897  ;;  %v18011_v40 = vpop.permute.xlu1 %8876 }
 0x3a7   : > { %v10486_v59 = vsel %vm9203_vm6, %v10485_v10, %v10481_v5  ;;  %v10777_v43 = vsel %vm9168_vm1, %v10776_v25, %v10772_v48  ;;  %v10801_v2 = vrot.slane %v10269_v23, %v19750_v29  ;;  %v10806_v53 = vrot.slane %v10270_v49, %v19751_v47  ;;  %19810 = vst [vmem:[#allocation114_spill] sm:$0xff] %v18001_v61  ;;  %v19860_v61 = vld [vmem:[#allocation76_spill] sm:$0xff] }
 0x3a8   : > { %v10491_v26 = vsel %vm9210_vm7, %v10490_v57, %v10486_v59  ;;  %v10782_v33 = vsel %vm9175_vm2, %v10781_v19, %v10777_v43  ;;  %v10811_v6 = vrot.slane %v10271_v34, %v19752_v17  ;;  %v10816_v31 = vrot.slane %v10272_v56, %v19754_v4 }
 0x3a9   : > { %v10496_v63 = vsel %vm9217_vm8, %v10495_v35, %v10491_v26  ;;  %v10787_v10 = vsel %vm9182_vm3, %v10786_v16, %v10782_v33  ;;  %v10821_v27 = vrot.slane %v10273_v50, %v19755_v60  ;;  %v10826_v22 = vrot.slane %v10274_v36, %v19756_v45  ;;  %12096 = vmatmul.mubr.bf16.vlgmr.msra.gmra.mxu0 %v17180_v30  ;;  %v19811_v36 = vld [vmem:[#allocation53_spill] sm:$0xff]  ;;  %v19814_v16 = vld [vmem:[#allocation96_spill] sm:$0xff] }
 0x3aa   : > { %v10501_v23 = vsel %vm9224_vm9, %v10500_v18, %v10496_v63  ;;  %v10792_v57 = vsel %vm9189_vm4, %v10791_v37, %v10787_v10  ;;  %v10831_v49 = vrot.slane %v10275_v21, %v19758_v54  ;;  %v10836_v56 = vrot.slane %v10276_v58, %v19759_v55  ;;  %v19812_v58 = vld [vmem:[#allocation42_spill] sm:$0xff]  ;;  %v18036_v59 = vpop.permute.xlu0 %8903  ;;  %v18047_v63 = vpop.permute.xlu1 %8882 }
 0x3ab   : > { %v10506_v34 = vsel %vm9231_vm10, %v10505_v51, %v10501_v23  ;;  %v10797_v35 = vsel %vm9196_vm5, %v10796_v38, %v10792_v57  ;;  %v10841_v50 = vrot.slane %v10277_v41, %v19761_v32  ;;  %v5511_v24 = vrot.slane %v19811_v36, %v19615_v12  ;;  %19815 = vst [vmem:[#allocation98_spill] sm:$0xff] %v18036_v59 }
 0x3ac   : > { %v10511_v18 = vsel %vm9238_vm11, %v10510_v11, %v10506_v34  ;;  %v10802_v44 = vsel %vm9203_vm6, %v10801_v2, %v10797_v35  ;;  %v5518_v21 = vrot.slane %v19811_v36, %v19617_v13  ;;  %v5525_v48 = vrot.slane %v19811_v36, %v19618_v28 }
 0x3ad   : > { %v10516_v30 = vsel %vm9245_vm12, %v10515_v3, %v10511_v18  ;;  %v10807_v51 = vsel %vm9210_vm7, %v10806_v53, %v10802_v44  ;;  %v5532_v41 = vrot.slane %v19811_v36, %v19812_v58  ;;  %v19813_v25 = vunpack.c.h.b16 %v17916_v20  ;;  %v19816_v20 = vld [vmem:[#allocation48_spill] sm:$0xff] }
 0x3ae   : > { %v10812_v11 = vsel %vm9217_vm8, %v10811_v6, %v10807_v51  ;;  %v8110_v5 = vcombine.low %v5511_v24, %v5518_v21  ;;  %v5259_v37 = vrot.slane %v19814_v16, %v19615_v12  ;;  %v10521_v3 = vsel %vm9252_vm13, %v10520_v7, %v10516_v30  ;;  %v18064_v21 = vpop.permute.xlu0 %8909 }
 0x3af   : > { %v10846_v19 = vrot.slane %v19813_v25, %v19763_v52  ;;  %v10817_v43 = vsel %vm9224_vm9, %v10816_v31, %v10812_v11  ;;  %v8111_v38 = vcombine.low %v5525_v48, %v5532_v41  ;;  %v5266_v2 = vrot.slane %v19814_v16, %v19617_v13  ;;  %19818 = vst [vmem:[#allocation45_spill] sm:$0xff] %v18064_v21  ;;  %v12944_v48 = vld [vmem:[%s14694_s26 + $0x458] ss:$24 sps:$4 sm:$0xff]  }
 0x3b0   : > { %v10526_v26 = vsel %vm9259_vm14, %v10525_v15, %v10521_v3  ;;  %v10822_v33 = vsel %vm9231_vm10, %v10821_v27, %v10817_v43  ;;  %v8118_v53 = vrot.slane %v8110_v5, %v19816_v20  ;;  %v5273_v6 = vrot.slane %v19814_v16, %v19618_v28  ;;  %v19817_v15 = vld [vmem:[#allocation101_spill] sm:$0xff]  ;;  %v18078_v5 = vpop.permute.xlu1 %8888 }
 0x3b1   : > { %v10827_v10 = vsel %vm9238_vm11, %v10826_v22, %v10822_v33  ;;  %v8125_v7 = vrot.slane %v8111_v38, %v19816_v20  ;;  %v5280_v31 = vrot.slane %v19814_v16, %v19812_v58  ;;  %v7957_v23 = vcombine.low %v5259_v37, %v5266_v2  ;;  %19820 = vst [vmem:[#allocation50_spill] sm:$0xff] %v18078_v5  ;;  %v12952_v37 = vld [vmem:[%s14694_s26 + $0x42c] ss:$24 sps:$4 sm:$0xff]  }
 0x3b2   : > { %v10832_v57 = vsel %vm9245_vm12, %v10831_v49, %v10827_v10  ;;  %v5567_v27 = vrot.slane %v19817_v15, %v19615_v12  ;;  %v10531_v22 = vsel %vm9266_vm15, %v10530_v14, %v10526_v26  ;;  %v5574_v24 = vrot.slane %v19817_v15, %v19617_v13  ;;  %v19819_v14 = vld [vmem:[#allocation97_spill] sm:$0xff] }
 0x3b3   : > { %v10837_v34 = vsel %vm9252_vm13, %v10836_v56, %v10832_v57  ;;  %v8126_v35 = vcombine.low %v8118_v53, %v8125_v7  ;;  %v7958_v18 = vcombine.low %v5273_v6, %v5280_v31  ;;  %v7965_v44 = vrot.slane %v7957_v23, %v19816_v20  ;;  %v19821_v6 = vld [vmem:[#allocation92_spill] sm:$0xff]  ;;  %v19822_v31 = vld [vmem:[#allocation103_spill] sm:$0xff]  ;;  %v18093_v57 = vpop.permute.xlu0 %8915 }
 0x3b4   : > { %v10842_v36 = vsel %vm9259_vm14, %v10841_v50, %v10837_v34  ;;  %v5581_v49 = vrot.slane %v19817_v15, %v19618_v28  ;;  %v5588_v51 = vrot.slane %v19817_v15, %v19812_v58  ;;  %v5315_v50 = vrot.slane %v19819_v14, %v19615_v12  ;;  %v12950_v10 = vld [vmem:[%s14694_s26 + $0x428] ss:$24 sps:$4 sm:$0xff]   ;;  %19823 = vst [vmem:[#allocation112_spill] sm:$0xff] %v18093_v57 }
 0x3b5   : > { %v10847_v30 = vsel %vm9266_vm15, %v10846_v19, %v10842_v36  ;;  %9041 = vperm.xlu0 %12798, %v8126_v35   ;;  %v7972_v56 = vrot.slane %v7958_v18, %v19816_v20  ;;  %v8144_v11 = vcombine.low %v5567_v27, %v5574_v24  ;;  %v5322_v25 = vrot.slane %v19819_v14, %v19617_v13  ;;  %v12958_v27 = vld [vmem:[%s14694_s26 + $0x3fc] ss:$24 sps:$4 sm:$0xff]  }
 0x3b6   : > { %v10929_v41 = vsel %vm9821_vm0, %v10847_v30, %v10531_v22  ;;  %v5329_v19 = vrot.slane %v19819_v14, %v19618_v28  ;;  %v8145_v43 = vcombine.low %v5581_v49, %v5588_v51  ;;  %v5336_v38 = vrot.slane %v19819_v14, %v19812_v58  ;;  %v19824_v22 = vld [vmem:[#allocation99_spill] sm:$0xff]  ;;  %v18109_v30 = vpop.permute.xlu1 %8894 }
 0x3b7   : > { %v18080_v16 = vpack.c.b16 %v10929_v41, %v10929_v41  ;;  %v7973_v3 = vcombine.low %v7965_v44, %v7972_v56  ;;  %v8152_v2 = vrot.slane %v8144_v11, %v19816_v20  ;;  %v7991_v26 = vcombine.low %v5315_v50, %v5322_v25  ;;  %19825 = vst [vmem:[#allocation68_spill] sm:$0xff] %v18109_v30  ;;  %v12956_v50 = vld [vmem:[%s14694_s26 + $0x3f8] ss:$24 sps:$4 sm:$0xff]   ;;  %v12964_v25 = vld [vmem:[%s14694_s26 + $0x3cc] ss:$24 sps:$4 sm:$0xff]  }
 0x3b8   : > { %v8159_v33 = vrot.slane %v8145_v43, %v19816_v20  ;;  %v7992_v53 = vcombine.low %v5329_v19, %v5336_v38  ;;  %v5623_v23 = vrot.slane %v19822_v31, %v19615_v12  ;;  %v5630_v35 = vrot.slane %v19822_v31, %v19617_v13 }
 0x3b9   : > { %11973 = vmatmul.mubr.bf16.vlgmr.msra.gmra.mxu1 %v18080_v16  ;;  %9014 = vperm.xlu1 %12799, %v7973_v3   ;;  %v7999_v7 = vrot.slane %v7991_v26, %v19816_v20  ;;  %v5637_v18 = vrot.slane %v19822_v31, %v19618_v28  ;;  %v5644_v44 = vrot.slane %v19822_v31, %v19812_v58  ;;  %v18122_v26 = vpop.permute.xlu0 %8921 }
 0x3ba   : > { %12023 = vmatpush1.bf16.msra.mxu1 %v12944_v48  ;;  %12054 = vmatprep.mubr.bf16.mxu1 %v19821_v6  ;;  %v8160_v15 = vcombine.low %v8152_v2, %v8159_v33  ;;  %v8006_v34 = vrot.slane %v7992_v53, %v19816_v20  ;;  %v5371_v36 = vrot.slane %v19824_v22, %v19615_v12 }
 0x3bb   : > { %12024 = vmatprep.subr.bf16.mxu1 %v12952_v37  ;;  %v5378_v24 = vrot.slane %v19824_v22, %v19617_v13  ;;  %v5385_v49 = vrot.slane %v19824_v22, %v19618_v28  ;;  %v8178_v51 = vcombine.low %v5623_v23, %v5630_v35  ;;  %v5392_v14 = vrot.slane %v19824_v22, %v19812_v58  ;;  %v19826_v37 = vld [vmem:[#allocation105_spill] sm:$0xff] }
 0x3bc   : > { %9047 = vperm.xlu0 %12798, %v8160_v15   ;;  %v8007_v56 = vcombine.low %v7999_v7, %v8006_v34  ;;  %v8179_v48 = vcombine.low %v5637_v18, %v5644_v44  ;;  %v5679_v3 = vrot.slane %v19826_v37, %v19615_v12  ;;  %v5686_v2 = vrot.slane %v19826_v37, %v19617_v13  ;;  %v19827_v7 = vld [vmem:[#allocation52_spill] sm:$0xff]  ;;  %v18136_v18 = vpop.permute.xlu1 %8900 }
 0x3bd   : > { %v8025_v41 = vcombine.low %v5371_v36, %v5378_v24  ;;  %v8186_v11 = vrot.slane %v8178_v51, %v19816_v20  ;;  %v8026_v19 = vcombine.low %v5385_v49, %v5392_v14  ;;  %v5693_v53 = vrot.slane %v19826_v37, %v19618_v28  ;;  %v12962_v15 = vld [vmem:[%s14694_s26 + $0x3c8] ss:$24 sps:$4 sm:$0xff]   ;;  %19828 = vst [vmem:[#allocation70_spill] sm:$0xff] %v18136_v18  ;;  %v12970_v36 = vld [vmem:[%s14694_s26 + $0x39c] ss:$24 sps:$4 sm:$0xff]  }
 0x3be   : > { %12025 = vmatpush1.bf16.msra.mxu1 %v12950_v10  ;;  %9020 = vperm.xlu1 %12799, %v8007_v56   ;;  %v8193_v43 = vrot.slane %v8179_v48, %v19816_v20  ;;  %v5700_v10 = vrot.slane %v19826_v37, %v19812_v58  ;;  %v5427_v31 = vrot.slane %v19827_v7, %v19615_v12 }
 0x3bf   : > { %12026 = vmatprep.subr.bf16.mxu1 %v12958_v27  ;;  %v8033_v38 = vrot.slane %v8025_v41, %v19816_v20  ;;  %v8040_v33 = vrot.slane %v8026_v19, %v19816_v20  ;;  %v8212_v27 = vcombine.low %v5679_v3, %v5686_v2  ;;  %v5434_v34 = vrot.slane %v19827_v7, %v19617_v13  ;;  %v18153_v3 = vpop.permute.xlu0 %8927 }
 0x3c0   : > { %v8194_v23 = vcombine.low %v8186_v11, %v8193_v43  ;;  %v5441_v35 = vrot.slane %v19827_v7, %v19618_v28  ;;  %v8213_v22 = vcombine.low %v5693_v53, %v5700_v10  ;;  %v5448_v24 = vrot.slane %v19827_v7, %v19812_v58  ;;  %v12968_v11 = vld [vmem:[%s14694_s26 + $0x398] ss:$24 sps:$4 sm:$0xff]   ;;  %19830 = vst [vmem:[#allocation72_spill] sm:$0xff] %v18153_v3  ;;  %v19831_v53 = vld [vmem:[#allocation100_spill] sm:$0xff] }
 0x3c1   : > { %v8041_v44 = vcombine.low %v8033_v38, %v8040_v33  ;;  %v8220_v49 = vrot.slane %v8212_v27, %v19816_v20  ;;  %v8059_v56 = vcombine.low %v5427_v31, %v5434_v34  ;;  %v12976_v33 = vld [vmem:[%s14694_s26 + $0x36c] ss:$24 sps:$4 sm:$0xff]   ;;  %v5483_v10 = vrot.slane %v19831_v53, %v19615_v12  ;;  %v18165_v27 = vpop.permute.xlu1 %8906 }
 0x3c2   : > { %12027 = vmatpush1.bf16.msra.mxu1 %v12956_v50  ;;  %9053 = vperm.xlu0 %12798, %v8194_v23   ;;  %v8227_v51 = vrot.slane %v8213_v22, %v19816_v20  ;;  %v8060_v14 = vcombine.low %v5441_v35, %v5448_v24  ;;  %v19829_v50 = vld [vmem:[#allocation107_spill] sm:$0xff]  ;;  %v5490_v31 = vrot.slane %v19831_v53, %v19617_v13  ;;  %v19874_v3 = vld [vmem:[#allocation116_spill] sm:$0xff] }
 0x3c3   : > { %12028 = vmatprep.subr.bf16.mxu1 %v12964_v25  ;;  %9026 = vperm.xlu1 %12799, %v8041_v44   ;;  %v5735_v48 = vrot.slane %v19829_v50, %v19615_v12  ;;  %v5742_v41 = vrot.slane %v19829_v50, %v19617_v13  ;;  %v8067_v25 = vrot.slane %v8059_v56, %v19816_v20  ;;  %v12974_v22 = vld [vmem:[%s14694_s26 + $0x368] ss:$24 sps:$4 sm:$0xff]  }
 0x3c4   : > { %v5749_v19 = vrot.slane %v19829_v50, %v19618_v28  ;;  %v5756_v37 = vrot.slane %v19829_v50, %v19812_v58  ;;  %v8228_v43 = vcombine.low %v8220_v49, %v8227_v51  ;;  %v8074_v38 = vrot.slane %v8060_v14, %v19816_v20  ;;  %19832 = vst [vmem:[#allocation74_spill] sm:$0xff] %v18165_v27  ;;  %v19833_v49 = vld [vmem:[#allocation109_spill] sm:$0xff]  ;;  %v12982_v14 = vld [vmem:[%s14694_s26 + $0x33c] ss:$24 sps:$4 sm:$0xff]  }
 0x3c5   : > { %v8246_v2 = vcombine.low %v5735_v48, %v5742_v41  ;;  %v5497_v23 = vrot.slane %v19831_v53, %v19618_v28  ;;  %v5791_v56 = vrot.slane %v19833_v49, %v19615_v12  ;;  %v5798_v51 = vrot.slane %v19833_v49, %v19617_v13 }
 0x3c6   : > { %12029 = vmatpush1.bf16.msra.mxu1 %v12962_v15  ;;  %v8247_v7 = vcombine.low %v5749_v19, %v5756_v37  ;;  %v5504_v15 = vrot.slane %v19831_v53, %v19812_v58  ;;  %9059 = vperm.xlu0 %12798, %v8228_v43   ;;  %v8075_v34 = vcombine.low %v8067_v25, %v8074_v38  ;;  %v18179_v25 = vpop.permute.xlu0 %8933  ;;  %v19835_v43 = vld [vmem:[#allocation102_spill] sm:$0xff] }
 0x3c7   : > { %12030 = vmatprep.subr.bf16.mxu1 %v12970_v36  ;;  %v8254_v35 = vrot.slane %v8246_v2, %v19816_v20  ;;  %v8093_v36 = vcombine.low %v5483_v10, %v5490_v31  ;;  %19834 = vst [vmem:[#allocation123_spill] sm:$0xff] %v18179_v25  ;;  %v5812_v19 = vrot.slane %v19833_v49, %v19812_v58  ;;  %v12980_v53 = vld [vmem:[%s14694_s26 + $0x338] ss:$24 sps:$4 sm:$0xff]   ;;  %v18192_v31 = vpop.permute.xlu1 %8912 }
 0x3c8   : > { %v8261_v44 = vrot.slane %v8247_v7, %v19816_v20  ;;  %v8094_v24 = vcombine.low %v5497_v23, %v5504_v15  ;;  %9032 = vperm.xlu1 %12799, %v8075_v34   ;;  %v8280_v37 = vcombine.low %v5791_v56, %v5798_v51  ;;  %v5539_v38 = vrot.slane %v19835_v43, %v19615_v12 }
 0x3c9   : > { %v8101_v48 = vrot.slane %v8093_v36, %v19816_v20  ;;  %v5546_v2 = vrot.slane %v19835_v43, %v19617_v13  ;;  %v5553_v10 = vrot.slane %v19835_v43, %v19618_v28  ;;  %v5560_v7 = vrot.slane %v19835_v43, %v19812_v58  ;;  %19836 = vst [vmem:[#allocation124_spill] sm:$0xff] %v18192_v31  ;;  %v13018_v31 = vld [vmem:[%s14694_s26 + $0x51c] ss:$24 sps:$4 sm:$0xff]  }
 0x3ca   : > { %12031 = vmatpush1.bf16.msra.mxu1 %v12968_v11  ;;  %v8262_v50 = vcombine.low %v8254_v35, %v8261_v44  ;;  %v8108_v41 = vrot.slane %v8094_v24, %v19816_v20  ;;  %v5805_v11 = vrot.slane %v19833_v49, %v19618_v28  ;;  %v8288_v15 = vrot.slane %v8280_v37, %v19816_v20  ;;  %v12988_v35 = vld [vmem:[%s14694_s26 + $0x30c] ss:$24 sps:$4 sm:$0xff]  }
 0x3cb   : > { %12032 = vmatprep.subr.bf16.mxu1 %v12976_v33  ;;  %v8127_v34 = vcombine.low %v5539_v38, %v5546_v2  ;;  %v8128_v44 = vcombine.low %v5553_v10, %v5560_v7  ;;  %v6575_v5 = vrot.slane %v19874_v3, %v19615_v12 }
 0x3cc   : > { %9065 = vperm.xlu0 %12798, %v8262_v50   ;;  %v8109_v33 = vcombine.low %v8101_v48, %v8108_v41  ;;  %v8281_v23 = vcombine.low %v5805_v11, %v5812_v19  ;;  %v12986_v48 = vld [vmem:[%s14694_s26 + $0x308] ss:$24 sps:$4 sm:$0xff]   ;;  %v18210_v19 = vpop.permute.xlu0 %8939 }
 0x3cd   : > { %v8135_v49 = vrot.slane %v8127_v34, %v19816_v20  ;;  %v19838_v41 = vld [vmem:[#allocation104_spill] sm:$0xff]  ;;  %19839 = vst [vmem:[#allocation125_spill] sm:$0xff] %v18210_v19 }
 0x3ce   : > { %12033 = vmatpush1.bf16.msra.mxu1 %v12974_v22  ;;  %9038 = vperm.xlu1 %12799, %v8109_v33   ;;  %v19837_v22 = vld [vmem:[#allocation118_spill] sm:$0xff]  ;;  %v8295_v24 = vrot.slane %v8281_v23, %v19816_v20  ;;  %v5595_v11 = vrot.slane %v19838_v41, %v19615_v12  ;;  %v5602_v38 = vrot.slane %v19838_v41, %v19617_v13  ;;  %v18219_v23 = vpop.permute.xlu1 %8918 }
 0x3cf   : > { %12034 = vmatprep.subr.bf16.mxu1 %v12982_v14  ;;  %v5847_v36 = vrot.slane %v19837_v22, %v19615_v12  ;;  %v5854_v56 = vrot.slane %v19837_v22, %v19617_v13  ;;  %v5861_v51 = vrot.slane %v19837_v22, %v19618_v28  ;;  %v8142_v14 = vrot.slane %v8128_v44, %v19816_v20  ;;  %v12994_v33 = vld [vmem:[%s14694_s26 + $0x5dc] ss:$24 sps:$4 sm:$0xff]  }
 0x3d0   : > { %v5868_v50 = vrot.slane %v19837_v22, %v19812_v58  ;;  %v8296_v37 = vcombine.low %v8288_v15, %v8295_v24  ;;  %v5609_v2 = vrot.slane %v19838_v41, %v19618_v28  ;;  %v5616_v7 = vrot.slane %v19838_v41, %v19812_v58  ;;  %v19840_v22 = vld [vmem:[#allocation121_spill] sm:$0xff] }
 0x3d1   : > { %v8314_v43 = vcombine.low %v5847_v36, %v5854_v56  ;;  %v8161_v34 = vcombine.low %v5595_v11, %v5602_v38  ;;  %v5903_v36 = vrot.slane %v19840_v22, %v19615_v12  ;;  %v5917_v56 = vrot.slane %v19840_v22, %v19618_v28 }
 0x3d2   : > { %12035 = vmatpush1.bf16.msra.mxu1 %v12980_v53  ;;  %v8143_v53 = vcombine.low %v8135_v49, %v8142_v14  ;;  %v8315_v10 = vcombine.low %v5861_v51, %v5868_v50  ;;  %9071 = vperm.xlu0 %12798, %v8296_v37   ;;  %v8162_v44 = vcombine.low %v5609_v2, %v5616_v7  ;;  %v12992_v51 = vld [vmem:[%s14694_s26 + $0x5d8] ss:$24 sps:$4 sm:$0xff]  }
 0x3d3   : > { %12036 = vmatprep.subr.bf16.mxu1 %v12988_v35  ;;  %v8322_v15 = vrot.slane %v8314_v43, %v19816_v20  ;;  %v8169_v24 = vrot.slane %v8161_v34, %v19816_v20  ;;  %v5910_v49 = vrot.slane %v19840_v22, %v19617_v13  ;;  %v5924_v41 = vrot.slane %v19840_v22, %v19812_v58  ;;  %v19842_v37 = vld [vmem:[#allocation106_spill] sm:$0xff] }
 0x3d4   : > { %9044 = vperm.xlu1 %12799, %v8143_v53   ;;  %v8329_v35 = vrot.slane %v8315_v10, %v19816_v20  ;;  %v8176_v50 = vrot.slane %v8162_v44, %v19816_v20  ;;  %v5651_v43 = vrot.slane %v19842_v37, %v19615_v12  ;;  %v5658_v38 = vrot.slane %v19842_v37, %v19617_v13  ;;  %v19843_v44 = vld [vmem:[#allocation130_spill] sm:$0xff] }
 0x3d5   : > { %v8348_v11 = vcombine.low %v5903_v36, %v5910_v49  ;;  %v5665_v2 = vrot.slane %v19842_v37, %v19618_v28  ;;  %v8349_v10 = vcombine.low %v5917_v56, %v5924_v41  ;;  %v5672_v7 = vrot.slane %v19842_v37, %v19812_v58  ;;  %v12998_v36 = vld [vmem:[%s14694_s26 + $0x5a8] ss:$24 sps:$4 sm:$0xff]   ;;  %v13006_v37 = vld [vmem:[%s14694_s26 + $0x57c] ss:$24 sps:$4 sm:$0xff]  }
 0x3d6   : > { %12037 = vmatpush1.bf16.msra.mxu1 %v12986_v48  ;;  %v8330_v14 = vcombine.low %v8322_v15, %v8329_v35  ;;  %v18234_v48 = vpop.permute.xlu0 %8945  ;;  %v8177_v53 = vcombine.low %v8169_v24, %v8176_v50  ;;  %v18245_v15 = vpop.permute.xlu1 %8924  ;;  %v8195_v35 = vcombine.low %v5651_v43, %v5658_v38  ;;  %v5959_v22 = vrot.slane %v19843_v44, %v19615_v12  ;;  %v19844_v41 = vld [vmem:[#allocation108_spill] sm:$0xff] }
 0x3d7   : > { %12038 = vmatprep.subr.bf16.mxu1 %v12994_v33  ;;  %19841 = vst [vmem:[#allocation127_spill] sm:$0xff] %v18234_v48  ;;  %v13000_v33 = vld [vmem:[%s14694_s26 + $0x5ac] ss:$24 sps:$4 sm:$0xff]   ;;  %v8356_v34 = vrot.slane %v8348_v11, %v19816_v20  ;;  %v8363_v49 = vrot.slane %v8349_v10, %v19816_v20  ;;  %v5966_v24 = vrot.slane %v19843_v44, %v19617_v13 }
 0x3d8   : > { %9077 = vperm.xlu0 %12798, %v8330_v14   ;;  %9050 = vperm.xlu1 %12799, %v8177_v53   ;;  %v8196_v14 = vcombine.low %v5665_v2, %v5672_v7  ;;  %v8203_v56 = vrot.slane %v8195_v35, %v19816_v20  ;;  %v5973_v50 = vrot.slane %v19843_v44, %v19618_v28 }
 0x3d9   : > { %v5707_v11 = vrot.slane %v19844_v41, %v19615_v12  ;;  %v8364_v43 = vcombine.low %v8356_v34, %v8363_v49  ;;  %v8382_v2 = vcombine.low %v5959_v22, %v5966_v24  ;;  %v5714_v53 = vrot.slane %v19844_v41, %v19617_v13  ;;  %v13012_v22 = vld [vmem:[%s14694_s26 + $0x54c] ss:$24 sps:$4 sm:$0xff]  }
 0x3da   : > { %12039 = vmatpush2.bf16.msra.mxu1 %v12992_v51  ;;  %v5980_v51 = vrot.slane %v19843_v44, %v19812_v58  ;;  %v8210_v38 = vrot.slane %v8196_v14, %v19816_v20  ;;  %v18265_v10 = vpop.permute.xlu0 %8951  ;;  %v5721_v35 = vrot.slane %v19844_v41, %v19618_v28  ;;  %v13004_v44 = vld [vmem:[%s14694_s26 + $0x578] ss:$24 sps:$4 sm:$0xff]   ;;  %v18274_v14 = vpop.permute.xlu1 %8930 }
 0x3db   : > { %12040 = vmatprep.subr.bf16.mxu1 %v13000_v33  ;;  %19845 = vst [vmem:[#allocation128_spill] sm:$0xff] %v18265_v10  ;;  %v5728_v33 = vrot.slane %v19844_v41, %v19812_v58  ;;  %v8390_v34 = vrot.slane %v8382_v2, %v19816_v20  ;;  %v8229_v49 = vcombine.low %v5707_v11, %v5714_v53  ;;  %19846 = vst [vmem:[#allocation129_spill] sm:$0xff] %v18274_v14  ;;  %v19848_v2 = vld [vmem:[#allocation110_spill] sm:$0xff] }
 0x3dc   : > { %v8383_v7 = vcombine.low %v5973_v50, %v5980_v51  ;;  %9083 = vperm.xlu0 %12798, %v8364_v43   ;;  %v8211_v57 = vcombine.low %v8203_v56, %v8210_v38  ;;  %v19847_v50 = vld [vmem:[#allocation20_spill] sm:$0xff] }
 0x3dd   : > { %v8230_v21 = vcombine.low %v5721_v35, %v5728_v33  ;;  %v6155_v51 = vrot.slane %v19847_v50, %v19615_v12  ;;  %v6162_v56 = vrot.slane %v19847_v50, %v19617_v13  ;;  %v6169_v41 = vrot.slane %v19847_v50, %v19618_v28 }
 0x3de   : > { %12041 = vmatpush2.bf16.msra.mxu1 %v12998_v36  ;;  %v8397_v24 = vrot.slane %v8383_v7, %v19816_v20  ;;  %9056 = vperm.xlu1 %12799, %v8211_v57   ;;  %v8237_v36 = vrot.slane %v8229_v49, %v19816_v20  ;;  %v6176_v11 = vrot.slane %v19847_v50, %v19812_v58  ;;  %v13010_v49 = vld [vmem:[%s14694_s26 + $0x548] ss:$24 sps:$4 sm:$0xff]  }
 0x3df   : > { %12042 = vmatprep.subr.bf16.mxu1 %v13006_v37  ;;  %v8244_v38 = vrot.slane %v8230_v21, %v19816_v20  ;;  %v5763_v37 = vrot.slane %v19848_v2, %v19615_v12  ;;  %v5770_v57 = vrot.slane %v19848_v2, %v19617_v13  ;;  %v8501_v7 = vcombine.low %v6155_v51, %v6162_v56  ;;  %v18298_v21 = vpop.permute.xlu0 %8957 }
 0x3e0   : > { %v8398_v43 = vcombine.low %v8390_v34, %v8397_v24  ;;  %v8502_v35 = vcombine.low %v6169_v41, %v6176_v11  ;;  %v5777_v33 = vrot.slane %v19848_v2, %v19618_v28  ;;  %v5784_v34 = vrot.slane %v19848_v2, %v19812_v58  ;;  %19849 = vst [vmem:[#allocation131_spill] sm:$0xff] %v18298_v21  ;;  %v18305_v41 = vpop.permute.xlu1 %8936 }
 0x3e1   : > { %v8245_v24 = vcombine.low %v8237_v36, %v8244_v38  ;;  %v8263_v50 = vcombine.low %v5763_v37, %v5770_v57  ;;  %19850 = vst [vmem:[#allocation132_spill] sm:$0xff] %v18305_v41 }
 0x3e2   : > { %12043 = vmatpush2.bf16.msra.mxu1 %v13004_v44  ;;  %v18291_v53 = vpop.f32.mrf.mxu0  ;;  %9089 = vperm.xlu0 %12798, %v8398_v43   ;;  %v8509_v44 = vrot.slane %v8501_v7, %v19816_v20  ;;  %v8516_v51 = vrot.slane %v8502_v35, %v19816_v20  ;;  %v8264_v56 = vcombine.low %v5777_v33, %v5784_v34  ;;  %v19852_v33 = vld [vmem:[#allocation119_spill] sm:$0xff] }
 0x3e3   : > { %12044 = vmatprep.subr.bf16.mxu1 %v13012_v22  ;;  %9062 = vperm.xlu1 %12799, %v8245_v24   ;;  %v8271_v11 = vrot.slane %v8263_v50, %v19816_v20  ;;  %v19851_v22 = vld [vmem:[#allocation22_spill] sm:$0xff]  ;;  %v5819_v34 = vrot.slane %v19852_v33, %v19615_v12  ;;  %v5826_v24 = vrot.slane %v19852_v33, %v19617_v13 }
 0x3e4   : > { %v18301_v10 = vpop.f32.mrf.mxu0  ;;  %v6211_v2 = vrot.slane %v19851_v22, %v19615_v12  ;;  %v6218_v36 = vrot.slane %v19851_v22, %v19617_v13  ;;  %v8517_v38 = vcombine.low %v8509_v44, %v8516_v51  ;;  %v8278_v37 = vrot.slane %v8264_v56, %v19816_v20  ;;  %v13016_v44 = vld [vmem:[%s14694_s26 + $0x518] ss:$24 sps:$4 sm:$0xff]  }
 0x3e5   : > { %v6225_v57 = vrot.slane %v19851_v22, %v19618_v28  ;;  %v6232_v7 = vrot.slane %v19851_v22, %v19812_v58  ;;  %v5833_v50 = vrot.slane %v19852_v33, %v19618_v28  ;;  %v13024_v22 = vld [vmem:[%s14694_s26 + $0x4ec] ss:$24 sps:$4 sm:$0xff]   ;;  %v8297_v21 = vcombine.low %v5819_v34, %v5826_v24 }
 0x3e6   : > { %v11937_v43 = vpop.f32.mrf.mxu0  ;;  %12045 = vmatpush2.bf16.msra.mxu1 %v13010_v49  ;;  %v8535_v35 = vcombine.low %v6211_v2, %v6218_v36  ;;  %9110 = vperm.xlu0 %12798, %v8517_v38   ;;  %v8279_v56 = vcombine.low %v8271_v11, %v8278_v37  ;;  %v5840_v49 = vrot.slane %v19852_v33, %v19812_v58  ;;  %v18327_v2 = vpop.permute.xlu0 %8963 }
 0x3e7   : > { %12046 = vmatprep.subr.bf16.mxu1 %v13018_v31  ;;  %v8536_v43 = vcombine.low %v6225_v57, %v6232_v7  ;;  %19853 = vst [vmem:[#allocation133_spill] sm:$0xff] %v18327_v2  ;;  %v19854_v31 = vld [vmem:[#allocation24_spill] sm:$0xff]  ;;  %v18335_v38 = vpop.permute.xlu1 %8942  ;;  %v8305_v37 = vrot.slane %v8297_v21, %v19816_v20 }
 0x3e8   : > { %v11938_v51 = vpop.f32.mrf.mxu0  ;;  %v8543_v36 = vrot.slane %v8535_v35, %v19816_v20  ;;  %9068 = vperm.xlu1 %12799, %v8279_v56   ;;  %v8298_v27 = vcombine.low %v5833_v50, %v5840_v49  ;;  %v6274_v11 = vrot.slane %v19854_v31, %v19617_v13  ;;  %19855 = vst [vmem:[#allocation134_spill] sm:$0xff] %v18335_v38  ;;  %v13022_v35 = vld [vmem:[%s14694_s26 + $0x4e8] ss:$24 sps:$4 sm:$0xff]   ;;  %v19856_v50 = vld [vmem:[#allocation126_spill] sm:$0xff] }
 0x3e9   : > { %v8550_v59 = vrot.slane %v8536_v43, %v19816_v20  ;;  %v6267_v51 = vrot.slane %v19854_v31, %v19615_v12  ;;  %v6281_v57 = vrot.slane %v19854_v31, %v19618_v28  ;;  %v6288_v7 = vrot.slane %v19854_v31, %v19812_v58  ;;  %v13030_v31 = vld [vmem:[%s14694_s26 + $0x4bc] ss:$24 sps:$4 sm:$0xff]  }
 0x3ea   : > { %12047 = vmatpush2.bf16.msra.mxu1 %v13016_v44  ;;  %v8312_v34 = vrot.slane %v8298_v27, %v19816_v20  ;;  %v5875_v56 = vrot.slane %v19856_v50, %v19615_v12  ;;  %v5882_v21 = vrot.slane %v19856_v50, %v19617_v13  ;;  %v5889_v49 = vrot.slane %v19856_v50, %v19618_v28 }
 0x3eb   : > { %v8551_v33 = vcombine.low %v8543_v36, %v8550_v59  ;;  %v8569_v24 = vcombine.low %v6267_v51, %v6274_v11  ;;  %12048 = vmatprep.subr.bf16.mxu1 %v13024_v22  ;;  %v8570_v43 = vcombine.low %v6281_v57, %v6288_v7  ;;  %v5896_v44 = vrot.slane %v19856_v50, %v19812_v58  ;;  %v18354_v36 = vpop.permute.xlu0 %8969  ;;  %v19857_v57 = vld [vmem:[#allocation30_spill] sm:$0xff] }
 0x3ec   : > { %v8313_v59 = vcombine.low %v8305_v37, %v8312_v34  ;;  %v8331_v51 = vcombine.low %v5875_v56, %v5882_v21  ;;  %v6323_v7 = vrot.slane %v19857_v57, %v19615_v12  ;;  %v6330_v50 = vrot.slane %v19857_v57, %v19617_v13  ;;  %v18364_v34 = vpop.permute.xlu1 %8948 }
 0x3ed   : > { %9116 = vperm.xlu0 %12798, %v8551_v33   ;;  %v8577_v27 = vrot.slane %v8569_v24, %v19816_v20  ;;  %v8584_v22 = vrot.slane %v8570_v43, %v19816_v20  ;;  %v8332_v11 = vcombine.low %v5889_v49, %v5896_v44  ;;  %v6337_v37 = vrot.slane %v19857_v57, %v19618_v28  ;;  %v13028_v33 = vld [vmem:[%s14694_s26 + $0x4b8] ss:$24 sps:$4 sm:$0xff]  }
 0x3ee   : > { %12049 = vmatpush2.bf16.msra.mxu1 %v13022_v35  ;;  %9074 = vperm.xlu1 %12799, %v8313_v59   ;;  %19858 = vst [vmem:[#allocation136_spill] sm:$0xff] %v18364_v34  ;;  %v8339_v43 = vrot.slane %v8331_v51, %v19816_v20  ;;  %v6344_v56 = vrot.slane %v19857_v57, %v19812_v58  ;;  %v19859_v49 = vld [vmem:[#allocation135_spill] sm:$0xff] }
 0x3ef   : > { %v8585_v24 = vcombine.low %v8577_v27, %v8584_v22  ;;  %v8346_v35 = vrot.slane %v8332_v11, %v19816_v20  ;;  %12050 = vmatprep.subr.bf16.mxu1 %v13030_v31  ;;  %v8603_v21 = vcombine.low %v6323_v7, %v6330_v50  ;;  %v5931_v44 = vrot.slane %v19859_v49, %v19615_v12  ;;  %v13036_v27 = vld [vmem:[%s14694_s26 + $0x48c] ss:$24 sps:$4 sm:$0xff]   ;;  %v13034_v7 = vld [vmem:[%s14694_s26 + $0x488] ss:$24 sps:$4 sm:$0xff]   ;;  %v18381_v50 = vpop.permute.xlu0 %8975 }
 0x3f0   : > { %v5938_v59 = vrot.slane %v19859_v49, %v19617_v13  ;;  %v5945_v2 = vrot.slane %v19859_v49, %v19618_v28  ;;  %v8604_v51 = vcombine.low %v6337_v37, %v6344_v56  ;;  %v5952_v11 = vrot.slane %v19859_v49, %v19812_v58  ;;  %v13042_v56 = vld [vmem:[%s14694_s26 + $0x464] ss:$24 sps:$4 sm:$0xff]  }
 0x3f1   : > { %9122 = vperm.xlu0 %12798, %v8585_v24   ;;  %v8347_v22 = vcombine.low %v8339_v43, %v8346_v35  ;;  %v8611_v31 = vrot.slane %v8603_v21, %v19816_v20  ;;  %v6379_v24 = vrot.slane %v19860_v61, %v19615_v12  ;;  %v6386_v37 = vrot.slane %v19860_v61, %v19617_v13  ;;  %v18394_v21 = vpop.permute.xlu1 %8954 }
 0x3f2   : > { %v8365_v57 = vcombine.low %v5931_v44, %v5938_v59  ;;  %12051 = vmatpush2.bf16.msra.mxu1 %v13028_v33  ;;  %v8618_v48 = vrot.slane %v8604_v51, %v19816_v20  ;;  %v8366_v34 = vcombine.low %v5945_v2, %v5952_v11  ;;  %v6393_v35 = vrot.slane %v19860_v61, %v19618_v28  ;;  %v19862_v59 = vld [vmem:[#allocation41_spill] sm:$0xff] }
 0x3f3   : > { %9080 = vperm.xlu1 %12799, %v8347_v22   ;;  %v6400_v33 = vrot.slane %v19860_v61, %v19812_v58  ;;  %12052 = vmatprep.subr.bf16.mxu1 %v13036_v27  ;;  %19861 = vst [vmem:[#allocation137_spill] sm:$0xff] %v18394_v21  ;;  %v8637_v44 = vcombine.low %v6379_v24, %v6386_v37 }
 0x3f4   : > { %v8373_v43 = vrot.slane %v8365_v57, %v19816_v20  ;;  %v8619_v2 = vcombine.low %v8611_v31, %v8618_v48  ;;  %v8380_v49 = vrot.slane %v8366_v34, %v19816_v20  ;;  %v5987_v22 = vrot.slane %v19862_v59, %v19615_v12  ;;  %v13040_v34 = vld [vmem:[%s14694_s26 + $0x460] ss:$24 sps:$4 sm:$0xff]  }
 0x3f5   : > { %v8638_v51 = vcombine.low %v6393_v35, %v6400_v33  ;;  %v5994_v11 = vrot.slane %v19862_v59, %v19617_v13  ;;  %v6001_v57 = vrot.slane %v19862_v59, %v19618_v28  ;;  %v6008_v61 = vrot.slane %v19862_v59, %v19812_v58  ;;  %v18408_v35 = vpop.permute.xlu0 %8981  ;;  %v19863_v33 = vld [vmem:[#allocation37_spill] sm:$0xff]  ;;  %v18421_v59 = vpop.permute.xlu1 %8960 }
 0x3f6   : > { %12053 = vmatpush2.bf16.msra.mxu1 %v13034_v7  ;;  %9128 = vperm.xlu0 %12798, %v8619_v2   ;;  %v8381_v27 = vcombine.low %v8373_v43, %v8380_v49  ;;  %v8645_v48 = vrot.slane %v8637_v44, %v19816_v20  ;;  %v6435_v21 = vrot.slane %v19863_v33, %v19615_v12 }
 0x3f7   : > { %v8652_v31 = vrot.slane %v8638_v51, %v19816_v20  ;;  %v8399_v24 = vcombine.low %v5987_v22, %v5994_v11  ;;  %v8400_v37 = vcombine.low %v6001_v57, %v6008_v61  ;;  %12104 = vmatprep.subr.bf16.mxu1 %v13042_v56  ;;  %v6442_v7 = vrot.slane %v19863_v33, %v19617_v13  ;;  %v19865_v51 = vld [vmem:[#allocation18_spill] sm:$0xff] }
 0x3f8   : > { %9086 = vperm.xlu1 %12799, %v8381_v27   ;;  %v6449_v43 = vrot.slane %v19863_v33, %v19618_v28  ;;  %v6456_v56 = vrot.slane %v19863_v33, %v19812_v58  ;;  %19864 = vst [vmem:[#allocation138_spill] sm:$0xff] %v18421_v59  ;;  %v6183_v11 = vrot.slane %v19865_v51, %v19615_v12  ;;  %v13045_v27 = vld [vmem:[%s14694_s26 + $0x434] ss:$24 sps:$4 sm:$0xff]  }
 0x3f9   : > { %v8653_v2 = vcombine.low %v8645_v48, %v8652_v31  ;;  %v8407_v49 = vrot.slane %v8399_v24, %v19816_v20  ;;  %v8414_v44 = vrot.slane %v8400_v37, %v19816_v20  ;;  %12055 = vmatmul.mubr.bf16.vlgmr.msra.gmra.mxu1 %v18080_v16  ;;  %v8671_v22 = vcombine.low %v6435_v21, %v6442_v7  ;;  %v13043_v37 = vld [vmem:[%s14694_s26 + $0x430] ss:$24 sps:$4 sm:$0xff]   ;;  %v13048_v7 = vld [vmem:[%s14694_s26 + $0x404] ss:$24 sps:$4 sm:$0xff]  }
 0x3fa   : > { %v6190_v57 = vrot.slane %v19865_v51, %v19617_v13  ;;  %v6197_v61 = vrot.slane %v19865_v51, %v19618_v28  ;;  %12105 = vmatpush1.bf16.msra.mxu1 %v13040_v34  ;;  %v8672_v31 = vcombine.low %v6449_v43, %v6456_v56  ;;  %v6204_v24 = vrot.slane %v19865_v51, %v19812_v58  ;;  %v19866_v34 = vld [vmem:[#allocation71_spill] sm:$0xff] }
 0x3fb   : > { %9134 = vperm.xlu0 %12798, %v8653_v2   ;;  %v8415_v48 = vcombine.low %v8407_v49, %v8414_v44  ;;  %v8679_v21 = vrot.slane %v8671_v22, %v19816_v20  ;;  %12136 = vmatprep.mubr.bf16.mxu1 %v19821_v6  ;;  %v6463_v18 = vrot.slane %v19866_v34, %v19615_v12  ;;  %v18441_v2 = vpop.permute.xlu0 %8987 }
 0x3fc   : > { %v8518_v33 = vcombine.low %v6183_v11, %v6190_v57  ;;  %v8686_v59 = vrot.slane %v8672_v31, %v19816_v20  ;;  %v8519_v19 = vcombine.low %v6197_v61, %v6204_v24  ;;  %v6470_v43 = vrot.slane %v19866_v34, %v19617_v13  ;;  %12106 = vmatprep.subr.bf16.mxu1 %v13045_v27  ;;  %v18449_v11 = vpop.permute.xlu1 %8966  ;;  %v19867_v61 = vld [vmem:[#allocation17_spill] sm:$0xff] }
 0x3fd   : > { %9092 = vperm.xlu1 %12799, %v8415_v48   ;;  %v6477_v44 = vrot.slane %v19866_v34, %v19618_v28  ;;  %v6484_v6 = vrot.slane %v19866_v34, %v19812_v58  ;;  %v6239_v48 = vrot.slane %v19867_v61, %v19615_v12  ;;  %v6246_v31 = vrot.slane %v19867_v61, %v19617_v13  ;;  %v13051_v27 = vld [vmem:[%s14694_s26 + $0x3d4] ss:$24 sps:$4 sm:$0xff]   ;;  %v19868_v34 = vld [vmem:[#allocation115_spill] sm:$0xff] }
 0x3fe   : > { %v8526_v49 = vrot.slane %v8518_v33, %v19816_v20  ;;  %v8687_v56 = vcombine.low %v8679_v21, %v8686_v59  ;;  %v8533_v22 = vrot.slane %v8519_v19, %v19816_v20  ;;  %v8688_v51 = vcombine.low %v6463_v18, %v6470_v43  ;;  %12107 = vmatpush1.bf16.msra.mxu1 %v13043_v37  ;;  %v13046_v33 = vld [vmem:[%s14694_s26 + $0x400] ss:$24 sps:$4 sm:$0xff]  }
 0x3ff   : > { %v8689_v57 = vcombine.low %v6477_v44, %v6484_v6  ;;  %v6253_v24 = vrot.slane %v19867_v61, %v19618_v28  ;;  %12108 = vmatprep.subr.bf16.mxu1 %v13048_v7  ;;  %v6260_v18 = vrot.slane %v19867_v61, %v19812_v58  ;;  %v8552_v21 = vcombine.low %v6239_v48, %v6246_v31  ;;  %v18469_v6 = vpop.permute.xlu0 %8993  ;;  %v13049_v48 = vld [vmem:[%s14694_s26 + $0x3d0] ss:$24 sps:$4 sm:$0xff]  }
 0x400   : > { %9140 = vperm.xlu0 %12798, %v8687_v56   ;;  %v8534_v59 = vcombine.low %v8526_v49, %v8533_v22  ;;  %v8696_v19 = vrot.slane %v8688_v51, %v19816_v20  ;;  %v6491_v43 = vrot.slane %v19868_v34, %v19615_v12  ;;  %v6498_v7 = vrot.slane %v19868_v34, %v19617_v13 }
 0x401   : > { %v8703_v37 = vrot.slane %v8689_v57, %v19816_v20  ;;  %v8553_v44 = vcombine.low %v6253_v24, %v6260_v18  ;;  %v6505_v49 = vrot.slane %v19868_v34, %v19618_v28  ;;  %v8560_v22 = vrot.slane %v8552_v21, %v19816_v20  ;;  %v19869_v57 = vld [vmem:[#allocation21_spill] sm:$0xff] }
 0x402   : > { %9113 = vperm.xlu1 %12799, %v8534_v59   ;;  %v6512_v51 = vrot.slane %v19868_v34, %v19812_v58  ;;  %v6295_v61 = vrot.slane %v19869_v57, %v19615_v12  ;;  %12109 = vmatpush1.bf16.msra.mxu1 %v13046_v33  ;;  %v8705_v24 = vcombine.low %v6491_v43, %v6498_v7  ;;  %v13054_v33 = vld [vmem:[%s14694_s26 + $0x3a4] ss:$24 sps:$4 sm:$0xff]  }
 0x403   : > { %v8704_v56 = vcombine.low %v8696_v19, %v8703_v37  ;;  %v8567_v31 = vrot.slane %v8553_v44, %v19816_v20  ;;  %v6302_v59 = vrot.slane %v19869_v57, %v19617_v13  ;;  %v6309_v18 = vrot.slane %v19869_v57, %v19618_v28  ;;  %12110 = vmatprep.subr.bf16.mxu1 %v13051_v27  ;;  %v18482_v19 = vpop.permute.xlu1 %8972  ;;  %v19870_v7 = vld [vmem:[#allocation75_spill] sm:$0xff] }
 0x404   : > { %v8706_v37 = vcombine.low %v6505_v49, %v6512_v51  ;;  %v6316_v21 = vrot.slane %v19869_v57, %v19812_v58  ;;  %v8713_v44 = vrot.slane %v8705_v24, %v19816_v20  ;;  %v6519_v38 = vrot.slane %v19870_v7, %v19615_v12  ;;  %v19871_v51 = vld [vmem:[#allocation27_spill] sm:$0xff] }
 0x405   : > { %9143 = vperm.xlu0 %12798, %v8704_v56   ;;  %v8568_v34 = vcombine.low %v8560_v22, %v8567_v31  ;;  %v8586_v43 = vcombine.low %v6295_v61, %v6302_v59  ;;  %v6526_v27 = vrot.slane %v19870_v7, %v19617_v13  ;;  %v6533_v56 = vrot.slane %v19870_v7, %v19618_v28  ;;  %v13052_v61 = vld [vmem:[%s14694_s26 + $0x3a0] ss:$24 sps:$4 sm:$0xff]   ;;  %v18501_v31 = vpop.permute.xlu0 %8999 }
 0x406   : > { %v8720_v8 = vrot.slane %v8706_v37, %v19816_v20  ;;  %v8587_v25 = vcombine.low %v6309_v18, %v6316_v21  ;;  %12111 = vmatpush1.bf16.msra.mxu1 %v13049_v48  ;;  %v6540_v22 = vrot.slane %v19870_v7, %v19812_v58  ;;  %v6351_v57 = vrot.slane %v19871_v51, %v19615_v12 }
 0x407   : > { %9119 = vperm.xlu1 %12799, %v8568_v34   ;;  %v8594_v49 = vrot.slane %v8586_v43, %v19816_v20  ;;  %v8722_v48 = vcombine.low %v6519_v38, %v6526_v27  ;;  %v6358_v18 = vrot.slane %v19871_v51, %v19617_v13  ;;  %12112 = vmatprep.subr.bf16.mxu1 %v13054_v33  ;;  %v13057_v43 = vld [vmem:[%s14694_s26 + $0x374] ss:$24 sps:$4 sm:$0xff]   ;;  %v18511_v7 = vpop.permute.xlu1 %8978 }
 0x408   : > { %v8721_v24 = vcombine.low %v8713_v44, %v8720_v8  ;;  %v8601_v59 = vrot.slane %v8587_v25, %v19816_v20  ;;  %v8723_v37 = vcombine.low %v6533_v56, %v6540_v22  ;;  %v6365_v21 = vrot.slane %v19871_v51, %v19618_v28  ;;  %v19872_v33 = vld [vmem:[#allocation77_spill] sm:$0xff] }
 0x409   : > { %v6372_v34 = vrot.slane %v19871_v51, %v19812_v58  ;;  %v8730_v25 = vrot.slane %v8722_v48, %v19816_v20  ;;  %v8620_v38 = vcombine.low %v6351_v57, %v6358_v18  ;;  %v6547_v56 = vrot.slane %v19872_v33, %v19615_v12  ;;  %v19873_v18 = vld [vmem:[#allocation33_spill] sm:$0xff] }
 0x40a   : > { %9146 = vperm.xlu0 %12798, %v8721_v24   ;;  %v8602_v8 = vcombine.low %v8594_v49, %v8601_v59  ;;  %v8737_v44 = vrot.slane %v8723_v37, %v19816_v20  ;;  %12113 = vmatpush1.bf16.msra.mxu1 %v13052_v61  ;;  %v6554_v51 = vrot.slane %v19872_v33, %v19617_v13  ;;  %v13055_v24 = vld [vmem:[%s14694_s26 + $0x370] ss:$24 sps:$4 sm:$0xff]   ;;  %v18528_v37 = vpop.permute.xlu0 %9005 }
 0x40b   : > { %v8621_v27 = vcombine.low %v6365_v21, %v6372_v34  ;;  %v8628_v22 = vrot.slane %v8620_v38, %v19816_v20  ;;  %v6561_v49 = vrot.slane %v19872_v33, %v19618_v28  ;;  %v6568_v48 = vrot.slane %v19872_v33, %v19812_v58  ;;  %12114 = vmatprep.subr.bf16.mxu1 %v13057_v43  ;;  %v13060_v38 = vld [vmem:[%s14694_s26 + $0x344] ss:$24 sps:$4 sm:$0xff]   ;;  %v18537_v33 = vpop.permute.xlu1 %8984 }
 0x40c   : > { %9125 = vperm.xlu1 %12799, %v8602_v8   ;;  %v8738_v59 = vcombine.low %v8730_v25, %v8737_v44  ;;  %v6407_v61 = vrot.slane %v19873_v18, %v19615_v12  ;;  %v8739_v21 = vcombine.low %v6547_v56, %v6554_v51  ;;  %v6414_v34 = vrot.slane %v19873_v18, %v19617_v13  ;;  %v13058_v56 = vld [vmem:[%s14694_s26 + $0x340] ss:$24 sps:$4 sm:$0xff]  }
 0x40d   : > { %v8635_v57 = vrot.slane %v8621_v27, %v19816_v20  ;;  %v6421_v8 = vrot.slane %v19873_v18, %v19618_v28  ;;  %v6428_v25 = vrot.slane %v19873_v18, %v19812_v58  ;;  %v8740_v27 = vcombine.low %v6561_v49, %v6568_v48 }
 0x40e   : > { %9149 = vperm.xlu0 %12798, %v8738_v59   ;;  %v8747_v43 = vrot.slane %v8739_v21, %v19816_v20  ;;  %v8654_v30 = vcombine.low %v6407_v61, %v6414_v34  ;;  %12115 = vmatpush1.bf16.msra.mxu1 %v13055_v24  ;;  %v6582_v59 = vrot.slane %v19874_v3, %v19617_v13  ;;  %v19875_v61 = vld [vmem:[#allocation36_spill] sm:$0xff] }
 0x40f   : > { %v8636_v44 = vcombine.low %v8628_v22, %v8635_v57  ;;  %v8655_v41 = vcombine.low %v6421_v8, %v6428_v25  ;;  %v8754_v51 = vrot.slane %v8740_v27, %v19816_v20  ;;  %v6589_v57 = vrot.slane %v19874_v3, %v19618_v28  ;;  %12116 = vmatprep.subr.bf16.mxu1 %v13060_v38  ;;  %v18557_v8 = vpop.permute.xlu0 %9011  ;;  %v13061_v38 = vld [vmem:[%s14694_s26 + $0x310] ss:$24 sps:$4 sm:$0xff]  }
 0x410   : > { %v8662_v22 = vrot.slane %v8654_v30, %v19816_v20  ;;  %v6596_v24 = vrot.slane %v19874_v3, %v19812_v58  ;;  %v8756_v18 = vcombine.low %v6575_v5, %v6582_v59  ;;  %v6015_v21 = vrot.slane %v19875_v61, %v19615_v12  ;;  %v13063_v30 = vld [vmem:[%s14694_s26 + $0x314] ss:$24 sps:$4 sm:$0xff]  }
 0x411   : > { %9131 = vperm.xlu1 %12799, %v8636_v44   ;;  %v8669_v49 = vrot.slane %v8655_v41, %v19816_v20  ;;  %v8755_v48 = vcombine.low %v8747_v43, %v8754_v51  ;;  %v6022_v34 = vrot.slane %v19875_v61, %v19617_v13  ;;  %v6029_v44 = vrot.slane %v19875_v61, %v19618_v28  ;;  %v13066_v43 = vld [vmem:[%s14694_s26 + $0x5e4] ss:$24 sps:$4 sm:$0xff]   ;;  %v18566_v51 = vpop.permute.xlu1 %8990 }
 0x412   : > { %v8757_v25 = vcombine.low %v6589_v57, %v6596_v24  ;;  %v6036_v3 = vrot.slane %v19875_v61, %v19812_v58  ;;  %12117 = vmatpush1.bf16.msra.mxu1 %v13058_v56  ;;  %v8764_v5 = vrot.slane %v8756_v18, %v19816_v20 }
 0x413   : > { %v8670_v41 = vcombine.low %v8662_v22, %v8669_v49  ;;  %9152 = vperm.xlu0 %12798, %v8755_v48   ;;  %v8416_v27 = vcombine.low %v6015_v21, %v6022_v34  ;;  %v19876_v49 = vld [vmem:[#allocation90_spill] sm:$0xff]  ;;  %12118 = vmatprep.subr.bf16.mxu1 %v13063_v30 }
 0x414   : > { %v8771_v59 = vrot.slane %v8757_v25, %v19816_v20  ;;  %v8417_v22 = vcombine.low %v6029_v44, %v6036_v3  ;;  %v6043_v57 = vrot.slane %v19876_v49, %v19615_v12  ;;  %v6050_v56 = vrot.slane %v19876_v49, %v19617_v13  ;;  %v13064_v44 = vld [vmem:[%s14694_s26 + $0x5e0] ss:$24 sps:$4 sm:$0xff]   ;;  %v18582_v3 = vpop.permute.xlu0 %9017 }
 0x415   : > { %9137 = vperm.xlu1 %12799, %v8670_v41   ;;  %v8424_v24 = vrot.slane %v8416_v27, %v19816_v20  ;;  %v6057_v48 = vrot.slane %v19876_v49, %v19618_v28  ;;  %v6064_v21 = vrot.slane %v19876_v49, %v19812_v58  ;;  %v19877_v41 = vld [vmem:[#allocation81_spill] sm:$0xff] }
 0x416   : > { %v8772_v18 = vcombine.low %v8764_v5, %v8771_v59  ;;  %v8431_v61 = vrot.slane %v8417_v22, %v19816_v20  ;;  %12119 = vmatpush1.bf16.msra.mxu1 %v13061_v38  ;;  %v8433_v34 = vcombine.low %v6043_v57, %v6050_v56  ;;  %v6071_v25 = vrot.slane %v19877_v41, %v19615_v12  ;;  %v13069_v59 = vld [vmem:[%s14694_s26 + $0x5b4] ss:$24 sps:$4 sm:$0xff]  }
 0x417   : > { %12120 = vmatprep.subr.bf16.mxu1 %v13066_v43  ;;  %v8434_v14 = vcombine.low %v6057_v48, %v6064_v21  ;;  %v6078_v30 = vrot.slane %v19877_v41, %v19617_v13  ;;  %v6085_v5 = vrot.slane %v19877_v41, %v19618_v28  ;;  %v6092_v22 = vrot.slane %v19877_v41, %v19812_v58  ;;  %v18592_v43 = vpop.permute.xlu1 %8996  ;;  %v19878_v56 = vld [vmem:[#allocation85_spill] sm:$0xff] }
 0x418   : > { %9155 = vperm.xlu0 %12798, %v8772_v18   ;;  %v8432_v27 = vcombine.low %v8424_v24, %v8431_v61  ;;  %v8441_v38 = vrot.slane %v8433_v34, %v19816_v20  ;;  %v6099_v48 = vrot.slane %v19878_v56, %v19615_v12  ;;  %v6106_v18 = vrot.slane %v19878_v56, %v19617_v13  ;;  %v13067_v61 = vld [vmem:[%s14694_s26 + $0x5b0] ss:$24 sps:$4 sm:$0xff]  }
 0x419   : > { %v8448_v49 = vrot.slane %v8434_v14, %v19816_v20  ;;  %v8450_v57 = vcombine.low %v6071_v25, %v6078_v30  ;;  %v8451_v24 = vcombine.low %v6085_v5, %v6092_v22  ;;  %v6113_v41 = vrot.slane %v19878_v56, %v19618_v28  ;;  %v13072_v25 = vld [vmem:[%s14694_s26 + $0x584] ss:$24 sps:$4 sm:$0xff]   ;;  %v18607_v5 = vpop.permute.xlu0 %9023 }
 0x41a   : > { %9095 = vperm.xlu1 %12799, %v8432_v27   ;;  %12121 = vmatpush2.bf16.msra.mxu1 %v13064_v44  ;;  %v6120_v14 = vrot.slane %v19878_v56, %v19812_v58  ;;  %v8467_v30 = vcombine.low %v6099_v48, %v6106_v18 }
 0x41b   : > { %v8449_v21 = vcombine.low %v8441_v38, %v8448_v49  ;;  %v8458_v34 = vrot.slane %v8450_v57, %v19816_v20  ;;  %12122 = vmatprep.subr.bf16.mxu1 %v13069_v59  ;;  %v8465_v27 = vrot.slane %v8451_v24, %v19816_v20  ;;  %v19879_v38 = vld [vmem:[#allocation91_spill] sm:$0xff]  ;;  %v9003_v48 = vpop.permute.xlu1 %9002 }
 0x41c   : > { %v8468_v44 = vcombine.low %v6113_v41, %v6120_v14  ;;  %v6127_v22 = vrot.slane %v19879_v38, %v19615_v12  ;;  %v6134_v49 = vrot.slane %v19879_v38, %v19617_v13  ;;  %v8475_v56 = vrot.slane %v8467_v30, %v19816_v20  ;;  %v13070_v24 = vld [vmem:[%s14694_s26 + $0x580] ss:$24 sps:$4 sm:$0xff]   ;;  %v13075_v13 = vld [vmem:[%s14694_s26 + $0x554] ss:$24 sps:$4 sm:$0xff]  }
 0x41d   : > { %v6141_v59 = vrot.slane %v19879_v38, %v19618_v28  ;;  %v8466_v18 = vcombine.low %v8458_v34, %v8465_v27  ;;  %v6148_v41 = vrot.slane %v19879_v38, %v19812_v58  ;;  %v9512_v30 = vrot.slane %v18354_v36, %v16731_v9  ;;  %v13073_v36 = vld [vmem:[%s14694_s26 + $0x550] ss:$24 sps:$4 sm:$0xff]  }
 0x41e   : > { %9098 = vperm.xlu1 %12799, %v8449_v21   ;;  %12123 = vmatpush2.bf16.msra.mxu1 %v13067_v61  ;;  %v8482_v21 = vrot.slane %v8468_v44, %v19816_v20  ;;  %v8484_v12 = vcombine.low %v6127_v22, %v6134_v49  ;;  %v9508_v28 = vrot.slane %v18449_v11, %v16720_v46  ;;  %v18637_v22 = vpop.permute.xlu0 %9029 }
 0x41f   : > { %12124 = vmatprep.subr.bf16.mxu1 %v13072_v25  ;;  %v9517_v61 = vrot.slane %v18482_v19, %v16748_v62  ;;  %v8485_v34 = vcombine.low %v6141_v59, %v6148_v41  ;;  %v9527_v58 = vrot.slane %v18511_v7, %v19748_v39  ;;  %v9522_v25 = vrot.slane %v18381_v50, %v19747_v42  ;;  %v13078_v50 = vld [vmem:[%s14694_s26 + $0x524] ss:$24 sps:$4 sm:$0xff]  }
 0x420   : > { %v8483_v44 = vcombine.low %v8475_v56, %v8482_v21  ;;  %v9513_v38 = vsel %vm9168_vm1, %v9512_v30, %v9508_v28  ;;  %v8492_v11 = vrot.slane %v8484_v12, %v19816_v20  ;;  %v9537_v7 = vrot.slane %v18537_v33, %v19750_v29  ;;  %v13081_v28 = vld [vmem:[%s14694_s26 + $0x4f4] ss:$24 sps:$4 sm:$0xff]  }
 0x421   : > { %v8499_v19 = vrot.slane %v8485_v34, %v19816_v20  ;;  %v9518_v49 = vsel %vm9175_vm2, %v9517_v61, %v9513_v38  ;;  %v9532_v59 = vrot.slane %v18408_v35, %v19749_v1  ;;  %v9547_v41 = vrot.slane %v18566_v51, %v19752_v17 }
 0x422   : > { %9101 = vperm.xlu1 %12799, %v8466_v18   ;;  %12125 = vmatpush2.bf16.msra.mxu1 %v13070_v24  ;;  %v9523_v24 = vsel %vm9182_vm3, %v9522_v25, %v9518_v49  ;;  %v9009_v18 = vpop.permute.xlu1 %9008  ;;  %v9542_v12 = vrot.slane %v18441_v2, %v19751_v47  ;;  %v9557_v61 = vrot.slane %v18592_v43, %v19755_v60  ;;  %v18662_v2 = vpop.permute.xlu0 %9035  ;;  %v13082_v49 = vld [vmem:[%s14694_s26 + $0x4c0] ss:$24 sps:$4 sm:$0xff]  }
 0x423   : > { %12126 = vmatprep.subr.bf16.mxu1 %v13075_v13  ;;  %v9528_v21 = vsel %vm9189_vm4, %v9527_v58, %v9523_v24  ;;  %v13076_v13 = vld [vmem:[%s14694_s26 + $0x520] ss:$24 sps:$4 sm:$0xff]   ;;  %v8500_v30 = vcombine.low %v8492_v11, %v8499_v19  ;;  %v9552_v51 = vrot.slane %v18469_v6, %v19754_v4  ;;  %v9562_v25 = vrot.slane %v18501_v31, %v19756_v45 }
 0x424   : > { %v9533_v33 = vsel %vm9196_vm5, %v9532_v59, %v9528_v21  ;;  %v9577_v11 = vrot.slane %v9009_v18, %v19761_v32  ;;  %v9572_v19 = vrot.slane %v18528_v37, %v19759_v55  ;;  %v13087_v59 = vld [vmem:[%s14694_s26 + $0x494] ss:$24 sps:$4 sm:$0xff]   ;;  %v9591_v37 = vrot.slane %v18582_v3, %v16731_v9  ;;  %v19880_v3 = vld [vmem:[#allocation84_spill] sm:$0xff] }
 0x425   : > { %v9538_v35 = vsel %vm9203_vm6, %v9537_v7, %v9533_v33 }
 0x426   : > { %v18613_v57 = vpop.f32.mrf.mxu0  ;;  %9104 = vperm.xlu1 %12799, %v8483_v44   ;;  %12127 = vmatpush2.bf16.msra.mxu1 %v13073_v36  ;;  %v9543_v34 = vsel %vm9210_vm7, %v9542_v12, %v9538_v35  ;;  %v13079_v44 = vld [vmem:[%s14694_s26 + $0x4f0] ss:$24 sps:$4 sm:$0xff]   ;;  %v13084_v36 = vld [vmem:[%s14694_s26 + $0x4c4] ss:$24 sps:$4 sm:$0xff]  }
 0x427   : > { %12128 = vmatprep.subr.bf16.mxu1 %v13078_v50  ;;  %v9548_v58 = vsel %vm9217_vm8, %v9547_v41, %v9543_v34  ;;  %v9601_v41 = vrot.slane %v18607_v5, %v19747_v42  ;;  %v13085_v12 = vld [vmem:[%s14694_s26 + $0x490] ss:$24 sps:$4 sm:$0xff]   ;;  %v19881_v5 = vld [vmem:[#allocation79_spill] sm:$0xff] }
 0x428   : > { %v18623_v14 = vpop.f32.mrf.mxu0  ;;  %v9553_v43 = vsel %vm9224_vm9, %v9552_v51, %v9548_v58  ;;  %v9280_v34 = vrot.slane %v19881_v5, %v16748_v62  ;;  %v9611_v58 = vrot.slane %v18637_v22, %v19749_v1 }
 0x429   : > { %v9558_v6 = vsel %vm9231_vm10, %v9557_v61, %v9553_v43  ;;  %v9271_v61 = vrot.slane %v19880_v3, %v16720_v46  ;;  %v19883_v43 = vld [vmem:[#allocation23_spill] sm:$0xff] }
 0x42a   : > { %v12019_v27 = vpop.f32.mrf.mxu0  ;;  %9107 = vperm.xlu1 %12799, %v8500_v30   ;;  %12129 = vmatpush2.bf16.msra.mxu1 %v13076_v13 }
 0x42b   : > { %v9567_v27 = vrot.slane %v9003_v48, %v19758_v54  ;;  %12130 = vmatprep.subr.bf16.mxu1 %v13081_v28  ;;  %v9563_v48 = vsel %vm9238_vm11, %v9562_v25, %v9558_v6 }
 0x42c   : > { %v12020_v56 = vpop.f32.mrf.mxu0 }
 0x42d   : > { %v9568_v31 = vsel %vm9245_vm12, %v9567_v27, %v9563_v48  ;;  %v19882_v27 = vld [vmem:[#allocation73_spill] sm:$0xff] }
 0x42e   : > { %12131 = vmatpush2.bf16.msra.mxu1 %v13079_v44  ;;  %v9573_v7 = vsel %vm9252_vm13, %v9572_v19, %v9568_v31  ;;  %v9275_v25 = vrot.slane %v19882_v27, %v16731_v9  ;;  %v19884_v19 = vld [vmem:[#allocation38_spill] sm:$0xff]  ;;  %v19885_v31 = vld [vmem:[#allocation83_spill] sm:$0xff] }
 0x42f   : > { %12132 = vmatprep.subr.bf16.mxu1 %v13084_v36  ;;  %v18684_v24 = vsel %vm9259_vm14, %v9577_v11, %v9573_v7  ;;  %v9167_v48 = vrot.slane %v19884_v19, %v16731_v9  ;;  %v19886_v7 = vld [vmem:[#allocation40_spill] sm:$0xff] }
 0x430   : > { %v18679_v50 = vpop.permute.xlu0 %9041  ;;  %v9276_v11 = vsel %vm9168_vm1, %v9275_v25, %v9271_v61  ;;  %v19890_v61 = vld [vmem:[#allocation28_spill] sm:$0xff] }
 0x431   : > { %v9281_v22 = vsel %vm9175_vm2, %v9280_v34, %v9276_v11  ;;  %v19891_v34 = vld [vmem:[#allocation87_spill] sm:$0xff] }
 0x432   : > { %12133 = vmatpush2.bf16.msra.mxu1 %v13082_v49  ;;  %v9290_v49 = vrot.slane %v19885_v31, %v19748_v39 }
 0x433   : > { %12134 = vmatprep.subr.bf16.mxu1 %v13087_v59  ;;  %v19887_v59 = vld [vmem:[#allocation122_spill] sm:$0xff] }
 0x434   : > { %v9015_v38 = vpop.permute.xlu1 %9014 }
 0x435   : > { %v9587_v56 = vrot.slane %v9015_v38, %v16720_v46  ;;  %v9162_v38 = vrot.slane %v19883_v43, %v16720_v46 }
 0x436   : > { %12135 = vmatpush2.bf16.msra.mxu1 %v13085_v12 }
 0x437   : > { %v9592_v33 = vsel %vm9168_vm1, %v9591_v37, %v9587_v56  ;;  %v18694_v30 = vpop.permute.xlu0 %9047  ;;  %v9174_v56 = vrot.slane %v19886_v7, %v16748_v62  ;;  %v9285_v37 = vrot.slane %v19887_v59, %v19747_v42  ;;  %v9631_v59 = vrot.slane %v18679_v50, %v19754_v4 }
 0x439   : > { %v9021_v18 = vpop.permute.xlu1 %9020  ;;  %12137 = vmatmul.mubr.bf16.vlgmr.msra.gmra.mxu1 %v18080_v16 }
 0x43a   : > { %v9596_v21 = vrot.slane %v9021_v18, %v16748_v62 }
 0x43c   : > { %v9597_v13 = vsel %vm9175_vm2, %v9596_v21, %v9592_v33  ;;  %v9169_v21 = vsel %vm9168_vm1, %v9167_v48, %v9162_v38  ;;  %v9621_v33 = vrot.slane %v18662_v2, %v19751_v47  ;;  %v19893_v38 = vld [vmem:[#allocation82_spill] sm:$0xff] }
 0x43d   : > { %v9602_v35 = vsel %vm9182_vm3, %v9601_v41, %v9597_v13  ;;  %v18710_v6 = vpop.permute.xlu0 %9053  ;;  %v19888_v41 = vld [vmem:[#allocation19_spill] sm:$0xff]  ;;  %v19889_v13 = vld [vmem:[#allocation26_spill] sm:$0xff]  ;;  %v9176_v2 = vsel %vm9175_vm2, %v9174_v56, %v9169_v21  ;;  %v19896_v21 = vld [vmem:[#allocation89_spill] sm:$0xff] }
 0x43e   : > { %v9027_v28 = vpop.permute.xlu1 %9026  ;;  %v9181_v12 = vrot.slane %v19888_v41, %v19747_v42  ;;  %v19894_v48 = vld [vmem:[#allocation78_spill] sm:$0xff]  ;;  %v9310_v41 = vrot.slane %v19896_v21, %v19752_v17 }
 0x43f   : > { %v9606_v51 = vrot.slane %v9027_v28, %v19748_v39  ;;  %v9286_v28 = vsel %vm9182_vm3, %v9285_v37, %v9281_v22  ;;  %v9209_v22 = vrot.slane %v19894_v48, %v19751_v47  ;;  %v9641_v48 = vrot.slane %v18694_v30, %v19756_v45  ;;  %v19904_v30 = vld [vmem:[#allocation49_spill] sm:$0xff] }
 0x440   : > { %v9291_v5 = vsel %vm9189_vm4, %v9290_v49, %v9286_v28  ;;  %v9183_v19 = vsel %vm9182_vm3, %v9181_v12, %v9176_v2 }
 0x441   : > { %v9607_v44 = vsel %vm9189_vm4, %v9606_v51, %v9602_v35  ;;  %v9188_v35 = vrot.slane %v19889_v13, %v19748_v39  ;;  %v9195_v51 = vrot.slane %v19890_v61, %v19749_v1  ;;  %v18738_v27 = vpop.permute.xlu0 %9059  ;;  %v19897_v13 = vld [vmem:[#allocation46_spill] sm:$0xff] }
 0x442   : > { %v9612_v36 = vsel %vm9196_vm5, %v9611_v58, %v9607_v44  ;;  %v9300_v58 = vrot.slane %v19891_v34, %v19750_v29  ;;  %v19892_v44 = vld [vmem:[#allocation32_spill] sm:$0xff] }
 0x443   : > { %v9033_v16 = vpop.permute.xlu1 %9032  ;;  %v9202_v43 = vrot.slane %v19892_v44, %v19750_v29  ;;  %v9190_v49 = vsel %vm9189_vm4, %v9188_v35, %v9183_v19  ;;  %v9305_v35 = vrot.slane %v19897_v13, %v19751_v47 }
 0x444   : > { %v9616_v18 = vrot.slane %v9033_v16, %v19750_v29  ;;  %v19895_v16 = vld [vmem:[#allocation117_spill] sm:$0xff]  ;;  %v9197_v37 = vsel %vm9196_vm5, %v9195_v51, %v9190_v49  ;;  %v19898_v51 = vld [vmem:[#allocation120_spill] sm:$0xff] }
 0x445   : > { %v9216_v7 = vrot.slane %v19895_v16, %v19752_v17  ;;  %v19902_v16 = vld [vmem:[#allocation16_spill] sm:$0xff] }
 0x446   : > { %v9617_v3 = vsel %vm9203_vm6, %v9616_v18, %v9612_v36  ;;  %v9295_v36 = vrot.slane %v19893_v38, %v19749_v1 }
 0x447   : > { %v9622_v25 = vsel %vm9210_vm7, %v9621_v33, %v9617_v3  ;;  %v9204_v33 = vsel %vm9203_vm6, %v9202_v43, %v9197_v37  ;;  %v18766_v61 = vpop.permute.xlu0 %9065  ;;  %v19900_v43 = vld [vmem:[#allocation39_spill] sm:$0xff]  ;;  %v19903_v37 = vld [vmem:[#allocation29_spill] sm:$0xff] }
 0x448   : > { %v9296_v56 = vsel %vm9196_vm5, %v9295_v36, %v9291_v5  ;;  %v9211_v3 = vsel %vm9210_vm7, %v9209_v22, %v9204_v33  ;;  %v9230_v5 = vrot.slane %v19898_v51, %v19755_v60  ;;  %v9320_v38 = vrot.slane %v19900_v43, %v19755_v60  ;;  %v19905_v33 = vld [vmem:[#allocation88_spill] sm:$0xff] }
 0x449   : > { %v9039_v11 = vpop.permute.xlu1 %9038  ;;  %v9301_v18 = vsel %vm9203_vm6, %v9300_v58, %v9296_v56  ;;  %v9218_v50 = vsel %vm9217_vm8, %v9216_v7, %v9211_v3  ;;  %v9244_v7 = vrot.slane %v19902_v16, %v19758_v54  ;;  %v9325_v13 = vrot.slane %v19905_v33, %v19756_v45 }
 0x44a   : > { %v9626_v31 = vrot.slane %v9039_v11, %v19752_v17  ;;  %v9306_v34 = vsel %vm9210_vm7, %v9305_v35, %v9301_v18  ;;  %v19901_v11 = vld [vmem:[#allocation86_spill] sm:$0xff]  ;;  %v9237_v18 = vrot.slane %v19903_v37, %v19756_v45  ;;  %v19910_v37 = vld [vmem:[#allocation80_spill] sm:$0xff]  ;;  %v9661_v33 = vrot.slane %v18738_v27, %v19763_v52 }
 0x44b   : > { %v9311_v44 = vsel %vm9217_vm8, %v9310_v41, %v9306_v34  ;;  %v9315_v19 = vrot.slane %v19901_v11, %v19754_v4  ;;  %v9330_v41 = vrot.slane %v19904_v30, %v19758_v54  ;;  %v19906_v34 = vld [vmem:[#allocation44_spill] sm:$0xff]  ;;  %v19909_v11 = vld [vmem:[#allocation43_spill] sm:$0xff] }
 0x44c   : > { %v9627_v12 = vsel %vm9217_vm8, %v9626_v31, %v9622_v25  ;;  %v19899_v25 = vld [vmem:[#allocation25_spill] sm:$0xff] }
 0x44d   : > { %v9632_v28 = vsel %vm9224_vm9, %v9631_v59, %v9627_v12  ;;  %v9223_v2 = vrot.slane %v19899_v25, %v19754_v4  ;;  %v9316_v56 = vsel %vm9224_vm9, %v9315_v19, %v9311_v44  ;;  %v18794_v12 = vpop.permute.xlu0 %9071  ;;  %v9335_v19 = vrot.slane %v19909_v11, %v19759_v55 }
 0x44e   : > { %v9321_v21 = vsel %vm9231_vm10, %v9320_v38, %v9316_v56  ;;  %v19908_v38 = vld [vmem:[#allocation69_spill] sm:$0xff] }
 0x44f   : > { %v9045_v58 = vpop.permute.xlu1 %9044  ;;  %v9225_v22 = vsel %vm9224_vm9, %v9223_v2, %v9218_v50  ;;  %v9326_v51 = vsel %vm9238_vm11, %v9325_v13, %v9321_v21  ;;  %v19907_v2 = vld [vmem:[#allocation111_spill] sm:$0xff] }
 0x450   : > { %v9636_v36 = vrot.slane %v9045_v58, %v19755_v60  ;;  %v9232_v49 = vsel %vm9231_vm10, %v9230_v5, %v9225_v22  ;;  %v9651_v5 = vrot.slane %v18710_v6, %v19759_v55  ;;  %v9258_v58 = vrot.slane %v19906_v34, %v19761_v32  ;;  %v19911_v21 = vld [vmem:[#allocation51_spill] sm:$0xff] }
 0x451   : > { %v9331_v25 = vsel %vm9245_vm12, %v9330_v41, %v9326_v51  ;;  %v9340_v44 = vrot.slane %v19907_v2, %v19761_v32  ;;  %v9345_v30 = vrot.slane %v19911_v21, %v19763_v52 }
 0x452   : > { %v9637_v31 = vsel %vm9231_vm10, %v9636_v36, %v9632_v28  ;;  %v9239_v28 = vsel %vm9238_vm11, %v9237_v18, %v9232_v49  ;;  %v9251_v36 = vrot.slane %v19908_v38, %v19759_v55  ;;  %v9582_v49 = vrot.slane %v18557_v8, %v19763_v52 }
 0x453   : > { %v9642_v59 = vsel %vm9238_vm11, %v9641_v48, %v9637_v31  ;;  %v9051_v35 = vpop.permute.xlu1 %9050  ;;  %v9246_v50 = vsel %vm9245_vm12, %v9244_v7, %v9239_v28  ;;  %v18815_v22 = vpop.permute.xlu0 %9077  ;;  %v9336_v31 = vsel %vm9252_vm13, %v9335_v19, %v9331_v25  ;;  %v9265_v18 = vrot.slane %v19910_v37, %v19763_v52 }
 0x454   : > { %v9646_v3 = vrot.slane %v9051_v35, %v19758_v54  ;;  %v9253_v6 = vsel %vm9252_vm13, %v9251_v36, %v9246_v50  ;;  %v9341_v56 = vsel %vm9259_vm14, %v9340_v44, %v9336_v31  ;;  %v9583_v41 = vsel %vm9266_vm15, %v9582_v49, %v18684_v24 }
 0x455   : > { %v9260_v7 = vsel %vm9259_vm14, %v9258_v58, %v9253_v6  ;;  %v9346_v35 = vsel %vm9266_vm15, %v9345_v30, %v9341_v56 }
 0x456   : > { %v9647_v43 = vsel %vm9245_vm12, %v9646_v3, %v9642_v59  ;;  %v9267_v13 = vsel %vm9266_vm15, %v9265_v18, %v9260_v7 }
 0x457   : > { %v9652_v48 = vsel %vm9252_vm13, %v9651_v5, %v9647_v43  ;;  %v18837_v3 = vsel %vm9821_vm0, %v9583_v41, %v9267_v13  ;;  %v18839_v50 = vpop.permute.xlu0 %9083 }
 0x459   : > { %v9057_v16 = vpop.permute.xlu1 %9056 }
 0x45a   : > { %v9656_v59 = vrot.slane %v9057_v16, %v19761_v32 }
 0x45c   : > { %v9657_v8 = vsel %vm9259_vm14, %v9656_v59, %v9652_v48 }
 0x45d   : > { %v9662_v28 = vsel %vm9266_vm15, %v9661_v33, %v9657_v8  ;;  %v18850_v34 = vpop.permute.xlu0 %9089 }
 0x45e   : > { %v18842_v51 = vsel %vm9821_vm0, %v9662_v28, %v9346_v35  ;;  %v18844_v24 = vpop.permute.xlu1 %9062  ;;  %v9350_v35 = vrot.slane %v17983_v0, %v16720_v46 }
 0x45f   : > { %v9826_v27 = vcombine.low %v18837_v3, %v18842_v51  ;;  %v9845_v51 = vld [vmem:[#allocation10] sm:$0xff] }
 0x461   : > { %v9111_v44 = vpop.permute.xlu0 %9110 }
 0x462   : > { %v9745_v8 = vrot.slane %v9111_v44, %v16720_v46 }
 0x463   : > { %v18848_v5 = vpop.permute.xlu1 %9068 }
 0x468   : > { %v9117_v11 = vpop.permute.xlu0 %9116 }
 0x469   : > { %v18852_v58 = vpop.f32.mrf.mxu0  ;;  %v18856_v2 = vpop.permute.xlu1 %9074  ;;  %v9754_v28 = vrot.slane %v9117_v11, %v16748_v62  ;;  %v9438_v11 = vrot.slane %v18245_v15, %v16748_v62 }
 0x46b   : > { %v18854_v25 = vpop.f32.mrf.mxu0 }
 0x46c   : > { %v9123_v6 = vpop.permute.xlu0 %9122 }
 0x46d   : > { %v12101_v43 = vpop.f32.mrf.mxu0 }
 0x46e   : > { %v18858_v36 = vpop.permute.xlu1 %9080 }
 0x46f   : > { %v12102_v38 = vpop.f32.mrf.mxu0 }
 0x470   : > { %v9359_v38 = vrot.slane %v18011_v40, %v16748_v62 }
 0x471   : > { %v9129_v18 = vpop.permute.xlu0 %9128 }
 0x473   : > { %v18860_v19 = vpop.permute.xlu1 %9086 }
 0x476   : > { %v9135_v30 = vpop.permute.xlu0 %9134 }
 0x478   : > { %v18868_v7 = vpop.permute.xlu1 %9092 }
 0x479   : > { %v11974_v48 = vpop.f32.mrf.mxu1 }
 0x47a   : > { %v18863_v49 = vadd.f32 %v11974_v48, %v18291_v53  ;;  %v19912_v48 = vld [vmem:[#allocation94_spill] sm:$0xff] }
 0x47b   : > { %v11976_v31 = vpop.f32.mrf.mxu1  ;;  %v18874_v53 = vpop.permute.xlu0 %9140 }
 0x47c   : > { %v18866_v16 = vadd.f32 %v11976_v31, %v18301_v10  ;;  %v9354_v31 = vrot.slane %v19912_v48, %v16731_v9 }
 0x47d   : > { %v11978_v56 = vpop.f32.mrf.mxu1  ;;  %v9114_v21 = vpop.permute.xlu1 %9113 }
 0x47e   : > { %v12151_v59 = vcombine.low %v18863_v49, %v18866_v16  ;;  %v9749_v41 = vrot.slane %v9114_v21, %v16731_v9  ;;  %v9429_v56 = vrot.slane %v18219_v23, %v16720_v46  ;;  %v9355_v0 = vsel %vm9168_vm1, %v9354_v31, %v9350_v35 }
 0x47f   : > { %v11979_v37 = vpop.f32.mrf.mxu1  ;;  %v9433_v23 = vrot.slane %v18122_v26, %v16731_v9  ;;  %v9774_v26 = vrot.slane %v9129_v18, %v19750_v29 }
 0x480   : > { %v9750_v10 = vsel %vm9168_vm1, %v9749_v41, %v9745_v8  ;;  %v9764_v41 = vrot.slane %v9123_v6, %v19748_v39  ;;  %v18894_v40 = vpop.permute.xlu0 %9143  ;;  %v9369_v8 = vrot.slane %v18047_v63, %v19748_v39  ;;  %v19914_v63 = vld [vmem:[#allocation129_spill] sm:$0xff] }
 0x481   : > { %v9755_v44 = vsel %vm9175_vm2, %v9754_v28, %v9750_v10  ;;  %v9434_v15 = vsel %vm9168_vm1, %v9433_v23, %v9429_v56  ;;  %v9448_v31 = vrot.slane %v19914_v63, %v19748_v39  ;;  %v19916_v56 = vld [vmem:[#allocation72_spill] sm:$0xff] }
 0x482   : > { %v9120_v33 = vpop.permute.xlu1 %9119  ;;  %v9439_v48 = vsel %vm9175_vm2, %v9438_v11, %v9434_v15  ;;  %v9675_v11 = vrot.slane %v18848_v5, %v16748_v62  ;;  %v9784_v5 = vrot.slane %v9135_v30, %v19752_v17 }
 0x483   : > { %v9759_v13 = vrot.slane %v9120_v33, %v19747_v42  ;;  %v9360_v33 = vsel %vm9175_vm2, %v9359_v38, %v9355_v0  ;;  %v19915_v0 = vld [vmem:[#allocation50_spill] sm:$0xff] }
 0x485   : > { %v9760_v37 = vsel %vm9182_vm3, %v9759_v13, %v9755_v44  ;;  %v19913_v13 = vld [vmem:[#allocation47_spill] sm:$0xff] }
 0x486   : > { %v9364_v28 = vrot.slane %v19913_v13, %v19747_v42  ;;  %v9765_v35 = vsel %vm9189_vm4, %v9764_v41, %v9760_v37  ;;  %v9379_v37 = vrot.slane %v19915_v0, %v19750_v29  ;;  %v9443_v41 = vrot.slane %v19916_v56, %v19747_v42 }
 0x487   : > { %v9126_v43 = vpop.permute.xlu1 %9125  ;;  %v9685_v0 = vrot.slane %v18856_v2, %v19748_v39  ;;  %v9680_v56 = vrot.slane %v18794_v12, %v19747_v42  ;;  %v19924_v42 = vld [vmem:[#allocation125_spill] sm:$0xff] }
 0x488   : > { %v9769_v21 = vrot.slane %v9126_v43, %v19749_v1  ;;  %v9365_v38 = vsel %vm9182_vm3, %v9364_v28, %v9360_v33  ;;  %v19917_v33 = vld [vmem:[#allocation93_spill] sm:$0xff]  ;;  %v9670_v28 = vrot.slane %v18766_v61, %v16731_v9  ;;  %v19920_v9 = vld [vmem:[#allocation123_spill] sm:$0xff]  ;;  %v9463_v12 = vrot.slane %v19924_v42, %v19751_v47 }
 0x489   : > { %v9370_v44 = vsel %vm9189_vm4, %v9369_v8, %v9365_v38  ;;  %v9374_v23 = vrot.slane %v19917_v33, %v19749_v1  ;;  %v9444_v8 = vsel %vm9182_vm3, %v9443_v41, %v9439_v48  ;;  %v19918_v38 = vld [vmem:[#allocation132_spill] sm:$0xff]  ;;  %v9453_v61 = vrot.slane %v19920_v9, %v19749_v1 }
 0x48a   : > { %v9770_v6 = vsel %vm9196_vm5, %v9769_v21, %v9765_v35  ;;  %v9666_v21 = vrot.slane %v18844_v24, %v16720_v46  ;;  %v9449_v24 = vsel %vm9189_vm4, %v9448_v31, %v9444_v8  ;;  %v9458_v62 = vrot.slane %v19918_v38, %v19750_v29  ;;  %v19919_v48 = vld [vmem:[#allocation68_spill] sm:$0xff]  ;;  %v19923_v8 = vld [vmem:[#allocation70_spill] sm:$0xff] }
 0x48b   : > { %v9775_v18 = vsel %vm9203_vm6, %v9774_v26, %v9770_v6  ;;  %v9375_v46 = vsel %vm9196_vm5, %v9374_v23, %v9370_v44  ;;  %v9389_v63 = vrot.slane %v19919_v48, %v19752_v17  ;;  %v19921_v26 = vld [vmem:[#allocation113_spill] sm:$0xff]  ;;  %v19922_v23 = vld [vmem:[#allocation134_spill] sm:$0xff]  ;;  %v19926_v9 = vld [vmem:[#allocation136_spill] sm:$0xff] }
 0x48c   : > { %v9132_v10 = vpop.permute.xlu1 %9131  ;;  %v9380_v6 = vsel %vm9203_vm6, %v9379_v37, %v9375_v46  ;;  %v9384_v44 = vrot.slane %v19921_v26, %v19751_v47  ;;  %v9454_v37 = vsel %vm9196_vm5, %v9453_v61, %v9449_v24  ;;  %v9478_v61 = vrot.slane %v19926_v9, %v19755_v60 }
 0x48d   : > { %v9779_v43 = vrot.slane %v9132_v10, %v19751_v47  ;;  %v9147_v10 = vpop.permute.xlu0 %9146 }
 0x48e   : > { %v9385_v33 = vsel %vm9210_vm7, %v9384_v44, %v9380_v6  ;;  %v9799_v6 = vrot.slane %v18894_v40, %v19756_v45 }
 0x48f   : > { %v9780_v35 = vsel %vm9210_vm7, %v9779_v43, %v9775_v18  ;;  %v9671_v43 = vsel %vm9168_vm1, %v9670_v28, %v9666_v21  ;;  %v9459_v21 = vsel %vm9203_vm6, %v9458_v62, %v9454_v37  ;;  %v9468_v18 = vrot.slane %v19922_v23, %v19752_v17 }
 0x490   : > { %v9138_v13 = vpop.permute.xlu1 %9137  ;;  %v9676_v31 = vsel %vm9175_vm2, %v9675_v11, %v9671_v43  ;;  %v9785_v30 = vsel %vm9217_vm8, %v9784_v5, %v9780_v35  ;;  %v9794_v11 = vrot.slane %v18874_v53, %v19755_v60  ;;  %v9399_v28 = vrot.slane %v19923_v8, %v19755_v60 }
 0x491   : > { %v9789_v15 = vrot.slane %v9138_v13, %v19754_v4  ;;  %v9150_v39 = vpop.permute.xlu0 %9149  ;;  %v9390_v13 = vsel %vm9217_vm8, %v9389_v63, %v9385_v33  ;;  %v9681_v35 = vsel %vm9182_vm3, %v9680_v56, %v9676_v31  ;;  %v9695_v53 = vrot.slane %v18858_v36, %v19750_v29  ;;  %v19927_v36 = vld [vmem:[#allocation127_spill] sm:$0xff]  ;;  %v19929_v56 = vld [vmem:[#allocation98_spill] sm:$0xff] }
 0x492   : > { %v9686_v24 = vsel %vm9189_vm4, %v9685_v0, %v9681_v35  ;;  %v9464_v62 = vsel %vm9210_vm7, %v9463_v12, %v9459_v21  ;;  %v9690_v5 = vrot.slane %v18815_v22, %v19749_v1  ;;  %v9473_v26 = vrot.slane %v19927_v36, %v19754_v4  ;;  %v19928_v22 = vld [vmem:[#allocation74_spill] sm:$0xff] }
 0x493   : > { %v9790_v41 = vsel %vm9224_vm9, %v9789_v15, %v9785_v30  ;;  %v19925_v15 = vld [vmem:[#allocation114_spill] sm:$0xff]  ;;  %v9469_v63 = vsel %vm9217_vm8, %v9468_v18, %v9464_v62  ;;  %v9409_v40 = vrot.slane %v19928_v22, %v19758_v54  ;;  %v9705_v0 = vrot.slane %v18860_v19, %v19752_v17  ;;  %v19930_v18 = vld [vmem:[#allocation137_spill] sm:$0xff]  ;;  %v19931_v19 = vld [vmem:[#allocation128_spill] sm:$0xff] }
 0x494   : > { %v9394_v46 = vrot.slane %v19925_v15, %v19754_v4  ;;  %v9795_v38 = vsel %vm9231_vm10, %v9794_v11, %v9790_v41  ;;  %v9691_v44 = vsel %vm9196_vm5, %v9690_v5, %v9686_v24  ;;  %v9804_v30 = vrot.slane %v9147_v10, %v19758_v54  ;;  %v19933_v62 = vld [vmem:[#allocation138_spill] sm:$0xff] }
 0x495   : > { %v9096_v2 = vpop.permute.xlu1 %9095  ;;  %v9800_v1 = vsel %vm9238_vm11, %v9799_v6, %v9795_v38  ;;  %v9696_v31 = vsel %vm9203_vm6, %v9695_v53, %v9691_v44  ;;  %v9153_v37 = vpop.permute.xlu0 %9152  ;;  %v9404_v41 = vrot.slane %v19929_v56, %v19756_v45  ;;  %v9474_v33 = vsel %vm9224_vm9, %v9473_v26, %v9469_v63 }
 0x496   : > { %v9395_v48 = vsel %vm9224_vm9, %v9394_v46, %v9390_v13  ;;  %v9700_v21 = vrot.slane %v18839_v50, %v19751_v47  ;;  %v9479_v23 = vsel %vm9231_vm10, %v9478_v61, %v9474_v33  ;;  %v9488_v11 = vrot.slane %v19930_v18, %v19758_v54  ;;  %v19932_v47 = vld [vmem:[#allocation124_spill] sm:$0xff] }
 0x497   : > { %v9400_v29 = vsel %vm9231_vm10, %v9399_v28, %v9395_v48  ;;  %v9805_v13 = vsel %vm9245_vm12, %v9804_v30, %v9800_v1  ;;  %v9483_v10 = vrot.slane %v19931_v19, %v19756_v45  ;;  %v9809_v42 = vrot.slane %v9150_v39, %v19759_v55  ;;  %v19936_v1 = vld [vmem:[#allocation112_spill] sm:$0xff] }
 0x498   : > { %v9405_v17 = vsel %vm9238_vm11, %v9404_v41, %v9400_v29  ;;  %v9701_v28 = vsel %vm9210_vm7, %v9700_v21, %v9696_v31  ;;  %v9419_v50 = vrot.slane %v19932_v47, %v19761_v32  ;;  %v9715_v15 = vrot.slane %v18868_v7, %v19755_v60  ;;  %v19934_v7 = vld [vmem:[#allocation45_spill] sm:$0xff] }
 0x499   : > { %v9099_v43 = vpop.permute.xlu1 %9098  ;;  %v9410_v12 = vsel %vm9245_vm12, %v9409_v40, %v9405_v17  ;;  %v9706_v35 = vsel %vm9217_vm8, %v9705_v0, %v9701_v28  ;;  %v9484_v46 = vsel %vm9238_vm11, %v9483_v10, %v9479_v23  ;;  %v9710_v24 = vrot.slane %v18850_v34, %v19754_v4  ;;  %v9156_v48 = vpop.permute.xlu0 %9155  ;;  %v19935_v4 = vld [vmem:[#allocation131_spill] sm:$0xff] }
 0x49a   : > { %v9810_v53 = vsel %vm9252_vm13, %v9809_v42, %v9805_v13  ;;  %v9720_v38 = vrot.slane %v9096_v2, %v19756_v45  ;;  %v9489_v39 = vsel %vm9245_vm12, %v9488_v11, %v9484_v46  ;;  %v9498_v5 = vrot.slane %v19933_v62, %v19761_v32  ;;  %v9846_v62 = vld [vmem:[#allocation10 + $0x8] sm:$0xf] }
 0x49b   : > { %v9814_v6 = vrot.slane %v9153_v37, %v19761_v32  ;;  %v9725_v63 = vrot.slane %v9099_v43, %v19758_v54  ;;  %v9414_v9 = vrot.slane %v19934_v7, %v19759_v55  ;;  %v9493_v34 = vrot.slane %v19935_v4, %v19759_v55 }
 0x49c   : > { %v9711_v61 = vsel %vm9224_vm9, %v9710_v24, %v9706_v35  ;;  %v9819_v43 = vrot.slane %v9156_v48, %v19763_v52  ;;  %v9424_v22 = vrot.slane %v19936_v1, %v19763_v52  ;;  %v9834_v17 = vrot.slane %v9826_v27, %v19816_v20 }
 0x49d   : > { %v9102_v8 = vpop.permute.xlu1 %9101  ;;  %v9716_v2 = vsel %vm9231_vm10, %v9715_v15, %v9711_v61  ;;  %v9815_v29 = vsel %vm9259_vm14, %v9814_v6, %v9810_v53  ;;  %v9415_v26 = vsel %vm9252_vm13, %v9414_v9, %v9410_v12  ;;  %v9494_v54 = vsel %vm9252_vm13, %v9493_v34, %v9489_v39 }
 0x49e   : > { %v9730_v45 = vrot.slane %v9102_v8, %v19759_v55  ;;  %v9721_v44 = vsel %vm9238_vm11, %v9720_v38, %v9716_v2  ;;  %v9420_v40 = vsel %vm9259_vm14, %v9419_v50, %v9415_v26  ;;  %v9499_v55 = vsel %vm9259_vm14, %v9498_v5, %v9494_v54 }
 0x49f   : > { %v9726_v31 = vsel %vm9245_vm12, %v9725_v63, %v9721_v44  ;;  %v9820_v37 = vsel %vm9266_vm15, %v9819_v43, %v9815_v29  ;;  %v9425_v21 = vsel %vm9266_vm15, %v9424_v22, %v9420_v40  ;;  %v12159_v15 = vrot.slane %v12151_v59, %v19816_v20 }
 0x4a0   : > { %v9731_v56 = vsel %vm9252_vm13, %v9730_v45, %v9726_v31 }
 0x4a1   : > { %v9105_v60 = vpop.permute.xlu1 %9104 }
 0x4a2   : > { %v9735_v36 = vrot.slane %v9105_v60, %v19761_v32  ;;  %v19937_v32 = vld [vmem:[#allocation133_spill] sm:$0xff] }
 0x4a3   : > { %v9503_v30 = vrot.slane %v19937_v32, %v19763_v52 }
 0x4a4   : > { %v9736_v33 = vsel %vm9259_vm14, %v9735_v36, %v9731_v56 }
 0x4a5   : > { %v9108_v0 = vpop.permute.xlu1 %9107  ;;  %v9504_v23 = vsel %vm9266_vm15, %v9503_v30, %v9499_v55 }
 0x4a6   : > { %v9740_v41 = vrot.slane %v9108_v0, %v19763_v52  ;;  %v9825_v11 = vsel %vm9821_vm0, %v9820_v37, %v9504_v23 }
 0x4a8   : > { %v9741_v18 = vsel %vm9266_vm15, %v9740_v41, %v9736_v33 }
 0x4a9   : > { %v9824_v13 = vsel %vm9821_vm0, %v9741_v18, %v9425_v21 }
 0x4aa   : > { %v9827_v8 = vcombine.low %v9824_v13, %v9825_v11 }
 0x4ac   : > { %v9841_v52 = vrot.slane %v9827_v8, %v19816_v20 }
 0x4ae   : > { %v9842_v19 = vcombine.low %v9834_v17, %v9841_v52 }
 0x4b0   : > { %9844 = vst [vmem:[%s14705_s8] sm:$0xff] %v9842_v19 }
 0x4b9   : > { %v12056_v10 = vpop.f32.mrf.mxu1 }
 0x4ba   : > { %v12057_v42 = vadd.f32 %v12056_v10, %v18613_v57 }
 0x4bb   : > { %v12058_v28 = vpop.f32.mrf.mxu1 }
 0x4bc   : > { %v12059_v12 = vadd.f32 %v12058_v28, %v18623_v14 }
 0x4bd   : > { %v12060_v47 = vpop.f32.mrf.mxu1 }
 0x4be   : > { %v12152_v50 = vcombine.low %v12057_v42, %v12059_v12 }
 0x4bf   : > { %v12061_v35 = vpop.f32.mrf.mxu1 }
 0x4c0   : > { %v12166_v3 = vrot.slane %v12152_v50, %v19816_v20 }
 0x4c2   : > { %v12167_v27 = vcombine.low %v12159_v15, %v12166_v3 }
 0x4c4   : > { %v12178_v46 = vadd.f32 %v12167_v27, %v9845_v51 }
 0x4c6   : > { %12180 = vst [vmem:[#allocation10] sm:$0xff] %v12178_v46 }
 0x4f9   : > { %v12138_v24 = vpop.f32.mrf.mxu1 }
 0x4fa   : > { %v12139_v57 = vadd.f32 %v12138_v24, %v18852_v58 }
 0x4fb   : > { %v12140_v53 = vpop.f32.mrf.mxu1 }
 0x4fc   : > { %v12141_v14 = vadd.f32 %v12140_v53, %v18854_v25 }
 0x4fd   : > { %v12142_v38 = vpop.f32.mrf.mxu1 }
 0x4fe   : > { %v12168_v39 = vcombine.low %v12139_v57, %v12141_v14 }
 0x4ff   : > { %v12143_v5 = vpop.f32.mrf.mxu1 }
 0x500   : > { %v12175_v6 = vrot.slane %v12168_v39, %v19816_v20  ;;  %12185 = sbr.rel (%p12715_p12) target bundleno = 1299 (0x513), region = 90 }
 0x502   : > { %v12179_v49 = vadd.f32 %v12175_v6, %v9846_v62 }
 0x504   : > { %12181 = vst [vmem:[#allocation10 + $0x8] sm:$0xf] %v12179_v49 }
 0x505   : > { %v12188_v16 = vld [vmem:[#allocation7] sm:$0x3f]  ;;  %v19938_v59 = vld [vmem:[#allocation34_spill] sm:$0xff] }
 0x506   : > { %v12192_v48 = vsub.s32 0, %v19938_v59  ;;  %v12196_v63 = vsub.s32 1, %v19938_v59  ;;  %v12200_v58 = vsub.s32 2, %v19938_v59  ;;  %v12204_v25 = vsub.s32 3, %v19938_v59  ;;  %v19939_v26 = vld [vmem:[#allocation48_spill] sm:$0xff]  ;;  %v12186_v22 = vld [vmem:[#allocation10] sm:$0xff] }
 0x507   : > { %v12208_v60 = vsub.s32 4, %v19938_v59  ;;  %v12212_v7 = vsub.s32 5, %v19938_v59 }
 0x508   : > { %v12193_v9 = vrot.slane %v12188_v16, %v12192_v48  ;;  %v12197_v20 = vrot.slane %v12188_v16, %v12196_v63  ;;  %v12201_v4 = vrot.slane %v12188_v16, %v12200_v58  ;;  %v12205_v34 = vrot.slane %v12188_v16, %v12204_v25 }
 0x509   : > { %v12209_v61 = vrot.slane %v12188_v16, %v12208_v60  ;;  %v12213_v45 = vrot.slane %v12188_v16, %v12212_v7 }
 0x50a   : > { %v12214_v2 = vcombine.low %v12193_v9, %v12197_v20  ;;  %v12215_v29 = vcombine.low %v12201_v4, %v12205_v34 }
 0x50b   : > { %v12231_v36 = vcombine.low %v12209_v61, %v12213_v45  ;;  %v12187_v43 = vld [vmem:[#allocation10 + $0x8] sm:$0xf] }
 0x50c   : > { %v12222_v54 = vrot.slane %v12214_v2, %v19939_v26  ;;  %v12229_v44 = vrot.slane %v12215_v29, %v19939_v26 }
 0x50d   : > { %v12238_v1 = vrot.slane %v12231_v36, %v19939_v26 }
 0x50e   : > { %v12230_v40 = vcombine.low %v12222_v54, %v12229_v44 }
 0x50f   : > { %v12242_v55 = vadd.f32 %v12238_v1, %v12187_v43 }
 0x510   : > { %v12241_v31 = vadd.f32 %v12230_v40, %v12186_v22 }
 0x511   : > { %12244 = vst [vmem:[#allocation10 + $0x8] sm:$0xf] %v12242_v55 }
 0x512   : > { %12243 = vst [vmem:[#allocation10] sm:$0xff] %v12241_v31 }
 0x513 PF: > { %s12724_s14 = sshll.u32 %s14331_s0, 7  ;;  %s12260_s11 = sshll.u32 %s14705_s8, 4  ;;  %s12261_s11 = int_to_ptr.vmem [resolvable:$true] %s12260_s11 }
 0x514   : > { %s12258_s10 = scalar_lea.hbm %s19123_s4, %s12724_s14  ;;  %s12246_s13 = scalar_lea.sflag [#allocation6], %s14687_s17 }
 0x515   : > { %s14166_s16 = scalar_lea.vmem %s12261_s11, 128  ;;  %p19940_p2 = scmp.ne.s32.totalorder %s19364_s6, 0 }
 0x516   : > { %p14167_p1 = scmp.ne.s32.totalorder %s12261_s11, %s14166_s16  ;;  %s14275_s18 = smov [#allocation9]  }
 0x517   : > { %s14170_s19 = sshll.u32 %s14275_s18, 4  ;;  %s14171_s19 = int_to_ptr.vmem [resolvable:$false] %s14170_s19 }
 0x518   : > { %p14168_p0 = pnand %p14167_p1, %p19940_p2  ;;  %s14172_s24 = scalar_lea.vmem %s14171_s19, 256 }
 0x519   : > { %p14173_p8 = scmp.lt.s32.totalorder %s12261_s11, %s14171_s19  ;;  %p14174_p9 = scmp.lt.s32.totalorder %s14172_s24, %s14166_s16 }
 0x51a   : > { %p14169_p3 = pneg %p14168_p0 }
 0x51b   : > { %p14175_p10 = por %p14174_p9, %p14173_p8 }
 0x51d   : > { %p14176_p6 = pnand %p14175_p10, %p14169_p3 }
 0x51f   : > { %14179 = shalt.err (!%p14176_p6)
}
 0x520   : > { %s14180_s27 = scalar_lea.hbm %s12258_s10, 128  ;;  %s14184_s29 = scalar_lea.hbm %s19123_s4, 512 }
 0x521   : > { %p14181_p7 = scmp.ne.s32.totalorder %s12258_s10, %s14180_s27  ;;  %p14185_p13 = scmp.lt.s32.totalorder %s12258_s10, %s19123_s4 }
 0x522   : > { %p14186_p11 = scmp.lt.s32.totalorder %s14184_s29, %s14180_s27 }
 0x523   : > { %p14182_p4 = pnand %p14181_p7, %p19940_p2 }
 0x524   : > { %p14187_p12 = por %p14186_p11, %p14185_p13 }
 0x525   : > { %p14183_p5 = pneg %p14182_p4 }
 0x527   : > { %p14188_p1 = pnand %p14187_p12, %p14183_p5 }
 0x529   : > { %14191 = shalt.err (!%p14188_p1)
}
 0x52a   : > { %12736 = dma.vmem_to_hbm [thread:$0]  (%p19940_p2), %s12261_s11, 128, %s12258_s10, %s12246_s13  }
 0x52b   : > { %s14276_s12 = smov [#allocation10]   ;;  %p19941_p3 = scmp.eq.s32.totalorder %s14331_s0, 3 }
 0x52c   : > { %s12271_s14 = sshll.u32 %s14276_s12, 4  ;;  %s12272_s14 = int_to_ptr.vmem [resolvable:$true] %s12271_s14 }
 0x52d   : > { %s14192_s15 = scalar_lea.vmem %s12272_s14, 192  ;;  %p14199_p10 = scmp.lt.s32.totalorder %s12272_s14, %s12272_s14 }
 0x52e   : > { %p14193_p0 = scmp.ne.s32.totalorder %s12272_s14, %s14192_s15  ;;  %p14200_p6 = scmp.lt.s32.totalorder %s14192_s15, %s14192_s15 }
 0x530   : > { %p14194_p8 = pnand %p14193_p0, %p19941_p3  ;;  %p14201_p7 = por %p14200_p6, %p14199_p10 }
 0x532   : > { %p14195_p9 = pneg %p14194_p8 }
 0x534   : > { %p14202_p4 = pnand %p14201_p7, %p14195_p9 }
 0x536   : > { %14205 = shalt.err (!%p14202_p4)
}
 0x537   : > { %p19942_p5 = pmov %p19941_p3  ;;  %p19943_p2 = pmov %p19941_p3 }
 0x539   : > { %12738 = dma.vmem_to_hbm [thread:$0]  (%p19942_p5), %s12272_s14, 192, %s19124_s5, [#allocation11]  }
 0x53a   : > { %14241 = dma.done.wait (%p19943_p2), [#allocation11], 192   ;;  %p19944_p13 = pmov %p19943_p2 }
 0x53c   : > { %14243 = vsyncadd (%p19944_p13), [#allocation11], 4294967104 }
 0x53d PF: > { %p12754_p11 = scmp.ge.s32.totalorder %s14262_s23, 2  ;;  %s12287_s6 = sand.u32 1, %s14250_s20  }
 0x53e   : > { %p19945_p12 = scmp.ne.s32.totalorder %s19365_s7, 0  ;;  %s12288_s10 = scalar_lea.sflag [#allocation6], %s12287_s6 }
 0x540   : > { %p12747_p1 = pnand %p12754_p11, %p19945_p12 }
 0x542   : > { %p12748_p0 = pneg %p12747_p1 }
 0x544   : > { %14245 = dma.done.wait (%p12748_p0), %s12288_s10, 128  }
 0x545   : > { %14247 = vsyncadd (%p12748_p0), %s12288_s10, 4294967168  ;;  %p22_p3 = scmp.ge.s32.totalorder %s14335_s25, 6   ;;  %s19946_s20 = smov %s14254_s21 }
 0x546   : > { %s19947_s21 = smov %s14258_s22  ;;  %s19948_s22 = smov %s14347_s28 }
 0x547   : > { %s19949_s23 = smov %s14335_s25  ;;  %24 = sbr.rel (!%p22_p3) target bundleno = 9 (0x9), region = 147 }
 0x54c   :  { %12293 = vsyncpa [#allocation5], 1 }
 0x54d   :  { %12295 = vsyncpa [#allocation5 + $0x1], 1 }
 0x54e   :  { %12296 = vsyncpa [#allocation8], 1 }
 0x54f   :  { %12297 = vsyncpa [#allocation6], 1 }
 0x550   :  { %12299 = vsyncpa [#allocation6 + $0x1], 1 }
 0x551   :  { %12300 = vsyncpa [#allocation11], 1 }

</bundles_post_ra>
